<compile_context>
chip_gen: v7x
topology: tpu7x:2x2x1
jax: 0.10.0
libtpu: 0.0.40
codegen_flags: <defaults>
</compile_context>

<pallas_src>
import functools
import math

import jax
import jax.numpy as jnp
from jax.experimental import pallas as pl
from jax.experimental.pallas import tpu as pltpu

# ----------------------------- config ---------------------------------------
N_CLS = 8            # number of classnames
CTX_LEN = 16         # tokenized prompt length (CLIP uses 77)
TEXT_DIM = 64        # clip_model.ln_final.weight.shape[0]
VIS_DIM = 64         # clip_model.visual.ln_post.weight.shape[0]
PROJ_DIM = 32        # joint embedding dim (text_projection / visual proj)
N_REP_LAYERS = 2     # len(cfg.TRAINER.PromptLT.REP_LAYERS)
N_REP_TOKENS = 2     # cfg.TRAINER.PromptLT.N_REP_TOKENS (==2 so FUSE broadcasting works)
REP_DIM = 16         # cfg.TRAINER.PromptLT.REP_DIM
MLP_HID = 32         # hidden width of the r2v / r2t projection MLPs
IMG_SIZE = 16
PATCH = 4
N_PATCH = (IMG_SIZE // PATCH) ** 2
BATCH = 2
DTYPE = jnp.float32       # stand-in for clip_model.dtype
MXU_DTYPE = jnp.bfloat16  # stored-weight / MXU operand dtype (f32 accumulate)
NEG_INF = -1e30


# ----------------------------- shared helpers --------------------------------
def _round_up(x, m):
    return ((x + m - 1) // m) * m


def _ln(x, g, b, eps=1e-5):
    mu = jnp.mean(x, axis=-1, keepdims=True)
    var = jnp.mean((x - mu) ** 2, axis=-1, keepdims=True)
    return (x - mu) * jax.lax.rsqrt(var + eps) * g + b


def _mxu(a, w_bf16):
    """MXU matmul: activation cast to bf16, weight already stored bf16, f32 acc."""
    return jnp.dot(a.astype(MXU_DTYPE), w_bf16, preferred_element_type=jnp.float32)


def _attn_bias(s_pad, s_real, causal):
    """(S, S) additive mask from iota: key padding + optional causal (no DMA)."""
    q_idx = jax.lax.broadcasted_iota(jnp.int32, (s_pad, s_pad), 0)
    k_idx = jax.lax.broadcasted_iota(jnp.int32, (s_pad, s_pad), 1)
    valid = k_idx < s_real
    if causal:
        valid = jnp.logical_and(valid, k_idx <= q_idx)
    return jnp.where(valid, 0.0, NEG_INF).astype(jnp.float32)


# ----------------------------- Pallas tower kernel ----------------------------
def _tower_kernel(x0_ref, rep_ref, sel_ref, lnf_ref, proj_ref,
                  ln_ref, wqkv_ref, bqkv_ref, wo_ref, bo_ref,
                  w1_ref, b1_ref, w2_ref, b2_ref,
                  o_ref, x_scr, *, n_tok, rep_start, s_real, causal):
    """One pre-LN transformer block per grid step; activation resident in x_scr.

    grid = (n_layers,), "arbitrary".  Per-layer weight slabs are streamed (bf16,
    double-buffered by the BlockSpec pipeline).  The epilogue (one-hot row pool,
    ln_final/ln_post, output projection, L2 norm) runs on the last grid step.
    """
    l = pl.program_id(0)
    n_seq, s_pad, dim = x_scr.shape
    rows = n_seq * s_pad

    @pl.when(l == 0)
    def _():
        x_scr[...] = x0_ref[...]

    # deep prompting: (re)insert this layer's rep tokens into their row range.
    x_scr[:, pl.ds(rep_start, n_tok), :] = rep_ref[0]

    ln = ln_ref[0]                                               # (4, dim)
    x2 = x_scr[...].reshape(rows, dim)

    # --- attention (single-head stand-in), batched over sequences ------------
    xn = _ln(x2, ln[0:1], ln[1:2])
    qkv = _mxu(xn, wqkv_ref[0]) + bqkv_ref[0]                    # (rows, 3*dim)
    q = qkv[:, :dim].reshape(n_seq, s_pad, dim)
    k = qkv[:, dim:2 * dim].reshape(n_seq, s_pad, dim)
    v = qkv[:, 2 * dim:].reshape(n_seq, s_pad, dim)
    bias = _attn_bias(s_pad, s_real, causal)                     # in-kernel iota
    s = jnp.einsum('bqd,bkd->bqk', q.astype(MXU_DTYPE), k.astype(MXU_DTYPE),
                   preferred_element_type=jnp.float32)
    s = s * (1.0 / math.sqrt(dim)) + bias[None]
    s = s - jnp.max(s, axis=-1, keepdims=True)
    pr = jnp.exp(s)
    pr = pr * pl.reciprocal(jnp.sum(pr, axis=-1, keepdims=True), approx=True)
    a = jnp.einsum('bqk,bkd->bqd', pr.astype(MXU_DTYPE), v.astype(MXU_DTYPE),
                   preferred_element_type=jnp.float32).reshape(rows, dim)
    a = _mxu(a, wo_ref[0]) + bo_ref[0]
    x2 = x2 + a

    # --- MLP with QuickGELU ---------------------------------------------------
    xn = _ln(x2, ln[2:3], ln[3:4])
    h = _mxu(xn, w1_ref[0]) + b1_ref[0]
    h = h * pl.reciprocal(1.0 + jnp.exp(-1.702 * h), approx=True)   # QuickGELU
    h = _mxu(h, w2_ref[0]) + b2_ref[0]
    x2 = x2 + h
    x_scr[...] = x2.reshape(n_seq, s_pad, dim)

    # --- fused epilogue on the final layer -------------------------------------
    @pl.when(l == pl.num_programs(0) - 1)
    def _():
        x3 = x_scr[...]
        pooled = jnp.sum(x3 * sel_ref[...][..., None], axis=1)       # (n_seq, dim)
        lnf = lnf_ref[...]
        pooled = _ln(pooled, lnf[0:1], lnf[1:2])
        feat = jnp.dot(pooled.astype(MXU_DTYPE), proj_ref[...],
                       preferred_element_type=jnp.float32)
        feat = feat * jax.lax.rsqrt(
            jnp.sum(feat * feat, axis=-1, keepdims=True) + 1e-12)    # fused L2 norm
        o_ref[...] = feat.astype(o_ref.dtype)


def _tower_forward(x0, rep, sel, lnf, proj, blk, *, n_tok, rep_start, s_real, causal):
    """One pallas_call per tower: layer grid axis + streamed bf16 weight slabs."""
    n_layers = rep.shape[0]
    n_seq, s_pad, dim = x0.shape
    proj_dim = proj.shape[1]

    def full(shape):
        nd = len(shape)
        return pl.BlockSpec(shape, lambda l: (0,) * nd)

    def per_layer(shape):
        nd = len(shape)
        return pl.BlockSpec((1,) + shape, lambda l: (l,) + (0,) * nd)

    kern = functools.partial(_tower_kernel, n_tok=n_tok, rep_start=rep_start,
                             s_real=s_real, causal=causal)
    return pl.pallas_call(
        kern,
        grid=(n_layers,),
        in_specs=[
            full((n_seq, s_pad, dim)),            # x0 (consumed at layer 0)
            per_layer((n_seq, n_tok, dim)),       # compact rep tokens, per layer
            full((n_seq, s_pad)),                 # pooled-row one-hot selector
            full((2, dim)),                       # ln_final / ln_post (gamma, beta)
            full((dim, proj_dim)),                # output projection (bf16)
            per_layer((4, dim)),                  # ln1/ln2 gamma,beta
            per_layer((dim, 3 * dim)),            # fused qkv weight (bf16)
            per_layer((1, 3 * dim)),              # qkv bias
            per_layer((dim, dim)),                # attn out weight (bf16)
            per_layer((1, dim)),                  # attn out bias
            per_layer((dim, 4 * dim)),            # mlp up weight (bf16)
            per_layer((1, 4 * dim)),              # mlp up bias
            per_layer((4 * dim, dim)),            # mlp down weight (bf16)
            per_layer((1, dim)),                  # mlp down bias
        ],
        out_specs=pl.BlockSpec((n_seq, proj_dim), lambda l: (0, 0)),
        out_shape=jax.ShapeDtypeStruct((n_seq, proj_dim), DTYPE),
        scratch_shapes=[pltpu.VMEM((n_seq, s_pad, dim), jnp.float32)],
        # NOTE: per-layer working set here is tiny; at real CLIP scale budget the
        # double-buffered bf16 slabs against 64 MiB (v7x) before raising limits.
        compiler_params=pltpu.CompilerParams(
            dimension_semantics=("arbitrary",)),
    )(x0, rep, sel, lnf, proj,
      blk["ln"], blk["w_qkv"], blk["b_qkv"], blk["wo"], blk["bo"],
      blk["w1"], blk["b1"], blk["w2"], blk["b2"])


# ----------------------------- pure-f32 JAX reference -------------------------
def _tower_ref(x0, rep, sel, lnf, proj, blk, *, n_tok, rep_start, s_real, causal):
    """Same semantics as the kernel, f32 activations (weights upcast from bf16)."""
    f32 = lambda a: a.astype(jnp.float32)
    n_layers = rep.shape[0]
    n_seq, s_pad, dim = x0.shape
    rows = n_seq * s_pad
    bias = _attn_bias(s_pad, s_real, causal)
    x = x0
    for l in range(n_layers):
        x = x.at[:, rep_start:rep_start + n_tok, :].set(rep[l])
        ln = blk["ln"][l]
        x2 = x.reshape(rows, dim)
        xn = _ln(x2, ln[0:1], ln[1:2])
        qkv = xn @ f32(blk["w_qkv"][l]) + blk["b_qkv"][l]
        q = qkv[:, :dim].reshape(n_seq, s_pad, dim)
        k = qkv[:, dim:2 * dim].reshape(n_seq, s_pad, dim)
        v = qkv[:, 2 * dim:].reshape(n_seq, s_pad, dim)
        s = jnp.einsum('bqd,bkd->bqk', q, k) / math.sqrt(dim) + bias[None]
        p_att = jax.nn.softmax(s, axis=-1)
        a = jnp.einsum('bqk,bkd->bqd', p_att, v).reshape(rows, dim)
        a = a @ f32(blk["wo"][l]) + blk["bo"][l]
        x2 = x2 + a
        xn = _ln(x2, ln[2:3], ln[3:4])
        h = xn @ f32(blk["w1"][l]) + blk["b1"][l]
        h = h * jax.nn.sigmoid(1.702 * h)
        h = h @ f32(blk["w2"][l]) + blk["b2"][l]
        x2 = x2 + h
        x = x2.reshape(n_seq, s_pad, dim)
    pooled = jnp.sum(x * sel[..., None], axis=1)
    pooled = _ln(pooled, lnf[0:1], lnf[1:2])
    feat = pooled @ f32(proj)
    return feat * jax.lax.rsqrt(jnp.sum(feat * feat, axis=-1, keepdims=True) + 1e-12)


# ----------------------------- parameters ------------------------------------
def _init_params(key):
    ks = iter(jax.random.split(key, 64))
    p = {}

    # PromptLearner parameters
    p["compound_rep_prompts"] = 0.02 * jax.random.normal(
        next(ks), (N_REP_LAYERS, N_REP_TOKENS, REP_DIM), DTYPE)
    p["extra_textual_prompts"] = 0.02 * jax.random.normal(
        next(ks), (N_REP_LAYERS, 2, REP_DIM), DTYPE)
    p["extra_visual_prompts"] = 0.02 * jax.random.normal(
        next(ks), (N_REP_LAYERS, 2, REP_DIM), DTYPE)

    def _mlp_stack(out_dim):
        return dict(
            w1=0.1 * jax.random.normal(next(ks), (N_REP_LAYERS, REP_DIM, MLP_HID), DTYPE),
            b1=jnp.zeros((N_REP_LAYERS, 1, MLP_HID), DTYPE),
            w2=0.1 * jax.random.normal(next(ks), (N_REP_LAYERS, MLP_HID, out_dim), DTYPE),
            b2=jnp.zeros((N_REP_LAYERS, 1, out_dim), DTYPE),
        )

    p["r2t"] = _mlp_stack(TEXT_DIM)
    p["r2v"] = _mlp_stack(VIS_DIM)

    def _block_stack(dim):
        L = N_REP_LAYERS
        ln = jnp.stack([jnp.ones((L, dim), DTYPE), jnp.zeros((L, dim), DTYPE),
                        jnp.ones((L, dim), DTYPE), jnp.zeros((L, dim), DTYPE)],
                       axis=1)                                    # (L, 4, dim)
        return dict(
            ln=ln,
            # matmul weights stored bf16 (halves weight DMA / VMEM residency)
            w_qkv=(0.05 * jax.random.normal(next(ks), (L, dim, 3 * dim), DTYPE)
                   ).astype(MXU_DTYPE),
            b_qkv=jnp.zeros((L, 1, 3 * dim), DTYPE),
            wo=(0.05 * jax.random.normal(next(ks), (L, dim, dim), DTYPE)
                ).astype(MXU_DTYPE),
            bo=jnp.zeros((L, 1, dim), DTYPE),
            w1=(0.05 * jax.random.normal(next(ks), (L, dim, 4 * dim), DTYPE)
                ).astype(MXU_DTYPE),
            b1=jnp.zeros((L, 1, 4 * dim), DTYPE),
            w2=(0.05 * jax.random.normal(next(ks), (L, 4 * dim, dim), DTYPE)
                ).astype(MXU_DTYPE),
            b2=jnp.zeros((L, 1, dim), DTYPE),
        )

    p["text_blocks"] = _block_stack(TEXT_DIM)
    p["vis_blocks"] = _block_stack(VIS_DIM)

    # text side (stand-in for clip_model text tower)
    p["pos_emb"] = 0.01 * jax.random.normal(next(ks), (CTX_LEN, TEXT_DIM), DTYPE)
    p["prompt_embeddings"] = 0.02 * jax.random.normal(
        next(ks), (N_CLS, CTX_LEN, TEXT_DIM), DTYPE)
    p["ln_final_g"] = jnp.ones((TEXT_DIM,), DTYPE)
    p["ln_final_b"] = jnp.zeros((TEXT_DIM,), DTYPE)
    p["text_projection"] = (0.05 * jax.random.normal(
        next(ks), (TEXT_DIM, PROJ_DIM), DTYPE)).astype(MXU_DTYPE)

    # synthetic tokenized prompts (clip.tokenize stand-in); argmax == EOT position
    eot_pos = 4 + (jnp.arange(N_CLS) % 5)
    positions = jnp.arange(CTX_LEN)[None, :]
    base_tok = jnp.where(positions < eot_pos[:, None], positions + 100, 0)
    p["tokenized_prompts"] = jnp.where(
        positions == eot_pos[:, None], 49407, base_tok).astype(jnp.int32)

    # vision side (stand-in for clip_model.visual)
    p["patch_w"] = 0.05 * jax.random.normal(next(ks), (3 * PATCH * PATCH, VIS_DIM), DTYPE)
    p["patch_b"] = jnp.zeros((VIS_DIM,), DTYPE)
    p["cls_token"] = 0.02 * jax.random.normal(next(ks), (1, 1, VIS_DIM), DTYPE)
    p["vis_pos"] = 0.01 * jax.random.normal(next(ks), (1 + N_PATCH, VIS_DIM), DTYPE)
    p["ln_post_g"] = jnp.ones((VIS_DIM,), DTYPE)
    p["ln_post_b"] = jnp.zeros((VIS_DIM,), DTYPE)
    p["vis_proj"] = (0.05 * jax.random.normal(
        next(ks), (VIS_DIM, PROJ_DIM), DTYPE)).astype(MXU_DTYPE)

    p["logit_scale"] = jnp.asarray(math.log(1.0 / 0.07), DTYPE)
    return p


# ----------------------------- model pieces ----------------------------------
def prompt_learner_forward(p):
    """PromptLearner.forward — a handful of (<=6x32) matmuls: plain XLA glue
    (dropping the dedicated pallas_call per the launch-count feedback)."""
    pin = jnp.concatenate([p["compound_rep_prompts"],
                           p["extra_textual_prompts"],
                           p["extra_visual_prompts"]], axis=1)   # (L, n_tok+4, REP_DIM)

    def mlp(x, m):
        h = jnp.maximum(jnp.einsum('lrd,ldh->lrh', x, m["w1"]) + m["b1"], 0.0)
        return jnp.einsum('lrh,lho->lro', h, m["w2"]) + m["b2"]

    t_all = mlp(pin, p["r2t"])
    v_all = mlp(pin, p["r2v"])
    n = N_REP_TOKENS
    after_text = t_all[:, :n]                    # r2t(rep)
    extra_text = t_all[:, n:n + 2]               # r2t(extra_textual)
    after_vis = v_all[:, :n]                     # r2v(rep)
    extra_vis = v_all[:, n + 2:n + 4]            # r2v(extra_visual)
    return after_text, after_vis, extra_text, extra_vis


def fuse(after_vision, after_text, extra_vision, extra_text, class_info,
         need_repeat, n_cls):
    """CustomCLIP.FUSE — broadcast + masked 0.5/0.5 mixing (elementwise glue)."""
    use_nc = 100
    many_sp, few_sp = use_nc * 0.2, use_nc * 0.6
    after_vision = jnp.broadcast_to(after_vision[None],
                                    (need_repeat,) + after_vision.shape)
    after_text = jnp.broadcast_to(after_text[None], (n_cls,) + after_text.shape)
    many_text = jnp.arange(n_cls) < many_sp
    mixed_t = after_text * 0.5 + extra_text[None] * 0.5
    after_text = jnp.where(many_text[:, None, None, None], mixed_t, after_text)
    if isinstance(class_info, str):
        if class_info not in ("base", "new"):
            raise NotImplementedError()
        after_vision = after_vision * 0.5 + extra_vision[None] * 0.5
    else:
        few_mask = class_info > few_sp
        mixed_v = after_vision * 0.5 + extra_vision[None] * 0.5
        after_vision = jnp.where(few_mask[:, None, None, None], mixed_v, after_vision)
    return after_vision, after_text


def text_encoder(p, after_text, tower_fn):
    """TextEncoder_PromptLT.forward — whole tower in one layer-streamed kernel."""
    nc, n_layers, n_tok, dim = after_text.shape
    ctx_len = p["prompt_embeddings"].shape[1]
    s_real = ctx_len + n_tok
    s_pad = _round_up(s_real, 8)                 # 18 -> 24 (sublane aligned)

    x_tok = p["prompt_embeddings"] + p["pos_emb"][None]
    x0 = jnp.zeros((nc, s_pad, dim), DTYPE)
    x0 = x0.at[:, 0:1].set(x_tok[:, 0:1])                       # SOS
    x0 = x0.at[:, 1 + n_tok:n_tok + ctx_len].set(x_tok[:, 1:])  # shifted tokens
    # rows 1..1+n_tok are the rep-token slots, filled in-kernel each layer.

    # NOTE: faithful reference quirk — the EOT shift is
    # compound_rep_tokens_text[0].shape[0] (== n_layers after FUSE); it only
    # equals the true inserted-token shift because N_REP_LAYERS == N_REP_TOKENS.
    n_rep_shift = n_layers
    eot_index = jnp.argmax(p["tokenized_prompts"], axis=-1)
    sel = jax.nn.one_hot(eot_index + n_rep_shift, s_pad, dtype=DTYPE)   # (nc, S)

    rep = jnp.transpose(after_text, (1, 0, 2, 3))               # (L, nc, n_tok, D)
    lnf = jnp.stack([p["ln_final_g"], p["ln_final_b"]], axis=0)
    return tower_fn(x0, rep, sel, lnf, p["text_projection"], p["text_blocks"],
                    n_tok=n_tok, rep_start=1, s_real=s_real, causal=True)


def image_encoder(p, image, after_vision, tower_fn):
    """clip_model.visual stand-in — deep-prompted tower, one layer-streamed kernel."""
    b, c, h, w = image.shape
    n_tok, dim = after_vision.shape[2], after_vision.shape[3]
    ph, pw = h // PATCH, w // PATCH
    n_patch = ph * pw
    s_real = 1 + n_patch + n_tok
    s_pad = _round_up(s_real, 8)                 # 19 -> 24 (sublane aligned)

    patches = image.reshape(b, c, ph, PATCH, pw, PATCH)
    patches = patches.transpose(0, 2, 4, 1, 3, 5).reshape(b, n_patch, c * PATCH * PATCH)
    # patch embed is one tiny matmul -> wrapper glue (launch-count feedback).
    pe = jnp.einsum('bpc,cd->bpd', patches, p["patch_w"]) + p["patch_b"]

    x0 = jnp.zeros((b, s_pad, dim), DTYPE)
    x0 = x0.at[:, 0].set(p["cls_token"][0, 0] + p["vis_pos"][0])
    x0 = x0.at[:, 1:1 + n_patch].set(pe + p["vis_pos"][1:][None])
    # last n_tok valid rows are the visual-prompt slots, filled in-kernel each layer.

    sel = jax.nn.one_hot(jnp.zeros((b,), jnp.int32), s_pad, dtype=DTYPE)   # CLS rows
    rep = jnp.transpose(after_vision, (1, 0, 2, 3))             # (L, B, n_tok, D)
    lnf = jnp.stack([p["ln_post_g"], p["ln_post_b"]], axis=0)
    return tower_fn(x0, rep, sel, lnf, p["vis_proj"], p["vis_blocks"],
                    n_tok=n_tok, rep_start=1 + n_patch, s_real=s_real, causal=False)


def custom_clip_forward(p, image, class_info=None, tower_fn=None):
    """CustomCLIP.forward."""
    tower_fn = _tower_forward if tower_fn is None else tower_fn
    need_repeat = image.shape[0]
    after_text, after_vision, extra_text, extra_vision = prompt_learner_forward(p)
    after_vision, after_text = fuse(after_vision, after_text, extra_vision,
                                    extra_text, class_info, need_repeat, N_CLS)
    text_features = text_encoder(p, after_text, tower_fn)          # L2-normalized
    image_features = image_encoder(p, image.astype(DTYPE), after_vision, tower_fn)
    scale = jnp.exp(p["logit_scale"])
    # (B, P) x (P, C) is one vreg of work -> plain XLA (launch-count feedback).
    logits = scale * (image_features @ text_features.T)
    return logits, image_features, text_features


# ----------------------------- main -------------------------------------------
if __name__ == "__main__":
    key = jax.random.PRNGKey(0)
    pkey, ikey = jax.random.split(key)
    params = _init_params(pkey)
    image = jax.random.normal(ikey, (BATCH, 3, IMG_SIZE, IMG_SIZE), DTYPE)  # NCHW

    fwd = jax.jit(functools.partial(custom_clip_forward, class_info="base"))
    logits, img_f, txt_f = fwd(params, image)
    jax.block_until_ready((logits, img_f, txt_f))

    # pure-f32 JAX reference (same bf16 weight values, f32 activations/math)
    ref_logits, ref_img, ref_txt = custom_clip_forward(
        params, image, class_info="base", tower_fn=_tower_ref)
    jax.block_until_ready((ref_logits, ref_img, ref_txt))

    assert logits.shape == (BATCH, N_CLS)
    assert img_f.shape == (BATCH, PROJ_DIM)
    assert txt_f.shape == (N_CLS, PROJ_DIM)
    assert bool(jnp.all(jnp.isfinite(logits)))
    # loose tolerances bound the bf16-MXU / approx-reciprocal drift vs f32 ref
    assert float(jnp.max(jnp.abs(img_f - ref_img))) < 1e-1
    assert float(jnp.max(jnp.abs(txt_f - ref_txt))) < 1e-1
    assert float(jnp.max(jnp.abs(logits - ref_logits))) < 1.5
    print("KERNEL_OK")
</pallas_src>

<mosaic_0001>
module attributes {stable_mosaic.version = 11 : i64} {
  func.func @_tower_kernel(%arg0: i32, %arg1: memref<8x24x64xf32, #tpu.memory_space<vmem>>, %arg2: memref<1x8x2x64xf32, #tpu.memory_space<vmem>>, %arg3: memref<8x24xf32, #tpu.memory_space<vmem>>, %arg4: memref<2x64xf32, #tpu.memory_space<vmem>>, %arg5: memref<64x32xbf16, #tpu.memory_space<vmem>>, %arg6: memref<1x4x64xf32, #tpu.memory_space<vmem>>, %arg7: memref<1x64x192xbf16, #tpu.memory_space<vmem>>, %arg8: memref<1x1x192xf32, #tpu.memory_space<vmem>>, %arg9: memref<1x64x64xbf16, #tpu.memory_space<vmem>>, %arg10: memref<1x1x64xf32, #tpu.memory_space<vmem>>, %arg11: memref<1x64x256xbf16, #tpu.memory_space<vmem>>, %arg12: memref<1x1x256xf32, #tpu.memory_space<vmem>>, %arg13: memref<1x256x64xbf16, #tpu.memory_space<vmem>>, %arg14: memref<1x1x64xf32, #tpu.memory_space<vmem>>, %arg15: memref<8x32xf32, #tpu.memory_space<vmem>>, %arg16: memref<8x24x64xf32, #tpu.memory_space<vmem>>) attributes {dimension_semantics = [#tpu.dimension_semantics<arbitrary>], iteration_bounds = array<i64: 2>, scalar_prefetch = 0 : i64, scratch_operands = 1 : i64, tpu.core_type = #tpu.core_type<tc>, window_params = [{pipeline_mode = #tpu.pipeline_mode<synchronous>, transform_indices = @transform_0, window_bounds = array<i64: 8, 24, 64>}, {transform_indices = @transform_1, window_bounds = array<i64: 1, 8, 2, 64>}, {pipeline_mode = #tpu.pipeline_mode<synchronous>, transform_indices = @transform_2, window_bounds = array<i64: 8, 24>}, {pipeline_mode = #tpu.pipeline_mode<synchronous>, transform_indices = @transform_3, window_bounds = array<i64: 2, 64>}, {pipeline_mode = #tpu.pipeline_mode<synchronous>, transform_indices = @transform_4, window_bounds = array<i64: 64, 32>}, {transform_indices = @transform_5, window_bounds = array<i64: 1, 4, 64>}, {transform_indices = @transform_6, window_bounds = array<i64: 1, 64, 192>}, {transform_indices = @transform_7, window_bounds = array<i64: 1, 1, 192>}, {transform_indices = @transform_8, window_bounds = array<i64: 1, 64, 64>}, {transform_indices = @transform_9, window_bounds = array<i64: 1, 1, 64>}, {transform_indices = @transform_10, window_bounds = array<i64: 1, 64, 256>}, {transform_indices = @transform_11, window_bounds = array<i64: 1, 1, 256>}, {transform_indices = @transform_12, window_bounds = array<i64: 1, 256, 64>}, {transform_indices = @transform_13, window_bounds = array<i64: 1, 1, 64>}, {pipeline_mode = #tpu.pipeline_mode<synchronous>, transform_indices = @transform_14, window_bounds = array<i64: 8, 32>}]} {
    %c0_i32 = arith.constant 0 : i32
    %0 = arith.cmpi eq, %arg0, %c0_i32 : i32
    %1 = arith.extui %0 : i1 to i32
    %c0_i32_0 = arith.constant 0 : i32
    %2 = arith.cmpi ne, %1, %c0_i32_0 : i32
    scf.if %2 {
      %c0_62 = arith.constant 0 : index
      %c0_63 = arith.constant 0 : index
      %c0_64 = arith.constant 0 : index
      %141 = vector.load %arg1[%c0_62, %c0_63, %c0_64] : memref<8x24x64xf32, #tpu.memory_space<vmem>>, vector<8x24x64xf32>
      %c0_65 = arith.constant 0 : index
      %c0_66 = arith.constant 0 : index
      %c0_67 = arith.constant 0 : index
      %142 = vector.load %arg16[%c0_65, %c0_66, %c0_67] : memref<8x24x64xf32, #tpu.memory_space<vmem>>, vector<8x24x64xf32>
      tpu.vector_store %arg16[%c0_65, %c0_66, %c0_67], %141 {strides = array<i32>} : memref<8x24x64xf32, #tpu.memory_space<vmem>>, vector<8x24x64xf32>,
    } else {
    }
    %c0 = arith.constant 0 : index
    %c0_1 = arith.constant 0 : index
    %c0_2 = arith.constant 0 : index
    %c0_3 = arith.constant 0 : index
    %3 = vector.load %arg2[%c0, %c0_1, %c0_2, %c0_3] : memref<1x8x2x64xf32, #tpu.memory_space<vmem>>, vector<1x8x2x64xf32>
    %4 = vector.shape_cast %3 : vector<1x8x2x64xf32> to vector<8x2x64xf32>
    %c0_4 = arith.constant 0 : index
    %c1 = arith.constant 1 : index
    %c0_5 = arith.constant 0 : index
    %5 = vector.load %arg16[%c0_4, %c1, %c0_5] : memref<8x24x64xf32, #tpu.memory_space<vmem>>, vector<8x2x64xf32>
    tpu.vector_store %arg16[%c0_4, %c1, %c0_5], %4 {strides = array<i32>} : memref<8x24x64xf32, #tpu.memory_space<vmem>>, vector<8x2x64xf32>,
    %c0_6 = arith.constant 0 : index
    %c0_7 = arith.constant 0 : index
    %c0_8 = arith.constant 0 : index
    %6 = vector.load %arg6[%c0_6, %c0_7, %c0_8] : memref<1x4x64xf32, #tpu.memory_space<vmem>>, vector<1x4x64xf32>
    %7 = vector.shape_cast %6 : vector<1x4x64xf32> to vector<4x64xf32>
    %c0_9 = arith.constant 0 : index
    %c0_10 = arith.constant 0 : index
    %c0_11 = arith.constant 0 : index
    %8 = vector.load %arg16[%c0_9, %c0_10, %c0_11] : memref<8x24x64xf32, #tpu.memory_space<vmem>>, vector<8x24x64xf32>
    %9 = vector.shape_cast %8 : vector<8x24x64xf32> to vector<192x64xf32>
    %10 = vector.extract_strided_slice %7 {offsets = [0, 0], sizes = [1, 64], strides = [1, 1]} : vector<4x64xf32> to vector<1x64xf32>
    %11 = vector.extract_strided_slice %7 {offsets = [1, 0], sizes = [1, 64], strides = [1, 1]} : vector<4x64xf32> to vector<1x64xf32>
    %cst = arith.constant dense<0.000000e+00> : vector<192xf32>
    %12 = vector.multi_reduction <add>, %9, %cst [1] : vector<192x64xf32> to vector<192xf32>
    %13 = vector.shape_cast %12 : vector<192xf32> to vector<192x1xf32>
    %cst_12 = arith.constant 6.400000e+01 : f32
    %14 = vector.broadcast %cst_12 : f32 to vector<192x1xf32>
    %15 = arith.divf %13, %14 : vector<192x1xf32>
    %16 = vector.broadcast %15 : vector<192x1xf32> to vector<192x64xf32>
    %17 = arith.subf %9, %16 : vector<192x64xf32>
    %18 = arith.mulf %17, %17 : vector<192x64xf32>
    %cst_13 = arith.constant dense<0.000000e+00> : vector<192xf32>
    %19 = vector.multi_reduction <add>, %18, %cst_13 [1] : vector<192x64xf32> to vector<192xf32>
    %20 = vector.shape_cast %19 : vector<192xf32> to vector<192x1xf32>
    %cst_14 = arith.constant 6.400000e+01 : f32
    %21 = vector.broadcast %cst_14 : f32 to vector<192x1xf32>
    %22 = arith.divf %20, %21 : vector<192x1xf32>
    %23 = vector.broadcast %15 : vector<192x1xf32> to vector<192x64xf32>
    %24 = arith.subf %9, %23 : vector<192x64xf32>
    %cst_15 = arith.constant 9.99999974E-6 : f32
    %25 = vector.broadcast %cst_15 : f32 to vector<192x1xf32>
    %26 = arith.addf %22, %25 : vector<192x1xf32>
    %27 = math.rsqrt %26 : vector<192x1xf32>
    %28 = vector.broadcast %27 : vector<192x1xf32> to vector<192x64xf32>
    %29 = arith.mulf %24, %28 : vector<192x64xf32>
    %30 = vector.broadcast %10 : vector<1x64xf32> to vector<192x64xf32>
    %31 = arith.mulf %29, %30 : vector<192x64xf32>
    %32 = vector.broadcast %11 : vector<1x64xf32> to vector<192x64xf32>
    %33 = arith.addf %31, %32 : vector<192x64xf32>
    %c0_16 = arith.constant 0 : index
    %c0_17 = arith.constant 0 : index
    %c0_18 = arith.constant 0 : index
    %34 = vector.load %arg7[%c0_16, %c0_17, %c0_18] : memref<1x64x192xbf16, #tpu.memory_space<vmem>>, vector<1x64x192xbf16>
    %35 = vector.shape_cast %34 : vector<1x64x192xbf16> to vector<64x192xbf16>
    %36 = arith.truncf %33 : vector<192x64xf32> to vector<192x64xbf16>
    %cst_19 = arith.constant dense<0.000000e+00> : vector<192x192xf32>
    %37 = tpu.matmul %36, %35, %cst_19 {dimension_numbers = #tpu.dot_dimension_numbers<[1], [0], [0], [1], [0, 0, 1, 1], [], []>} : vector<192x64xbf16>, vector<64x192xbf16>, vector<192x192xf32> -> vector<192x192xf32>
    %c0_20 = arith.constant 0 : index
    %c0_21 = arith.constant 0 : index
    %c0_22 = arith.constant 0 : index
    %38 = vector.load %arg8[%c0_20, %c0_21, %c0_22] : memref<1x1x192xf32, #tpu.memory_space<vmem>>, vector<1x1x192xf32>
    %39 = vector.shape_cast %38 : vector<1x1x192xf32> to vector<1x192xf32>
    %40 = vector.broadcast %39 : vector<1x192xf32> to vector<192x192xf32>
    %41 = arith.addf %37, %40 : vector<192x192xf32>
    %42 = vector.extract_strided_slice %41 {offsets = [0, 0], sizes = [192, 64], strides = [1, 1]} : vector<192x192xf32> to vector<192x64xf32>
    %43 = vector.shape_cast %42 : vector<192x64xf32> to vector<8x24x64xf32>
    %44 = vector.extract_strided_slice %41 {offsets = [0, 64], sizes = [192, 64], strides = [1, 1]} : vector<192x192xf32> to vector<192x64xf32>
    %45 = vector.shape_cast %44 : vector<192x64xf32> to vector<8x24x64xf32>
    %46 = vector.extract_strided_slice %41 {offsets = [0, 128], sizes = [192, 64], strides = [1, 1]} : vector<192x192xf32> to vector<192x64xf32>
    %47 = vector.shape_cast %46 : vector<192x64xf32> to vector<8x24x64xf32>
    %48 = tpu.iota {dimensions = array<i32: 0>} : vector<24x24xi32>
    %49 = tpu.iota {dimensions = array<i32: 1>} : vector<24x24xi32>
    %c18_i32 = arith.constant 18 : i32
    %50 = vector.broadcast %c18_i32 : i32 to vector<24x24xi32>
    %51 = arith.cmpi slt, %49, %50 : vector<24x24xi32>
    %52 = arith.cmpi sle, %49, %48 : vector<24x24xi32>
    %53 = arith.andi %51, %52 : vector<24x24xi1>
    %cst_23 = arith.constant 0.000000e+00 : f32
    %cst_24 = arith.constant -1.000000e+30 : f32
    %54 = vector.broadcast %cst_23 : f32 to vector<24x24xf32>
    %55 = vector.broadcast %cst_24 : f32 to vector<24x24xf32>
    %56 = arith.select %53, %54, %55 : vector<24x24xi1>, vector<24x24xf32>
    %57 = arith.truncf %43 : vector<8x24x64xf32> to vector<8x24x64xbf16>
    %58 = arith.truncf %45 : vector<8x24x64xf32> to vector<8x24x64xbf16>
    "tpu.trace_start"() <{level = 10 : i32, message = "bqd,bkd->bqk"}> : () -> ()
    %cst_25 = arith.constant dense<0.000000e+00> : vector<8x24x24xf32>
    %59 = tpu.matmul %57, %58, %cst_25 {dimension_numbers = #tpu.dot_dimension_numbers<[2], [2], [1], [1], [0, 0, 0, 1, 1, 1], [0], [0]>} : vector<8x24x64xbf16>, vector<8x24x64xbf16>, vector<8x24x24xf32> -> vector<8x24x24xf32>
    "tpu.trace_stop"() : () -> ()
    %cst_26 = arith.constant 1.250000e-01 : f32
    %60 = vector.broadcast %cst_26 : f32 to vector<8x24x24xf32>
    %61 = arith.mulf %59, %60 : vector<8x24x24xf32>
    %62 = vector.shape_cast %56 : vector<24x24xf32> to vector<1x24x24xf32>
    %63 = vector.broadcast %62 : vector<1x24x24xf32> to vector<8x24x24xf32>
    %64 = arith.addf %61, %63 : vector<8x24x24xf32>
    %cst_27 = arith.constant dense<0xFF800000> : vector<8x24xf32>
    %65 = vector.multi_reduction <maximumf>, %64, %cst_27 [2] : vector<8x24x24xf32> to vector<8x24xf32>
    %66 = vector.shape_cast %65 : vector<8x24xf32> to vector<8x24x1xf32>
    %67 = vector.broadcast %66 : vector<8x24x1xf32> to vector<8x24x24xf32>
    %68 = arith.subf %64, %67 : vector<8x24x24xf32>
    %69 = math.exp %68 : vector<8x24x24xf32>
    %cst_28 = arith.constant dense<0.000000e+00> : vector<8x24xf32>
    %70 = vector.multi_reduction <add>, %69, %cst_28 [2] : vector<8x24x24xf32> to vector<8x24xf32>
    %71 = vector.shape_cast %70 : vector<8x24xf32> to vector<8x24x1xf32>
    %72 = tpu.reciprocal %71 {approx = true} : vector<8x24x1xf32> -> vector<8x24x1xf32>
    %73 = vector.broadcast %72 : vector<8x24x1xf32> to vector<8x24x24xf32>
    %74 = arith.mulf %69, %73 : vector<8x24x24xf32>
    %75 = arith.truncf %74 : vector<8x24x24xf32> to vector<8x24x24xbf16>
    %76 = arith.truncf %47 : vector<8x24x64xf32> to vector<8x24x64xbf16>
    "tpu.trace_start"() <{level = 10 : i32, message = "bqk,bkd->bqd"}> : () -> ()
    %cst_29 = arith.constant dense<0.000000e+00> : vector<8x24x64xf32>
    %77 = tpu.matmul %75, %76, %cst_29 {dimension_numbers = #tpu.dot_dimension_numbers<[2], [1], [1], [2], [0, 0, 0, 1, 1, 2], [0], [0]>} : vector<8x24x24xbf16>, vector<8x24x64xbf16>, vector<8x24x64xf32> -> vector<8x24x64xf32>
    "tpu.trace_stop"() : () -> ()
    %78 = vector.shape_cast %77 : vector<8x24x64xf32> to vector<192x64xf32>
    %c0_30 = arith.constant 0 : index
    %c0_31 = arith.constant 0 : index
    %c0_32 = arith.constant 0 : index
    %79 = vector.load %arg9[%c0_30, %c0_31, %c0_32] : memref<1x64x64xbf16, #tpu.memory_space<vmem>>, vector<1x64x64xbf16>
    %80 = vector.shape_cast %79 : vector<1x64x64xbf16> to vector<64x64xbf16>
    %81 = arith.truncf %78 : vector<192x64xf32> to vector<192x64xbf16>
    %cst_33 = arith.constant dense<0.000000e+00> : vector<192x64xf32>
    %82 = tpu.matmul %81, %80, %cst_33 {dimension_numbers = #tpu.dot_dimension_numbers<[1], [0], [0], [1], [0, 0, 1, 1], [], []>} : vector<192x64xbf16>, vector<64x64xbf16>, vector<192x64xf32> -> vector<192x64xf32>
    %c0_34 = arith.constant 0 : index
    %c0_35 = arith.constant 0 : index
    %c0_36 = arith.constant 0 : index
    %83 = vector.load %arg10[%c0_34, %c0_35, %c0_36] : memref<1x1x64xf32, #tpu.memory_space<vmem>>, vector<1x1x64xf32>
    %84 = vector.shape_cast %83 : vector<1x1x64xf32> to vector<1x64xf32>
    %85 = vector.broadcast %84 : vector<1x64xf32> to vector<192x64xf32>
    %86 = arith.addf %82, %85 : vector<192x64xf32>
    %87 = arith.addf %9, %86 : vector<192x64xf32>
    %88 = vector.extract_strided_slice %7 {offsets = [2, 0], sizes = [1, 64], strides = [1, 1]} : vector<4x64xf32> to vector<1x64xf32>
    %89 = vector.extract_strided_slice %7 {offsets = [3, 0], sizes = [1, 64], strides = [1, 1]} : vector<4x64xf32> to vector<1x64xf32>
    %cst_37 = arith.constant dense<0.000000e+00> : vector<192xf32>
    %90 = vector.multi_reduction <add>, %87, %cst_37 [1] : vector<192x64xf32> to vector<192xf32>
    %91 = vector.shape_cast %90 : vector<192xf32> to vector<192x1xf32>
    %cst_38 = arith.constant 6.400000e+01 : f32
    %92 = vector.broadcast %cst_38 : f32 to vector<192x1xf32>
    %93 = arith.divf %91, %92 : vector<192x1xf32>
    %94 = vector.broadcast %93 : vector<192x1xf32> to vector<192x64xf32>
    %95 = arith.subf %87, %94 : vector<192x64xf32>
    %96 = arith.mulf %95, %95 : vector<192x64xf32>
    %cst_39 = arith.constant dense<0.000000e+00> : vector<192xf32>
    %97 = vector.multi_reduction <add>, %96, %cst_39 [1] : vector<192x64xf32> to vector<192xf32>
    %98 = vector.shape_cast %97 : vector<192xf32> to vector<192x1xf32>
    %cst_40 = arith.constant 6.400000e+01 : f32
    %99 = vector.broadcast %cst_40 : f32 to vector<192x1xf32>
    %100 = arith.divf %98, %99 : vector<192x1xf32>
    %101 = vector.broadcast %93 : vector<192x1xf32> to vector<192x64xf32>
    %102 = arith.subf %87, %101 : vector<192x64xf32>
    %cst_41 = arith.constant 9.99999974E-6 : f32
    %103 = vector.broadcast %cst_41 : f32 to vector<192x1xf32>
    %104 = arith.addf %100, %103 : vector<192x1xf32>
    %105 = math.rsqrt %104 : vector<192x1xf32>
    %106 = vector.broadcast %105 : vector<192x1xf32> to vector<192x64xf32>
    %107 = arith.mulf %102, %106 : vector<192x64xf32>
    %108 = vector.broadcast %88 : vector<1x64xf32> to vector<192x64xf32>
    %109 = arith.mulf %107, %108 : vector<192x64xf32>
    %110 = vector.broadcast %89 : vector<1x64xf32> to vector<192x64xf32>
    %111 = arith.addf %109, %110 : vector<192x64xf32>
    %c0_42 = arith.constant 0 : index
    %c0_43 = arith.constant 0 : index
    %c0_44 = arith.constant 0 : index
    %112 = vector.load %arg11[%c0_42, %c0_43, %c0_44] : memref<1x64x256xbf16, #tpu.memory_space<vmem>>, vector<1x64x256xbf16>
    %113 = vector.shape_cast %112 : vector<1x64x256xbf16> to vector<64x256xbf16>
    %114 = arith.truncf %111 : vector<192x64xf32> to vector<192x64xbf16>
    %cst_45 = arith.constant dense<0.000000e+00> : vector<192x256xf32>
    %115 = tpu.matmul %114, %113, %cst_45 {dimension_numbers = #tpu.dot_dimension_numbers<[1], [0], [0], [1], [0, 0, 1, 1], [], []>} : vector<192x64xbf16>, vector<64x256xbf16>, vector<192x256xf32> -> vector<192x256xf32>
    %c0_46 = arith.constant 0 : index
    %c0_47 = arith.constant 0 : index
    %c0_48 = arith.constant 0 : index
    %116 = vector.load %arg12[%c0_46, %c0_47, %c0_48] : memref<1x1x256xf32, #tpu.memory_space<vmem>>, vector<1x1x256xf32>
    %117 = vector.shape_cast %116 : vector<1x1x256xf32> to vector<1x256xf32>
    %118 = vector.broadcast %117 : vector<1x256xf32> to vector<192x256xf32>
    %119 = arith.addf %115, %118 : vector<192x256xf32>
    %cst_49 = arith.constant -1.702000e+00 : f32
    %120 = vector.broadcast %cst_49 : f32 to vector<192x256xf32>
    %121 = arith.mulf %120, %119 : vector<192x256xf32>
    %122 = math.exp %121 : vector<192x256xf32>
    %cst_50 = arith.constant 1.000000e+00 : f32
    %123 = vector.broadcast %cst_50 : f32 to vector<192x256xf32>
    %124 = arith.addf %123, %122 : vector<192x256xf32>
    %125 = tpu.reciprocal %124 {approx = true} : vector<192x256xf32> -> vector<192x256xf32>
    %126 = arith.mulf %119, %125 : vector<192x256xf32>
    %c0_51 = arith.constant 0 : index
    %c0_52 = arith.constant 0 : index
    %c0_53 = arith.constant 0 : index
    %127 = vector.load %arg13[%c0_51, %c0_52, %c0_53] : memref<1x256x64xbf16, #tpu.memory_space<vmem>>, vector<1x256x64xbf16>
    %128 = vector.shape_cast %127 : vector<1x256x64xbf16> to vector<256x64xbf16>
    %129 = arith.truncf %126 : vector<192x256xf32> to vector<192x256xbf16>
    %cst_54 = arith.constant dense<0.000000e+00> : vector<192x64xf32>
    %130 = tpu.matmul %129, %128, %cst_54 {dimension_numbers = #tpu.dot_dimension_numbers<[1], [0], [0], [1], [0, 0, 1, 1], [], []>} : vector<192x256xbf16>, vector<256x64xbf16>, vector<192x64xf32> -> vector<192x64xf32>
    %c0_55 = arith.constant 0 : index
    %c0_56 = arith.constant 0 : index
    %c0_57 = arith.constant 0 : index
    %131 = vector.load %arg14[%c0_55, %c0_56, %c0_57] : memref<1x1x64xf32, #tpu.memory_space<vmem>>, vector<1x1x64xf32>
    %132 = vector.shape_cast %131 : vector<1x1x64xf32> to vector<1x64xf32>
    %133 = vector.broadcast %132 : vector<1x64xf32> to vector<192x64xf32>
    %134 = arith.addf %130, %133 : vector<192x64xf32>
    %135 = arith.addf %87, %134 : vector<192x64xf32>
    %136 = vector.shape_cast %135 : vector<192x64xf32> to vector<8x24x64xf32>
    %c0_58 = arith.constant 0 : index
    %c0_59 = arith.constant 0 : index
    %c0_60 = arith.constant 0 : index
    %137 = vector.load %arg16[%c0_58, %c0_59, %c0_60] : memref<8x24x64xf32, #tpu.memory_space<vmem>>, vector<8x24x64xf32>
    tpu.vector_store %arg16[%c0_58, %c0_59, %c0_60], %136 {strides = array<i32>} : memref<8x24x64xf32, #tpu.memory_space<vmem>>, vector<8x24x64xf32>,
    %c1_i32 = arith.constant 1 : i32
    %138 = arith.cmpi eq, %arg0, %c1_i32 : i32
    %139 = arith.extui %138 : i1 to i32
    %c0_i32_61 = arith.constant 0 : i32
    %140 = arith.cmpi ne, %139, %c0_i32_61 : i32
    scf.if %140 {
      %c0_62 = arith.constant 0 : index
      %c0_63 = arith.constant 0 : index
      %c0_64 = arith.constant 0 : index
      %141 = vector.load %arg16[%c0_62, %c0_63, %c0_64] : memref<8x24x64xf32, #tpu.memory_space<vmem>>, vector<8x24x64xf32>
      %c0_65 = arith.constant 0 : index
      %c0_66 = arith.constant 0 : index
      %142 = vector.load %arg3[%c0_65, %c0_66] : memref<8x24xf32, #tpu.memory_space<vmem>>, vector<8x24xf32>
      %143 = vector.shape_cast %142 : vector<8x24xf32> to vector<8x24x1xf32>
      %144 = vector.broadcast %143 : vector<8x24x1xf32> to vector<8x24x64xf32>
      %145 = arith.mulf %141, %144 : vector<8x24x64xf32>
      %cst_67 = arith.constant dense<0.000000e+00> : vector<8x64xf32>
      %146 = vector.multi_reduction <add>, %145, %cst_67 [1] : vector<8x24x64xf32> to vector<8x64xf32>
      %c0_68 = arith.constant 0 : index
      %c0_69 = arith.constant 0 : index
      %147 = vector.load %arg4[%c0_68, %c0_69] : memref<2x64xf32, #tpu.memory_space<vmem>>, vector<2x64xf32>
      %148 = vector.extract_strided_slice %147 {offsets = [0, 0], sizes = [1, 64], strides = [1, 1]} : vector<2x64xf32> to vector<1x64xf32>
      %149 = vector.extract_strided_slice %147 {offsets = [1, 0], sizes = [1, 64], strides = [1, 1]} : vector<2x64xf32> to vector<1x64xf32>
      %cst_70 = arith.constant dense<0.000000e+00> : vector<8xf32>
      %150 = vector.multi_reduction <add>, %146, %cst_70 [1] : vector<8x64xf32> to vector<8xf32>
      %151 = vector.shape_cast %150 : vector<8xf32> to vector<8x1xf32>
      %cst_71 = arith.constant 6.400000e+01 : f32
      %152 = vector.broadcast %cst_71 : f32 to vector<8x1xf32>
      %153 = arith.divf %151, %152 : vector<8x1xf32>
      %154 = vector.broadcast %153 : vector<8x1xf32> to vector<8x64xf32>
      %155 = arith.subf %146, %154 : vector<8x64xf32>
      %156 = arith.mulf %155, %155 : vector<8x64xf32>
      %cst_72 = arith.constant dense<0.000000e+00> : vector<8xf32>
      %157 = vector.multi_reduction <add>, %156, %cst_72 [1] : vector<8x64xf32> to vector<8xf32>
      %158 = vector.shape_cast %157 : vector<8xf32> to vector<8x1xf32>
      %cst_73 = arith.constant 6.400000e+01 : f32
      %159 = vector.broadcast %cst_73 : f32 to vector<8x1xf32>
      %160 = arith.divf %158, %159 : vector<8x1xf32>
      %161 = vector.broadcast %153 : vector<8x1xf32> to vector<8x64xf32>
      %162 = arith.subf %146, %161 : vector<8x64xf32>
      %cst_74 = arith.constant 9.99999974E-6 : f32
      %163 = vector.broadcast %cst_74 : f32 to vector<8x1xf32>
      %164 = arith.addf %160, %163 : vector<8x1xf32>
      %165 = math.rsqrt %164 : vector<8x1xf32>
      %166 = vector.broadcast %165 : vector<8x1xf32> to vector<8x64xf32>
      %167 = arith.mulf %162, %166 : vector<8x64xf32>
      %168 = vector.broadcast %148 : vector<1x64xf32> to vector<8x64xf32>
      %169 = arith.mulf %167, %168 : vector<8x64xf32>
      %170 = vector.broadcast %149 : vector<1x64xf32> to vector<8x64xf32>
      %171 = arith.addf %169, %170 : vector<8x64xf32>
      %172 = arith.truncf %171 : vector<8x64xf32> to vector<8x64xbf16>
      %c0_75 = arith.constant 0 : index
      %c0_76 = arith.constant 0 : index
      %173 = vector.load %arg5[%c0_75, %c0_76] : memref<64x32xbf16, #tpu.memory_space<vmem>>, vector<64x32xbf16>
      %cst_77 = arith.constant dense<0.000000e+00> : vector<8x32xf32>
      %174 = tpu.matmul %172, %173, %cst_77 {dimension_numbers = #tpu.dot_dimension_numbers<[1], [0], [0], [1], [0, 0, 1, 1], [], []>} : vector<8x64xbf16>, vector<64x32xbf16>, vector<8x32xf32> -> vector<8x32xf32>
      %175 = arith.mulf %174, %174 : vector<8x32xf32>
      %cst_78 = arith.constant dense<0.000000e+00> : vector<8xf32>
      %176 = vector.multi_reduction <add>, %175, %cst_78 [1] : vector<8x32xf32> to vector<8xf32>
      %177 = vector.shape_cast %176 : vector<8xf32> to vector<8x1xf32>
      %cst_79 = arith.constant 9.99999996E-13 : f32
      %178 = vector.broadcast %cst_79 : f32 to vector<8x1xf32>
      %179 = arith.addf %177, %178 : vector<8x1xf32>
      %180 = math.rsqrt %179 : vector<8x1xf32>
      %181 = vector.broadcast %180 : vector<8x1xf32> to vector<8x32xf32>
      %182 = arith.mulf %174, %181 : vector<8x32xf32>
      %c0_80 = arith.constant 0 : index
      %c0_81 = arith.constant 0 : index
      %183 = vector.load %arg15[%c0_80, %c0_81] : memref<8x32xf32, #tpu.memory_space<vmem>>, vector<8x32xf32>
      tpu.vector_store %arg15[%c0_80, %c0_81], %182 {strides = array<i32>} : memref<8x32xf32, #tpu.memory_space<vmem>>, vector<8x32xf32>,
    } else {
    }
    return
  }
  func.func @transform_0(%arg0: i32) -> (i32, i32, i32) {
    %c0_i32 = arith.constant 0 : i32
    %c0_i32_0 = arith.constant 0 : i32
    %c0_i32_1 = arith.constant 0 : i32
    %c0_i32_2 = arith.constant 0 : i32
    return %c0_i32, %c0_i32_0, %c0_i32_1 : i32, i32, i32
  }
  func.func @transform_1(%arg0: i32) -> (i32, i32, i32, i32) {
    %c0_i32 = arith.constant 0 : i32
    %c0_i32_0 = arith.constant 0 : i32
    %c0_i32_1 = arith.constant 0 : i32
    %c0_i32_2 = arith.constant 0 : i32
    return %arg0, %c0_i32, %c0_i32_0, %c0_i32_1 : i32, i32, i32, i32
  }
  func.func @transform_2(%arg0: i32) -> (i32, i32) {
    %c0_i32 = arith.constant 0 : i32
    %c0_i32_0 = arith.constant 0 : i32
    %c0_i32_1 = arith.constant 0 : i32
    return %c0_i32, %c0_i32_0 : i32, i32
  }
  func.func @transform_3(%arg0: i32) -> (i32, i32) {
    %c0_i32 = arith.constant 0 : i32
    %c0_i32_0 = arith.constant 0 : i32
    %c0_i32_1 = arith.constant 0 : i32
    return %c0_i32, %c0_i32_0 : i32, i32
  }
  func.func @transform_4(%arg0: i32) -> (i32, i32) {
    %c0_i32 = arith.constant 0 : i32
    %c0_i32_0 = arith.constant 0 : i32
    %c0_i32_1 = arith.constant 0 : i32
    return %c0_i32, %c0_i32_0 : i32, i32
  }
  func.func @transform_5(%arg0: i32) -> (i32, i32, i32) {
    %c0_i32 = arith.constant 0 : i32
    %c0_i32_0 = arith.constant 0 : i32
    %c0_i32_1 = arith.constant 0 : i32
    return %arg0, %c0_i32, %c0_i32_0 : i32, i32, i32
  }
  func.func @transform_6(%arg0: i32) -> (i32, i32, i32) {
    %c0_i32 = arith.constant 0 : i32
    %c0_i32_0 = arith.constant 0 : i32
    %c0_i32_1 = arith.constant 0 : i32
    return %arg0, %c0_i32, %c0_i32_0 : i32, i32, i32
  }
  func.func @transform_7(%arg0: i32) -> (i32, i32, i32) {
    %c0_i32 = arith.constant 0 : i32
    %c0_i32_0 = arith.constant 0 : i32
    %c0_i32_1 = arith.constant 0 : i32
    return %arg0, %c0_i32, %c0_i32_0 : i32, i32, i32
  }
  func.func @transform_8(%arg0: i32) -> (i32, i32, i32) {
    %c0_i32 = arith.constant 0 : i32
    %c0_i32_0 = arith.constant 0 : i32
    %c0_i32_1 = arith.constant 0 : i32
    return %arg0, %c0_i32, %c0_i32_0 : i32, i32, i32
  }
  func.func @transform_9(%arg0: i32) -> (i32, i32, i32) {
    %c0_i32 = arith.constant 0 : i32
    %c0_i32_0 = arith.constant 0 : i32
    %c0_i32_1 = arith.constant 0 : i32
    return %arg0, %c0_i32, %c0_i32_0 : i32, i32, i32
  }
  func.func @transform_10(%arg0: i32) -> (i32, i32, i32) {
    %c0_i32 = arith.constant 0 : i32
    %c0_i32_0 = arith.constant 0 : i32
    %c0_i32_1 = arith.constant 0 : i32
    return %arg0, %c0_i32, %c0_i32_0 : i32, i32, i32
  }
  func.func @transform_11(%arg0: i32) -> (i32, i32, i32) {
    %c0_i32 = arith.constant 0 : i32
    %c0_i32_0 = arith.constant 0 : i32
    %c0_i32_1 = arith.constant 0 : i32
    return %arg0, %c0_i32, %c0_i32_0 : i32, i32, i32
  }
  func.func @transform_12(%arg0: i32) -> (i32, i32, i32) {
    %c0_i32 = arith.constant 0 : i32
    %c0_i32_0 = arith.constant 0 : i32
    %c0_i32_1 = arith.constant 0 : i32
    return %arg0, %c0_i32, %c0_i32_0 : i32, i32, i32
  }
  func.func @transform_13(%arg0: i32) -> (i32, i32, i32) {
    %c0_i32 = arith.constant 0 : i32
    %c0_i32_0 = arith.constant 0 : i32
    %c0_i32_1 = arith.constant 0 : i32
    return %arg0, %c0_i32, %c0_i32_0 : i32, i32, i32
  }
  func.func @transform_14(%arg0: i32) -> (i32, i32) {
    %c0_i32 = arith.constant 0 : i32
    %c0_i32_0 = arith.constant 0 : i32
    %c0_i32_1 = arith.constant 0 : i32
    return %c0_i32, %c0_i32_0 : i32, i32
  }
}

module attributes {stable_mosaic.version = 11 : i64} {
  func.func @_tower_kernel(%arg0: i32, %arg1: memref<2x24x64xf32, #tpu.memory_space<vmem>>, %arg2: memref<1x2x2x64xf32, #tpu.memory_space<vmem>>, %arg3: memref<2x24xf32, #tpu.memory_space<vmem>>, %arg4: memref<2x64xf32, #tpu.memory_space<vmem>>, %arg5: memref<64x32xbf16, #tpu.memory_space<vmem>>, %arg6: memref<1x4x64xf32, #tpu.memory_space<vmem>>, %arg7: memref<1x64x192xbf16, #tpu.memory_space<vmem>>, %arg8: memref<1x1x192xf32, #tpu.memory_space<vmem>>, %arg9: memref<1x64x64xbf16, #tpu.memory_space<vmem>>, %arg10: memref<1x1x64xf32, #tpu.memory_space<vmem>>, %arg11: memref<1x64x256xbf16, #tpu.memory_space<vmem>>, %arg12: memref<1x1x256xf32, #tpu.memory_space<vmem>>, %arg13: memref<1x256x64xbf16, #tpu.memory_space<vmem>>, %arg14: memref<1x1x64xf32, #tpu.memory_space<vmem>>, %arg15: memref<2x32xf32, #tpu.memory_space<vmem>>, %arg16: memref<2x24x64xf32, #tpu.memory_space<vmem>>) attributes {dimension_semantics = [#tpu.dimension_semantics<arbitrary>], iteration_bounds = array<i64: 2>, scalar_prefetch = 0 : i64, scratch_operands = 1 : i64, tpu.core_type = #tpu.core_type<tc>, window_params = [{pipeline_mode = #tpu.pipeline_mode<synchronous>, transform_indices = @transform_0, window_bounds = array<i64: 2, 24, 64>}, {transform_indices = @transform_1, window_bounds = array<i64: 1, 2, 2, 64>}, {pipeline_mode = #tpu.pipeline_mode<synchronous>, transform_indices = @transform_2, window_bounds = array<i64: 2, 24>}, {pipeline_mode = #tpu.pipeline_mode<synchronous>, transform_indices = @transform_3, window_bounds = array<i64: 2, 64>}, {pipeline_mode = #tpu.pipeline_mode<synchronous>, transform_indices = @transform_4, window_bounds = array<i64: 64, 32>}, {transform_indices = @transform_5, window_bounds = array<i64: 1, 4, 64>}, {transform_indices = @transform_6, window_bounds = array<i64: 1, 64, 192>}, {transform_indices = @transform_7, window_bounds = array<i64: 1, 1, 192>}, {transform_indices = @transform_8, window_bounds = array<i64: 1, 64, 64>}, {transform_indices = @transform_9, window_bounds = array<i64: 1, 1, 64>}, {transform_indices = @transform_10, window_bounds = array<i64: 1, 64, 256>}, {transform_indices = @transform_11, window_bounds = array<i64: 1, 1, 256>}, {transform_indices = @transform_12, window_bounds = array<i64: 1, 256, 64>}, {transform_indices = @transform_13, window_bounds = array<i64: 1, 1, 64>}, {pipeline_mode = #tpu.pipeline_mode<synchronous>, transform_indices = @transform_14, window_bounds = array<i64: 2, 32>}]} {
    %c0_i32 = arith.constant 0 : i32
    %0 = arith.cmpi eq, %arg0, %c0_i32 : i32
    %1 = arith.extui %0 : i1 to i32
    %c0_i32_0 = arith.constant 0 : i32
    %2 = arith.cmpi ne, %1, %c0_i32_0 : i32
    scf.if %2 {
      %c0_62 = arith.constant 0 : index
      %c0_63 = arith.constant 0 : index
      %c0_64 = arith.constant 0 : index
      %138 = vector.load %arg1[%c0_62, %c0_63, %c0_64] : memref<2x24x64xf32, #tpu.memory_space<vmem>>, vector<2x24x64xf32>
      %c0_65 = arith.constant 0 : index
      %c0_66 = arith.constant 0 : index
      %c0_67 = arith.constant 0 : index
      %139 = vector.load %arg16[%c0_65, %c0_66, %c0_67] : memref<2x24x64xf32, #tpu.memory_space<vmem>>, vector<2x24x64xf32>
      tpu.vector_store %arg16[%c0_65, %c0_66, %c0_67], %138 {strides = array<i32>} : memref<2x24x64xf32, #tpu.memory_space<vmem>>, vector<2x24x64xf32>,
    } else {
    }
    %c0 = arith.constant 0 : index
    %c0_1 = arith.constant 0 : index
    %c0_2 = arith.constant 0 : index
    %c0_3 = arith.constant 0 : index
    %3 = vector.load %arg2[%c0, %c0_1, %c0_2, %c0_3] : memref<1x2x2x64xf32, #tpu.memory_space<vmem>>, vector<1x2x2x64xf32>
    %4 = vector.shape_cast %3 : vector<1x2x2x64xf32> to vector<2x2x64xf32>
    %c0_4 = arith.constant 0 : index
    %c17 = arith.constant 17 : index
    %c0_5 = arith.constant 0 : index
    %5 = vector.load %arg16[%c0_4, %c17, %c0_5] : memref<2x24x64xf32, #tpu.memory_space<vmem>>, vector<2x2x64xf32>
    tpu.vector_store %arg16[%c0_4, %c17, %c0_5], %4 {strides = array<i32>} : memref<2x24x64xf32, #tpu.memory_space<vmem>>, vector<2x2x64xf32>,
    %c0_6 = arith.constant 0 : index
    %c0_7 = arith.constant 0 : index
    %c0_8 = arith.constant 0 : index
    %6 = vector.load %arg6[%c0_6, %c0_7, %c0_8] : memref<1x4x64xf32, #tpu.memory_space<vmem>>, vector<1x4x64xf32>
    %7 = vector.shape_cast %6 : vector<1x4x64xf32> to vector<4x64xf32>
    %c0_9 = arith.constant 0 : index
    %c0_10 = arith.constant 0 : index
    %c0_11 = arith.constant 0 : index
    %8 = vector.load %arg16[%c0_9, %c0_10, %c0_11] : memref<2x24x64xf32, #tpu.memory_space<vmem>>, vector<2x24x64xf32>
    %9 = vector.shape_cast %8 : vector<2x24x64xf32> to vector<48x64xf32>
    %10 = vector.extract_strided_slice %7 {offsets = [0, 0], sizes = [1, 64], strides = [1, 1]} : vector<4x64xf32> to vector<1x64xf32>
    %11 = vector.extract_strided_slice %7 {offsets = [1, 0], sizes = [1, 64], strides = [1, 1]} : vector<4x64xf32> to vector<1x64xf32>
    %cst = arith.constant dense<0.000000e+00> : vector<48xf32>
    %12 = vector.multi_reduction <add>, %9, %cst [1] : vector<48x64xf32> to vector<48xf32>
    %13 = vector.shape_cast %12 : vector<48xf32> to vector<48x1xf32>
    %cst_12 = arith.constant 6.400000e+01 : f32
    %14 = vector.broadcast %cst_12 : f32 to vector<48x1xf32>
    %15 = arith.divf %13, %14 : vector<48x1xf32>
    %16 = vector.broadcast %15 : vector<48x1xf32> to vector<48x64xf32>
    %17 = arith.subf %9, %16 : vector<48x64xf32>
    %18 = arith.mulf %17, %17 : vector<48x64xf32>
    %cst_13 = arith.constant dense<0.000000e+00> : vector<48xf32>
    %19 = vector.multi_reduction <add>, %18, %cst_13 [1] : vector<48x64xf32> to vector<48xf32>
    %20 = vector.shape_cast %19 : vector<48xf32> to vector<48x1xf32>
    %cst_14 = arith.constant 6.400000e+01 : f32
    %21 = vector.broadcast %cst_14 : f32 to vector<48x1xf32>
    %22 = arith.divf %20, %21 : vector<48x1xf32>
    %23 = vector.broadcast %15 : vector<48x1xf32> to vector<48x64xf32>
    %24 = arith.subf %9, %23 : vector<48x64xf32>
    %cst_15 = arith.constant 9.99999974E-6 : f32
    %25 = vector.broadcast %cst_15 : f32 to vector<48x1xf32>
    %26 = arith.addf %22, %25 : vector<48x1xf32>
    %27 = math.rsqrt %26 : vector<48x1xf32>
    %28 = vector.broadcast %27 : vector<48x1xf32> to vector<48x64xf32>
    %29 = arith.mulf %24, %28 : vector<48x64xf32>
    %30 = vector.broadcast %10 : vector<1x64xf32> to vector<48x64xf32>
    %31 = arith.mulf %29, %30 : vector<48x64xf32>
    %32 = vector.broadcast %11 : vector<1x64xf32> to vector<48x64xf32>
    %33 = arith.addf %31, %32 : vector<48x64xf32>
    %c0_16 = arith.constant 0 : index
    %c0_17 = arith.constant 0 : index
    %c0_18 = arith.constant 0 : index
    %34 = vector.load %arg7[%c0_16, %c0_17, %c0_18] : memref<1x64x192xbf16, #tpu.memory_space<vmem>>, vector<1x64x192xbf16>
    %35 = vector.shape_cast %34 : vector<1x64x192xbf16> to vector<64x192xbf16>
    %36 = arith.truncf %33 : vector<48x64xf32> to vector<48x64xbf16>
    %cst_19 = arith.constant dense<0.000000e+00> : vector<48x192xf32>
    %37 = tpu.matmul %36, %35, %cst_19 {dimension_numbers = #tpu.dot_dimension_numbers<[1], [0], [0], [1], [0, 0, 1, 1], [], []>} : vector<48x64xbf16>, vector<64x192xbf16>, vector<48x192xf32> -> vector<48x192xf32>
    %c0_20 = arith.constant 0 : index
    %c0_21 = arith.constant 0 : index
    %c0_22 = arith.constant 0 : index
    %38 = vector.load %arg8[%c0_20, %c0_21, %c0_22] : memref<1x1x192xf32, #tpu.memory_space<vmem>>, vector<1x1x192xf32>
    %39 = vector.shape_cast %38 : vector<1x1x192xf32> to vector<1x192xf32>
    %40 = vector.broadcast %39 : vector<1x192xf32> to vector<48x192xf32>
    %41 = arith.addf %37, %40 : vector<48x192xf32>
    %42 = vector.extract_strided_slice %41 {offsets = [0, 0], sizes = [48, 64], strides = [1, 1]} : vector<48x192xf32> to vector<48x64xf32>
    %43 = vector.shape_cast %42 : vector<48x64xf32> to vector<2x24x64xf32>
    %44 = vector.extract_strided_slice %41 {offsets = [0, 64], sizes = [48, 64], strides = [1, 1]} : vector<48x192xf32> to vector<48x64xf32>
    %45 = vector.shape_cast %44 : vector<48x64xf32> to vector<2x24x64xf32>
    %46 = vector.extract_strided_slice %41 {offsets = [0, 128], sizes = [48, 64], strides = [1, 1]} : vector<48x192xf32> to vector<48x64xf32>
    %47 = vector.shape_cast %46 : vector<48x64xf32> to vector<2x24x64xf32>
    %48 = tpu.iota {dimensions = array<i32: 1>} : vector<24x24xi32>
    %c19_i32 = arith.constant 19 : i32
    %49 = vector.broadcast %c19_i32 : i32 to vector<24x24xi32>
    %50 = arith.cmpi slt, %48, %49 : vector<24x24xi32>
    %cst_23 = arith.constant 0.000000e+00 : f32
    %cst_24 = arith.constant -1.000000e+30 : f32
    %51 = vector.broadcast %cst_23 : f32 to vector<24x24xf32>
    %52 = vector.broadcast %cst_24 : f32 to vector<24x24xf32>
    %53 = arith.select %50, %51, %52 : vector<24x24xi1>, vector<24x24xf32>
    %54 = arith.truncf %43 : vector<2x24x64xf32> to vector<2x24x64xbf16>
    %55 = arith.truncf %45 : vector<2x24x64xf32> to vector<2x24x64xbf16>
    "tpu.trace_start"() <{level = 10 : i32, message = "bqd,bkd->bqk"}> : () -> ()
    %cst_25 = arith.constant dense<0.000000e+00> : vector<2x24x24xf32>
    %56 = tpu.matmul %54, %55, %cst_25 {dimension_numbers = #tpu.dot_dimension_numbers<[2], [2], [1], [1], [0, 0, 0, 1, 1, 1], [0], [0]>} : vector<2x24x64xbf16>, vector<2x24x64xbf16>, vector<2x24x24xf32> -> vector<2x24x24xf32>
    "tpu.trace_stop"() : () -> ()
    %cst_26 = arith.constant 1.250000e-01 : f32
    %57 = vector.broadcast %cst_26 : f32 to vector<2x24x24xf32>
    %58 = arith.mulf %56, %57 : vector<2x24x24xf32>
    %59 = vector.shape_cast %53 : vector<24x24xf32> to vector<1x24x24xf32>
    %60 = vector.broadcast %59 : vector<1x24x24xf32> to vector<2x24x24xf32>
    %61 = arith.addf %58, %60 : vector<2x24x24xf32>
    %cst_27 = arith.constant dense<0xFF800000> : vector<2x24xf32>
    %62 = vector.multi_reduction <maximumf>, %61, %cst_27 [2] : vector<2x24x24xf32> to vector<2x24xf32>
    %63 = vector.shape_cast %62 : vector<2x24xf32> to vector<2x24x1xf32>
    %64 = vector.broadcast %63 : vector<2x24x1xf32> to vector<2x24x24xf32>
    %65 = arith.subf %61, %64 : vector<2x24x24xf32>
    %66 = math.exp %65 : vector<2x24x24xf32>
    %cst_28 = arith.constant dense<0.000000e+00> : vector<2x24xf32>
    %67 = vector.multi_reduction <add>, %66, %cst_28 [2] : vector<2x24x24xf32> to vector<2x24xf32>
    %68 = vector.shape_cast %67 : vector<2x24xf32> to vector<2x24x1xf32>
    %69 = tpu.reciprocal %68 {approx = true} : vector<2x24x1xf32> -> vector<2x24x1xf32>
    %70 = vector.broadcast %69 : vector<2x24x1xf32> to vector<2x24x24xf32>
    %71 = arith.mulf %66, %70 : vector<2x24x24xf32>
    %72 = arith.truncf %71 : vector<2x24x24xf32> to vector<2x24x24xbf16>
    %73 = arith.truncf %47 : vector<2x24x64xf32> to vector<2x24x64xbf16>
    "tpu.trace_start"() <{level = 10 : i32, message = "bqk,bkd->bqd"}> : () -> ()
    %cst_29 = arith.constant dense<0.000000e+00> : vector<2x24x64xf32>
    %74 = tpu.matmul %72, %73, %cst_29 {dimension_numbers = #tpu.dot_dimension_numbers<[2], [1], [1], [2], [0, 0, 0, 1, 1, 2], [0], [0]>} : vector<2x24x24xbf16>, vector<2x24x64xbf16>, vector<2x24x64xf32> -> vector<2x24x64xf32>
    "tpu.trace_stop"() : () -> ()
    %75 = vector.shape_cast %74 : vector<2x24x64xf32> to vector<48x64xf32>
    %c0_30 = arith.constant 0 : index
    %c0_31 = arith.constant 0 : index
    %c0_32 = arith.constant 0 : index
    %76 = vector.load %arg9[%c0_30, %c0_31, %c0_32] : memref<1x64x64xbf16, #tpu.memory_space<vmem>>, vector<1x64x64xbf16>
    %77 = vector.shape_cast %76 : vector<1x64x64xbf16> to vector<64x64xbf16>
    %78 = arith.truncf %75 : vector<48x64xf32> to vector<48x64xbf16>
    %cst_33 = arith.constant dense<0.000000e+00> : vector<48x64xf32>
    %79 = tpu.matmul %78, %77, %cst_33 {dimension_numbers = #tpu.dot_dimension_numbers<[1], [0], [0], [1], [0, 0, 1, 1], [], []>} : vector<48x64xbf16>, vector<64x64xbf16>, vector<48x64xf32> -> vector<48x64xf32>
    %c0_34 = arith.constant 0 : index
    %c0_35 = arith.constant 0 : index
    %c0_36 = arith.constant 0 : index
    %80 = vector.load %arg10[%c0_34, %c0_35, %c0_36] : memref<1x1x64xf32, #tpu.memory_space<vmem>>, vector<1x1x64xf32>
    %81 = vector.shape_cast %80 : vector<1x1x64xf32> to vector<1x64xf32>
    %82 = vector.broadcast %81 : vector<1x64xf32> to vector<48x64xf32>
    %83 = arith.addf %79, %82 : vector<48x64xf32>
    %84 = arith.addf %9, %83 : vector<48x64xf32>
    %85 = vector.extract_strided_slice %7 {offsets = [2, 0], sizes = [1, 64], strides = [1, 1]} : vector<4x64xf32> to vector<1x64xf32>
    %86 = vector.extract_strided_slice %7 {offsets = [3, 0], sizes = [1, 64], strides = [1, 1]} : vector<4x64xf32> to vector<1x64xf32>
    %cst_37 = arith.constant dense<0.000000e+00> : vector<48xf32>
    %87 = vector.multi_reduction <add>, %84, %cst_37 [1] : vector<48x64xf32> to vector<48xf32>
    %88 = vector.shape_cast %87 : vector<48xf32> to vector<48x1xf32>
    %cst_38 = arith.constant 6.400000e+01 : f32
    %89 = vector.broadcast %cst_38 : f32 to vector<48x1xf32>
    %90 = arith.divf %88, %89 : vector<48x1xf32>
    %91 = vector.broadcast %90 : vector<48x1xf32> to vector<48x64xf32>
    %92 = arith.subf %84, %91 : vector<48x64xf32>
    %93 = arith.mulf %92, %92 : vector<48x64xf32>
    %cst_39 = arith.constant dense<0.000000e+00> : vector<48xf32>
    %94 = vector.multi_reduction <add>, %93, %cst_39 [1] : vector<48x64xf32> to vector<48xf32>
    %95 = vector.shape_cast %94 : vector<48xf32> to vector<48x1xf32>
    %cst_40 = arith.constant 6.400000e+01 : f32
    %96 = vector.broadcast %cst_40 : f32 to vector<48x1xf32>
    %97 = arith.divf %95, %96 : vector<48x1xf32>
    %98 = vector.broadcast %90 : vector<48x1xf32> to vector<48x64xf32>
    %99 = arith.subf %84, %98 : vector<48x64xf32>
    %cst_41 = arith.constant 9.99999974E-6 : f32
    %100 = vector.broadcast %cst_41 : f32 to vector<48x1xf32>
    %101 = arith.addf %97, %100 : vector<48x1xf32>
    %102 = math.rsqrt %101 : vector<48x1xf32>
    %103 = vector.broadcast %102 : vector<48x1xf32> to vector<48x64xf32>
    %104 = arith.mulf %99, %103 : vector<48x64xf32>
    %105 = vector.broadcast %85 : vector<1x64xf32> to vector<48x64xf32>
    %106 = arith.mulf %104, %105 : vector<48x64xf32>
    %107 = vector.broadcast %86 : vector<1x64xf32> to vector<48x64xf32>
    %108 = arith.addf %106, %107 : vector<48x64xf32>
    %c0_42 = arith.constant 0 : index
    %c0_43 = arith.constant 0 : index
    %c0_44 = arith.constant 0 : index
    %109 = vector.load %arg11[%c0_42, %c0_43, %c0_44] : memref<1x64x256xbf16, #tpu.memory_space<vmem>>, vector<1x64x256xbf16>
    %110 = vector.shape_cast %109 : vector<1x64x256xbf16> to vector<64x256xbf16>
    %111 = arith.truncf %108 : vector<48x64xf32> to vector<48x64xbf16>
    %cst_45 = arith.constant dense<0.000000e+00> : vector<48x256xf32>
    %112 = tpu.matmul %111, %110, %cst_45 {dimension_numbers = #tpu.dot_dimension_numbers<[1], [0], [0], [1], [0, 0, 1, 1], [], []>} : vector<48x64xbf16>, vector<64x256xbf16>, vector<48x256xf32> -> vector<48x256xf32>
    %c0_46 = arith.constant 0 : index
    %c0_47 = arith.constant 0 : index
    %c0_48 = arith.constant 0 : index
    %113 = vector.load %arg12[%c0_46, %c0_47, %c0_48] : memref<1x1x256xf32, #tpu.memory_space<vmem>>, vector<1x1x256xf32>
    %114 = vector.shape_cast %113 : vector<1x1x256xf32> to vector<1x256xf32>
    %115 = vector.broadcast %114 : vector<1x256xf32> to vector<48x256xf32>
    %116 = arith.addf %112, %115 : vector<48x256xf32>
    %cst_49 = arith.constant -1.702000e+00 : f32
    %117 = vector.broadcast %cst_49 : f32 to vector<48x256xf32>
    %118 = arith.mulf %117, %116 : vector<48x256xf32>
    %119 = math.exp %118 : vector<48x256xf32>
    %cst_50 = arith.constant 1.000000e+00 : f32
    %120 = vector.broadcast %cst_50 : f32 to vector<48x256xf32>
    %121 = arith.addf %120, %119 : vector<48x256xf32>
    %122 = tpu.reciprocal %121 {approx = true} : vector<48x256xf32> -> vector<48x256xf32>
    %123 = arith.mulf %116, %122 : vector<48x256xf32>
    %c0_51 = arith.constant 0 : index
    %c0_52 = arith.constant 0 : index
    %c0_53 = arith.constant 0 : index
    %124 = vector.load %arg13[%c0_51, %c0_52, %c0_53] : memref<1x256x64xbf16, #tpu.memory_space<vmem>>, vector<1x256x64xbf16>
    %125 = vector.shape_cast %124 : vector<1x256x64xbf16> to vector<256x64xbf16>
    %126 = arith.truncf %123 : vector<48x256xf32> to vector<48x256xbf16>
    %cst_54 = arith.constant dense<0.000000e+00> : vector<48x64xf32>
    %127 = tpu.matmul %126, %125, %cst_54 {dimension_numbers = #tpu.dot_dimension_numbers<[1], [0], [0], [1], [0, 0, 1, 1], [], []>} : vector<48x256xbf16>, vector<256x64xbf16>, vector<48x64xf32> -> vector<48x64xf32>
    %c0_55 = arith.constant 0 : index
    %c0_56 = arith.constant 0 : index
    %c0_57 = arith.constant 0 : index
    %128 = vector.load %arg14[%c0_55, %c0_56, %c0_57] : memref<1x1x64xf32, #tpu.memory_space<vmem>>, vector<1x1x64xf32>
    %129 = vector.shape_cast %128 : vector<1x1x64xf32> to vector<1x64xf32>
    %130 = vector.broadcast %129 : vector<1x64xf32> to vector<48x64xf32>
    %131 = arith.addf %127, %130 : vector<48x64xf32>
    %132 = arith.addf %84, %131 : vector<48x64xf32>
    %133 = vector.shape_cast %132 : vector<48x64xf32> to vector<2x24x64xf32>
    %c0_58 = arith.constant 0 : index
    %c0_59 = arith.constant 0 : index
    %c0_60 = arith.constant 0 : index
    %134 = vector.load %arg16[%c0_58, %c0_59, %c0_60] : memref<2x24x64xf32, #tpu.memory_space<vmem>>, vector<2x24x64xf32>
    tpu.vector_store %arg16[%c0_58, %c0_59, %c0_60], %133 {strides = array<i32>} : memref<2x24x64xf32, #tpu.memory_space<vmem>>, vector<2x24x64xf32>,
    %c1_i32 = arith.constant 1 : i32
    %135 = arith.cmpi eq, %arg0, %c1_i32 : i32
    %136 = arith.extui %135 : i1 to i32
    %c0_i32_61 = arith.constant 0 : i32
    %137 = arith.cmpi ne, %136, %c0_i32_61 : i32
    scf.if %137 {
      %c0_62 = arith.constant 0 : index
      %c0_63 = arith.constant 0 : index
      %c0_64 = arith.constant 0 : index
      %138 = vector.load %arg16[%c0_62, %c0_63, %c0_64] : memref<2x24x64xf32, #tpu.memory_space<vmem>>, vector<2x24x64xf32>
      %c0_65 = arith.constant 0 : index
      %c0_66 = arith.constant 0 : index
      %139 = vector.load %arg3[%c0_65, %c0_66] : memref<2x24xf32, #tpu.memory_space<vmem>>, vector<2x24xf32>
      %140 = vector.shape_cast %139 : vector<2x24xf32> to vector<2x24x1xf32>
      %141 = vector.broadcast %140 : vector<2x24x1xf32> to vector<2x24x64xf32>
      %142 = arith.mulf %138, %141 : vector<2x24x64xf32>
      %cst_67 = arith.constant dense<0.000000e+00> : vector<2x64xf32>
      %143 = vector.multi_reduction <add>, %142, %cst_67 [1] : vector<2x24x64xf32> to vector<2x64xf32>
      %c0_68 = arith.constant 0 : index
      %c0_69 = arith.constant 0 : index
      %144 = vector.load %arg4[%c0_68, %c0_69] : memref<2x64xf32, #tpu.memory_space<vmem>>, vector<2x64xf32>
      %145 = vector.extract_strided_slice %144 {offsets = [0, 0], sizes = [1, 64], strides = [1, 1]} : vector<2x64xf32> to vector<1x64xf32>
      %146 = vector.extract_strided_slice %144 {offsets = [1, 0], sizes = [1, 64], strides = [1, 1]} : vector<2x64xf32> to vector<1x64xf32>
      %cst_70 = arith.constant dense<0.000000e+00> : vector<2xf32>
      %147 = vector.multi_reduction <add>, %143, %cst_70 [1] : vector<2x64xf32> to vector<2xf32>
      %148 = vector.shape_cast %147 : vector<2xf32> to vector<2x1xf32>
      %cst_71 = arith.constant 6.400000e+01 : f32
      %149 = vector.broadcast %cst_71 : f32 to vector<2x1xf32>
      %150 = arith.divf %148, %149 : vector<2x1xf32>
      %151 = vector.broadcast %150 : vector<2x1xf32> to vector<2x64xf32>
      %152 = arith.subf %143, %151 : vector<2x64xf32>
      %153 = arith.mulf %152, %152 : vector<2x64xf32>
      %cst_72 = arith.constant dense<0.000000e+00> : vector<2xf32>
      %154 = vector.multi_reduction <add>, %153, %cst_72 [1] : vector<2x64xf32> to vector<2xf32>
      %155 = vector.shape_cast %154 : vector<2xf32> to vector<2x1xf32>
      %cst_73 = arith.constant 6.400000e+01 : f32
      %156 = vector.broadcast %cst_73 : f32 to vector<2x1xf32>
      %157 = arith.divf %155, %156 : vector<2x1xf32>
      %158 = vector.broadcast %150 : vector<2x1xf32> to vector<2x64xf32>
      %159 = arith.subf %143, %158 : vector<2x64xf32>
      %cst_74 = arith.constant 9.99999974E-6 : f32
      %160 = vector.broadcast %cst_74 : f32 to vector<2x1xf32>
      %161 = arith.addf %157, %160 : vector<2x1xf32>
      %162 = math.rsqrt %161 : vector<2x1xf32>
      %163 = vector.broadcast %162 : vector<2x1xf32> to vector<2x64xf32>
      %164 = arith.mulf %159, %163 : vector<2x64xf32>
      %165 = vector.broadcast %145 : vector<1x64xf32> to vector<2x64xf32>
      %166 = arith.mulf %164, %165 : vector<2x64xf32>
      %167 = vector.broadcast %146 : vector<1x64xf32> to vector<2x64xf32>
      %168 = arith.addf %166, %167 : vector<2x64xf32>
      %169 = arith.truncf %168 : vector<2x64xf32> to vector<2x64xbf16>
      %c0_75 = arith.constant 0 : index
      %c0_76 = arith.constant 0 : index
      %170 = vector.load %arg5[%c0_75, %c0_76] : memref<64x32xbf16, #tpu.memory_space<vmem>>, vector<64x32xbf16>
      %cst_77 = arith.constant dense<0.000000e+00> : vector<2x32xf32>
      %171 = tpu.matmul %169, %170, %cst_77 {dimension_numbers = #tpu.dot_dimension_numbers<[1], [0], [0], [1], [0, 0, 1, 1], [], []>} : vector<2x64xbf16>, vector<64x32xbf16>, vector<2x32xf32> -> vector<2x32xf32>
      %172 = arith.mulf %171, %171 : vector<2x32xf32>
      %cst_78 = arith.constant dense<0.000000e+00> : vector<2xf32>
      %173 = vector.multi_reduction <add>, %172, %cst_78 [1] : vector<2x32xf32> to vector<2xf32>
      %174 = vector.shape_cast %173 : vector<2xf32> to vector<2x1xf32>
      %cst_79 = arith.constant 9.99999996E-13 : f32
      %175 = vector.broadcast %cst_79 : f32 to vector<2x1xf32>
      %176 = arith.addf %174, %175 : vector<2x1xf32>
      %177 = math.rsqrt %176 : vector<2x1xf32>
      %178 = vector.broadcast %177 : vector<2x1xf32> to vector<2x32xf32>
      %179 = arith.mulf %171, %178 : vector<2x32xf32>
      %c0_80 = arith.constant 0 : index
      %c0_81 = arith.constant 0 : index
      %180 = vector.load %arg15[%c0_80, %c0_81] : memref<2x32xf32, #tpu.memory_space<vmem>>, vector<2x32xf32>
      tpu.vector_store %arg15[%c0_80, %c0_81], %179 {strides = array<i32>} : memref<2x32xf32, #tpu.memory_space<vmem>>, vector<2x32xf32>,
    } else {
    }
    return
  }
  func.func @transform_0(%arg0: i32) -> (i32, i32, i32) {
    %c0_i32 = arith.constant 0 : i32
    %c0_i32_0 = arith.constant 0 : i32
    %c0_i32_1 = arith.constant 0 : i32
    %c0_i32_2 = arith.constant 0 : i32
    return %c0_i32, %c0_i32_0, %c0_i32_1 : i32, i32, i32
  }
  func.func @transform_1(%arg0: i32) -> (i32, i32, i32, i32) {
    %c0_i32 = arith.constant 0 : i32
    %c0_i32_0 = arith.constant 0 : i32
    %c0_i32_1 = arith.constant 0 : i32
    %c0_i32_2 = arith.constant 0 : i32
    return %arg0, %c0_i32, %c0_i32_0, %c0_i32_1 : i32, i32, i32, i32
  }
  func.func @transform_2(%arg0: i32) -> (i32, i32) {
    %c0_i32 = arith.constant 0 : i32
    %c0_i32_0 = arith.constant 0 : i32
    %c0_i32_1 = arith.constant 0 : i32
    return %c0_i32, %c0_i32_0 : i32, i32
  }
  func.func @transform_3(%arg0: i32) -> (i32, i32) {
    %c0_i32 = arith.constant 0 : i32
    %c0_i32_0 = arith.constant 0 : i32
    %c0_i32_1 = arith.constant 0 : i32
    return %c0_i32, %c0_i32_0 : i32, i32
  }
  func.func @transform_4(%arg0: i32) -> (i32, i32) {
    %c0_i32 = arith.constant 0 : i32
    %c0_i32_0 = arith.constant 0 : i32
    %c0_i32_1 = arith.constant 0 : i32
    return %c0_i32, %c0_i32_0 : i32, i32
  }
  func.func @transform_5(%arg0: i32) -> (i32, i32, i32) {
    %c0_i32 = arith.constant 0 : i32
    %c0_i32_0 = arith.constant 0 : i32
    %c0_i32_1 = arith.constant 0 : i32
    return %arg0, %c0_i32, %c0_i32_0 : i32, i32, i32
  }
  func.func @transform_6(%arg0: i32) -> (i32, i32, i32) {
    %c0_i32 = arith.constant 0 : i32
    %c0_i32_0 = arith.constant 0 : i32
    %c0_i32_1 = arith.constant 0 : i32
    return %arg0, %c0_i32, %c0_i32_0 : i32, i32, i32
  }
  func.func @transform_7(%arg0: i32) -> (i32, i32, i32) {
    %c0_i32 = arith.constant 0 : i32
    %c0_i32_0 = arith.constant 0 : i32
    %c0_i32_1 = arith.constant 0 : i32
    return %arg0, %c0_i32, %c0_i32_0 : i32, i32, i32
  }
  func.func @transform_8(%arg0: i32) -> (i32, i32, i32) {
    %c0_i32 = arith.constant 0 : i32
    %c0_i32_0 = arith.constant 0 : i32
    %c0_i32_1 = arith.constant 0 : i32
    return %arg0, %c0_i32, %c0_i32_0 : i32, i32, i32
  }
  func.func @transform_9(%arg0: i32) -> (i32, i32, i32) {
    %c0_i32 = arith.constant 0 : i32
    %c0_i32_0 = arith.constant 0 : i32
    %c0_i32_1 = arith.constant 0 : i32
    return %arg0, %c0_i32, %c0_i32_0 : i32, i32, i32
  }
  func.func @transform_10(%arg0: i32) -> (i32, i32, i32) {
    %c0_i32 = arith.constant 0 : i32
    %c0_i32_0 = arith.constant 0 : i32
    %c0_i32_1 = arith.constant 0 : i32
    return %arg0, %c0_i32, %c0_i32_0 : i32, i32, i32
  }
  func.func @transform_11(%arg0: i32) -> (i32, i32, i32) {
    %c0_i32 = arith.constant 0 : i32
    %c0_i32_0 = arith.constant 0 : i32
    %c0_i32_1 = arith.constant 0 : i32
    return %arg0, %c0_i32, %c0_i32_0 : i32, i32, i32
  }
  func.func @transform_12(%arg0: i32) -> (i32, i32, i32) {
    %c0_i32 = arith.constant 0 : i32
    %c0_i32_0 = arith.constant 0 : i32
    %c0_i32_1 = arith.constant 0 : i32
    return %arg0, %c0_i32, %c0_i32_0 : i32, i32, i32
  }
  func.func @transform_13(%arg0: i32) -> (i32, i32, i32) {
    %c0_i32 = arith.constant 0 : i32
    %c0_i32_0 = arith.constant 0 : i32
    %c0_i32_1 = arith.constant 0 : i32
    return %arg0, %c0_i32, %c0_i32_0 : i32, i32, i32
  }
  func.func @transform_14(%arg0: i32) -> (i32, i32) {
    %c0_i32 = arith.constant 0 : i32
    %c0_i32_0 = arith.constant 0 : i32
    %c0_i32_1 = arith.constant 0 : i32
    return %c0_i32, %c0_i32_0 : i32, i32
  }
}

</mosaic_0001>

<bundles_post_ra>
// kernel: custom_clip_forward.3
= control target key start
LH: loop header
LB: loop body
LE: loop exit
PB: predicated region body
PF: predicated region fallthrough
CT: control target
= control target key end

     0   :  { %s2666_s29 = smov 0   ;;  %s3117_s0 = inlined_call_operand.vmem [shape: f32[2,24,64], index: 0, kind: input, shape index: {}]   ;;  %s3118_s1 = inlined_call_operand.vmem [shape: f32[2,2,2,64], index: 1, kind: input, shape index: {}]   ;;  %s3119_s2 = inlined_call_operand.vmem [shape: f32[2,24], index: 2, kind: input, shape index: {}]   ;;  %s3120_s3 = inlined_call_operand.vmem [shape: f32[2,64], index: 3, kind: input, shape index: {}]   ;;  %s3121_s4 = inlined_call_operand.vmem [shape: bf16[64,32], index: 4, kind: input, shape index: {}]   ;;  %s3122_s5 = inlined_call_operand.vmem [shape: f32[2,4,64], index: 5, kind: input, shape index: {}]   ;;  %s3123_s6 = inlined_call_operand.vmem [shape: bf16[2,64,192], index: 6, kind: input, shape index: {}]   ;;  %s3124_s7 = inlined_call_operand.vmem [shape: f32[2,1,192], index: 7, kind: input, shape index: {}]   ;;  %s3125_s8 = inlined_call_operand.vmem [shape: bf16[2,64,64], index: 8, kind: input, shape index: {}]   ;;  %s3126_s9 = inlined_call_operand.vmem [shape: f32[2,1,64], index: 9, kind: input, shape index: {}]   ;;  %s3127_s10 = inlined_call_operand.vmem [shape: bf16[2,64,256], index: 10, kind: input, shape index: {}]   ;;  %s3128_s11 = inlined_call_operand.vmem [shape: f32[2,1,256], index: 11, kind: input, shape index: {}]   ;;  %s3129_s12 = inlined_call_operand.vmem [shape: bf16[2,256,64], index: 12, kind: input, shape index: {}]   ;;  %s3130_s13 = inlined_call_operand.vmem [shape: f32[2,1,64], index: 13, kind: input, shape index: {}]   ;;  %s3131_s14 = inlined_call_operand.vmem [shape: f32[2,32], index: 14, kind: output, shape index: {}]  }
   0x1   :  { %3134 = sst [smem:[#allocation4_spill]] %s3118_s1 }
   0x2   :  { %3135 = sst [smem:[#allocation5_spill]] %s3119_s2 }
   0x3   :  { %3136 = sst [smem:[#allocation6_spill]] %s3120_s3 }
   0x4   :  { %3137 = sst [smem:[#allocation7_spill]] %s3121_s4 }
   0x5   :  { %3138 = sst [smem:[#allocation8_spill]] %s3122_s5 }
   0x6   :  { %3139 = sst [smem:[#allocation9_spill]] %s3123_s6 }
   0x7   :  { %3140 = sst [smem:[#allocation10_spill]] %s3124_s7 }
   0x8   :  { %3141 = sst [smem:[#allocation11_spill]] %s3131_s14 }
   0x9 LB: > { %3142 = sst [smem:[#allocation3_spill]] %s2582_s29  ;;  %s2672_s30 = sadd.s32 4294967295, %s2582_s29   ;;  %s2582_s29 = sphi %s2666_s29, %s24_s29  }
   0xa   : > { %p2190_p0 = scmp.ge.s32.totalorder %s2582_s29, 1  ;;  %p490_p1 = scmp.lt.s32.totalorder %s2582_s29, 3 }
   0xc   : > { %p491_p2 = pnand %p2190_p0, %p490_p1 }
   0xd   : > { %p569_p3 = scmp.lt.s32.totalorder (!%p491_p2), %s2672_s30, 1  ;;  %s3143_s1 = sld [smem:[#allocation4_spill]] (!%p491_p2) }
   0xe   : > { %494 = sbr.rel (%p491_p2) target bundleno = 3325 (0xcfd), region = 76  ;;  %s3144_s5 = sld [smem:[#allocation8_spill]] (!%p491_p2) }
   0xf   : > { %s3145_s6 = sld [smem:[#allocation9_spill]] (!%p491_p2)  ;;  %s3146_s7 = sld [smem:[#allocation10_spill]] (!%p491_p2) }
  0x10   : > { %p2204_p4 = scmp.ne.s32.totalorder (!%p491_p2), %s2672_s30, 0 }
  0x15   : > { %s2678_s15 = scalar_select %p569_p3, %s2672_s30, 1 }
  0x16   : > { %v617_v0 = vld [vmem:[%s3117_s0] sm:$0xff] (!%p2204_p4)  ;;  %vm623_vm0 = vcmask (!%p2204_p4), 523264   ;;  %v618_v1 = vld [vmem:[%s3117_s0 + $0x8] sm:$0xff] (!%p2204_p4)  ;;  %v619_v2 = vld [vmem:[%s3117_s0 + $0x10] sm:$0xff] (!%p2204_p4) }
  0x17   : > { %s2268_s16 = sshll.u32 %s2678_s15, 2  ;;  %s2269_s17 = sshll.u32 %s2678_s15, 6  ;;  %624 = vst.msk [vmem:[#allocation2] sm:$0xff] (!%p2204_p4), %vm623_vm0, %v617_v0  ;;  %625 = vst.msk [vmem:[#allocation2 + $0x8] sm:$0xff] (!%p2204_p4), %vm623_vm0, %v618_v1  ;;  %v620_v3 = vld [vmem:[%s3117_s0 + $0x18] sm:$0xff] (!%p2204_p4)  ;;  %v621_v4 = vld [vmem:[%s3117_s0 + $0x20] sm:$0xff] (!%p2204_p4) }
  0x18   : > { %s2685_s20 = scalar_lea.vmem %s3143_s1, %s2268_s16  ;;  %s2690_s23 = scalar_lea.vmem %s3144_s5, %s2268_s16  ;;  %626 = vst.msk [vmem:[#allocation2 + $0x10] sm:$0xff] (!%p2204_p4), %vm623_vm0, %v619_v2  ;;  %v622_v5 = vld [vmem:[%s3117_s0 + $0x28] sm:$0xff] (!%p2204_p4)  ;;  %627 = vst.msk [vmem:[#allocation2 + $0x18] sm:$0xff] (!%p2204_p4), %vm623_vm0, %v620_v3 }
  0x19   : > { %s2695_s26 = scalar_lea.vmem %s3145_s6, %s2269_s17  ;;  %s2196_s27 = sshll.u32 %s2678_s15, 1  ;;  %628 = vst.msk [vmem:[#allocation2 + $0x20] sm:$0xff] (!%p2204_p4), %vm623_vm0, %v621_v4  ;;  %629 = vst.msk [vmem:[#allocation2 + $0x28] sm:$0xff] (!%p2204_p4), %vm623_vm0, %v622_v5 }
  0x1a   : > { %s2701_s14 = scalar_lea.vmem %s3146_s7, %s2196_s27  ;;  %s2270_s3 = sshll.u32 %s2678_s15, 5 }
  0x1b   : > { %s2707_s1 = scalar_lea.vmem %s3125_s8, %s2270_s3  ;;  %s594_s22 = scalar_lea.vmem %s3126_s9, %s2678_s15 }
  0x1c   : > { %s2716_s25 = scalar_lea.vmem %s3127_s10, %s2269_s17  ;;  %s2721_s29 = scalar_lea.vmem %s3128_s11, %s2196_s27 }
  0x1d   : > { %s2272_s28 = sshll.u32 %s2678_s15, 7  ;;  %s611_s3 = scalar_lea.vmem %s3130_s13, %s2678_s15 }
  0x1e   : > { %s2731_s21 = scalar_lea.vmem %s3129_s12, %s2272_s28  ;;  %616 = sbr.rel (%p2204_p4) target bundleno = 37 (0x25), region = 80 }
  0x25 PF: > { %v2752_v6 = vld [vmem:[#allocation2] sm:$0xff]  ;;  %vm642_vm1 = vcmask 523264   ;;  %v2754_v7 = vld [vmem:[#allocation2 + $0x8] sm:$0xff]  ;;  %vm632_vm2 = vcmask 517120   ;;  %v2766_v13 = vld [vmem:[#allocation2 + $0x18] sm:$0xff]  ;;  %v2584_v58 = vmov 0   ;;  %v722_v63 = vlaneseq }
  0x26   : > { %v630_v8 = vld [vmem:[%s2685_s20] sm:$0x3]  ;;  %v643_v9 = vsel %vm642_vm1, %v2752_v6, 0.0  ;;  %v631_v10 = vld [vmem:[%s2685_s20 + $0x2] sm:$0x3]  ;;  %v646_v12 = vsel %vm642_vm1, %v2754_v7, 0.0  ;;  %846 = vmatprep.mubr.bf16.mxu0 %v2584_v58  ;;  %856 = vmatprep.mubr.bf16.mxu1 %v2584_v58 }
  0x27   : > { %633 = vst.msk [vmem:[#allocation2 + $0x11] sm:$0x3] %vm632_vm2, %v630_v8  ;;  %644 = vadd.xlane.f32.xlu0 %v643_v9  ;;  %v2761_v11 = vld [vmem:[#allocation2 + $0x20] sm:$0xff]  ;;  %634 = vst.msk [vmem:[#allocation2 + $0x29] sm:$0x3] %vm632_vm2, %v631_v10  ;;  %v652_v18 = vsel %vm642_vm1, %v2766_v13, 0.0 }
  0x28   : > { %v655_v14 = vsel %vm642_vm1, %v2761_v11, 0.0  ;;  %v2428_v50 = vld [vmem:[%s2695_s26 + $0x4] ss:$8 sps:$4 sm:$0xff]   ;;  %v2430_v51 = vld [vmem:[%s2695_s26] ss:$8 sps:$4 sm:$0xff]   ;;  %v2827_v3 = vshrl.u32 %v722_v63, 7 }
  0x29   : > { %814 = vmatprep.subr.bf16.mxu0 %v2428_v50  ;;  %2399 = vmatprep.subr.bf16.mxu1 %v2428_v50  ;;  %v2431_v52 = vld [vmem:[%s2695_s26 + $0x14] ss:$8 sps:$4 sm:$0xff]   ;;  %v2433_v53 = vld [vmem:[%s2695_s26 + $0x10] ss:$8 sps:$4 sm:$0xff]   ;;  %v2434_v54 = vld [vmem:[%s2695_s26 + $0x24] ss:$8 sps:$4 sm:$0xff]  }
  0x2a   : > { %815 = vmatpush1.bf16.msra.mxu0 %v2430_v51  ;;  %2403 = vmatpush1.bf16.msra.mxu1 %v2430_v51  ;;  %v2436_v55 = vld [vmem:[%s2695_s26 + $0x20] ss:$8 sps:$4 sm:$0xff]   ;;  %v2437_v56 = vld [vmem:[%s2695_s26 + $0x34] ss:$8 sps:$4 sm:$0xff]   ;;  %v2439_v57 = vld [vmem:[%s2695_s26 + $0x30] ss:$8 sps:$4 sm:$0xff]  }
  0x2b   : > { %647 = vadd.xlane.f32.xlu0 %v646_v12  ;;  %816 = vmatprep.subr.bf16.mxu0 %v2431_v52  ;;  %v2830_v10 = vsub.s32 0, %v2827_v3  ;;  %s2585_s20 = smov 64   ;;  %vm1110_vm3 = vcmask 1043456   ;;  %vm1029_vm5 = vcmask 195584   ;;  %vm2588_vm6 = vmmov 0   ;;  %p2260_p5 = scmp.ne.s32.totalorder %s2672_s30, 1 }
  0x2c   : > { %2400 = vmatprep.subr.bf16.mxu1 %v2431_v52  ;;  %vm1920_vm7 = vcmask (!%p2260_p5), 1041409   ;;  %vm2590_vm8 = vmmov (!%p2260_p5), 0   ;;  %s3149_s16 = sld [smem:[#allocation6_spill]] (!%p2260_p5)  ;;  %vm2049_vm9 = vcmask (!%p2260_p5), 254976   ;;  %s3150_s18 = sld [smem:[#allocation11_spill]] (!%p2260_p5) }
  0x2e   : > { %v2770_v15 = vld [vmem:[#allocation2 + $0x10] sm:$0xff]  ;;  %v2774_v17 = vld [vmem:[#allocation2 + $0x28] sm:$0xff]  ;;  %817 = vmatpush1.bf16.msra.mxu0 %v2433_v53  ;;  %2404 = vmatpush1.bf16.msra.mxu1 %v2433_v53 }
  0x2f   : > { %v649_v16 = vsel %vm642_vm1, %v2770_v15, 0.0  ;;  %656 = vadd.xlane.f32.xlu0 %v655_v14  ;;  %v658_v19 = vsel %vm642_vm1, %v2774_v17, 0.0  ;;  %818 = vmatprep.subr.bf16.mxu0 %v2434_v54 }
  0x30   : > { %650 = vadd.xlane.f32.xlu1 %v649_v16  ;;  %2401 = vmatprep.subr.bf16.mxu1 %v2434_v54  ;;  %v2833_v16 = vld [vmem:[%s2690_s23] sm:$0xf] }
  0x32   : > { %819 = vmatpush1.bf16.msra.mxu0 %v2436_v55  ;;  %2405 = vmatpush1.bf16.msra.mxu1 %v2436_v55  ;;  %v753_v55 = vld [vmem:[%s2701_s14] sm:$0x3] }
  0x33   : > { %820 = vmatprep.subr.bf16.mxu0 %v2437_v56  ;;  %2402 = vmatprep.subr.bf16.mxu1 %v2437_v56  ;;  %v758_v56 = vrot.slane %v753_v55, %v2830_v10 }
  0x34   : > { %653 = vadd.xlane.f32.xlu1 %v652_v18 }
  0x36   : > { %821 = vmatpush1.bf16.msra.mxu0 %v2439_v57  ;;  %2406 = vmatpush1.bf16.msra.mxu1 %v2439_v57 }
  0x38   : > { %659 = vadd.xlane.f32.xlu1 %v658_v19 }
  0xb4   : > { %v645_v20 = vpop.xlane.xlu0 %644 }
  0xb5   : > { %v662_v21 = vmul.f32 0.015625, %v645_v20 }
  0xb7   : > { %v2781_v22 = vsub.f32 %v2752_v6, %v662_v21 }
  0xb8   : > { %v648_v23 = vpop.xlane.xlu0 %647 }
  0xb9   : > { %v663_v24 = vmul.f32 0.015625, %v648_v23  ;;  %v674_v25 = vmul.f32 %v2781_v22, %v2781_v22 }
  0xbb   : > { %v2786_v26 = vsub.f32 %v2754_v7, %v663_v24  ;;  %v680_v27 = vsel %vm642_vm1, %v674_v25, 0.0  ;;  %v725_v24 = vrot.slane %v2833_v16, %v2830_v10  ;;  %v2839_v25 = vsub.s32 1, %v2827_v3 }
  0xbc   : > { %681 = vadd.xlane.f32.xlu0 %v680_v27  ;;  %v657_v29 = vpop.xlane.xlu0 %656 }
  0xbd   : > { %v651_v28 = vpop.xlane.xlu1 %650  ;;  %v666_v31 = vmul.f32 0.015625, %v657_v29  ;;  %v675_v32 = vmul.f32 %v2786_v26, %v2786_v26 }
  0xbe   : > { %v664_v30 = vmul.f32 0.015625, %v651_v28 }
  0xbf   : > { %v2795_v34 = vsub.f32 %v2761_v11, %v666_v31  ;;  %v683_v35 = vsel %vm642_vm1, %v675_v32, 0.0  ;;  %v735_v32 = vrot.slane %v2833_v16, %v2839_v25 }
  0xc0   : > { %v2792_v33 = vsub.f32 %v2770_v15, %v664_v30  ;;  %684 = vadd.xlane.f32.xlu1 %v683_v35 }
  0xc1   : > { %v654_v36 = vpop.xlane.xlu1 %653  ;;  %v678_v39 = vmul.f32 %v2795_v34, %v2795_v34 }
  0xc2   : > { %v665_v37 = vmul.f32 0.015625, %v654_v36  ;;  %v676_v38 = vmul.f32 %v2792_v33, %v2792_v33 }
  0xc3   : > { %v692_v44 = vsel %vm642_vm1, %v678_v39, 0.0 }
  0xc4   : > { %v2803_v40 = vsub.f32 %v2766_v13, %v665_v37  ;;  %v686_v41 = vsel %vm642_vm1, %v676_v38, 0.0 }
  0xc5   : > { %687 = vadd.xlane.f32.xlu0 %v686_v41  ;;  %v660_v42 = vpop.xlane.xlu1 %659 }
  0xc6   : > { %v667_v43 = vmul.f32 0.015625, %v660_v42  ;;  %v677_v45 = vmul.f32 %v2803_v40, %v2803_v40 }
  0xc8   : > { %v2810_v46 = vsub.f32 %v2774_v17, %v667_v43  ;;  %v689_v47 = vsel %vm642_vm1, %v677_v45, 0.0 }
  0xc9   : > { %693 = vadd.xlane.f32.xlu0 %v692_v44  ;;  %690 = vadd.xlane.f32.xlu1 %v689_v47 }
  0xca   : > { %v679_v48 = vmul.f32 %v2810_v46, %v2810_v46 }
  0xcc   : > { %v695_v49 = vsel %vm642_vm1, %v679_v48, 0.0 }
  0xcd   : > { %696 = vadd.xlane.f32.xlu1 %v695_v49 }
 0x149   : > { %v682_v59 = vpop.xlane.xlu0 %681 }
 0x14a   : > { %v698_v60 = vmul.f32 0.015625, %v682_v59 }
 0x14c   : > { %v704_v61 = vadd.f32 1e-05, %v698_v60 }
 0x14d   : > { %v685_v62 = vpop.xlane.xlu1 %684 }
 0x14e   : > { %2472 = vrsqrt.f32 %v704_v61  ;;  %v699_v0 = vmul.f32 0.015625, %v685_v62 }
 0x150   : > { %v705_v1 = vadd.f32 1e-05, %v699_v0 }
 0x152   : > { %v688_v2 = vpop.xlane.xlu0 %687  ;;  %2474 = vrsqrt.f32 %v705_v1 }
 0x153   : > { %v700_v4 = vmul.f32 0.015625, %v688_v2 }
 0x155   : > { %v706_v5 = vadd.f32 1e-05, %v700_v4 }
 0x156   : > { %v694_v8 = vpop.xlane.xlu0 %693  ;;  %v691_v9 = vpop.xlane.xlu1 %690 }
 0x157   : > { %2476 = vrsqrt.f32 %v706_v5  ;;  %v702_v12 = vmul.f32 0.015625, %v694_v8  ;;  %v701_v14 = vmul.f32 0.015625, %v691_v9 }
 0x158   : > { %v2473_v18 = vpop.eup %2472 }
 0x159   : > { %v707_v19 = vadd.f32 1e-05, %v701_v14  ;;  %v716_v20 = vmul.f32 %v2473_v18, %v2781_v22  ;;  %v708_v21 = vadd.f32 1e-05, %v702_v12 }
 0x15a   : > { %v697_v23 = vpop.xlane.xlu1 %696 }
 0x15b   : > { %v703_v27 = vmul.f32 0.015625, %v697_v23  ;;  %2478 = vrsqrt.f32 %v707_v19  ;;  %v726_v31 = vmul.f32 %v725_v24, %v716_v20 }
 0x15c   : > { %v2475_v28 = vpop.eup %2474  ;;  %2480 = vrsqrt.f32 %v708_v21 }
 0x15d   : > { %v709_v29 = vadd.f32 1e-05, %v703_v27  ;;  %v717_v30 = vmul.f32 %v2475_v28, %v2786_v26  ;;  %v736_v36 = vadd.f32 %v735_v32, %v726_v31 }
 0x15f   : > { %2482 = vrsqrt.f32 %v709_v29  ;;  %v727_v22 = vmul.f32 %v725_v24, %v717_v30 }
 0x161   : > { %v2477_v35 = vpop.eup %2476  ;;  %v737_v37 = vadd.f32 %v735_v32, %v727_v22 }
 0x162   : > { %v718_v38 = vmul.f32 %v2477_v35, %v2792_v33 }
 0x163   : > { %v750_v39 = vpack.c.bf16 %v737_v37, %v736_v36 }
 0x164   : > { %v728_v43 = vmul.f32 %v725_v24, %v718_v38 }
 0x165   : > { %v2479_v41 = vpop.eup %2478  ;;  %2213 = vmatmul.mubr.msk.bf16.vlgmr.msra.gmra.mrb[0].mxu0 %vm642_vm1, %v750_v39 }
 0x166   : > { %v719_v42 = vmul.f32 %v2479_v41, %v2803_v40  ;;  %v2481_v26 = vpop.eup %2480  ;;  %v738_v49 = vadd.f32 %v735_v32, %v728_v43 }
 0x167   : > { %v720_v48 = vmul.f32 %v2481_v26, %v2795_v34  ;;  %v762_v34 = vrot.slane %v753_v55, %v2839_v25 }
 0x168   : > { %v729_v45 = vmul.f32 %v725_v24, %v719_v42 }
 0x169   : > { %v2483_v44 = vpop.eup %2482  ;;  %v730_v33 = vmul.f32 %v725_v24, %v720_v48 }
 0x16a   : > { %v721_v47 = vmul.f32 %v2483_v44, %v2810_v46  ;;  %v739_v50 = vadd.f32 %v735_v32, %v729_v45 }
 0x16b   : > { %v740_v40 = vadd.f32 %v735_v32, %v730_v33  ;;  %v2586_v33 = vmov -1e+30  }
 0x16c   : > { %v751_v51 = vpack.c.bf16 %v739_v50, %v738_v49  ;;  %v731_v52 = vmul.f32 %v725_v24, %v721_v47  ;;  %v878_v50 = vand.u32 127, %v722_v63 }
 0x16e   : > { %2214 = vmatmul.mubr.msk.bf16.vlgmr.msra.gmra.mrb[0].mxu1 %vm642_vm1, %v751_v51  ;;  %v741_v53 = vadd.f32 %v735_v32, %v731_v52  ;;  %vm879_vm4 = vcmp.lt.s32.totalorder %v878_v50, 19 }
 0x16f   : > { %866 = vmatprep.mubr.bf16.mxu1 %v2584_v58 }
 0x170   : > { %v752_v54 = vpack.c.bf16 %v741_v53, %v740_v40  ;;  %v880_v53 = vsel %vm879_vm4, 0.0, %v2586_v33 }
 0x176   : > { %2215 = vmatmul.mubr.msk.bf16.gmra.mrb[4].mxu1 %vm642_vm1, %v752_v54 }
 0x238   : > { %v848_v46 = vpop.f32.mrb[0].mxu0 }
 0x239   : > { %v850_v57 = vpop.f32.mrb[1].mxu0  ;;  %v849_v60 = vadd.f32 %v848_v46, %v758_v56 }
 0x23a   : > { %v852_v59 = vpop.f32.mrb[2].mxu0  ;;  %v851_v0 = vadd.f32 %v850_v57, %v762_v34 }
 0x23b   : > { %v853_v61 = vadd.f32 %v852_v59, %v758_v56  ;;  %v854_v62 = vpop.f32.mrb[3].mxu0 }
 0x23c   : > { %v855_v1 = vadd.f32 %v854_v62, %v762_v34 }
 0x23d   : > { %v881_v2 = vpack.c.bf16 %v853_v61, %v849_v60 }
 0x23e   : > { %v1100_v4 = vpack.c.bf16 %v855_v1, %v851_v0 }
 0x23f   : > { %887 = vrot.lane.b32.xlu0 %v881_v2, %s2585_s20  ;;  %2339 = vmatprep.mubr.msk.bf16.mxu1 %vm642_vm1, %v881_v2 }
 0x240   : > { %2351 = vmatprep.subr.bf16.mxu0 %v1100_v4 }
 0x241   : > { %v858_v5 = vpop.f32.mrb[0].mxu1  ;;  %2352 = vmatpush3.bf16.msra.mxu0 %v1100_v4 }
 0x242   : > { %v859_v8 = vadd.f32 %v858_v5, %v758_v56  ;;  %v860_v9 = vpop.f32.mrb[1].mxu1 }
 0x243   : > { %v861_v12 = vadd.f32 %v860_v9, %v762_v34  ;;  %v862_v14 = vpop.f32.mrb[2].mxu1 }
 0x244   : > { %v882_v18 = vpack.c.bf16 %v859_v8, %v859_v8  ;;  %v864_v19 = vpop.f32.mrb[3].mxu1  ;;  %v863_v27 = vadd.f32 %v862_v14, %v758_v56 }
 0x245   : > { %v1101_v20 = vpack.c.bf16 %v861_v12, %v861_v12  ;;  %v865_v21 = vadd.f32 %v864_v19, %v762_v34 }
 0x246   : > { %889 = vrot.lane.b32.xlu1 %v882_v18, %s2585_s20 }
 0x247   : > { %v1112_v23 = vsel %vm1110_vm3, %v1101_v20, 0  ;;  %2411 = vmatprep.subr.msk.bf16.mxu0 %vm1110_vm3, %v1101_v20 }
 0x248   : > { %2354 = vmatpush3.bf16.msra.mxu0 %v1112_v23 }
 0x249   : > { %v868_v24 = vpop.f32.mrb[4].mxu1 }
 0x24a   : > { %v869_v28 = vadd.f32 %v868_v24, %v758_v56  ;;  %v870_v29 = vpop.f32.mrb[5].mxu1 }
 0x24b   : > { %v871_v30 = vadd.f32 %v870_v29, %v762_v34  ;;  %v872_v31 = vpop.f32.mrb[6].mxu1 }
 0x24c   : > { %v883_v32 = vpack.c.bf16 %v869_v28, %v863_v27  ;;  %v873_v22 = vadd.f32 %v872_v31, %v758_v56  ;;  %v874_v35 = vpop.f32.mrb[7].mxu1 }
 0x24d   : > { %v1102_v36 = vpack.c.bf16 %v871_v30, %v865_v21  ;;  %v875_v37 = vadd.f32 %v874_v35, %v762_v34 }
 0x24e   : > { %953 = vrot.lane.b32.xlu1 %v883_v32, %s2585_s20  ;;  %v884_v38 = vpack.c.bf16 %v873_v22, %v873_v22 }
 0x24f   : > { %v1103_v48 = vpack.c.bf16 %v875_v37, %v875_v37 }
 0x251   : > { %v1169_v49 = vsel %vm1110_vm3, %v1103_v48, 0 }
 0x252   : > { %955 = vrot.lane.b32.xlu1 %v884_v38, %s2585_s20 }
 0x2b1   : > { %v888_v39 = vpop.permute.xlu0 %887 }
 0x2b2   : > { %v898_v41 = vsel %vm642_vm1, %v888_v39, 0  ;;  %2407 = vmatprep.subr.msk.bf16.mxu1 %vm642_vm1, %v888_v39 }
 0x2b3   : > { %2336 = vmatpush3.bf16.xpose.msra.mxu1 %v898_v41 }
 0x2b8   : > { %v890_v42 = vpop.permute.xlu1 %889 }
 0x2b9   : > { %2408 = vmatprep.subr.msk.bf16.mxu1 %vm642_vm1, %v890_v42  ;;  %v901_v43 = vsel %vm642_vm1, %v890_v42, 0 }
 0x2bb   : > { %2338 = vmatpush3.bf16.xpose.msra.mxu1 %v901_v43 }
 0x2c0   : > { %v954_v26 = vpop.permute.xlu1 %953 }
 0x2c1   : > { %2409 = vmatprep.subr.msk.bf16.mxu1 %vm642_vm1, %v954_v26  ;;  %v964_v44 = vsel %vm642_vm1, %v954_v26, 0 }
 0x2c2   : > { %2340 = vmatmul.mubr.msk.bf16.vlgmr.msra.gmra.mrb[8].mxu1 %vm642_vm1, %v882_v18 }
 0x2c3   : > { %2344 = vmatpush3.bf16.xpose.msra.mxu1 %v964_v44  ;;  %2347 = vmatprep.mubr.msk.bf16.mxu1 %vm642_vm1, %v883_v32 }
 0x2c4   : > { %v956_v45 = vpop.permute.xlu1 %955 }
 0x2c5   : > { %2410 = vmatprep.subr.msk.bf16.mxu1 %vm642_vm1, %v956_v45  ;;  %v967_v47 = vsel %vm642_vm1, %v956_v45, 0 }
 0x2cb   : > { %2346 = vmatpush3.bf16.xpose.msra.mxu1 %v967_v47 }
 0x2cc   : > { %2359 = vmatprep.subr.bf16.mxu1 %v1102_v36 }
 0x2d2   : > { %2348 = vmatmul.mubr.msk.bf16.vlgmr.msra.gmra.mrb[12].mxu1 %vm642_vm1, %v884_v38 }
 0x2d3   : > { %2360 = vmatpush3.bf16.msra.mxu1 %v1102_v36 }
 0x2d4   : > { %2412 = vmatprep.subr.msk.bf16.mxu1 %vm1110_vm3, %v1103_v48 }
 0x2d7   : > { %2362 = vmatpush3.bf16.msra.mxu1 %v1169_v49 }
 0x395   : > { %v2341_v51 = vpop.f32.mrb[8].mxu1 }
 0x396   : > { %v937_v52 = vpop.f32.mrb[9].mxu1  ;;  %v1019_v40 = vmul.f32 0.125, %v2341_v51 }
 0x397   : > { %v1017_v54 = vmul.f32 0.125, %v937_v52  ;;  %v2342_v55 = vpop.f32.mrb[10].mxu1 }
 0x398   : > { %v940_v56 = vpop.f32.mrb[11].mxu1  ;;  %v1025_v60 = vadd.f32 %v1019_v40, %v880_v53 }
 0x399   : > { %v1018_v46 = vmul.f32 0.125, %v940_v56  ;;  %v1023_v34 = vadd.f32 %v1017_v54, %v880_v53  ;;  %v2587_v54 = vmov 0.0  }
 0x39a   : > { %v1036_v63 = vsel %vm1029_vm5, %v1025_v60, -inf  ;;  %2367 = vmatprep.subr.bf16.mxu0 %v2587_v54 }
 0x39b   : > { %v1030_v57 = vsel %vm1029_vm5, %v1023_v34, -inf  ;;  %v1024_v59 = vadd.f32 %v1018_v46, %v880_v53 }
 0x39c   : > { %1031 = vmax.xlane.f32.xlu0 %v1030_v57 }
 0x39d   : > { %v1033_v61 = vsel %vm1029_vm5, %v1024_v59, -inf }
 0x39e   : > { %1034 = vmax.xlane.f32.xlu1 %v1033_v61 }
 0x3a0   : > { %1037 = vmax.xlane.f32.xlu0 %v1036_v63 }
 0x3a5   : > { %v2349_v62 = vpop.f32.mrb[12].mxu1 }
 0x3a6   : > { %v1022_v0 = vmul.f32 0.125, %v2349_v62  ;;  %v1003_v1 = vpop.f32.mrb[13].mxu1 }
 0x3a7   : > { %v1020_v2 = vmul.f32 0.125, %v1003_v1  ;;  %v2350_v4 = vpop.f32.mrb[14].mxu1  ;;  %v2440_v1 = vld [vmem:[%s2707_s1] sm:$0xff]  }
 0x3a8   : > { %v1006_v5 = vpop.f32.mrb[15].mxu1  ;;  %v1028_v8 = vadd.f32 %v1022_v0, %v880_v53 }
 0x3a9   : > { %v1021_v9 = vmul.f32 0.125, %v1006_v5  ;;  %v1026_v12 = vadd.f32 %v1020_v2, %v880_v53 }
 0x3aa   : > { %v1045_v14 = vsel %vm1029_vm5, %v1028_v8, -inf }
 0x3ab   : > { %1046 = vmax.xlane.f32.xlu1 %v1045_v14  ;;  %v1039_v18 = vsel %vm1029_vm5, %v1026_v12, -inf  ;;  %v1027_v19 = vadd.f32 %v1021_v9, %v880_v53  ;;  %v2442_v9 = vld [vmem:[%s2707_s1 + $0x10] sm:$0xff]  }
 0x3ac   : > { %1040 = vmax.xlane.f32.xlu0 %v1039_v18 }
 0x3ad   : > { %v1042_v20 = vsel %vm1029_vm5, %v1027_v19, -inf }
 0x3b0   : > { %1043 = vmax.xlane.f32.xlu0 %v1042_v20 }
 0x429   : > { %v1032_v21 = vpop.xlane.xlu0 %1031 }
 0x42a   : > { %v1048_v23 = vsub.f32 %v1023_v34, %v1032_v21 }
 0x42b   : > { %v1035_v24 = vpop.xlane.xlu1 %1034 }
 0x42c   : > { %v1054_v27 = vmul.f32 1.442695, %v1048_v23  ;;  %v1049_v28 = vsub.f32 %v1024_v59, %v1035_v24 }
 0x42d   : > { %v1038_v29 = vpop.xlane.xlu0 %1037 }
 0x42e   : > { %2484 = vpow2.f32 %v1054_v27  ;;  %v1056_v30 = vmul.f32 1.442695, %v1049_v28  ;;  %v1050_v31 = vsub.f32 %v1025_v60, %v1038_v29  ;;  %v2443_v27 = vld [vmem:[%s2707_s1 + $0x18] sm:$0xff]  }
 0x430   : > { %2486 = vpow2.f32 %v1056_v30  ;;  %v1058_v32 = vmul.f32 1.442695, %v1050_v31 }
 0x432   : > { %2488 = vpow2.f32 %v1058_v32 }
 0x438   : > { %v2485_v22 = vpop.eup %2484  ;;  %v1047_v35 = vpop.xlane.xlu1 %1046 }
 0x439   : > { %v1053_v36 = vsub.f32 %v1028_v8, %v1047_v35  ;;  %v1041_v37 = vpop.xlane.xlu0 %1040  ;;  %v1066_v38 = vsel %vm1029_vm5, %v2485_v22, 0.0  ;;  %v2441_v8 = vld [vmem:[%s2707_s1 + $0x8] sm:$0xff]  }
 0x43a   : > { %v2487_v39 = vpop.eup %2486  ;;  %v1051_v41 = vsub.f32 %v1026_v12, %v1041_v37  ;;  %1067 = vadd.xlane.f32.xlu0 %v1066_v38 }
 0x43b   : > { %v1069_v42 = vsel %vm1029_vm5, %v2487_v39, 0.0  ;;  %v1064_v26 = vmul.f32 1.442695, %v1053_v36 }
 0x43c   : > { %v2489_v43 = vpop.eup %2488  ;;  %v1060_v44 = vmul.f32 1.442695, %v1051_v41  ;;  %1070 = vadd.xlane.f32.xlu1 %v1069_v42  ;;  %v2224_v41 = vld [vmem:[%s594_s22] ss:$0 sm:$0xff] }
 0x43d   : > { %v1044_v45 = vpop.xlane.xlu0 %1043  ;;  %v1072_v47 = vsel %vm1029_vm5, %v2489_v43, 0.0 }
 0x43e   : > { %2490 = vpow2.f32 %v1060_v44  ;;  %v1052_v48 = vsub.f32 %v1027_v19, %v1044_v45  ;;  %1073 = vadd.xlane.f32.xlu0 %v1072_v47 }
 0x43f   : > { %2492 = vpow2.f32 %v1064_v26 }
 0x440   : > { %v1062_v49 = vmul.f32 1.442695, %v1052_v48 }
 0x442   : > { %2494 = vpow2.f32 %v1062_v49 }
 0x448   : > { %v2491_v50 = vpop.eup %2490 }
 0x449   : > { %v1075_v51 = vsel %vm1029_vm5, %v2491_v50, 0.0  ;;  %v2493_v52 = vpop.eup %2492 }
 0x44a   : > { %1076 = vadd.xlane.f32.xlu1 %v1075_v51  ;;  %v1081_v40 = vsel %vm1029_vm5, %v2493_v52, 0.0 }
 0x44c   : > { %v2495_v33 = vpop.eup %2494 }
 0x44d   : > { %v1078_v53 = vsel %vm1029_vm5, %v2495_v33, 0.0 }
 0x44e   : > { %1079 = vadd.xlane.f32.xlu0 %v1078_v53  ;;  %1082 = vadd.xlane.f32.xlu1 %v1081_v40 }
 0x4c7   : > { %v1068_v55 = vpop.xlane.xlu0 %1067 }
 0x4c8   : > { %2496 = vrcp.f32 %v1068_v55 }
 0x4c9   : > { %v1071_v56 = vpop.xlane.xlu1 %1070 }
 0x4ca   : > { %2498 = vrcp.f32 %v1071_v56 }
 0x4cb   : > { %v1074_v46 = vpop.xlane.xlu0 %1073 }
 0x4cc   : > { %2500 = vrcp.f32 %v1074_v46 }
 0x4d2   : > { %v2497_v34 = vpop.eup %2496 }
 0x4d3   : > { %v1090_v59 = vmul.f32 %v2497_v34, %v2485_v22 }
 0x4d4   : > { %v2499_v57 = vpop.eup %2498 }
 0x4d5   : > { %v1091_v60 = vmul.f32 %v2499_v57, %v2487_v39 }
 0x4d6   : > { %v2501_v61 = vpop.eup %2500 }
 0x4d7   : > { %v1092_v63 = vmul.f32 %v2501_v61, %v2489_v43  ;;  %v1077_v62 = vpop.xlane.xlu1 %1076  ;;  %v1096_v0 = vpack.c.bf16 %v1091_v60, %v1090_v59 }
 0x4d8   : > { %2502 = vrcp.f32 %v1077_v62 }
 0x4d9   : > { %2355 = vmatprep.mubr.msk.bf16.mxu0 %vm1029_vm5, %v1096_v0  ;;  %v1097_v2 = vpack.c.bf16 %v1092_v63, %v1092_v63 }
 0x4db   : > { %v1080_v4 = vpop.xlane.xlu0 %1079  ;;  %2356 = vmatmul.mubr.msk.bf16.vlgmr.msra.gmra.mrb[4].mxu0 %vm1029_vm5, %v1097_v2  ;;  %v1083_v5 = vpop.xlane.xlu1 %1082 }
 0x4dc   : > { %2504 = vrcp.f32 %v1080_v4  ;;  %2368 = vmatpush3.bf16.msra.mxu0 %v2440_v1  ;;  %2375 = vmatprep.mubr.msk.bf16.mxu0 %vm2588_vm6, %v2587_v54 }
 0x4dd   : > { %2506 = vrcp.f32 %v1083_v5  ;;  %2369 = vmatprep.subr.bf16.mxu0 %v2587_v54 }
 0x4e0   : > { %2370 = vmatpush3.bf16.msra.mxu0 %v2441_v8 }
 0x4e1   : > { %2371 = vmatprep.subr.bf16.mxu0 %v2587_v54 }
 0x4e2   : > { %v2503_v12 = vpop.eup %2502 }
 0x4e3   : > { %v1093_v19 = vmul.f32 %v2503_v12, %v2491_v50 }
 0x4e4   : > { %2372 = vmatpush3.bf16.msra.mxu0 %v2442_v9 }
 0x4e5   : > { %2373 = vmatprep.subr.bf16.mxu0 %v2587_v54 }
 0x4e6   : > { %v2505_v14 = vpop.eup %2504 }
 0x4e7   : > { %v2507_v18 = vpop.eup %2506  ;;  %v1094_v20 = vmul.f32 %v2505_v14, %v2495_v33 }
 0x4e8   : > { %v1095_v21 = vmul.f32 %v2507_v18, %v2493_v52  ;;  %2374 = vmatpush3.bf16.msra.mxu0 %v2443_v27 }
 0x4e9   : > { %v1098_v23 = vpack.c.bf16 %v1094_v20, %v1093_v19 }
 0x4ea   : > { %v1099_v24 = vpack.c.bf16 %v1095_v21, %v1095_v21 }
 0x4eb   : > { %2363 = vmatprep.mubr.msk.bf16.mxu1 %vm1029_vm5, %v1098_v23 }
 0x4ec   : > { %2364 = vmatmul.mubr.msk.bf16.vlgmr.msra.gmra.mrb[16].mxu1 %vm1029_vm5, %v1099_v24 }
 0x4ed   : > { %1535 = vmatprep.mubr.bf16.mxu1 %v2584_v58 }
 0x5ae   : > { %v2357_v28 = vpop.f32.mrb[4].mxu0 }
 0x5af   : > { %v1148_v29 = vpop.f32.mrb[5].mxu0 }
 0x5b0   : > { %v2358_v30 = vpop.f32.mrb[6].mxu0 }
 0x5b1   : > { %v1151_v31 = vpop.f32.mrb[7].mxu0 }
 0x5b2   : > { %v1227_v32 = vpack.c.bf16 %v1151_v31, %v1148_v29 }
 0x5b4   : > { %2376 = vmatmul.mubr.msk.bf16.vlgmr.msra.gmra.mrb[8].mxu0 %vm642_vm1, %v1227_v32 }
 0x5b5   : > { %2379 = vmatprep.mubr.msk.bf16.mxu0 %vm2588_vm6, %v2587_v54 }
 0x5bf   : > { %v2365_v22 = vpop.f32.mrb[16].mxu1 }
 0x5c0   : > { %v1205_v35 = vpop.f32.mrb[17].mxu1 }
 0x5c1   : > { %v1228_v36 = vpack.c.bf16 %v1205_v35, %v2357_v28  ;;  %v2366_v37 = vpop.f32.mrb[18].mxu1 }
 0x5c2   : > { %v1208_v38 = vpop.f32.mrb[19].mxu1 }
 0x5c3   : > { %v1229_v39 = vpack.c.bf16 %v2365_v22, %v1208_v38  ;;  %2380 = vmatmul.mubr.msk.bf16.gmra.mrb[12].mxu0 %vm642_vm1, %v1228_v36 }
 0x5c4   : > { %2383 = vmatprep.mubr.msk.bf16.mxu0 %vm2588_vm6, %v2587_v54 }
 0x5cb   : > { %2384 = vmatmul.mubr.msk.bf16.gmra.mrb[16].mxu0 %vm642_vm1, %v1229_v39 }
 0x687   : > { %v1304_v42 = vpop.f32.mrb[8].mxu0 }
 0x688   : > { %v1305_v43 = vadd.f32 %v2224_v41, %v1304_v42  ;;  %v2377_v26 = vpop.f32.mrb[9].mxu0  ;;  %v2446_v42 = vld [vmem:[%s2716_s25 + $0x4] ss:$8 sps:$4 sm:$0xff]  }
 0x689   : > { %v1307_v44 = vpop.f32.mrb[10].mxu0  ;;  %1503 = vmatprep.subr.bf16.mxu1 %v2446_v42 }
 0x68a   : > { %v2909_v45 = vadd.f32 %v1305_v43, %v2752_v6  ;;  %v1308_v47 = vadd.f32 %v2224_v41, %v1307_v44  ;;  %v2378_v48 = vpop.f32.mrb[11].mxu0  ;;  %v2444_v43 = vld [vmem:[%s2716_s25] ss:$8 sps:$4 sm:$0xff]   ;;  %v2449_v44 = vld [vmem:[%s2716_s25 + $0x14] ss:$8 sps:$4 sm:$0xff]  }
 0x68b   : > { %1504 = vmatpush1.bf16.msra.mxu1 %v2444_v43  ;;  %v2452_v48 = vld [vmem:[%s2716_s25 + $0x24] ss:$8 sps:$4 sm:$0xff]  }
 0x68c   : > { %v2912_v49 = vadd.f32 %v1308_v47, %v2754_v7  ;;  %v1333_v50 = vsel %vm642_vm1, %v2909_v45, 0.0  ;;  %v2447_v47 = vld [vmem:[%s2716_s25 + $0x10] ss:$8 sps:$4 sm:$0xff]   ;;  %1505 = vmatprep.subr.bf16.mxu1 %v2449_v44 }
 0x68d   : > { %1334 = vadd.xlane.f32.xlu0 %v1333_v50  ;;  %v2450_v50 = vld [vmem:[%s2716_s25 + $0x20] ss:$8 sps:$4 sm:$0xff]  }
 0x68e   : > { %v1336_v51 = vsel %vm642_vm1, %v2912_v49, 0.0 }
 0x68f   : > { %1337 = vadd.xlane.f32.xlu1 %v1336_v51  ;;  %1506 = vmatpush1.bf16.msra.mxu1 %v2447_v47  ;;  %v2455_v51 = vld [vmem:[%s2716_s25 + $0x34] ss:$8 sps:$4 sm:$0xff]  }
 0x690   : > { %1507 = vmatprep.subr.bf16.mxu1 %v2452_v48  ;;  %v2457_v48 = vld [vmem:[%s2731_s21] sm:$0xff]  }
 0x693   : > { %1508 = vmatpush1.bf16.msra.mxu1 %v2450_v50  ;;  %v2459_v50 = vld [vmem:[%s2731_s21 + $0x8] sm:$0xff]  }
 0x694   : > { %1509 = vmatprep.subr.bf16.mxu1 %v2455_v51  ;;  %v2461_v51 = vld [vmem:[%s2731_s21 + $0x10] sm:$0xff]  }
 0x696   : > { %v1312_v52 = vpop.f32.mrb[12].mxu0 }
 0x697   : > { %v1313_v33 = vadd.f32 %v2224_v41, %v1312_v52  ;;  %v2381_v53 = vpop.f32.mrb[13].mxu0  ;;  %v2453_v52 = vld [vmem:[%s2716_s25 + $0x30] ss:$8 sps:$4 sm:$0xff]   ;;  %s3147_s25 = sld [smem:[#allocation5_spill]] (!%p2260_p5) }
 0x698   : > { %v1315_v40 = vpop.f32.mrb[14].mxu0  ;;  %1510 = vmatpush1.bf16.msra.mxu1 %v2453_v52  ;;  %v2462_v52 = vld [vmem:[%s2731_s21 + $0x58] sm:$0xff]  }
 0x699   : > { %v2919_v6 = vadd.f32 %v1313_v33, %v2770_v15  ;;  %v1316_v54 = vadd.f32 %v2224_v41, %v1315_v40  ;;  %v2382_v55 = vpop.f32.mrb[15].mxu0 }
 0x69b   : > { %v2922_v7 = vadd.f32 %v1316_v54, %v2766_v13  ;;  %v1339_v56 = vsel %vm642_vm1, %v2919_v6, 0.0 }
 0x69c   : > { %1340 = vadd.xlane.f32.xlu0 %v1339_v56 }
 0x69d   : > { %v1342_v46 = vsel %vm642_vm1, %v2922_v7, 0.0 }
 0x69e   : > { %1343 = vadd.xlane.f32.xlu1 %v1342_v46  ;;  %v1320_v34 = vpop.f32.mrb[16].mxu0  ;;  %v1413_v46 = vsub.s32 2, %v2827_v3 }
 0x69f   : > { %v1321_v57 = vadd.f32 %v2224_v41, %v1320_v34  ;;  %v2385_v59 = vpop.f32.mrb[17].mxu0  ;;  %v1423_v34 = vsub.s32 3, %v2827_v3 }
 0x6a0   : > { %v1323_v60 = vpop.f32.mrb[18].mxu0 }
 0x6a1   : > { %v2929_v15 = vadd.f32 %v1321_v57, %v2761_v11  ;;  %v1324_v61 = vadd.f32 %v2224_v41, %v1323_v60  ;;  %v2386_v63 = vpop.f32.mrb[19].mxu0  ;;  %v1414_v57 = vrot.slane %v2833_v16, %v1413_v46  ;;  %v2469_v46 = vld [vmem:[%s2731_s21 + $0x30] sm:$0xff]  }
 0x6a3   : > { %v2932_v13 = vadd.f32 %v1324_v61, %v2774_v17  ;;  %v1345_v62 = vsel %vm642_vm1, %v2929_v15, 0.0 }
 0x6a4   : > { %1346 = vadd.xlane.f32.xlu0 %v1345_v62 }
 0x6a5   : > { %v1348_v0 = vsel %vm642_vm1, %v2932_v13, 0.0 }
 0x6a6   : > { %1349 = vadd.xlane.f32.xlu1 %v1348_v0 }
 0x71a   : > { %v1335_v1 = vpop.xlane.xlu0 %1334 }
 0x71b   : > { %v1351_v2 = vmul.f32 0.015625, %v1335_v1  ;;  %v1424_v1 = vrot.slane %v2833_v16, %v1423_v34  ;;  %v2470_v34 = vld [vmem:[%s2731_s21 + $0x78] sm:$0xff]  }
 0x71c   : > { %v1338_v4 = vpop.xlane.xlu1 %1337 }
 0x71d   : > { %v1357_v5 = vsub.f32 %v2909_v45, %v1351_v2  ;;  %v1352_v11 = vmul.f32 0.015625, %v1338_v4 }
 0x71f   : > { %v2940_v8 = vsub.f32 %v2912_v49, %v1352_v11  ;;  %v1363_v9 = vmul.f32 %v1357_v5, %v1357_v5 }
 0x721   : > { %v1369_v17 = vsel %vm642_vm1, %v1363_v9, 0.0  ;;  %v1364_v12 = vmul.f32 %v2940_v8, %v2940_v8 }
 0x722   : > { %1370 = vadd.xlane.f32.xlu0 %v1369_v17 }
 0x723   : > { %v1372_v14 = vsel %vm642_vm1, %v1364_v12, 0.0 }
 0x724   : > { %1373 = vadd.xlane.f32.xlu1 %v1372_v14 }
 0x729   : > { %v1341_v18 = vpop.xlane.xlu0 %1340 }
 0x72a   : > { %v1353_v19 = vmul.f32 0.015625, %v1341_v18 }
 0x72b   : > { %v1344_v20 = vpop.xlane.xlu1 %1343 }
 0x72c   : > { %v2947_v21 = vsub.f32 %v2919_v6, %v1353_v19  ;;  %v1354_v23 = vmul.f32 0.015625, %v1344_v20 }
 0x72e   : > { %v2950_v24 = vsub.f32 %v2922_v7, %v1354_v23  ;;  %v1365_v27 = vmul.f32 %v2947_v21, %v2947_v21 }
 0x730   : > { %v1375_v28 = vsel %vm642_vm1, %v1365_v27, 0.0  ;;  %v1366_v29 = vmul.f32 %v2950_v24, %v2950_v24 }
 0x731   : > { %1376 = vadd.xlane.f32.xlu0 %v1375_v28  ;;  %v1347_v30 = vpop.xlane.xlu0 %1346 }
 0x732   : > { %v1355_v31 = vmul.f32 0.015625, %v1347_v30  ;;  %v1378_v32 = vsel %vm642_vm1, %v1366_v29, 0.0 }
 0x733   : > { %1379 = vadd.xlane.f32.xlu1 %v1378_v32  ;;  %v1350_v22 = vpop.xlane.xlu1 %1349 }
 0x734   : > { %v2959_v35 = vsub.f32 %v2929_v15, %v1355_v31  ;;  %v1356_v36 = vmul.f32 0.015625, %v1350_v22 }
 0x736   : > { %v2962_v37 = vsub.f32 %v2932_v13, %v1356_v36  ;;  %v1367_v38 = vmul.f32 %v2959_v35, %v2959_v35 }
 0x738   : > { %v1381_v39 = vsel %vm642_vm1, %v1367_v38, 0.0  ;;  %v1368_v41 = vmul.f32 %v2962_v37, %v2962_v37 }
 0x739   : > { %1382 = vadd.xlane.f32.xlu0 %v1381_v39 }
 0x73a   : > { %v1384_v26 = vsel %vm642_vm1, %v1368_v41, 0.0 }
 0x73b   : > { %1385 = vadd.xlane.f32.xlu1 %v1384_v26 }
 0x7af   : > { %v1371_v33 = vpop.xlane.xlu0 %1370 }
 0x7b0   : > { %v1387_v53 = vmul.f32 0.015625, %v1371_v33  ;;  %v2463_v33 = vld [vmem:[%s2731_s21 + $0x18] sm:$0xff]  }
 0x7b1   : > { %v1374_v40 = vpop.xlane.xlu1 %1373 }
 0x7b2   : > { %v1393_v54 = vadd.f32 1e-05, %v1387_v53  ;;  %v1388_v55 = vmul.f32 0.015625, %v1374_v40  ;;  %v2464_v53 = vld [vmem:[%s2731_s21 + $0x60] sm:$0xff]  }
 0x7b3   : > { %v2465_v40 = vld [vmem:[%s2731_s21 + $0x20] sm:$0xff]  }
 0x7b4   : > { %2508 = vrsqrt.f32 %v1393_v54  ;;  %v1394_v56 = vadd.f32 1e-05, %v1388_v55  ;;  %v2466_v54 = vld [vmem:[%s2731_s21 + $0x68] sm:$0xff]  }
 0x7b5   : > { %v2467_v55 = vld [vmem:[%s2731_s21 + $0x28] sm:$0xff]  }
 0x7b6   : > { %2510 = vrsqrt.f32 %v1394_v56  ;;  %v2468_v56 = vld [vmem:[%s2731_s21 + $0x70] sm:$0xff]  }
 0x7be   : > { %v2509_v59 = vpop.eup %2508  ;;  %v1377_v60 = vpop.xlane.xlu0 %1376 }
 0x7bf   : > { %v1405_v61 = vmul.f32 %v2509_v59, %v1357_v5  ;;  %v1389_v63 = vmul.f32 0.015625, %v1377_v60  ;;  %v1442_v59 = vld [vmem:[%s2721_s29] sm:$0x3] }
 0x7c0   : > { %v2511_v62 = vpop.eup %2510  ;;  %v1380_v0 = vpop.xlane.xlu1 %1379  ;;  %v1447_v60 = vrot.slane %v1442_v59, %v2830_v10 }
 0x7c1   : > { %v1415_v2 = vmul.f32 %v1414_v57, %v1405_v61  ;;  %v1406_v4 = vmul.f32 %v2511_v62, %v2940_v8  ;;  %v1395_v11 = vadd.f32 1e-05, %v1389_v63  ;;  %v1390_v9 = vmul.f32 0.015625, %v1380_v0 }
 0x7c2   : > { %v1451_v61 = vrot.slane %v1442_v59, %v2839_v25 }
 0x7c3   : > { %v1416_v17 = vmul.f32 %v1414_v57, %v1406_v4  ;;  %2512 = vrsqrt.f32 %v1395_v11  ;;  %v1396_v12 = vadd.f32 1e-05, %v1390_v9  ;;  %v1425_v3 = vadd.f32 %v1424_v1, %v1415_v2 }
 0x7c5   : > { %2514 = vrsqrt.f32 %v1396_v12  ;;  %v1426_v14 = vadd.f32 %v1424_v1, %v1416_v17 }
 0x7c6   : > { %v1383_v18 = vpop.xlane.xlu0 %1382 }
 0x7c7   : > { %v1391_v19 = vmul.f32 0.015625, %v1383_v18  ;;  %v1439_v20 = vpack.c.bf16 %v1426_v14, %v1425_v3 }
 0x7c8   : > { %v1386_v5 = vpop.xlane.xlu1 %1385 }
 0x7c9   : > { %v1397_v23 = vadd.f32 1e-05, %v1391_v19  ;;  %v1392_v27 = vmul.f32 0.015625, %v1386_v5  ;;  %2240 = vmatmul.mubr.msk.bf16.vlgmr.msra.gmra.mrb[20].mxu1 %vm642_vm1, %v1439_v20 }
 0x7ca   : > { %1545 = vmatprep.mubr.bf16.mxu1 %v2584_v58 }
 0x7cb   : > { %2516 = vrsqrt.f32 %v1397_v23  ;;  %v1398_v16 = vadd.f32 1e-05, %v1392_v27 }
 0x7cd   : > { %v2513_v8 = vpop.eup %2512  ;;  %2518 = vrsqrt.f32 %v1398_v16 }
 0x7ce   : > { %v1407_v28 = vmul.f32 %v2513_v8, %v2947_v21 }
 0x7cf   : > { %v2515_v29 = vpop.eup %2514 }
 0x7d0   : > { %v1408_v30 = vmul.f32 %v2515_v29, %v2950_v24  ;;  %v1417_v31 = vmul.f32 %v1414_v57, %v1407_v28 }
 0x7d2   : > { %v1418_v32 = vmul.f32 %v1414_v57, %v1408_v30  ;;  %v1427_v22 = vadd.f32 %v1424_v1, %v1417_v31 }
 0x7d4   : > { %v1428_v36 = vadd.f32 %v1424_v1, %v1418_v32 }
 0x7d5   : > { %v2517_v38 = vpop.eup %2516 }
 0x7d6   : > { %v1409_v39 = vmul.f32 %v2517_v38, %v2959_v35  ;;  %v1440_v41 = vpack.c.bf16 %v1428_v36, %v1427_v22  ;;  %v2456_v35 = vld [vmem:[%s2731_s21 + $0x40] sm:$0xff]  }
 0x7d7   : > { %v2519_v42 = vpop.eup %2518  ;;  %2296 = vmatprep.subr.bf16.mxu0 %v2456_v35 }
 0x7d8   : > { %v1410_v43 = vmul.f32 %v2519_v42, %v2962_v37  ;;  %2241 = vmatmul.mubr.msk.bf16.gmra.mrb[24].mxu1 %vm642_vm1, %v1440_v41  ;;  %v1419_v21 = vmul.f32 %v1414_v57, %v1409_v39  ;;  %2297 = vmatpush3.bf16.msra.mxu0 %v2457_v48  ;;  %v2458_v37 = vld [vmem:[%s2731_s21 + $0x48] sm:$0xff]  }
 0x7d9   : > { %1555 = vmatprep.mubr.bf16.mxu1 %v2584_v58  ;;  %2298 = vmatprep.subr.bf16.mxu0 %v2458_v37  ;;  %v2460_v58 = vld [vmem:[%s2731_s21 + $0x50] sm:$0xff]  }
 0x7da   : > { %v1420_v24 = vmul.f32 %v1414_v57, %v1410_v43  ;;  %v1429_v26 = vadd.f32 %v1424_v1, %v1419_v21  ;;  %v2471_v57 = vld [vmem:[%s2731_s21 + $0x38] sm:$0xff]  }
 0x7dc   : > { %v1430_v44 = vadd.f32 %v1424_v1, %v1420_v24  ;;  %2299 = vmatpush3.bf16.msra.mxu0 %v2459_v50 }
 0x7dd   : > { %2300 = vmatprep.subr.bf16.mxu0 %v2460_v58 }
 0x7de   : > { %v1441_v47 = vpack.c.bf16 %v1430_v44, %v1429_v26 }
 0x7e0   : > { %2242 = vmatmul.mubr.msk.bf16.gmra.mrb[28].mxu1 %vm642_vm1, %v1441_v47  ;;  %2301 = vmatpush3.bf16.msra.mxu0 %v2461_v51 }
 0x7e1   : > { %2302 = vmatprep.subr.bf16.mxu0 %v2462_v52 }
 0x7e4   : > { %2303 = vmatpush3.bf16.msra.mxu0 %v2463_v33 }
 0x7e5   : > { %2304 = vmatprep.subr.bf16.mxu0 %v2464_v53 }
 0x7e8   : > { %2305 = vmatpush3.bf16.msra.mxu0 %v2465_v40 }
 0x7e9   : > { %2306 = vmatprep.subr.bf16.mxu0 %v2466_v54 }
 0x7ec   : > { %2307 = vmatpush3.bf16.msra.mxu0 %v2467_v55 }
 0x7ed   : > { %2308 = vmatprep.subr.bf16.mxu0 %v2468_v56 }
 0x7f0   : > { %2309 = vmatpush3.bf16.msra.mxu0 %v2469_v46 }
 0x7f1   : > { %2310 = vmatprep.subr.bf16.mxu0 %v2470_v34 }
 0x7f4   : > { %2311 = vmatpush3.bf16.msra.mxu0 %v2471_v57 }
 0x89c   : > { %v1537_v63 = vpop.f32.mrb[20].mxu1 }
 0x89d   : > { %v3011_v62 = vadd.f32 %v1537_v63, %v1447_v60  ;;  %v1539_v0 = vpop.f32.mrb[21].mxu1 }
 0x89e   : > { %v3013_v1 = vadd.f32 %v1539_v0, %v1451_v61  ;;  %v1541_v2 = vpop.f32.mrb[22].mxu1 }
 0x89f   : > { %v1566_v4 = vmul.f32 -1.702, %v3011_v62  ;;  %v3016_v11 = vadd.f32 %v1541_v2, %v1447_v60  ;;  %v1543_v9 = vpop.f32.mrb[23].mxu1 }
 0x8a0   : > { %v1567_v17 = vmul.f32 -1.702, %v3013_v1  ;;  %v3019_v12 = vadd.f32 %v1543_v9, %v1451_v61 }
 0x8a1   : > { %v1578_v3 = vmul.f32 1.442695, %v1566_v4  ;;  %v1568_v14 = vmul.f32 -1.702, %v3016_v11 }
 0x8a2   : > { %v1580_v18 = vmul.f32 1.442695, %v1567_v17  ;;  %v1569_v19 = vmul.f32 -1.702, %v3019_v12 }
 0x8a3   : > { %2520 = vpow2.f32 %v1578_v3  ;;  %v1582_v20 = vmul.f32 1.442695, %v1568_v14 }
 0x8a4   : > { %2522 = vpow2.f32 %v1580_v18  ;;  %v1584_v5 = vmul.f32 1.442695, %v1569_v19 }
 0x8a5   : > { %2524 = vpow2.f32 %v1582_v20 }
 0x8a6   : > { %2526 = vpow2.f32 %v1584_v5 }
 0x8ab   : > { %v1547_v23 = vpop.f32.mrb[24].mxu1 }
 0x8ac   : > { %v3023_v27 = vadd.f32 %v1547_v23, %v1447_v60  ;;  %v1549_v16 = vpop.f32.mrb[25].mxu1 }
 0x8ad   : > { %v2521_v8 = vpop.eup %2520  ;;  %v3025_v28 = vadd.f32 %v1549_v16, %v1451_v61  ;;  %v1551_v29 = vpop.f32.mrb[26].mxu1 }
 0x8ae   : > { %v2523_v30 = vpop.eup %2522  ;;  %v1602_v31 = vadd.f32 1.0, %v2521_v8  ;;  %v1570_v32 = vmul.f32 -1.702, %v3023_v27  ;;  %v3028_v22 = vadd.f32 %v1551_v29, %v1447_v60  ;;  %v1553_v36 = vpop.f32.mrb[27].mxu1 }
 0x8af   : > { %v2525_v38 = vpop.eup %2524  ;;  %v1603_v39 = vadd.f32 1.0, %v2523_v30  ;;  %v1571_v41 = vmul.f32 -1.702, %v3025_v28  ;;  %v3031_v42 = vadd.f32 %v1553_v36, %v1451_v61 }
 0x8b0   : > { %v2527_v43 = vpop.eup %2526  ;;  %2528 = vrcp.f32 %v1602_v31  ;;  %v1604_v21 = vadd.f32 1.0, %v2525_v38  ;;  %v1586_v24 = vmul.f32 1.442695, %v1570_v32  ;;  %v1572_v26 = vmul.f32 -1.702, %v3028_v22 }
 0x8b1   : > { %2530 = vrcp.f32 %v1603_v39  ;;  %v1605_v44 = vadd.f32 1.0, %v2527_v43  ;;  %v1588_v47 = vmul.f32 1.442695, %v1571_v41  ;;  %v1573_v35 = vmul.f32 -1.702, %v3031_v42 }
 0x8b2   : > { %2532 = vrcp.f32 %v1604_v21  ;;  %v1590_v48 = vmul.f32 1.442695, %v1572_v26 }
 0x8b3   : > { %2534 = vrcp.f32 %v1605_v44  ;;  %v1592_v37 = vmul.f32 1.442695, %v1573_v35  ;;  %v1557_v50 = vpop.f32.mrb[28].mxu1 }
 0x8b4   : > { %2536 = vpow2.f32 %v1586_v24  ;;  %v3035_v58 = vadd.f32 %v1557_v50, %v1447_v60  ;;  %v1559_v51 = vpop.f32.mrb[29].mxu1 }
 0x8b5   : > { %2538 = vpow2.f32 %v1588_v47  ;;  %v3037_v52 = vadd.f32 %v1559_v51, %v1451_v61  ;;  %v1561_v33 = vpop.f32.mrb[30].mxu1 }
 0x8b6   : > { %2540 = vpow2.f32 %v1590_v48  ;;  %v1574_v53 = vmul.f32 -1.702, %v3035_v58  ;;  %v3040_v40 = vadd.f32 %v1561_v33, %v1447_v60  ;;  %v1563_v54 = vpop.f32.mrb[31].mxu1 }
 0x8b7   : > { %2542 = vpow2.f32 %v1592_v37  ;;  %v1575_v55 = vmul.f32 -1.702, %v3037_v52  ;;  %v3043_v56 = vadd.f32 %v1563_v54, %v1451_v61 }
 0x8b8   : > { %v1594_v46 = vmul.f32 1.442695, %v1574_v53  ;;  %v1576_v34 = vmul.f32 -1.702, %v3040_v40 }
 0x8b9   : > { %v1596_v57 = vmul.f32 1.442695, %v1575_v55  ;;  %v1577_v59 = vmul.f32 -1.702, %v3043_v56 }
 0x8ba   : > { %v2529_v63 = vpop.eup %2528  ;;  %2544 = vpow2.f32 %v1594_v46  ;;  %v1598_v0 = vmul.f32 1.442695, %v1576_v34  ;;  %v2243_v34 = vld [vmem:[%s611_s3] ss:$0 sm:$0xff]  ;;  %s3148_s3 = sld [smem:[#allocation7_spill]] (!%p2260_p5) }
 0x8bb   : > { %v2531_v2 = vpop.eup %2530  ;;  %2546 = vpow2.f32 %v1596_v57  ;;  %v1600_v4 = vmul.f32 1.442695, %v1577_v59  ;;  %v1626_v17 = vmul.f32 %v2529_v63, %v3011_v62 }
 0x8bc   : > { %v2533_v60 = vpop.eup %2532  ;;  %2548 = vpow2.f32 %v1598_v0  ;;  %v1627_v14 = vmul.f32 %v2531_v2, %v3013_v1 }
 0x8bd   : > { %v2535_v9 = vpop.eup %2534  ;;  %v1628_v61 = vmul.f32 %v2533_v60, %v3016_v11  ;;  %2550 = vpow2.f32 %v1600_v4 }
 0x8be   : > { %v2537_v3 = vpop.eup %2536  ;;  %v1629_v18 = vmul.f32 %v2535_v9, %v3019_v12 }
 0x8bf   : > { %v2539_v19 = vpop.eup %2538  ;;  %v1670_v20 = vpack.c.bf16 %v1628_v61, %v1626_v17  ;;  %v1606_v5 = vadd.f32 1.0, %v2537_v3 }
 0x8c0   : > { %v2541_v23 = vpop.eup %2540  ;;  %v1607_v16 = vadd.f32 1.0, %v2539_v19  ;;  %v1671_v8 = vpack.c.bf16 %v1629_v18, %v1627_v14 }
 0x8c1   : > { %v2543_v29 = vpop.eup %2542  ;;  %2552 = vrcp.f32 %v1606_v5  ;;  %v1608_v30 = vadd.f32 1.0, %v2541_v23 }
 0x8c2   : > { %2554 = vrcp.f32 %v1607_v16  ;;  %v1609_v31 = vadd.f32 1.0, %v2543_v29  ;;  %1811 = vmatprep.mubr.bf16.mxu0 %v1671_v8 }
 0x8c3   : > { %2556 = vrcp.f32 %v1608_v30  ;;  %1812 = vmatmul.mubr.bf16.vlgmr.msra.gmra.mrb[20].mxu0 %v1670_v20 }
 0x8c4   : > { %v2545_v62 = vpop.eup %2544  ;;  %2558 = vrcp.f32 %v1609_v31 }
 0x8c5   : > { %v2547_v11 = vpop.eup %2546  ;;  %v1610_v1 = vadd.f32 1.0, %v2545_v62 }
 0x8c6   : > { %v2549_v32 = vpop.eup %2548  ;;  %v1611_v12 = vadd.f32 1.0, %v2547_v11 }
 0x8c7   : > { %v2551_v36 = vpop.eup %2550  ;;  %2560 = vrcp.f32 %v1610_v1  ;;  %v1612_v38 = vadd.f32 1.0, %v2549_v32 }
 0x8c8   : > { %2562 = vrcp.f32 %v1611_v12  ;;  %v1613_v39 = vadd.f32 1.0, %v2551_v36 }
 0x8c9   : > { %2564 = vrcp.f32 %v1612_v38 }
 0x8ca   : > { %2566 = vrcp.f32 %v1613_v39 }
 0x8cb   : > { %v2553_v41 = vpop.eup %2552 }
 0x8cc   : > { %v2555_v43 = vpop.eup %2554  ;;  %v1630_v26 = vmul.f32 %v2553_v41, %v3023_v27 }
 0x8cd   : > { %v2557_v21 = vpop.eup %2556  ;;  %v1631_v47 = vmul.f32 %v2555_v43, %v3025_v28 }
 0x8ce   : > { %v2559_v24 = vpop.eup %2558  ;;  %v1632_v44 = vmul.f32 %v2557_v21, %v3028_v22 }
 0x8cf   : > { %v1633_v35 = vmul.f32 %v2559_v24, %v3031_v42 }
 0x8d0   : > { %v1672_v48 = vpack.c.bf16 %v1632_v44, %v1630_v26 }
 0x8d1   : > { %v2561_v37 = vpop.eup %2560  ;;  %v1673_v50 = vpack.c.bf16 %v1633_v35, %v1631_v47 }
 0x8d2   : > { %v2563_v51 = vpop.eup %2562  ;;  %v1634_v54 = vmul.f32 %v2561_v37, %v3035_v58 }
 0x8d3   : > { %v2565_v33 = vpop.eup %2564  ;;  %1819 = vmatprep.mubr.bf16.mxu0 %v1673_v50  ;;  %v1635_v27 = vmul.f32 %v2563_v51, %v3037_v52 }
 0x8d4   : > { %v2567_v53 = vpop.eup %2566  ;;  %v1636_v55 = vmul.f32 %v2565_v33, %v3040_v40  ;;  %1820 = vmatmul.mubr.bf16.gmra.mrb[24].mxu0 %v1672_v48 }
 0x8d5   : > { %v1637_v22 = vmul.f32 %v2567_v53, %v3043_v56 }
 0x8d6   : > { %v1674_v28 = vpack.c.bf16 %v1636_v55, %v1634_v54 }
 0x8d7   : > { %v1675_v46 = vpack.c.bf16 %v1637_v22, %v1635_v27 }
 0x8d9   : > { %1827 = vmatprep.mubr.bf16.mxu0 %v1675_v46 }
 0x8dc   : > { %1828 = vmatmul.mubr.bf16.gmra.mrb[28].mxu0 %v1674_v28 }
 0x996   : > { %v2312_v42 = vpop.f32.mrb[20].mxu0 }
 0x997   : > { %v2313_v57 = vpop.f32.mrb[21].mxu0 }
 0x998   : > { %v2314_v59 = vadd.f32 %v2313_v57, %v2312_v42  ;;  %v2315_v58 = vpop.f32.mrb[22].mxu0 }
 0x999   : > { %v2316_v63 = vpop.f32.mrb[23].mxu0 }
 0x99a   : > { %v1814_v40 = vadd.f32 %v2314_v59, %v2243_v34  ;;  %v2317_v0 = vadd.f32 %v2316_v63, %v2315_v58 }
 0x99c   : > { %v1836_v52 = vadd.f32 %v1814_v40, %v2909_v45  ;;  %v1817_v2 = vadd.f32 %v2317_v0, %v2243_v34 }
 0x99e   : > { %1842 = vst.msk [vmem:[#allocation2] sm:$0xff] %vm642_vm1, %v1836_v52  ;;  %v1837_v56 = vadd.f32 %v1817_v2, %v2912_v49 }
 0x9a0   : > { %1843 = vst.msk [vmem:[#allocation2 + $0x8] sm:$0xff] %vm642_vm1, %v1837_v56 }
 0x9a5   : > { %v1852_v32 = vld [vmem:[#allocation2] sm:$0xff] (!%p2260_p5) }
 0x9a7   : > { %v2318_v4 = vpop.f32.mrb[24].mxu0  ;;  %v1853_v36 = vld [vmem:[#allocation2 + $0x8] sm:$0xff] (!%p2260_p5) }
 0x9a8   : > { %v2319_v60 = vpop.f32.mrb[25].mxu0 }
 0x9a9   : > { %v2320_v9 = vadd.f32 %v2319_v60, %v2318_v4  ;;  %v2321_v17 = vpop.f32.mrb[26].mxu0 }
 0x9aa   : > { %v2322_v61 = vpop.f32.mrb[27].mxu0 }
 0x9ab   : > { %v1822_v3 = vadd.f32 %v2320_v9, %v2243_v34  ;;  %v2323_v14 = vadd.f32 %v2322_v61, %v2321_v17 }
 0x9ad   : > { %v1838_v18 = vadd.f32 %v1822_v3, %v2919_v6  ;;  %v1825_v19 = vadd.f32 %v2323_v14, %v2243_v34 }
 0x9af   : > { %1844 = vst.msk [vmem:[#allocation2 + $0x10] sm:$0xff] %vm642_vm1, %v1838_v18  ;;  %v1839_v45 = vadd.f32 %v1825_v19, %v2922_v7  ;;  %v2324_v20 = vpop.f32.mrb[28].mxu0  ;;  %v1858_v7 = vld [vmem:[%s3147_s25] sm:$0x3] (!%p2260_p5) }
 0x9b0   : > { %v2325_v5 = vpop.f32.mrb[29].mxu0  ;;  %v1877_v62 = vrot.slane (!%p2260_p5), %v1858_v7, %v2839_v25  ;;  %v1862_v11 = vrot.slane (!%p2260_p5), %v1858_v7, %v2830_v10 }
 0x9b1   : > { %1845 = vst.msk [vmem:[#allocation2 + $0x18] sm:$0xff] %vm642_vm1, %v1839_v45  ;;  %v2326_v49 = vadd.f32 %v2325_v5, %v2324_v20  ;;  %v2327_v23 = vpop.f32.mrb[30].mxu0 }
 0x9b2   : > { %v2328_v16 = vpop.f32.mrb[31].mxu0  ;;  %1879 = vbcast.lane.b32.xlu1 (!%p2260_p5), %v1877_v62, 256  ;;  %1864 = vbcast.lane.b32.xlu0 (!%p2260_p5), %v1862_v11, 256 }
 0x9b3   : > { %v1830_v8 = vadd.f32 %v2326_v49, %v2243_v34  ;;  %v2329_v29 = vadd.f32 %v2328_v16, %v2327_v23  ;;  %1851 = sbr.rel (%p2260_p5) target bundleno = 3325 (0xcfd), region = 84  ;;  %v2568_v23 = vld [vmem:[%s3148_s3] sm:$0xff] (!%p2260_p5)   ;;  %v2589_v16 = vmov (!%p2260_p5), 0.0  }
 0x9b4   : > { %2387 = vmatprep.subr.bf16.mxu0 (!%p2260_p5), %v2589_v16  ;;  %2395 = vmatprep.mubr.msk.bf16.mxu0 (!%p2260_p5), %vm2590_vm8, %v2589_v16 }
 0x9b5   : > { %v1840_v30 = vadd.f32 %v1830_v8, %v2929_v15  ;;  %v1833_v31 = vadd.f32 %v2329_v29, %v2243_v34  ;;  %2388 = vmatpush3.bf16.msra.mxu0 (!%p2260_p5), %v2568_v23  ;;  %v2569_v8 = vld [vmem:[%s3148_s3 + $0x8] sm:$0xff] (!%p2260_p5)   ;;  %v2570_v29 = vld [vmem:[%s3148_s3 + $0x10] sm:$0xff] (!%p2260_p5)  }
 0x9b6   : > { %1883 = vbcast.lane.b32.xlu1 (!%p2260_p5), %v1877_v62, 264  ;;  %1868 = vbcast.lane.b32.xlu0 (!%p2260_p5), %v1862_v11, 264  ;;  %v1854_v44 = vld [vmem:[#allocation2 + $0x10] sm:$0xff] (!%p2260_p5) }
 0x9b7   : > { %1846 = vst.msk [vmem:[#allocation2 + $0x20] sm:$0xff] %vm642_vm1, %v1840_v30  ;;  %v1841_v6 = vadd.f32 %v1833_v31, %v2932_v13  ;;  %2389 = vmatprep.subr.bf16.mxu0 (!%p2260_p5), %v2589_v16  ;;  %v2571_v30 = vld [vmem:[%s3148_s3 + $0x18] sm:$0xff] (!%p2260_p5)  }
 0x9b8   : > { %v1855_v1 = vld [vmem:[#allocation2 + $0x18] sm:$0xff] (!%p2260_p5) }
 0x9b9   : > { %1847 = vst.msk [vmem:[#allocation2 + $0x28] sm:$0xff] %vm642_vm1, %v1841_v6  ;;  %2390 = vmatpush3.bf16.msra.mxu0 (!%p2260_p5), %v2569_v8 }
 0x9ba   : > { %1887 = vbcast.lane.b32.xlu1 %v1877_v62, 272  ;;  %1872 = vbcast.lane.b32.xlu0 %v1862_v11, 272  ;;  %v1917_v62 = vld [vmem:[%s3149_s16] sm:$0x3] }
 0x9bb   : > { %2391 = vmatprep.subr.bf16.mxu0 %v2589_v16  ;;  %v1955_v11 = vrot.slane %v1917_v62, %v2830_v10 }
 0x9bd   : > { %2392 = vmatpush3.bf16.msra.mxu0 %v2570_v29 }
 0x9be   : > { %v1856_v12 = vld [vmem:[#allocation2 + $0x20] sm:$0xff]  ;;  %2393 = vmatprep.subr.bf16.mxu0 %v2589_v16 }
 0x9c0   : > { %v1857_v26 = vld [vmem:[#allocation2 + $0x28] sm:$0xff] }
 0x9c1   : > { %2394 = vmatpush3.bf16.msra.mxu0 %v2571_v30 }
 0xa24   : > { %v1880_v15 = vpop.permute.xlu1 %1879  ;;  %v1865_v13 = vpop.permute.xlu0 %1864 }
 0xa25   : > { %v1892_v41 = vmul.f32 %v1880_v15, %v1855_v1  ;;  %v1889_v43 = vmul.f32 %v1865_v13, %v1852_v32  ;;  %v1961_v32 = vrot.slane %v1917_v62, %v2839_v25 }
 0xa27   : > { %v1906_v50 = vsel %vm642_vm1, %v1892_v41, 0.0  ;;  %v1895_v51 = vsel %vm642_vm1, %v1889_v43, 0.0 }
 0xa28   : > { %v1884_v38 = vpop.permute.xlu1 %1883  ;;  %v1869_v39 = vpop.permute.xlu0 %1868 }
 0xa29   : > { %v1893_v21 = vmul.f32 %v1884_v38, %v1856_v12  ;;  %v1890_v24 = vmul.f32 %v1869_v39, %v1853_v36 }
 0xa2b   : > { %v1907_v47 = vsel %vm642_vm1, %v1893_v21, 0.0  ;;  %v1896_v35 = vsel %vm642_vm1, %v1890_v24, 0.0 }
 0xa2c   : > { %v1888_v48 = vpop.permute.xlu1 %1887  ;;  %v1873_v37 = vpop.permute.xlu0 %1872  ;;  %v1908_v54 = vadd.f32 %v1907_v47, %v1906_v50  ;;  %v1897_v55 = vadd.f32 %v1896_v35, %v1895_v51 }
 0xa2d   : > { %v1894_v33 = vmul.f32 %v1888_v48, %v1857_v26  ;;  %v1891_v53 = vmul.f32 %v1873_v37, %v1854_v44 }
 0xa2f   : > { %v1909_v27 = vsel %vm642_vm1, %v1894_v33, 0.0  ;;  %v1898_v22 = vsel %vm642_vm1, %v1891_v53, 0.0 }
 0xa30   : > { %v1910_v28 = vadd.f32 %v1909_v27, %v1908_v54  ;;  %v1899_v46 = vadd.f32 %v1898_v22, %v1897_v55 }
 0xa32   : > { %v1911_v42 = vrot.slane %v1910_v28, 4  ;;  %v1900_v34 = vrot.slane %v1899_v46, 4 }
 0xa34   : > { %v1912_v57 = vadd.f32 %v1911_v42, %v1910_v28  ;;  %v1901_v59 = vadd.f32 %v1900_v34, %v1899_v46 }
 0xa36   : > { %v1913_v58 = vrot.slane %v1912_v57, 2  ;;  %v1902_v63 = vrot.slane %v1901_v59, 2 }
 0xa38   : > { %v1914_v40 = vadd.f32 %v1913_v58, %v1912_v57  ;;  %v1903_v0 = vadd.f32 %v1902_v63, %v1901_v59 }
 0xa3a   : > { %v1904_v52 = vrot.slane %v1903_v0, 1  ;;  %v1915_v2 = vrot.slane %v1914_v40, 1 }
 0xa3c   : > { %v1905_v56 = vadd.f32 %v1904_v52, %v1903_v0  ;;  %v1916_v4 = vadd.f32 %v1915_v2, %v1914_v40 }
 0xa3e   : > { %v1921_v60 = vsel %vm1920_vm7, %v1916_v4, %v1905_v56 }
 0xa3f   : > { %v1923_v9 = vsel %vm632_vm2, %v1921_v60, 0.0 }
 0xa40   : > { %1924 = vadd.xlane.f32.xlu0 %v1923_v9 }
 0xacd   : > { %v1925_v17 = vpop.xlane.xlu0 %1924 }
 0xace   : > { %v1926_v61 = vmul.f32 0.015625, %v1925_v17 }
 0xad0   : > { %v1928_v3 = vrot.slane %v1926_v61, 1  ;;  %v1931_v14 = vsub.f32 %v1905_v56, %v1926_v61 }
 0xad2   : > { %v1932_v18 = vsub.f32 %v1916_v4, %v1928_v3  ;;  %v1933_v45 = vmul.f32 %v1931_v14, %v1931_v14 }
 0xad4   : > { %v1934_v19 = vmul.f32 %v1932_v18, %v1932_v18 }
 0xad6   : > { %v1937_v20 = vrot.slane %v1934_v19, 7 }
 0xad8   : > { %v1938_v5 = vsel %vm1920_vm7, %v1937_v20, %v1933_v45 }
 0xad9   : > { %v1940_v49 = vsel %vm632_vm2, %v1938_v5, 0.0 }
 0xada   : > { %1941 = vadd.xlane.f32.xlu1 %v1940_v49 }
 0xb67   : > { %v1942_v31 = vpop.xlane.xlu1 %1941 }
 0xb68   : > { %v1943_v6 = vmul.f32 0.015625, %v1942_v31 }
 0xb6a   : > { %v1944_v7 = vadd.f32 1e-05, %v1943_v6 }
 0xb6c   : > { %2572 = vrsqrt.f32 %v1944_v7 }
 0xb76   : > { %v2573_v15 = vpop.eup %2572 }
 0xb77   : > { %v1947_v13 = vrot.slane %v2573_v15, 1  ;;  %v1950_v1 = vmul.f32 %v2573_v15, %v1931_v14 }
 0xb79   : > { %v1951_v12 = vmul.f32 %v1947_v13, %v1932_v18  ;;  %v1956_v36 = vmul.f32 %v1955_v11, %v1950_v1 }
 0xb7b   : > { %v1957_v38 = vmul.f32 %v1955_v11, %v1951_v12  ;;  %v1962_v39 = vadd.f32 %v1961_v32, %v1956_v36 }
 0xb7d   : > { %v1963_v41 = vadd.f32 %v1961_v32, %v1957_v38  ;;  %v1964_v43 = vpack.c.bf16 %v1962_v39, %v1962_v39 }
 0xb7f   : > { %v1965_v21 = vpack.c.bf16 %v1963_v41, %v1963_v41  ;;  %v1976_v26 = vunpack.c.l.b16 %v1964_v43 }
 0xb81   : > { %v1977_v24 = vunpack.c.l.b16 %v1965_v21 }
 0xb83   : > { %v1978_v44 = vrot.slane %v1977_v24, 7 }
 0xb85   : > { %v1979_v47 = vsel %vm1920_vm7, %v1978_v44, %v1976_v26 }
 0xb86   : > { %v1980_v35 = vpack.c.b16 %v1979_v47, %v1979_v47 }
 0xb88   : > { %2396 = vmatmul.mubr.msk.bf16.vlgmr.msra.gmra.mrb[0].mxu0 %vm642_vm1, %v1980_v35 }
 0xc5b   : > { %v2042_v10 = vpop.f32.mrb[0].mxu0 }
 0xc5c   : > { %v2048_v48 = vmul.f32 %v2042_v10, %v2042_v10  ;;  %v2397_v37 = vpop.f32.mrb[1].mxu0 }
 0xc5d   : > { %v2045_v25 = vpop.f32.mrb[2].mxu0 }
 0xc5e   : > { %v2398_v50 = vpop.f32.mrb[3].mxu0  ;;  %v2050_v51 = vsel %vm2049_vm9, %v2048_v48, 0.0 }
 0xc5f   : > { %2051 = vadd.xlane.f32.xlu0 %v2050_v51 }
 0xcec   : > { %v2052_v33 = vpop.xlane.xlu0 %2051 }
 0xced   : > { %v2053_v53 = vadd.f32 1e-12, %v2052_v33 }
 0xcef   : > { %2574 = vrsqrt.f32 %v2053_v53 }
 0xcf9   : > { %v2575_v54 = vpop.eup %2574 }
 0xcfa   : > { %v2055_v55 = vmul.f32 %v2575_v54, %v2042_v10 }
 0xcfc   : > { %2056 = vst.msk [vmem:[%s3150_s18] sm:$0x3] %vm2049_vm9, %v2055_v55 }
 0xcfd PF: > { %s3151_s19 = sld [smem:[#allocation3_spill]] }
 0xd03   : > { %s24_s29 = sadd.s32 1, %s3151_s19  }
 0xd04   : > { %p21_p6 = scmp.ge.s32.totalorder %s24_s29, 4  }
 0xd06   :  { %23 = sbr.rel (!%p21_p6) target bundleno = 9 (0x9), region = 137 }

// kernel: custom_clip_forward.2
= control target key start
LH: loop header
LB: loop body
LE: loop exit
PB: predicated region body
PF: predicated region fallthrough
CT: control target
= control target key end

     0   :  { %s5921_s29 = smov 0   ;;  %s7804_s0 = inlined_call_operand.vmem [shape: f32[8,24,64], index: 0, kind: input, shape index: {}]   ;;  %s7805_s1 = inlined_call_operand.vmem [shape: f32[2,8,2,64], index: 1, kind: input, shape index: {}]   ;;  %s7806_s2 = inlined_call_operand.vmem [shape: f32[8,24], index: 2, kind: input, shape index: {}]   ;;  %s7807_s3 = inlined_call_operand.vmem [shape: f32[2,64], index: 3, kind: input, shape index: {}]   ;;  %s7808_s4 = inlined_call_operand.vmem [shape: bf16[64,32], index: 4, kind: input, shape index: {}]   ;;  %s7809_s5 = inlined_call_operand.vmem [shape: f32[2,4,64], index: 5, kind: input, shape index: {}]   ;;  %s7810_s6 = inlined_call_operand.vmem [shape: bf16[2,64,192], index: 6, kind: input, shape index: {}]   ;;  %s7811_s7 = inlined_call_operand.vmem [shape: f32[2,1,192], index: 7, kind: input, shape index: {}]   ;;  %s7812_s8 = inlined_call_operand.vmem [shape: bf16[2,64,64], index: 8, kind: input, shape index: {}]   ;;  %s7813_s9 = inlined_call_operand.vmem [shape: f32[2,1,64], index: 9, kind: input, shape index: {}]   ;;  %s7814_s10 = inlined_call_operand.vmem [shape: bf16[2,64,256], index: 10, kind: input, shape index: {}]   ;;  %s7815_s11 = inlined_call_operand.vmem [shape: f32[2,1,256], index: 11, kind: input, shape index: {}]   ;;  %s7816_s12 = inlined_call_operand.vmem [shape: bf16[2,256,64], index: 12, kind: input, shape index: {}]   ;;  %s7817_s13 = inlined_call_operand.vmem [shape: f32[2,1,64], index: 13, kind: input, shape index: {}]   ;;  %s7818_s14 = inlined_call_operand.vmem [shape: f32[8,32], index: 14, kind: output, shape index: {}]  }
   0x1   :  { %7831 = sst [smem:[#allocation10_spill]] %s7805_s1 }
   0x2   :  { %7832 = sst [smem:[#allocation11_spill]] %s7806_s2 }
   0x3   :  { %7833 = sst [smem:[#allocation12_spill]] %s7807_s3 }
   0x4   :  { %7834 = sst [smem:[#allocation13_spill]] %s7808_s4 }
   0x5   :  { %7835 = sst [smem:[#allocation14_spill]] %s7809_s5 }
   0x6   :  { %7836 = sst [smem:[#allocation15_spill]] %s7810_s6 }
   0x7   :  { %7837 = sst [smem:[#allocation16_spill]] %s7811_s7 }
   0x8   :  { %7838 = sst [smem:[#allocation17_spill]] %s7818_s14 }
   0x9 LB: > { %7839 = sst [smem:[#allocation3_spill]] %s5839_s29  ;;  %s5927_s30 = sadd.s32 4294967295, %s5839_s29   ;;  %s5839_s29 = sphi %s5921_s29, %s24_s29  }
   0xa   : > { %p4848_p0 = scmp.ge.s32.totalorder %s5839_s29, 1  ;;  %p490_p1 = scmp.lt.s32.totalorder %s5839_s29, 3 }
   0xc   : > { %p491_p2 = pnand %p4848_p0, %p490_p1 }
   0xe   : > { %494 = sbr.rel (%p491_p2) target bundleno = 3553 (0xde1), region = 76 }
  0x15   : > { %p569_p3 = scmp.lt.s32.totalorder %s5927_s30, 1  ;;  %s7840_s1 = sld [smem:[#allocation10_spill]] }
  0x16   : > { %s7841_s5 = sld [smem:[#allocation14_spill]]  ;;  %s7842_s6 = sld [smem:[#allocation15_spill]] }
  0x17   : > { %s5933_s15 = scalar_select %p569_p3, %s5927_s30, 1 }
  0x18   : > { %s7843_s7 = sld [smem:[#allocation16_spill]]  ;;  %p4862_p4 = scmp.ne.s32.totalorder %s5927_s30, 0 }
  0x19   : > { %s4977_s16 = sshll.u32 %s5933_s15, 4  ;;  %s4851_s17 = sshll.u32 %s5933_s15, 2  ;;  %v617_v0 = vld [vmem:[%s7804_s0] sm:$0xff] (!%p4862_p4)  ;;  %vm641_vm0 = vcmask (!%p4862_p4), 523264   ;;  %v618_v1 = vld [vmem:[%s7804_s0 + $0x8] sm:$0xff] (!%p4862_p4)  ;;  %v619_v2 = vld [vmem:[%s7804_s0 + $0x10] sm:$0xff] (!%p4862_p4) }
  0x1a   : > { %s4978_s24 = sshll.u32 %s5933_s15, 6  ;;  %s4854_s25 = sshll.u32 %s5933_s15, 1  ;;  %642 = vst.msk [vmem:[#allocation2] sm:$0xff] (!%p4862_p4), %vm641_vm0, %v617_v0  ;;  %643 = vst.msk [vmem:[#allocation2 + $0x8] sm:$0xff] (!%p4862_p4), %vm641_vm0, %v618_v1  ;;  %v620_v3 = vld [vmem:[%s7804_s0 + $0x18] sm:$0xff] (!%p4862_p4)  ;;  %v621_v4 = vld [vmem:[%s7804_s0 + $0x20] sm:$0xff] (!%p4862_p4) }
  0x1b   : > { %s5940_s20 = scalar_lea.vmem %s7840_s1, %s4977_s16  ;;  %s4979_s18 = sshll.u32 %s5933_s15, 5  ;;  %644 = vst.msk [vmem:[#allocation2 + $0x10] sm:$0xff] (!%p4862_p4), %vm641_vm0, %v619_v2  ;;  %v622_v5 = vld [vmem:[%s7804_s0 + $0x28] sm:$0xff] (!%p4862_p4)  ;;  %645 = vst.msk [vmem:[#allocation2 + $0x18] sm:$0xff] (!%p4862_p4), %vm641_vm0, %v620_v3  ;;  %v623_v6 = vld [vmem:[%s7804_s0 + $0x30] sm:$0xff] (!%p4862_p4) }
  0x1c   : > { %s5945_s23 = scalar_lea.vmem %s7841_s5, %s4851_s17  ;;  %s5952_s28 = scalar_lea.vmem %s7842_s6, %s4978_s24  ;;  %646 = vst.msk [vmem:[#allocation2 + $0x20] sm:$0xff] (!%p4862_p4), %vm641_vm0, %v621_v4  ;;  %647 = vst.msk [vmem:[#allocation2 + $0x28] sm:$0xff] (!%p4862_p4), %vm641_vm0, %v622_v5  ;;  %v624_v7 = vld [vmem:[%s7804_s0 + $0x38] sm:$0xff] (!%p4862_p4)  ;;  %v625_v8 = vld [vmem:[%s7804_s0 + $0x40] sm:$0xff] (!%p4862_p4) }
  0x1d   : > { %s594_s1 = scalar_lea.vmem %s7813_s9, %s5933_s15  ;;  %s5967_s22 = scalar_lea.vmem %s7812_s8, %s4979_s18  ;;  %648 = vst.msk [vmem:[#allocation2 + $0x30] sm:$0xff] (!%p4862_p4), %vm641_vm0, %v623_v6  ;;  %649 = vst.msk [vmem:[#allocation2 + $0x38] sm:$0xff] (!%p4862_p4), %vm641_vm0, %v624_v7  ;;  %v626_v9 = vld [vmem:[%s7804_s0 + $0x48] sm:$0xff] (!%p4862_p4)  ;;  %v627_v10 = vld [vmem:[%s7804_s0 + $0x50] sm:$0xff] (!%p4862_p4) }
  0x1e   : > { %s5957_s3 = scalar_lea.vmem %s7843_s7, %s4854_s25  ;;  %s5972_s26 = scalar_lea.vmem %s7814_s10, %s4978_s24  ;;  %650 = vst.msk [vmem:[#allocation2 + $0x40] sm:$0xff] (!%p4862_p4), %vm641_vm0, %v625_v8  ;;  %v628_v11 = vld [vmem:[%s7804_s0 + $0x58] sm:$0xff] (!%p4862_p4)  ;;  %651 = vst.msk [vmem:[#allocation2 + $0x48] sm:$0xff] (!%p4862_p4), %vm641_vm0, %v626_v9  ;;  %v629_v12 = vld [vmem:[%s7804_s0 + $0x60] sm:$0xff] (!%p4862_p4) }
  0x1f   : > { %s5977_s14 = scalar_lea.vmem %s7815_s11, %s4854_s25  ;;  %s4981_s29 = sshll.u32 %s5933_s15, 7  ;;  %652 = vst.msk [vmem:[#allocation2 + $0x50] sm:$0xff] (!%p4862_p4), %vm641_vm0, %v627_v10  ;;  %653 = vst.msk [vmem:[#allocation2 + $0x58] sm:$0xff] (!%p4862_p4), %vm641_vm0, %v628_v11  ;;  %v630_v13 = vld [vmem:[%s7804_s0 + $0x68] sm:$0xff] (!%p4862_p4)  ;;  %v631_v14 = vld [vmem:[%s7804_s0 + $0x70] sm:$0xff] (!%p4862_p4) }
  0x20   : > { %s5983_s16 = scalar_lea.vmem %s7816_s12, %s4981_s29  ;;  %s611_s18 = scalar_lea.vmem %s7817_s13, %s5933_s15  ;;  %654 = vst.msk [vmem:[#allocation2 + $0x60] sm:$0xff] (!%p4862_p4), %vm641_vm0, %v629_v12  ;;  %655 = vst.msk [vmem:[#allocation2 + $0x68] sm:$0xff] (!%p4862_p4), %vm641_vm0, %v630_v13  ;;  %v632_v15 = vld [vmem:[%s7804_s0 + $0x78] sm:$0xff] (!%p4862_p4)  ;;  %v633_v16 = vld [vmem:[%s7804_s0 + $0x80] sm:$0xff] (!%p4862_p4) }
  0x21   : > { %616 = sbr.rel (%p4862_p4) target bundleno = 40 (0x28), region = 80  ;;  %656 = vst.msk [vmem:[#allocation2 + $0x70] sm:$0xff] (!%p4862_p4), %vm641_vm0, %v631_v14  ;;  %v634_v17 = vld [vmem:[%s7804_s0 + $0x88] sm:$0xff] (!%p4862_p4)  ;;  %657 = vst.msk [vmem:[#allocation2 + $0x78] sm:$0xff] (!%p4862_p4), %vm641_vm0, %v632_v15  ;;  %v635_v18 = vld [vmem:[%s7804_s0 + $0x90] sm:$0xff] (!%p4862_p4) }
  0x22   : > { %658 = vst.msk [vmem:[#allocation2 + $0x80] sm:$0xff] (!%p4862_p4), %vm641_vm0, %v633_v16  ;;  %659 = vst.msk [vmem:[#allocation2 + $0x88] sm:$0xff] (!%p4862_p4), %vm641_vm0, %v634_v17  ;;  %v636_v19 = vld [vmem:[%s7804_s0 + $0x98] sm:$0xff] (!%p4862_p4)  ;;  %v637_v20 = vld [vmem:[%s7804_s0 + $0xa0] sm:$0xff] (!%p4862_p4) }
  0x23   : > { %660 = vst.msk [vmem:[#allocation2 + $0x90] sm:$0xff] (!%p4862_p4), %vm641_vm0, %v635_v18  ;;  %661 = vst.msk [vmem:[#allocation2 + $0x98] sm:$0xff] (!%p4862_p4), %vm641_vm0, %v636_v19  ;;  %v638_v21 = vld [vmem:[%s7804_s0 + $0xa8] sm:$0xff] (!%p4862_p4)  ;;  %v639_v22 = vld [vmem:[%s7804_s0 + $0xb0] sm:$0xff] (!%p4862_p4) }
  0x24   : > { %662 = vst.msk [vmem:[#allocation2 + $0xa0] sm:$0xff] (!%p4862_p4), %vm641_vm0, %v637_v20  ;;  %v640_v23 = vld [vmem:[%s7804_s0 + $0xb8] sm:$0xff] (!%p4862_p4)  ;;  %663 = vst.msk [vmem:[#allocation2 + $0xa8] sm:$0xff] (!%p4862_p4), %vm641_vm0, %v638_v21 }
  0x25   : > { %664 = vst.msk [vmem:[#allocation2 + $0xb0] sm:$0xff] (!%p4862_p4), %vm641_vm0, %v639_v22  ;;  %665 = vst.msk [vmem:[#allocation2 + $0xb8] sm:$0xff] (!%p4862_p4), %vm641_vm0, %v640_v23 }
  0x28 PF: > { %v666_v24 = vld [vmem:[%s5940_s20] sm:$0x3]  ;;  %vm674_vm1 = vcmask 517120   ;;  %vm708_vm2 = vcmask 523264   ;;  %v6087_v25 = vld [vmem:[#allocation2 + $0x10] sm:$0xff]  ;;  %v685_v32 = vld [vmem:[#allocation2 + $0x8] sm:$0xff] }
  0x29   : > { %675 = vst.msk [vmem:[#allocation2 + $0x1] sm:$0x3] %vm674_vm1, %v666_v24  ;;  %v715_v26 = vsel %vm708_vm2, %v6087_v25, 0.0  ;;  %v667_v27 = vld [vmem:[%s5940_s20 + $0x2] sm:$0x3]  ;;  %v6102_v33 = vld [vmem:[#allocation2 + $0x28] sm:$0xff] }
  0x2a   : > { %716 = vadd.xlane.f32.xlu1 %v715_v26  ;;  %676 = vst.msk [vmem:[#allocation2 + $0x19] sm:$0x3] %vm674_vm1, %v667_v27  ;;  %v668_v28 = vld [vmem:[%s5940_s20 + $0x4] sm:$0x3]  ;;  %v669_v29 = vld [vmem:[%s5940_s20 + $0x6] sm:$0x3] }
  0x2b   : > { %677 = vst.msk [vmem:[#allocation2 + $0x31] sm:$0x3] %vm674_vm1, %v668_v28  ;;  %678 = vst.msk [vmem:[#allocation2 + $0x49] sm:$0x3] %vm674_vm1, %v669_v29  ;;  %v670_v30 = vld [vmem:[%s5940_s20 + $0x8] sm:$0x3] }
  0x2c   : > { %679 = vst.msk [vmem:[#allocation2 + $0x61] sm:$0x3] %vm674_vm1, %v670_v30  ;;  %v671_v31 = vld [vmem:[%s5940_s20 + $0xa] sm:$0x3]  ;;  %v6104_v35 = vld [vmem:[#allocation2 + $0x20] sm:$0xff]  ;;  %v6106_v36 = vld [vmem:[#allocation2 + $0x38] sm:$0xff] }
  0x2d   : > { %680 = vst.msk [vmem:[#allocation2 + $0x79] sm:$0x3] %vm674_vm1, %v671_v31  ;;  %v6109_v39 = vld [vmem:[#allocation2 + $0x40] sm:$0xff]  ;;  %v6112_v41 = vld [vmem:[#allocation2 + $0x58] sm:$0xff]  ;;  %v712_v42 = vsel %vm708_vm2, %v685_v32, 0.0  ;;  %v724_v44 = vsel %vm708_vm2, %v6102_v33, 0.0 }
  0x2e   : > { %v721_v46 = vsel %vm708_vm2, %v6104_v35, 0.0  ;;  %v730_v47 = vsel %vm708_vm2, %v6106_v36, 0.0  ;;  %v733_v49 = vsel %vm708_vm2, %v6109_v39, 0.0  ;;  %v742_v50 = vsel %vm708_vm2, %v6112_v41, 0.0  ;;  %v6133_v52 = vld [vmem:[#allocation2 + $0x50] sm:$0xff]  ;;  %v6135_v53 = vld [vmem:[#allocation2 + $0x68] sm:$0xff] }
  0x2f   : > { %v739_v54 = vsel %vm708_vm2, %v6133_v52, 0.0  ;;  %v748_v56 = vsel %vm708_vm2, %v6135_v53, 0.0  ;;  %v6147_v59 = vld [vmem:[#allocation2 + $0x70] sm:$0xff]  ;;  %v672_v61 = vld [vmem:[%s5940_s20 + $0xc] sm:$0x3]  ;;  %v6164_v11 = vld [vmem:[#allocation2 + $0x80] sm:$0xff] }
  0x30   : > { %v684_v34 = vld [vmem:[#allocation2] sm:$0xff]  ;;  %681 = vst.msk [vmem:[#allocation2 + $0x91] sm:$0x3] %vm674_vm1, %v672_v61  ;;  %v751_v62 = vsel %vm708_vm2, %v6147_v59, 0.0  ;;  %v673_v63 = vld [vmem:[%s5940_s20 + $0xe] sm:$0x3] }
  0x31   : > { %v709_v37 = vsel %vm708_vm2, %v684_v34, 0.0  ;;  %v687_v38 = vld [vmem:[#allocation2 + $0x18] sm:$0xff]  ;;  %682 = vst.msk [vmem:[#allocation2 + $0xa9] sm:$0x3] %vm674_vm1, %v673_v63  ;;  %v757_v14 = vsel %vm708_vm2, %v6164_v11, 0.0  ;;  %v6177_v19 = vld [vmem:[#allocation2 + $0x88] sm:$0xff] }
  0x32   : > { %710 = vadd.xlane.f32.xlu0 %v709_v37  ;;  %v718_v40 = vsel %vm708_vm2, %v687_v38, 0.0  ;;  %v6115_v43 = vld [vmem:[#allocation2 + $0x30] sm:$0xff]  ;;  %v6119_v45 = vld [vmem:[#allocation2 + $0x48] sm:$0xff]  ;;  %v760_v23 = vsel %vm708_vm2, %v6177_v19, 0.0  ;;  %vm2250_vm3 = vcmask 1043456   ;;  %vm1947_vm11 = vcmask 195584  }
  0x33   : > { %719 = vadd.xlane.f32.xlu1 %v718_v40  ;;  %v727_v48 = vsel %vm708_vm2, %v6115_v43, 0.0  ;;  %v736_v51 = vsel %vm708_vm2, %v6119_v45, 0.0  ;;  %v6139_v55 = vld [vmem:[#allocation2 + $0x60] sm:$0xff]  ;;  %p4969_p5 = scmp.ne.s32.totalorder %s5927_s30, 1 }
  0x34   : > { %v6143_v57 = vld [vmem:[#allocation2 + $0x78] sm:$0xff]  ;;  %v745_v58 = vsel %vm708_vm2, %v6139_v55, 0.0  ;;  %vm4464_vm12 = vcmask (!%p4969_p5), 1041409   ;;  %vm4466_vm13 = vcmask (!%p4969_p5), 1042434   ;;  %vm4468_vm14 = vcmask (!%p4969_p5), 1043459   ;;  %s7862_s17 = sld [smem:[#allocation12_spill]] (!%p4969_p5) }
  0x35   : > { %v754_v60 = vsel %vm708_vm2, %v6143_v57, 0.0  ;;  %vm4470_vm15 = vcmask (!%p4969_p5), 1044484   ;;  %vm4472_vm0 = vcmask (!%p4969_p5), 1045509   ;;  %vm4474_vm1 = vcmask (!%p4969_p5), 1046534   ;;  %s7863_s19 = sld [smem:[#allocation17_spill]] (!%p4969_p5) }
  0x36   : > { %713 = vadd.xlane.f32.xlu0 %v712_v42 }
  0x37   : > { %725 = vadd.xlane.f32.xlu1 %v724_v44  ;;  %v6186_v28 = vld [vmem:[#allocation2 + $0x90] sm:$0xff] }
  0x38   : > { %v763_v30 = vsel %vm708_vm2, %v6186_v28, 0.0 }
  0x3a   : > { %722 = vadd.xlane.f32.xlu0 %v721_v46 }
  0x3b   : > { %731 = vadd.xlane.f32.xlu1 %v730_v47 }
  0x3e   : > { %728 = vadd.xlane.f32.xlu0 %v727_v48 }
  0x3f   : > { %737 = vadd.xlane.f32.xlu1 %v736_v51 }
  0x42   : > { %734 = vadd.xlane.f32.xlu0 %v733_v49  ;;  %v6208_v49 = vld [vmem:[#allocation2 + $0xa0] sm:$0xff] }
  0x43   : > { %743 = vadd.xlane.f32.xlu1 %v742_v50  ;;  %v769_v51 = vsel %vm708_vm2, %v6208_v49, 0.0 }
  0x46   : > { %740 = vadd.xlane.f32.xlu0 %v739_v54 }
  0x47   : > { %749 = vadd.xlane.f32.xlu1 %v748_v56 }
  0x4a   : > { %746 = vadd.xlane.f32.xlu0 %v745_v58 }
  0x4b   : > { %755 = vadd.xlane.f32.xlu1 %v754_v60 }
  0x4e   : > { %752 = vadd.xlane.f32.xlu0 %v751_v62 }
  0xb7   : > { %v717_v0 = vpop.xlane.xlu1 %716 }
  0xb8   : > { %v784_v3 = vmul.f32 0.015625, %v717_v0 }
  0xba   : > { %v6160_v8 = vsub.f32 %v6087_v25, %v784_v3  ;;  %v6228_v3 = vld [vmem:[#allocation2 + $0xb0] sm:$0xff] }
  0xbc   : > { %v832_v18 = vmul.f32 %v6160_v8, %v6160_v8 }
  0xbe   : > { %v860_v25 = vsel %vm708_vm2, %v832_v18, 0.0 }
  0xbf   : > { %v711_v1 = vpop.xlane.xlu0 %710 }
  0xc0   : > { %v782_v2 = vmul.f32 0.015625, %v711_v1  ;;  %v720_v4 = vpop.xlane.xlu1 %719 }
  0xc1   : > { %v785_v10 = vmul.f32 0.015625, %v720_v4 }
  0xc2   : > { %v6157_v5 = vsub.f32 %v684_v34, %v782_v2 }
  0xc3   : > { %v714_v6 = vpop.xlane.xlu0 %713  ;;  %v6171_v16 = vsub.f32 %v687_v38, %v785_v10 }
  0xc4   : > { %v783_v7 = vmul.f32 0.015625, %v714_v6  ;;  %v830_v9 = vmul.f32 %v6157_v5, %v6157_v5  ;;  %v726_v21 = vpop.xlane.xlu1 %725  ;;  %v5372_v6 = vld [vmem:[%s5952_s28 + $0x4] ss:$8 sps:$4 sm:$0xff]  }
  0xc5   : > { %v787_v27 = vmul.f32 0.015625, %v726_v21  ;;  %v833_v29 = vmul.f32 %v6171_v16, %v6171_v16  ;;  %1186 = vmatprep.subr.bf16.mxu0 %v5372_v6  ;;  %5327 = vmatprep.subr.bf16.mxu1 %v5372_v6  ;;  %v5375_v21 = vld [vmem:[%s5952_s28 + $0x14] ss:$8 sps:$4 sm:$0xff]  }
  0xc6   : > { %v6166_v12 = vsub.f32 %v685_v32, %v783_v7  ;;  %v854_v13 = vsel %vm708_vm2, %v830_v9, 0.0  ;;  %v775_v9 = vsel %vm708_vm2, %v6228_v3, 0.0 }
  0xc7   : > { %855 = vadd.xlane.f32.xlu0 %v854_v13  ;;  %v723_v15 = vpop.xlane.xlu0 %722  ;;  %v6193_v34 = vsub.f32 %v6102_v33, %v787_v27  ;;  %v863_v37 = vsel %vm708_vm2, %v833_v29, 0.0 }
  0xc8   : > { %v831_v17 = vmul.f32 %v6166_v12, %v6166_v12  ;;  %v786_v20 = vmul.f32 0.015625, %v723_v15  ;;  %v732_v31 = vpop.xlane.xlu1 %731 }
  0xc9   : > { %v789_v33 = vmul.f32 0.015625, %v732_v31  ;;  %v835_v48 = vmul.f32 %v6193_v34, %v6193_v34 }
  0xca   : > { %v857_v22 = vsel %vm708_vm2, %v831_v17, 0.0  ;;  %v6184_v26 = vsub.f32 %v6104_v35, %v786_v20  ;;  %v6196_v35 = vld [vmem:[#allocation2 + $0x98] sm:$0xff] }
  0xcb   : > { %758 = vadd.xlane.f32.xlu0 %v757_v14  ;;  %858 = vadd.xlane.f32.xlu1 %v857_v22  ;;  %v729_v24 = vpop.xlane.xlu0 %728  ;;  %v766_v42 = vsel %vm708_vm2, %v6196_v35, 0.0  ;;  %v6213_v54 = vsub.f32 %v6106_v36, %v789_v33  ;;  %v869_v56 = vsel %vm708_vm2, %v835_v48, 0.0  ;;  %v6241_v17 = vld [vmem:[#allocation2 + $0xb8] sm:$0xff] }
  0xcc   : > { %v834_v38 = vmul.f32 %v6184_v26, %v6184_v26  ;;  %v788_v40 = vmul.f32 0.015625, %v729_v24  ;;  %v738_v44 = vpop.xlane.xlu1 %737 }
  0xcd   : > { %v791_v63 = vmul.f32 0.015625, %v738_v44  ;;  %v837_v2 = vmul.f32 %v6213_v54, %v6213_v54 }
  0xce   : > { %v866_v46 = vsel %vm708_vm2, %v834_v38, 0.0  ;;  %v6204_v47 = vsub.f32 %v6115_v43, %v788_v40  ;;  %v6216_v43 = vld [vmem:[#allocation2 + $0xa8] sm:$0xff] }
  0xcf   : > { %861 = vadd.xlane.f32.xlu0 %v860_v25  ;;  %761 = vadd.xlane.f32.xlu1 %v760_v23  ;;  %v735_v32 = vpop.xlane.xlu0 %734  ;;  %v772_v62 = vsel %vm708_vm2, %v6216_v43, 0.0  ;;  %v6232_v7 = vsub.f32 %v6119_v45, %v791_v63  ;;  %v875_v14 = vsel %vm708_vm2, %v837_v2, 0.0  ;;  %v5377_v25 = vld [vmem:[%s5952_s28 + $0x10] ss:$8 sps:$4 sm:$0xff]   ;;  %v5380_v40 = vld [vmem:[%s5952_s28 + $0x20] ss:$8 sps:$4 sm:$0xff]  }
  0xd0   : > { %v836_v58 = vmul.f32 %v6204_v47, %v6204_v47  ;;  %v790_v60 = vmul.f32 0.015625, %v735_v32  ;;  %v744_v61 = vpop.xlane.xlu1 %743  ;;  %v5378_v32 = vld [vmem:[%s5952_s28 + $0x24] ss:$8 sps:$4 sm:$0xff]  }
  0xd1   : > { %v793_v10 = vmul.f32 0.015625, %v744_v61  ;;  %v839_v24 = vmul.f32 %v6232_v7, %v6232_v7 }
  0xd2   : > { %v872_v36 = vsel %vm708_vm2, %v836_v58, 0.0  ;;  %v6224_v1 = vsub.f32 %v6109_v39, %v790_v60  ;;  %v5374_v39 = vld [vmem:[%s5952_s28] ss:$8 sps:$4 sm:$0xff]  }
  0xd3   : > { %764 = vadd.xlane.f32.xlu0 %v763_v30  ;;  %864 = vadd.xlane.f32.xlu1 %v863_v37  ;;  %v741_v50 = vpop.xlane.xlu0 %740  ;;  %v6247_v22 = vsub.f32 %v6112_v41, %v793_v10 }
  0xd4   : > { %v792_v4 = vmul.f32 0.015625, %v741_v50  ;;  %v750_v13 = vpop.xlane.xlu1 %749  ;;  %v838_v18 = vmul.f32 %v6224_v1, %v6224_v1  ;;  %1187 = vmatpush1.bf16.msra.mxu0 %v5374_v39  ;;  %5331 = vmatpush1.bf16.msra.mxu1 %v5374_v39  ;;  %v5383_v50 = vld [vmem:[%s5952_s28 + $0x30] ss:$8 sps:$4 sm:$0xff]  }
  0xd5   : > { %v795_v23 = vmul.f32 0.015625, %v750_v13  ;;  %1188 = vmatprep.subr.bf16.mxu0 %v5375_v21  ;;  %5328 = vmatprep.subr.bf16.mxu1 %v5375_v21  ;;  %v841_v38 = vmul.f32 %v6247_v22, %v6247_v22 }
  0xd6   : > { %v6239_v15 = vsub.f32 %v6133_v52, %v792_v4  ;;  %v778_v52 = vsel %vm708_vm2, %v6241_v17, 0.0  ;;  %v878_v27 = vsel %vm708_vm2, %v838_v18, 0.0 }
  0xd7   : > { %767 = vadd.xlane.f32.xlu1 %v766_v42  ;;  %867 = vadd.xlane.f32.xlu0 %v866_v46  ;;  %v747_v0 = vpop.xlane.xlu0 %746  ;;  %v6262_v37 = vsub.f32 %v6135_v53, %v795_v23  ;;  %v5381_v53 = vld [vmem:[%s5952_s28 + $0x34] ss:$8 sps:$4 sm:$0xff]   ;;  %v887_v48 = vsel %vm708_vm2, %v841_v38, 0.0  ;;  %v683_v38 = vld [vmem:[%s5945_s23] sm:$0xf] }
  0xd8   : > { %v794_v20 = vmul.f32 0.015625, %v747_v0  ;;  %v840_v30 = vmul.f32 %v6239_v15, %v6239_v15  ;;  %v756_v41 = vpop.xlane.xlu1 %755  ;;  %1189 = vmatpush1.bf16.msra.mxu0 %v5377_v25  ;;  %5332 = vmatpush1.bf16.msra.mxu1 %v5377_v25 }
  0xd9   : > { %v797_v46 = vmul.f32 0.015625, %v756_v41  ;;  %1190 = vmatprep.subr.bf16.mxu0 %v5378_v32  ;;  %5329 = vmatprep.subr.bf16.mxu1 %v5378_v32 }
  0xda   : > { %v6256_v29 = vsub.f32 %v6139_v55, %v794_v20  ;;  %v881_v55 = vsel %vm708_vm2, %v839_v24, 0.0  ;;  %v884_v42 = vsel %vm708_vm2, %v840_v30, 0.0 }
  0xdb   : > { %870 = vadd.xlane.f32.xlu1 %v869_v56  ;;  %770 = vadd.xlane.f32.xlu0 %v769_v51  ;;  %v753_v45 = vpop.xlane.xlu0 %752  ;;  %v6278_v51 = vsub.f32 %v6143_v57, %v797_v46  ;;  %v843_v56 = vmul.f32 %v6262_v37, %v6262_v37 }
  0xdc   : > { %v796_v31 = vmul.f32 0.015625, %v753_v45  ;;  %v842_v33 = vmul.f32 %v6256_v29, %v6256_v29  ;;  %1191 = vmatpush1.bf16.msra.mxu0 %v5380_v40  ;;  %5333 = vmatpush1.bf16.msra.mxu1 %v5380_v40 }
  0xdd   : > { %1192 = vmatprep.subr.bf16.mxu0 %v5381_v53  ;;  %5330 = vmatprep.subr.bf16.mxu1 %v5381_v53  ;;  %v893_v60 = vsel %vm708_vm2, %v843_v56, 0.0  ;;  %v845_v57 = vmul.f32 %v6278_v51, %v6278_v51 }
  0xde   : > { %v6270_v44 = vsub.f32 %v6147_v59, %v796_v31  ;;  %v890_v59 = vsel %vm708_vm2, %v842_v33, 0.0 }
  0xdf   : > { %773 = vadd.xlane.f32.xlu1 %v772_v62  ;;  %873 = vadd.xlane.f32.xlu0 %v872_v36  ;;  %v7821_v62 = vmov 0   ;;  %v899_v63 = vsel %vm708_vm2, %v845_v57, 0.0 }
  0xe0   : > { %v844_v58 = vmul.f32 %v6270_v44, %v6270_v44  ;;  %1193 = vmatpush1.bf16.msra.mxu0 %v5383_v50  ;;  %5334 = vmatpush1.bf16.msra.mxu1 %v5383_v50 }
  0xe1   : > { %1218 = vmatprep.mubr.bf16.mxu0 %v7821_v62  ;;  %1308 = vmatprep.mubr.bf16.mxu1 %v7821_v62 }
  0xe2   : > { %v896_v61 = vsel %vm708_vm2, %v844_v58, 0.0 }
  0xe3   : > { %876 = vadd.xlane.f32.xlu1 %v875_v14  ;;  %776 = vadd.xlane.f32.xlu0 %v775_v9  ;;  %v1022_v9 = vlaneseq }
  0xe5   : > { %v6296_v45 = vshrl.u32 %v1022_v9, 7 }
  0xe7   : > { %779 = vadd.xlane.f32.xlu1 %v778_v52  ;;  %879 = vadd.xlane.f32.xlu0 %v878_v27  ;;  %7844 = vst [vmem:[#allocation4_spill] sm:$0xff] %v6296_v45  ;;  %v6305_v31 = vsub.s32 0, %v6296_v45 }
  0xe9   : > { %v6316_v50 = vrot.slane %v683_v38, %v6305_v31 }
  0xeb   : > { %882 = vadd.xlane.f32.xlu1 %v881_v55  ;;  %885 = vadd.xlane.f32.xlu0 %v884_v42 }
  0xef   : > { %888 = vadd.xlane.f32.xlu1 %v887_v48  ;;  %891 = vadd.xlane.f32.xlu0 %v890_v59  ;;  %v6319_v59 = vsub.s32 1, %v6296_v45 }
  0xf3   : > { %894 = vadd.xlane.f32.xlu1 %v893_v60  ;;  %897 = vadd.xlane.f32.xlu0 %v896_v61 }
  0xf7   : > { %900 = vadd.xlane.f32.xlu1 %v899_v63 }
 0x154   : > { %v856_v0 = vpop.xlane.xlu0 %855 }
 0x155   : > { %v926_v36 = vmul.f32 0.015625, %v856_v0 }
 0x157   : > { %v950_v2 = vadd.f32 1e-05, %v926_v36 }
 0x158   : > { %v859_v4 = vpop.xlane.xlu1 %858  ;;  %v759_v6 = vpop.xlane.xlu0 %758 }
 0x159   : > { %5416 = vrsqrt.f32 %v950_v2  ;;  %v927_v10 = vmul.f32 0.015625, %v859_v4  ;;  %v798_v13 = vmul.f32 0.015625, %v759_v6  ;;  %v6330_v4 = vrot.slane %v683_v38, %v6319_v59 }
 0x15b   : > { %v951_v39 = vadd.f32 1e-05, %v927_v10  ;;  %v6293_v14 = vsub.f32 %v6164_v11, %v798_v13 }
 0x15c   : > { %v762_v18 = vpop.xlane.xlu1 %761  ;;  %v862_v20 = vpop.xlane.xlu0 %861 }
 0x15d   : > { %5418 = vrsqrt.f32 %v951_v39  ;;  %v799_v21 = vmul.f32 0.015625, %v762_v18  ;;  %v928_v52 = vmul.f32 0.015625, %v862_v20  ;;  %v846_v23 = vmul.f32 %v6293_v14, %v6293_v14 }
 0x15f   : > { %v6301_v24 = vsub.f32 %v6177_v19, %v799_v21  ;;  %v952_v25 = vadd.f32 1e-05, %v928_v52  ;;  %v902_v27 = vsel %vm708_vm2, %v846_v23, 0.0 }
 0x160   : > { %v865_v11 = vpop.xlane.xlu1 %864  ;;  %903 = vadd.xlane.f32.xlu0 %v902_v27  ;;  %v765_v30 = vpop.xlane.xlu0 %764 }
 0x161   : > { %5420 = vrsqrt.f32 %v952_v25  ;;  %v929_v41 = vmul.f32 0.015625, %v865_v11  ;;  %v800_v32 = vmul.f32 0.015625, %v765_v30  ;;  %v847_v55 = vmul.f32 %v6301_v24, %v6301_v24 }
 0x163   : > { %v5417_v40 = vpop.eup %5416  ;;  %v953_v42 = vadd.f32 1e-05, %v929_v41  ;;  %v6311_v19 = vsub.f32 %v6186_v28, %v800_v32  ;;  %v905_v46 = vsel %vm708_vm2, %v847_v55, 0.0 }
 0x164   : > { %906 = vadd.xlane.f32.xlu1 %v905_v46  ;;  %v768_v33 = vpop.xlane.xlu1 %767  ;;  %v868_v53 = vpop.xlane.xlu0 %867  ;;  %v998_v48 = vmul.f32 %v5417_v40, %v6157_v5 }
 0x165   : > { %5422 = vrsqrt.f32 %v953_v42  ;;  %v801_v56 = vmul.f32 0.015625, %v768_v33  ;;  %v930_v58 = vmul.f32 0.015625, %v868_v53  ;;  %v848_v28 = vmul.f32 %v6311_v19, %v6311_v19 }
 0x166   : > { %v1026_v2 = vmul.f32 %v6316_v50, %v998_v48 }
 0x167   : > { %v5419_v60 = vpop.eup %5418  ;;  %v6324_v61 = vsub.f32 %v6196_v35, %v801_v56  ;;  %v954_v57 = vadd.f32 1e-05, %v930_v58  ;;  %v908_v63 = vsel %vm708_vm2, %v848_v28, 0.0 }
 0x168   : > { %v871_v5 = vpop.xlane.xlu1 %870  ;;  %909 = vadd.xlane.f32.xlu0 %v908_v63  ;;  %v771_v0 = vpop.xlane.xlu0 %770  ;;  %v999_v36 = vmul.f32 %v5419_v60, %v6166_v12  ;;  %v1054_v23 = vadd.f32 %v6330_v4, %v1026_v2 }
 0x169   : > { %5424 = vrsqrt.f32 %v954_v57  ;;  %v931_v6 = vmul.f32 0.015625, %v871_v5  ;;  %v802_v10 = vmul.f32 0.015625, %v771_v0  ;;  %v849_v35 = vmul.f32 %v6324_v61, %v6324_v61 }
 0x16a   : > { %v1027_v13 = vmul.f32 %v6316_v50, %v999_v36 }
 0x16b   : > { %v5421_v39 = vpop.eup %5420  ;;  %v955_v18 = vadd.f32 1e-05, %v931_v6  ;;  %v6336_v20 = vsub.f32 %v6208_v49, %v802_v10  ;;  %v911_v12 = vsel %vm708_vm2, %v849_v35, 0.0 }
 0x16c   : > { %912 = vadd.xlane.f32.xlu1 %v911_v12  ;;  %v774_v21 = vpop.xlane.xlu1 %773  ;;  %v874_v52 = vpop.xlane.xlu0 %873  ;;  %v1055_v25 = vadd.f32 %v6330_v4, %v1027_v13  ;;  %v1000_v27 = vmul.f32 %v5421_v39, %v6160_v8 }
 0x16d   : > { %5426 = vrsqrt.f32 %v955_v18  ;;  %v803_v11 = vmul.f32 0.015625, %v774_v21  ;;  %v932_v30 = vmul.f32 0.015625, %v874_v52  ;;  %v850_v41 = vmul.f32 %v6336_v20, %v6336_v20 }
 0x16e   : > { %v1086_v32 = vpack.c.bf16 %v1055_v25, %v1054_v23  ;;  %v1028_v33 = vmul.f32 %v6316_v50, %v1000_v27 }
 0x16f   : > { %v5423_v49 = vpop.eup %5422  ;;  %v6345_v55 = vsub.f32 %v6216_v43, %v803_v11  ;;  %v956_v38 = vadd.f32 1e-05, %v932_v30  ;;  %v914_v40 = vsel %vm708_vm2, %v850_v41, 0.0 }
 0x170   : > { %v877_v42 = vpop.xlane.xlu1 %876  ;;  %4871 = vmatmul.mubr.msk.bf16.vlgmr.msra.gmra.mrb[0].mxu0 %vm708_vm2, %v1086_v32  ;;  %915 = vadd.xlane.f32.xlu0 %v914_v40  ;;  %v777_v46 = vpop.xlane.xlu0 %776  ;;  %v1001_v8 = vmul.f32 %v5423_v49, %v6171_v16  ;;  %v1056_v5 = vadd.f32 %v6330_v4, %v1028_v33 }
 0x171   : > { %5428 = vrsqrt.f32 %v956_v38  ;;  %v933_v53 = vmul.f32 0.015625, %v877_v42  ;;  %v804_v48 = vmul.f32 0.015625, %v777_v46  ;;  %v851_v56 = vmul.f32 %v6345_v55, %v6345_v55  ;;  %1228 = vmatprep.mubr.bf16.mxu0 %v7821_v62 }
 0x172   : > { %v1029_v43 = vmul.f32 %v6316_v50, %v1001_v8 }
 0x173   : > { %v5425_v58 = vpop.eup %5424  ;;  %v957_v28 = vadd.f32 1e-05, %v933_v53  ;;  %v6356_v60 = vsub.f32 %v6228_v3, %v804_v48  ;;  %v917_v57 = vsel %vm708_vm2, %v851_v56, 0.0 }
 0x174   : > { %918 = vadd.xlane.f32.xlu1 %v917_v57  ;;  %v780_v16 = vpop.xlane.xlu1 %779  ;;  %v880_v63 = vpop.xlane.xlu0 %879  ;;  %v1057_v0 = vadd.f32 %v6330_v4, %v1029_v43  ;;  %v1002_v36 = vmul.f32 %v5425_v58, %v6184_v26 }
 0x175   : > { %5430 = vrsqrt.f32 %v957_v28  ;;  %v805_v2 = vmul.f32 0.015625, %v780_v16  ;;  %v934_v6 = vmul.f32 0.015625, %v880_v63  ;;  %v852_v10 = vmul.f32 %v6356_v60, %v6356_v60 }
 0x176   : > { %v1087_v35 = vpack.c.bf16 %v1057_v0, %v1056_v5  ;;  %v1030_v52 = vmul.f32 %v6316_v50, %v1002_v36 }
 0x177   : > { %v5427_v3 = vpop.eup %5426  ;;  %v6365_v13 = vsub.f32 %v6241_v17, %v805_v2  ;;  %v958_v39 = vadd.f32 1e-05, %v934_v6  ;;  %v920_v18 = vsel %vm708_vm2, %v852_v10, 0.0 }
 0x178   : > { %v883_v12 = vpop.xlane.xlu1 %882  ;;  %4872 = vmatmul.mubr.msk.bf16.gmra.mrb[4].mxu0 %vm708_vm2, %v1087_v35  ;;  %921 = vadd.xlane.f32.xlu0 %v920_v18  ;;  %v886_v21 = vpop.xlane.xlu0 %885  ;;  %v1003_v26 = vmul.f32 %v5427_v3, %v6193_v34  ;;  %v1058_v38 = vadd.f32 %v6330_v4, %v1030_v52 }
 0x179   : > { %5432 = vrsqrt.f32 %v958_v39  ;;  %v935_v23 = vmul.f32 0.015625, %v883_v12  ;;  %v936_v25 = vmul.f32 0.015625, %v886_v21  ;;  %v853_v27 = vmul.f32 %v6365_v13, %v6365_v13  ;;  %1238 = vmatprep.mubr.bf16.mxu0 %v7821_v62 }
 0x17a   : > { %v1031_v17 = vmul.f32 %v6316_v50, %v1003_v26 }
 0x17b   : > { %v5429_v11 = vpop.eup %5428  ;;  %v959_v30 = vadd.f32 1e-05, %v935_v23  ;;  %v960_v41 = vadd.f32 1e-05, %v936_v25  ;;  %v923_v32 = vsel %vm708_vm2, %v853_v27, 0.0 }
 0x17c   : > { %924 = vadd.xlane.f32.xlu1 %v923_v32  ;;  %v889_v49 = vpop.xlane.xlu1 %888  ;;  %v892_v34 = vpop.xlane.xlu0 %891  ;;  %v1059_v40 = vadd.f32 %v6330_v4, %v1031_v17  ;;  %v1004_v42 = vmul.f32 %v5429_v11, %v6204_v47 }
 0x17d   : > { %5434 = vrsqrt.f32 %v959_v30  ;;  %v937_v46 = vmul.f32 0.015625, %v889_v49  ;;  %v938_v48 = vmul.f32 0.015625, %v892_v34 }
 0x17e   : > { %v1088_v8 = vpack.c.bf16 %v1059_v40, %v1058_v38  ;;  %5436 = vrsqrt.f32 %v960_v41  ;;  %v1032_v58 = vmul.f32 %v6316_v50, %v1004_v42 }
 0x17f   : > { %v5431_v33 = vpop.eup %5430  ;;  %v961_v53 = vadd.f32 1e-05, %v937_v46  ;;  %v962_v16 = vadd.f32 1e-05, %v938_v48 }
 0x180   : > { %v895_v56 = vpop.xlane.xlu1 %894  ;;  %4873 = vmatmul.mubr.msk.bf16.gmra.mrb[8].mxu0 %vm708_vm2, %v1088_v8  ;;  %v1005_v43 = vmul.f32 %v5431_v33, %v6213_v54  ;;  %v898_v5 = vpop.xlane.xlu0 %897  ;;  %v1060_v36 = vadd.f32 %v6330_v4, %v1032_v58 }
 0x181   : > { %5438 = vrsqrt.f32 %v961_v53  ;;  %v939_v28 = vmul.f32 0.015625, %v895_v56  ;;  %1248 = vmatprep.mubr.bf16.mxu0 %v7821_v62  ;;  %v940_v3 = vmul.f32 0.015625, %v898_v5 }
 0x182   : > { %v1033_v47 = vmul.f32 %v6316_v50, %v1005_v43 }
 0x183   : > { %v5433_v57 = vpop.eup %5432  ;;  %v963_v63 = vadd.f32 1e-05, %v939_v28 }
 0x184   : > { %v901_v0 = vpop.xlane.xlu1 %900  ;;  %v1061_v2 = vadd.f32 %v6330_v4, %v1033_v47  ;;  %v1006_v6 = vmul.f32 %v5433_v57, %v6224_v1  ;;  %v964_v1 = vadd.f32 1e-05, %v940_v3 }
 0x185   : > { %5440 = vrsqrt.f32 %v963_v63  ;;  %v941_v54 = vmul.f32 0.015625, %v901_v0 }
 0x186   : > { %v1089_v10 = vpack.c.bf16 %v1061_v2, %v1060_v36  ;;  %5442 = vrsqrt.f32 %v962_v16  ;;  %v1034_v18 = vmul.f32 %v6316_v50, %v1006_v6 }
 0x187   : > { %v5435_v35 = vpop.eup %5434  ;;  %v965_v21 = vadd.f32 1e-05, %v941_v54 }
 0x188   : > { %4874 = vmatmul.mubr.msk.bf16.gmra.mrb[12].mxu0 %vm708_vm2, %v1089_v10  ;;  %v1007_v39 = vmul.f32 %v5435_v35, %v6232_v7  ;;  %v5437_v12 = vpop.eup %5436  ;;  %v1062_v23 = vadd.f32 %v6330_v4, %v1034_v18 }
 0x189   : > { %1258 = vmatprep.mubr.bf16.mxu0 %v7821_v62  ;;  %v1008_v27 = vmul.f32 %v5437_v12, %v6239_v15  ;;  %5444 = vrsqrt.f32 %v965_v21 }
 0x18a   : > { %v1035_v26 = vmul.f32 %v6316_v50, %v1007_v39  ;;  %5446 = vrsqrt.f32 %v964_v1 }
 0x18b   : > { %v5439_v52 = vpop.eup %5438  ;;  %v1036_v41 = vmul.f32 %v6316_v50, %v1008_v27 }
 0x18c   : > { %v1063_v25 = vadd.f32 %v6330_v4, %v1035_v26  ;;  %v1009_v17 = vmul.f32 %v5439_v52, %v6247_v22 }
 0x18d   : > { %v1064_v15 = vadd.f32 %v6330_v4, %v1036_v41 }
 0x18e   : > { %v1090_v7 = vpack.c.bf16 %v1063_v25, %v1062_v23  ;;  %v1037_v11 = vmul.f32 %v6316_v50, %v1009_v17 }
 0x18f   : > { %v5441_v30 = vpop.eup %5440 }
 0x190   : > { %4875 = vmatmul.mubr.msk.bf16.gmra.mrb[16].mxu0 %vm708_vm2, %v1090_v7  ;;  %v5443_v32 = vpop.eup %5442  ;;  %v1065_v49 = vadd.f32 %v6330_v4, %v1037_v11  ;;  %v1011_v34 = vmul.f32 %v5441_v30, %v6262_v37 }
 0x191   : > { %1268 = vmatprep.mubr.bf16.mxu0 %v7821_v62  ;;  %v1010_v22 = vmul.f32 %v5443_v32, %v6256_v29 }
 0x192   : > { %v1091_v38 = vpack.c.bf16 %v1065_v49, %v1064_v15  ;;  %v1039_v40 = vmul.f32 %v6316_v50, %v1011_v34 }
 0x193   : > { %v5445_v42 = vpop.eup %5444  ;;  %v1038_v46 = vmul.f32 %v6316_v50, %v1010_v22 }
 0x194   : > { %v5447_v8 = vpop.eup %5446  ;;  %v1067_v33 = vadd.f32 %v6330_v4, %v1039_v40  ;;  %v1013_v53 = vmul.f32 %v5445_v42, %v6278_v51 }
 0x195   : > { %v1066_v37 = vadd.f32 %v6330_v4, %v1038_v46  ;;  %v1012_v48 = vmul.f32 %v5447_v8, %v6270_v44 }
 0x196   : > { %v1041_v56 = vmul.f32 %v6316_v50, %v1013_v53 }
 0x197   : > { %v1092_v29 = vpack.c.bf16 %v1067_v33, %v1066_v37  ;;  %v1040_v43 = vmul.f32 %v6316_v50, %v1012_v48 }
 0x198   : > { %4876 = vmatmul.mubr.msk.bf16.gmra.mrb[20].mxu0 %vm708_vm2, %v1091_v38  ;;  %v1069_v58 = vadd.f32 %v6330_v4, %v1041_v56 }
 0x199   : > { %1278 = vmatprep.mubr.bf16.mxu0 %v7821_v62  ;;  %v1068_v28 = vadd.f32 %v6330_v4, %v1040_v43 }
 0x19b   : > { %v1093_v47 = vpack.c.bf16 %v1069_v58, %v1068_v28 }
 0x1a0   : > { %4877 = vmatmul.mubr.msk.bf16.gmra.mrb[24].mxu0 %vm708_vm2, %v1092_v29 }
 0x1a1   : > { %1288 = vmatprep.mubr.bf16.mxu0 %v7821_v62 }
 0x1a8   : > { %4878 = vmatmul.mubr.msk.bf16.gmra.mrb[28].mxu0 %vm708_vm2, %v1093_v47 }
 0x1a9   : > { %1298 = vmatprep.mubr.bf16.mxu0 %v7821_v62 }
 0x1ed   : > { %v904_v51 = vpop.xlane.xlu0 %903 }
 0x1ee   : > { %v942_v44 = vmul.f32 0.015625, %v904_v51 }
 0x1f0   : > { %v966_v57 = vadd.f32 1e-05, %v942_v44 }
 0x1f1   : > { %v907_v16 = vpop.xlane.xlu1 %906 }
 0x1f2   : > { %5448 = vrsqrt.f32 %v966_v57  ;;  %v943_v63 = vmul.f32 0.015625, %v907_v16 }
 0x1f4   : > { %v967_v5 = vadd.f32 1e-05, %v943_v63 }
 0x1f5   : > { %v910_v0 = vpop.xlane.xlu0 %909 }
 0x1f6   : > { %5450 = vrsqrt.f32 %v967_v5  ;;  %v944_v36 = vmul.f32 0.015625, %v910_v0 }
 0x1f8   : > { %v968_v2 = vadd.f32 1e-05, %v944_v36 }
 0x1f9   : > { %v913_v6 = vpop.xlane.xlu1 %912 }
 0x1fa   : > { %5452 = vrsqrt.f32 %v968_v2  ;;  %v945_v54 = vmul.f32 0.015625, %v913_v6 }
 0x1fc   : > { %v5449_v10 = vpop.eup %5448  ;;  %v969_v35 = vadd.f32 1e-05, %v945_v54 }
 0x1fd   : > { %v916_v3 = vpop.xlane.xlu0 %915  ;;  %v1014_v39 = vmul.f32 %v5449_v10, %v6293_v14 }
 0x1fe   : > { %5454 = vrsqrt.f32 %v969_v35  ;;  %v946_v18 = vmul.f32 0.015625, %v916_v3 }
 0x1ff   : > { %v1042_v1 = vmul.f32 %v6316_v50, %v1014_v39 }
 0x200   : > { %v5451_v12 = vpop.eup %5450  ;;  %v970_v21 = vadd.f32 1e-05, %v946_v18 }
 0x201   : > { %v919_v26 = vpop.xlane.xlu1 %918  ;;  %v1015_v52 = vmul.f32 %v5451_v12, %v6301_v24  ;;  %v1070_v11 = vadd.f32 %v6330_v4, %v1042_v1 }
 0x202   : > { %5456 = vrsqrt.f32 %v970_v21  ;;  %v947_v23 = vmul.f32 0.015625, %v919_v26 }
 0x203   : > { %v1043_v25 = vmul.f32 %v6316_v50, %v1015_v52 }
 0x204   : > { %v5453_v27 = vpop.eup %5452  ;;  %v971_v17 = vadd.f32 1e-05, %v947_v23 }
 0x205   : > { %v922_v7 = vpop.xlane.xlu0 %921  ;;  %v1071_v14 = vadd.f32 %v6330_v4, %v1043_v25  ;;  %v1016_v30 = vmul.f32 %v5453_v27, %v6311_v19 }
 0x206   : > { %5458 = vrsqrt.f32 %v971_v17  ;;  %v948_v41 = vmul.f32 0.015625, %v922_v7 }
 0x207   : > { %v1094_v32 = vpack.c.bf16 %v1071_v14, %v1070_v11  ;;  %v1044_v22 = vmul.f32 %v6316_v50, %v1016_v30 }
 0x208   : > { %v5455_v49 = vpop.eup %5454  ;;  %v972_v24 = vadd.f32 1e-05, %v948_v41 }
 0x209   : > { %v925_v34 = vpop.xlane.xlu1 %924  ;;  %4879 = vmatmul.mubr.msk.bf16.gmra.mrb[32].mxu0 %vm708_vm2, %v1094_v32  ;;  %v1017_v15 = vmul.f32 %v5455_v49, %v6324_v61  ;;  %v1072_v19 = vadd.f32 %v6330_v4, %v1044_v22 }
 0x20a   : > { %5460 = vrsqrt.f32 %v972_v24  ;;  %v949_v38 = vmul.f32 0.015625, %v925_v34 }
 0x20b   : > { %v1045_v40 = vmul.f32 %v6316_v50, %v1017_v15 }
 0x20c   : > { %v5457_v42 = vpop.eup %5456  ;;  %v973_v46 = vadd.f32 1e-05, %v949_v38 }
 0x20d   : > { %v1073_v8 = vadd.f32 %v6330_v4, %v1045_v40  ;;  %v1018_v33 = vmul.f32 %v5457_v42, %v6336_v20 }
 0x20e   : > { %5462 = vrsqrt.f32 %v973_v46 }
 0x20f   : > { %v1095_v53 = vpack.c.bf16 %v1073_v8, %v1072_v19  ;;  %v1046_v48 = vmul.f32 %v6316_v50, %v1018_v33 }
 0x210   : > { %v5459_v37 = vpop.eup %5458 }
 0x211   : > { %4880 = vmatmul.mubr.msk.bf16.vlgmr.msra.gmra.mrb[0].mxu1 %vm708_vm2, %v1095_v53  ;;  %v1019_v61 = vmul.f32 %v5459_v37, %v6345_v55  ;;  %v1074_v43 = vadd.f32 %v6330_v4, %v1046_v48 }
 0x212   : > { %1318 = vmatprep.mubr.bf16.mxu1 %v7821_v62 }
 0x213   : > { %v1047_v29 = vmul.f32 %v6316_v50, %v1019_v61 }
 0x214   : > { %v5461_v56 = vpop.eup %5460 }
 0x215   : > { %v1075_v58 = vadd.f32 %v6330_v4, %v1047_v29  ;;  %v1020_v20 = vmul.f32 %v5461_v56, %v6356_v60  ;;  %v1098_v60 = vld [vmem:[%s5957_s3] sm:$0x3]  ;;  %s5842_s3 = smov 64  }
 0x216   : > { %v6452_v5 = vrot.slane %v1098_v60, %v6305_v31 }
 0x217   : > { %v1096_v28 = vpack.c.bf16 %v1075_v58, %v1074_v43  ;;  %v1048_v51 = vmul.f32 %v6316_v50, %v1020_v20 }
 0x218   : > { %v5463_v47 = vpop.eup %5462 }
 0x219   : > { %4881 = vmatmul.mubr.msk.bf16.gmra.mrb[4].mxu1 %vm708_vm2, %v1096_v28  ;;  %v1021_v55 = vmul.f32 %v5463_v47, %v6365_v13  ;;  %v1076_v57 = vadd.f32 %v6330_v4, %v1048_v51  ;;  %v6455_v13 = vrot.slane %v1098_v60, %v6319_v59 }
 0x21a   : > { %1328 = vmatprep.mubr.bf16.mxu1 %v7821_v62 }
 0x21b   : > { %v1049_v44 = vmul.f32 %v6316_v50, %v1021_v55 }
 0x21d   : > { %v1077_v16 = vadd.f32 %v6330_v4, %v1049_v44 }
 0x21f   : > { %v1097_v63 = vpack.c.bf16 %v1077_v16, %v1076_v57 }
 0x221   : > { %4882 = vmatmul.mubr.msk.bf16.gmra.mrb[8].mxu1 %vm708_vm2, %v1097_v63 }
 0x243   : > { %v1220_v0 = vpop.f32.mrb[0].mxu0 }
 0x244   : > { %v1222_v36 = vpop.f32.mrb[1].mxu0  ;;  %v1221_v6 = vadd.f32 %v1220_v0, %v6452_v5 }
 0x245   : > { %v1224_v2 = vpop.f32.mrb[2].mxu0  ;;  %v1223_v4 = vadd.f32 %v1222_v36, %v6455_v13 }
 0x246   : > { %v1225_v50 = vadd.f32 %v1224_v2, %v6452_v5  ;;  %v1226_v54 = vpop.f32.mrb[3].mxu0 }
 0x247   : > { %v1227_v10 = vadd.f32 %v1226_v54, %v6455_v13 }
 0x248   : > { %v1355_v35 = vpack.c.bf16 %v1225_v50, %v1221_v6 }
 0x249   : > { %v6461_v3 = vpack.c.bf16 %v1227_v10, %v1223_v4 }
 0x24a   : > { %1373 = vrot.lane.b32.xlu0 %v1355_v35, %s5842_s3  ;;  %5159 = vmatprep.mubr.msk.bf16.mxu1 %vm708_vm2, %v1355_v35 }
 0x24b   : > { %v1230_v39 = vpop.f32.mrb[4].mxu0 }
 0x24c   : > { %v1231_v18 = vadd.f32 %v1230_v39, %v6452_v5  ;;  %v6466_v12 = vpop.f32.mrb[5].mxu0 }
 0x24d   : > { %v1234_v21 = vpop.f32.mrb[6].mxu0 }
 0x24e   : > { %v6468_v26 = vpack.c.bf16 %v1231_v18, %v1231_v18  ;;  %v1236_v52 = vpop.f32.mrb[7].mxu0  ;;  %v1235_v23 = vadd.f32 %v1234_v21, %v6452_v5 }
 0x24f   : > { %v1237_v17 = vadd.f32 %v1236_v52, %v6455_v13 }
 0x250   : > { %1375 = vrot.lane.b32.xlu1 %v6468_v26, %s5842_s3 }
 0x253   : > { %v1240_v1 = vpop.f32.mrb[8].mxu0 }
 0x254   : > { %v1241_v25 = vadd.f32 %v1240_v1, %v6452_v5  ;;  %v1242_v27 = vpop.f32.mrb[9].mxu0 }
 0x255   : > { %v1243_v7 = vadd.f32 %v1242_v27, %v6455_v13  ;;  %v1244_v11 = vpop.f32.mrb[10].mxu0 }
 0x256   : > { %v6476_v14 = vpack.c.bf16 %v1241_v25, %v1235_v23  ;;  %v1245_v30 = vadd.f32 %v1244_v11, %v6452_v5  ;;  %v6479_v41 = vpop.f32.mrb[11].mxu0 }
 0x257   : > { %v6481_v32 = vpack.c.bf16 %v1243_v7, %v1237_v17 }
 0x258   : > { %1439 = vrot.lane.b32.xlu1 %v6476_v14, %s5842_s3  ;;  %v6485_v49 = vpack.c.bf16 %v1245_v30, %v1245_v30 }
 0x25b   : > { %v1250_v24 = vpop.f32.mrb[12].mxu0 }
 0x25c   : > { %1441 = vrot.lane.b32.xlu1 %v6485_v49, %s5842_s3  ;;  %v1252_v34 = vpop.f32.mrb[13].mxu0  ;;  %v1251_v22 = vadd.f32 %v1250_v24, %v6452_v5 }
 0x25d   : > { %v1254_v15 = vpop.f32.mrb[14].mxu0  ;;  %v1253_v42 = vadd.f32 %v1252_v34, %v6455_v13 }
 0x25e   : > { %v1255_v38 = vadd.f32 %v1254_v15, %v6452_v5  ;;  %v1256_v40 = vpop.f32.mrb[15].mxu0 }
 0x25f   : > { %v1257_v46 = vadd.f32 %v1256_v40, %v6455_v13 }
 0x260   : > { %v6493_v19 = vpack.c.bf16 %v1255_v38, %v1251_v22 }
 0x261   : > { %v6495_v8 = vpack.c.bf16 %v1257_v46, %v1253_v42 }
 0x262   : > { %1505 = vrot.lane.b32.xlu0 %v6493_v19, %s5842_s3 }
 0x263   : > { %v1260_v33 = vpop.f32.mrb[16].mxu0 }
 0x264   : > { %v1261_v53 = vadd.f32 %v1260_v33, %v6452_v5  ;;  %v6500_v37 = vpop.f32.mrb[17].mxu0 }
 0x265   : > { %v1264_v61 = vpop.f32.mrb[18].mxu0 }
 0x266   : > { %v6502_v48 = vpack.c.bf16 %v1261_v53, %v1261_v53  ;;  %v1266_v29 = vpop.f32.mrb[19].mxu0  ;;  %v1265_v43 = vadd.f32 %v1264_v61, %v6452_v5 }
 0x267   : > { %v1267_v28 = vadd.f32 %v1266_v29, %v6455_v13 }
 0x268   : > { %1507 = vrot.lane.b32.xlu1 %v6502_v48, %s5842_s3 }
 0x26b   : > { %v1270_v56 = vpop.f32.mrb[20].mxu0 }
 0x26c   : > { %v1271_v58 = vadd.f32 %v1270_v56, %v6452_v5  ;;  %v1272_v20 = vpop.f32.mrb[21].mxu0 }
 0x26d   : > { %v1273_v47 = vadd.f32 %v1272_v20, %v6455_v13  ;;  %v1274_v55 = vpop.f32.mrb[22].mxu0 }
 0x26e   : > { %v6510_v51 = vpack.c.bf16 %v1271_v58, %v1265_v43  ;;  %v1275_v44 = vadd.f32 %v1274_v55, %v6452_v5  ;;  %v6513_v57 = vpop.f32.mrb[23].mxu0 }
 0x26f   : > { %v6515_v16 = vpack.c.bf16 %v1273_v47, %v1267_v28 }
 0x270   : > { %v6517_v63 = vpack.c.bf16 %v1275_v44, %v1275_v44  ;;  %1571 = vrot.lane.b32.xlu0 %v6510_v51, %s5842_s3 }
 0x272   : > { %1573 = vrot.lane.b32.xlu1 %v6517_v63, %s5842_s3 }
 0x273   : > { %v1280_v60 = vpop.f32.mrb[24].mxu0 }
 0x274   : > { %v1282_v0 = vpop.f32.mrb[25].mxu0  ;;  %v1281_v2 = vadd.f32 %v1280_v60, %v6452_v5 }
 0x275   : > { %v1284_v36 = vpop.f32.mrb[26].mxu0  ;;  %v1283_v54 = vadd.f32 %v1282_v0, %v6455_v13 }
 0x276   : > { %v1285_v6 = vadd.f32 %v1284_v36, %v6452_v5  ;;  %v1286_v50 = vpop.f32.mrb[27].mxu0 }
 0x277   : > { %v1287_v4 = vadd.f32 %v1286_v50, %v6455_v13 }
 0x278   : > { %v6527_v10 = vpack.c.bf16 %v1285_v6, %v1281_v2 }
 0x279   : > { %v6529_v35 = vpack.c.bf16 %v1287_v4, %v1283_v54 }
 0x27a   : > { %1637 = vrot.lane.b32.xlu0 %v6527_v10, %s5842_s3 }
 0x27b   : > { %v1290_v39 = vpop.f32.mrb[28].mxu0 }
 0x27c   : > { %v1291_v18 = vadd.f32 %v1290_v39, %v6452_v5  ;;  %v6534_v21 = vpop.f32.mrb[29].mxu0 }
 0x27d   : > { %v1294_v52 = vpop.f32.mrb[30].mxu0 }
 0x27e   : > { %v6536_v1 = vpack.c.bf16 %v1291_v18, %v1291_v18  ;;  %v1296_v23 = vpop.f32.mrb[31].mxu0  ;;  %v1295_v38 = vadd.f32 %v1294_v52, %v6452_v5 }
 0x280   : > { %1639 = vrot.lane.b32.xlu1 %v6536_v1, %s5842_s3 }
 0x2bc   : > { %v1374_v25 = vpop.permute.xlu0 %1373 }
 0x2bd   : > { %5335 = vmatprep.subr.msk.bf16.mxu1 %vm708_vm2, %v1374_v25  ;;  %v1384_v27 = vsel %vm708_vm2, %v1374_v25, 0 }
 0x2be   : > { %5156 = vmatpush3.bf16.xpose.msra.mxu1 %v1384_v27 }
 0x2c2   : > { %v1376_v17 = vpop.permute.xlu1 %1375 }
 0x2c3   : > { %5336 = vmatprep.subr.msk.bf16.mxu1 %vm708_vm2, %v1376_v17  ;;  %v1387_v7 = vsel %vm708_vm2, %v1376_v17, 0 }
 0x2c6   : > { %5158 = vmatpush3.bf16.xpose.msra.mxu1 %v1387_v7 }
 0x2ca   : > { %v1440_v11 = vpop.permute.xlu1 %1439 }
 0x2cb   : > { %5337 = vmatprep.subr.msk.bf16.mxu1 %vm708_vm2, %v1440_v11  ;;  %v1450_v30 = vsel %vm708_vm2, %v1440_v11, 0 }
 0x2cd   : > { %5160 = vmatmul.mubr.msk.bf16.vlgmr.msra.gmra.mrb[12].mxu1 %vm708_vm2, %v6468_v26 }
 0x2ce   : > { %v1442_v24 = vpop.permute.xlu1 %1441  ;;  %5164 = vmatpush3.bf16.xpose.msra.mxu1 %v1450_v30  ;;  %5167 = vmatprep.mubr.msk.bf16.mxu1 %vm708_vm2, %v6476_v14  ;;  %v1297_v14 = vadd.f32 %v1296_v23, %v6455_v13 }
 0x2cf   : > { %5338 = vmatprep.subr.msk.bf16.mxu1 %vm708_vm2, %v1442_v24  ;;  %v1453_v34 = vsel %vm708_vm2, %v1442_v24, 0 }
 0x2d4   : > { %v1506_v15 = vpop.permute.xlu0 %1505 }
 0x2d5   : > { %v1516_v42 = vsel %vm708_vm2, %v1506_v15, 0 }
 0x2d6   : > { %5166 = vmatpush3.bf16.xpose.msra.mxu1 %v1453_v34 }
 0x2d7   : > { %5339 = vmatprep.subr.msk.bf16.mxu1 %vm708_vm2, %v1506_v15 }
 0x2da   : > { %v1508_v46 = vpop.permute.xlu1 %1507 }
 0x2db   : > { %v1519_v20 = vsel %vm708_vm2, %v1508_v46, 0 }
 0x2dc   : > { %v1300_v22 = vpop.f32.mrb[32].mxu0 }
 0x2dd   : > { %v1301_v26 = vadd.f32 %v1300_v22, %v6452_v5  ;;  %v1302_v40 = vpop.f32.mrb[33].mxu0  ;;  %5168 = vmatmul.mubr.msk.bf16.vlgmr.msra.gmra.mrb[16].mxu1 %vm708_vm2, %v6485_v49 }
 0x2de   : > { %v1303_v33 = vadd.f32 %v1302_v40, %v6455_v13  ;;  %v1304_v53 = vpop.f32.mrb[34].mxu0  ;;  %5172 = vmatpush3.bf16.xpose.msra.mxu1 %v1516_v42  ;;  %5175 = vmatprep.mubr.msk.bf16.mxu1 %vm708_vm2, %v6493_v19 }
 0x2df   : > { %v6562_v61 = vpack.c.bf16 %v1301_v26, %v1295_v38  ;;  %v1305_v29 = vadd.f32 %v1304_v53, %v6452_v5  ;;  %v6565_v56 = vpop.f32.mrb[35].mxu0  ;;  %5340 = vmatprep.subr.msk.bf16.mxu1 %vm708_vm2, %v1508_v46 }
 0x2e0   : > { %v6568_v49 = vpack.c.bf16 %v1303_v33, %v1297_v14 }
 0x2e1   : > { %v6570_v43 = vpack.c.bf16 %v1305_v29, %v1305_v29  ;;  %1703 = vrot.lane.b32.xlu0 %v6562_v61, %s5842_s3 }
 0x2e2   : > { %v1572_v28 = vpop.permute.xlu0 %1571 }
 0x2e3   : > { %1705 = vrot.lane.b32.xlu1 %v6570_v43, %s5842_s3  ;;  %v1582_v39 = vsel %vm708_vm2, %v1572_v28, 0 }
 0x2e4   : > { %v1310_v58 = vpop.f32.mrb[0].mxu1  ;;  %v1574_v18 = vpop.permute.xlu1 %1573 }
 0x2e5   : > { %v1312_v19 = vpop.f32.mrb[1].mxu1  ;;  %v1311_v55 = vadd.f32 %v1310_v58, %v6452_v5  ;;  %v1585_v11 = vsel %vm708_vm2, %v1574_v18, 0  ;;  %v1233_v58 = vadd.f32 %v6466_v12, %v6455_v13 }
 0x2e6   : > { %v1314_v47 = vpop.f32.mrb[2].mxu1  ;;  %5174 = vmatpush3.bf16.xpose.msra.mxu1 %v1519_v20  ;;  %v1313_v0 = vadd.f32 %v1312_v19, %v6455_v13 }
 0x2e7   : > { %v1315_v44 = vadd.f32 %v1314_v47, %v6452_v5  ;;  %v1316_v60 = vpop.f32.mrb[3].mxu1  ;;  %5341 = vmatprep.subr.msk.bf16.mxu1 %vm708_vm2, %v1572_v28 }
 0x2e8   : > { %v1317_v36 = vadd.f32 %v1316_v60, %v6455_v13  ;;  %v1342_v60 = vadd.s32 16, %v6296_v45 }
 0x2e9   : > { %v1367_v2 = vpack.c.bf16 %v1315_v44, %v1311_v55  ;;  %v1247_v55 = vadd.f32 %v6479_v41, %v6455_v13 }
 0x2ea   : > { %v6582_v6 = vpack.c.bf16 %v1317_v36, %v1313_v0  ;;  %v1344_v0 = vand.u32 127, %v1022_v9  ;;  %v1341_v36 = vadd.s32 8, %v6296_v45 }
 0x2eb   : > { %1769 = vrot.lane.b32.xlu0 %v1367_v2, %s5842_s3  ;;  %5207 = vmatprep.mubr.msk.bf16.mxu0 %vm708_vm2, %v1367_v2  ;;  %v2231_v44 = vpack.c.bf16 %v1247_v55, %v1247_v55 }
 0x2ec   : > { %v1320_v50 = vpop.f32.mrb[4].mxu1  ;;  %v1638_v30 = vpop.permute.xlu0 %1637  ;;  %vm1345_vm4 = vcmp.lt.s32.totalorder %v1344_v0, 18  ;;  %vm1348_vm5 = vcmp.le.s32.totalorder %v1344_v0, %v1342_v60  ;;  %vm1346_vm6 = vcmp.le.s32.totalorder %v1344_v0, %v6296_v45  ;;  %vm1347_vm8 = vcmp.le.s32.totalorder %v1344_v0, %v1341_v36 }
 0x2ed   : > { %v1321_v54 = vadd.f32 %v1320_v50, %v6452_v5  ;;  %v6587_v4 = vpop.f32.mrb[5].mxu1  ;;  %5176 = vmatmul.mubr.msk.bf16.vlgmr.msra.gmra.mrb[20].mxu1 %vm708_vm2, %v6502_v48  ;;  %v1648_v42 = vsel %vm708_vm2, %v1638_v30, 0  ;;  %vm1351_vm7 = vmand %vm1345_vm4, %vm1348_vm5  ;;  %vm4707_vm5 = vcmask (!%p4969_p5), 261120  }
 0x2ee   : > { %v1324_v52 = vpop.f32.mrb[6].mxu1  ;;  %5180 = vmatpush3.bf16.xpose.msra.mxu1 %v1582_v39  ;;  %5183 = vmatprep.mubr.msk.bf16.mxu1 %vm708_vm2, %v6510_v51  ;;  %vm1349_vm9 = vmand %vm1345_vm4, %vm1346_vm6 }
 0x2ef   : > { %v1368_v23 = vpack.c.bf16 %v1321_v54, %v1321_v54  ;;  %v1326_v25 = vpop.f32.mrb[7].mxu1  ;;  %5342 = vmatprep.subr.msk.bf16.mxu1 %vm708_vm2, %v1574_v18  ;;  %v1325_v17 = vadd.f32 %v1324_v52, %v6452_v5  ;;  %vm1350_vm10 = vmand %vm1345_vm4, %vm1347_vm8  ;;  %vm5845_vm4 = vmmov (!%p4969_p5), 0  }
 0x2f0   : > { %v1327_v24 = vadd.f32 %v1326_v25, %v6455_v13 }
 0x2f1   : > { %1771 = vrot.lane.b32.xlu1 %v1368_v23, %s5842_s3 }
 0x2f2   : > { %v1640_v14 = vpop.permute.xlu1 %1639 }
 0x2f4   : > { %v1330_v27 = vpop.f32.mrb[8].mxu1 }
 0x2f5   : > { %v1331_v7 = vadd.f32 %v1330_v27, %v6452_v5  ;;  %v1332_v48 = vpop.f32.mrb[9].mxu1 }
 0x2f6   : > { %v1333_v34 = vadd.f32 %v1332_v48, %v6455_v13  ;;  %v1334_v51 = vpop.f32.mrb[10].mxu1  ;;  %5182 = vmatpush3.bf16.xpose.msra.mxu1 %v1585_v11 }
 0x2f7   : > { %v1369_v15 = vpack.c.bf16 %v1331_v7, %v1325_v17  ;;  %v1335_v22 = vadd.f32 %v1334_v51, %v6452_v5  ;;  %v6602_v38 = vpop.f32.mrb[11].mxu1  ;;  %5343 = vmatprep.subr.msk.bf16.mxu1 %vm708_vm2, %v1638_v30  ;;  %v1651_v5 = vsel %vm708_vm2, %v1640_v14, 0 }
 0x2f8   : > { %v6605_v26 = vpack.c.bf16 %v1333_v34, %v1327_v24 }
 0x2f9   : > { %v1370_v40 = vpack.c.bf16 %v1335_v22, %v1335_v22  ;;  %1835 = vrot.lane.b32.xlu0 %v1369_v15, %s5842_s3 }
 0x2fb   : > { %1837 = vrot.lane.b32.xlu1 %v1370_v40, %s5842_s3 }
 0x2fd   : > { %5184 = vmatmul.mubr.msk.bf16.vlgmr.msra.gmra.mrb[24].mxu1 %vm708_vm2, %v6517_v63 }
 0x2fe   : > { %5188 = vmatpush3.bf16.xpose.msra.mxu1 %v1648_v42  ;;  %5191 = vmatprep.mubr.msk.bf16.mxu1 %vm708_vm2, %v6527_v10 }
 0x2ff   : > { %5344 = vmatprep.subr.msk.bf16.mxu1 %vm708_vm2, %v1640_v14 }
 0x306   : > { %5190 = vmatpush3.bf16.xpose.msra.mxu1 %v1651_v5 }
 0x30d   : > { %5192 = vmatmul.mubr.msk.bf16.vlgmr.msra.gmra.mrb[28].mxu1 %vm708_vm2, %v6536_v1 }
 0x30e   : > { %5199 = vmatprep.mubr.msk.bf16.mxu1 %vm708_vm2, %v6562_v61 }
 0x353   : > { %v1704_v46 = vpop.permute.xlu0 %1703 }
 0x354   : > { %5345 = vmatprep.subr.msk.bf16.mxu1 %vm708_vm2, %v1704_v46  ;;  %v1714_v63 = vsel %vm708_vm2, %v1704_v46, 0 }
 0x355   : > { %v1706_v33 = vpop.permute.xlu1 %1705  ;;  %5196 = vmatpush3.bf16.xpose.msra.mxu1 %v1714_v63 }
 0x356   : > { %5346 = vmatprep.subr.msk.bf16.mxu1 %vm708_vm2, %v1706_v33  ;;  %v1717_v10 = vsel %vm708_vm2, %v1706_v33, 0 }
 0x35d   : > { %5198 = vmatpush3.bf16.xpose.msra.mxu1 %v1717_v10  ;;  %v1770_v53 = vpop.permute.xlu0 %1769 }
 0x35e   : > { %5347 = vmatprep.subr.msk.bf16.mxu0 %vm708_vm2, %v1770_v53  ;;  %v1780_v1 = vsel %vm708_vm2, %v1770_v53, 0 }
 0x35f   : > { %5204 = vmatpush3.bf16.xpose.msra.mxu0 %v1780_v1 }
 0x363   : > { %v1772_v29 = vpop.permute.xlu1 %1771 }
 0x364   : > { %5200 = vmatmul.mubr.msk.bf16.vlgmr.msra.gmra.mrb[32].mxu1 %vm708_vm2, %v6570_v43  ;;  %5348 = vmatprep.subr.msk.bf16.mxu0 %vm708_vm2, %v1772_v29  ;;  %v1783_v61 = vsel %vm708_vm2, %v1772_v29, 0  ;;  %v2229_v43 = vpack.c.bf16 %v1233_v58, %v1233_v58 }
 0x365   : > { %5215 = vmatprep.mubr.msk.bf16.mxu1 %vm708_vm2, %v1369_v15 }
 0x366   : > { %v2252_v47 = vsel %vm2250_vm3, %v2229_v43, 0 }
 0x367   : > { %5206 = vmatpush3.bf16.xpose.msra.mxu0 %v1783_v61 }
 0x368   : > { %5219 = vmatprep.subr.bf16.mxu0 %v6461_v3 }
 0x36b   : > { %v1836_v19 = vpop.permute.xlu0 %1835 }
 0x36c   : > { %5349 = vmatprep.subr.msk.bf16.mxu1 %vm708_vm2, %v1836_v19  ;;  %v1846_v20 = vsel %vm708_vm2, %v1836_v19, 0 }
 0x36d   : > { %v1838_v28 = vpop.permute.xlu1 %1837  ;;  %5212 = vmatpush3.bf16.xpose.msra.mxu1 %v1846_v20 }
 0x36e   : > { %5208 = vmatmul.mubr.msk.bf16.vlgmr.msra.gmra.mrb[36].mxu0 %vm708_vm2, %v1368_v23  ;;  %5350 = vmatprep.subr.msk.bf16.mxu1 %vm708_vm2, %v1838_v28  ;;  %v1849_v12 = vsel %vm708_vm2, %v1838_v28, 0 }
 0x36f   : > { %5220 = vmatpush3.bf16.msra.mxu0 %v6461_v3  ;;  %v2309_v3 = vsel %vm2250_vm3, %v2231_v44, 0 }
 0x370   : > { %5351 = vmatprep.subr.msk.bf16.mxu0 %vm2250_vm3, %v2229_v43 }
 0x373   : > { %5222 = vmatpush3.bf16.msra.mxu0 %v2252_v47 }
 0x374   : > { %5235 = vmatprep.subr.bf16.mxu0 %v6495_v8 }
 0x375   : > { %5214 = vmatpush3.bf16.xpose.msra.mxu1 %v1849_v12 }
 0x376   : > { %5227 = vmatprep.subr.bf16.mxu1 %v6481_v32 }
 0x37c   : > { %5216 = vmatmul.mubr.msk.bf16.vlgmr.msra.gmra.mrb[36].mxu1 %vm708_vm2, %v1370_v40 }
 0x37d   : > { %5228 = vmatpush3.bf16.msra.mxu1 %v6481_v32  ;;  %v5843_v32 = vmov -1e+30  }
 0x37e   : > { %5352 = vmatprep.subr.msk.bf16.mxu1 %vm2250_vm3, %v2231_v44  ;;  %v6655_v2 = vsel %vm1351_vm7, 0.0, %v5843_v32  ;;  %v6657_v9 = vsel %vm1349_vm9, 0.0, %v5843_v32  ;;  %v6662_v25 = vsel %vm1350_vm10, 0.0, %v5843_v32 }
 0x381   : > { %5230 = vmatpush3.bf16.msra.mxu1 %v2309_v3 }
 0x382   : > { %5243 = vmatprep.subr.bf16.mxu1 %v6515_v16 }
 0x3a0   : > { %v5161_v41 = vpop.f32.mrb[12].mxu1 }
 0x3a1   : > { %v1901_v50 = vmul.f32 0.125, %v5161_v41  ;;  %v1423_v54 = vpop.f32.mrb[13].mxu1 }
 0x3a2   : > { %v1899_v39 = vmul.f32 0.125, %v1423_v54  ;;  %v5162_v18 = vpop.f32.mrb[14].mxu1 }
 0x3a3   : > { %v1426_v52 = vpop.f32.mrb[15].mxu1  ;;  %v6660_v23 = vadd.f32 %v1901_v50, %v6655_v2 }
 0x3a4   : > { %v1900_v27 = vmul.f32 0.125, %v1426_v52  ;;  %v6667_v7 = vadd.f32 %v1899_v39, %v6657_v9 }
 0x3a5   : > { %v1954_v17 = vsel %vm1947_vm11, %v6660_v23, -inf }
 0x3a6   : > { %1955 = vmax.xlane.f32.xlu0 %v1954_v17  ;;  %v6670_v48 = vadd.f32 %v1900_v27, %v6662_v25  ;;  %v1948_v30 = vsel %vm1947_vm11, %v6667_v7, -inf }
 0x3a8   : > { %v1951_v11 = vsel %vm1947_vm11, %v6670_v48, -inf }
 0x3a9   : > { %1952 = vmax.xlane.f32.xlu1 %v1951_v11 }
 0x3aa   : > { %1949 = vmax.xlane.f32.xlu0 %v1948_v30 }
 0x3b0   : > { %v5169_v24 = vpop.f32.mrb[16].mxu1 }
 0x3b1   : > { %v1904_v34 = vmul.f32 0.125, %v5169_v24  ;;  %v1489_v51 = vpop.f32.mrb[17].mxu1 }
 0x3b2   : > { %v1902_v15 = vmul.f32 0.125, %v1489_v51  ;;  %v5170_v22 = vpop.f32.mrb[18].mxu1 }
 0x3b3   : > { %v1492_v40 = vpop.f32.mrb[19].mxu1  ;;  %v6677_v42 = vadd.f32 %v1904_v34, %v6655_v2 }
 0x3b4   : > { %v1903_v14 = vmul.f32 0.125, %v1492_v40  ;;  %v6680_v5 = vadd.f32 %v1902_v15, %v6657_v9 }
 0x3b5   : > { %v1963_v46 = vsel %vm1947_vm11, %v6677_v42, -inf }
 0x3b6   : > { %1964 = vmax.xlane.f32.xlu1 %v1963_v46  ;;  %v1957_v63 = vsel %vm1947_vm11, %v6680_v5, -inf  ;;  %v6687_v33 = vadd.f32 %v1903_v14, %v6662_v25 }
 0x3b7   : > { %1958 = vmax.xlane.f32.xlu0 %v1957_v63 }
 0x3b8   : > { %v1960_v10 = vsel %vm1947_vm11, %v6687_v33, -inf }
 0x3bb   : > { %1961 = vmax.xlane.f32.xlu0 %v1960_v10 }
 0x3c0   : > { %v5177_v53 = vpop.f32.mrb[20].mxu1 }
 0x3c1   : > { %v1555_v1 = vpop.f32.mrb[21].mxu1  ;;  %v1907_v29 = vmul.f32 0.125, %v5177_v53 }
 0x3c2   : > { %v1905_v61 = vmul.f32 0.125, %v1555_v1  ;;  %v5178_v58 = vpop.f32.mrb[22].mxu1 }
 0x3c3   : > { %v1558_v19 = vpop.f32.mrb[23].mxu1  ;;  %v6700_v12 = vadd.f32 %v1907_v29, %v6655_v2 }
 0x3c4   : > { %v1906_v20 = vmul.f32 0.125, %v1558_v19  ;;  %v6692_v28 = vadd.f32 %v1905_v61, %v6657_v9 }
 0x3c5   : > { %v1972_v44 = vsel %vm1947_vm11, %v6700_v12, -inf }
 0x3c6   : > { %v1966_v43 = vsel %vm1947_vm11, %v6692_v28, -inf  ;;  %v6697_v47 = vadd.f32 %v1906_v20, %v6662_v25 }
 0x3c7   : > { %1967 = vmax.xlane.f32.xlu0 %v1966_v43 }
 0x3c8   : > { %v1969_v55 = vsel %vm1947_vm11, %v6697_v47, -inf }
 0x3c9   : > { %1970 = vmax.xlane.f32.xlu1 %v1969_v55 }
 0x3cb   : > { %1973 = vmax.xlane.f32.xlu0 %v1972_v44 }
 0x3d0   : > { %v5185_v3 = vpop.f32.mrb[24].mxu1 }
 0x3d1   : > { %v1621_v60 = vpop.f32.mrb[25].mxu1  ;;  %v1910_v0 = vmul.f32 0.125, %v5185_v3 }
 0x3d2   : > { %v1908_v36 = vmul.f32 0.125, %v1621_v60  ;;  %v5186_v41 = vpop.f32.mrb[26].mxu1 }
 0x3d3   : > { %v1624_v32 = vpop.f32.mrb[27].mxu1  ;;  %v6715_v52 = vadd.f32 %v1910_v0, %v6655_v2 }
 0x3d4   : > { %v1909_v50 = vmul.f32 0.125, %v1624_v32  ;;  %v6707_v54 = vadd.f32 %v1908_v36, %v6657_v9 }
 0x3d5   : > { %v1981_v17 = vsel %vm1947_vm11, %v6715_v52, -inf }
 0x3d6   : > { %v1975_v39 = vsel %vm1947_vm11, %v6707_v54, -inf  ;;  %v6712_v18 = vadd.f32 %v1909_v50, %v6662_v25 }
 0x3d7   : > { %1976 = vmax.xlane.f32.xlu1 %v1975_v39 }
 0x3d8   : > { %v1978_v27 = vsel %vm1947_vm11, %v6712_v18, -inf }
 0x3d9   : > { %1979 = vmax.xlane.f32.xlu0 %v1978_v27 }
 0x3db   : > { %1982 = vmax.xlane.f32.xlu1 %v1981_v17 }
 0x3e0   : > { %v5193_v11 = vpop.f32.mrb[28].mxu1 }
 0x3e1   : > { %v1913_v30 = vmul.f32 0.125, %v5193_v11  ;;  %v1687_v24 = vpop.f32.mrb[29].mxu1 }
 0x3e2   : > { %v1911_v34 = vmul.f32 0.125, %v1687_v24  ;;  %v5194_v51 = vpop.f32.mrb[30].mxu1 }
 0x3e3   : > { %v1690_v15 = vpop.f32.mrb[31].mxu1  ;;  %v6722_v22 = vadd.f32 %v1913_v30, %v6655_v2 }
 0x3e4   : > { %v1912_v40 = vmul.f32 0.125, %v1690_v15  ;;  %v6727_v46 = vadd.f32 %v1911_v34, %v6657_v9 }
 0x3e5   : > { %v1990_v14 = vsel %vm1947_vm11, %v6722_v22, -inf }
 0x3e6   : > { %1991 = vmax.xlane.f32.xlu0 %v1990_v14  ;;  %v6730_v63 = vadd.f32 %v1912_v40, %v6662_v25  ;;  %v1984_v53 = vsel %vm1947_vm11, %v6727_v46, -inf }
 0x3e8   : > { %v1987_v10 = vsel %vm1947_vm11, %v6730_v63, -inf }
 0x3e9   : > { %1988 = vmax.xlane.f32.xlu1 %v1987_v10 }
 0x3ea   : > { %1985 = vmax.xlane.f32.xlu0 %v1984_v53 }
 0x433   : > { %v1956_v43 = vpop.xlane.xlu0 %1955 }
 0x434   : > { %v2022_v40 = vsub.f32 %v6660_v23, %v1956_v43 }
 0x436   : > { %v1953_v30 = vpop.xlane.xlu1 %1952 }
 0x437   : > { %v5201_v1 = vpop.f32.mrb[32].mxu1  ;;  %v1950_v41 = vpop.xlane.xlu0 %1949  ;;  %v2021_v14 = vsub.f32 %v6670_v48, %v1953_v30 }
 0x438   : > { %v1753_v29 = vpop.f32.mrb[33].mxu1  ;;  %v1916_v61 = vmul.f32 0.125, %v5201_v1 }
 0x439   : > { %v1914_v58 = vmul.f32 0.125, %v1753_v29  ;;  %v5202_v19 = vpop.f32.mrb[34].mxu1  ;;  %v2046_v23 = vmul.f32 1.442695, %v2021_v14 }
 0x43a   : > { %v1756_v20 = vpop.f32.mrb[35].mxu1  ;;  %v6745_v0 = vadd.f32 %v1916_v61, %v6655_v2  ;;  %v2048_v61 = vmul.f32 1.442695, %v2022_v40 }
 0x43b   : > { %v1915_v55 = vmul.f32 0.125, %v1756_v20  ;;  %v6737_v44 = vadd.f32 %v1914_v58, %v6657_v9  ;;  %v2020_v58 = vsub.f32 %v6667_v7, %v1950_v41 }
 0x43c   : > { %v1999_v50 = vsel %vm1947_vm11, %v6745_v0, -inf  ;;  %5464 = vpow2.f32 %v2048_v61 }
 0x43d   : > { %v1993_v3 = vsel %vm1947_vm11, %v6737_v44, -inf  ;;  %v6742_v60 = vadd.f32 %v1915_v55, %v6662_v25  ;;  %v2044_v55 = vmul.f32 1.442695, %v2020_v58  ;;  %5466 = vpow2.f32 %v2046_v23 }
 0x43e   : > { %1994 = vmax.xlane.f32.xlu1 %v1993_v3 }
 0x43f   : > { %v1996_v36 = vsel %vm1947_vm11, %v6742_v60, -inf  ;;  %5468 = vpow2.f32 %v2044_v55 }
 0x440   : > { %1997 = vmax.xlane.f32.xlu0 %v1996_v36 }
 0x441   : > { %v5209_v32 = vpop.f32.mrb[36].mxu0 }
 0x442   : > { %2000 = vmax.xlane.f32.xlu1 %v1999_v50  ;;  %v1819_v39 = vpop.f32.mrb[37].mxu0  ;;  %v1919_v27 = vmul.f32 0.125, %v5209_v32 }
 0x443   : > { %v1917_v17 = vmul.f32 0.125, %v1819_v39  ;;  %v5210_v11 = vpop.f32.mrb[38].mxu0  ;;  %v1965_v43 = vpop.xlane.xlu1 %1964 }
 0x444   : > { %v1822_v24 = vpop.f32.mrb[39].mxu0  ;;  %v1959_v51 = vpop.xlane.xlu0 %1958  ;;  %v6762_v1 = vadd.f32 %v1919_v27, %v6655_v2  ;;  %v2025_v36 = vsub.f32 %v6677_v42, %v1965_v43 }
 0x445   : > { %v1918_v34 = vmul.f32 0.125, %v1822_v24  ;;  %v6752_v15 = vadd.f32 %v1917_v17, %v6657_v9  ;;  %v2023_v48 = vsub.f32 %v6680_v5, %v1959_v51 }
 0x446   : > { %v2008_v20 = vsel %vm1947_vm11, %v6762_v1, -inf  ;;  %v2054_v30 = vmul.f32 1.442695, %v2025_v36  ;;  %v6787_v61 = vpop.eup %5464 }
 0x447   : > { %v2002_v10 = vsel %vm1947_vm11, %v6752_v15, -inf  ;;  %v6759_v53 = vadd.f32 %v1918_v34, %v6662_v25  ;;  %v2050_v32 = vmul.f32 1.442695, %v2023_v48  ;;  %v6791_v58 = vpop.eup %5466 }
 0x448   : > { %2003 = vmax.xlane.f32.xlu0 %v2002_v10  ;;  %v1962_v19 = vpop.xlane.xlu0 %1961 }
 0x449   : > { %v2005_v29 = vsel %vm1947_vm11, %v6759_v53, -inf  ;;  %v2024_v3 = vsub.f32 %v6687_v33, %v1962_v19  ;;  %5470 = vpow2.f32 %v2050_v32  ;;  %v6796_v19 = vpop.eup %5468 }
 0x44a   : > { %2006 = vmax.xlane.f32.xlu1 %v2005_v29 }
 0x44b   : > { %v2052_v5 = vmul.f32 1.442695, %v2024_v3 }
 0x44c   : > { %2009 = vmax.xlane.f32.xlu0 %v2008_v20  ;;  %v2095_v20 = vsel %vm1947_vm11, %v6791_v58, 0.0 }
 0x44d   : > { %5472 = vpow2.f32 %v2052_v5 }
 0x44e   : > { %5474 = vpow2.f32 %v2054_v30 }
 0x44f   : > { %v5217_v50 = vpop.f32.mrb[36].mxu1 }
 0x450   : > { %v1922_v7 = vmul.f32 0.125, %v5217_v50  ;;  %v1885_v41 = vpop.f32.mrb[37].mxu1 }
 0x451   : > { %v1920_v39 = vmul.f32 0.125, %v1885_v41  ;;  %v5218_v27 = vpop.f32.mrb[38].mxu1 }
 0x452   : > { %v1888_v17 = vpop.f32.mrb[39].mxu1  ;;  %v6773_v11 = vadd.f32 %v1922_v7, %v6655_v2 }
 0x453   : > { %v1921_v24 = vmul.f32 0.125, %v1888_v17  ;;  %v6778_v42 = vadd.f32 %v1920_v39, %v6657_v9  ;;  %v6800_v43 = vpop.eup %5470 }
 0x454   : > { %v1968_v34 = vpop.xlane.xlu0 %1967  ;;  %v2017_v33 = vsel %vm1947_vm11, %v6773_v11, -inf  ;;  %v2101_v3 = vsel %vm1947_vm11, %v6800_v43, 0.0 }
 0x455   : > { %v2026_v51 = vsub.f32 %v6692_v28, %v1968_v34  ;;  %2018 = vmax.xlane.f32.xlu1 %v2017_v33  ;;  %v6782_v40 = vadd.f32 %v1921_v24, %v6662_v25  ;;  %v2011_v28 = vsel %vm1947_vm11, %v6778_v42, -inf }
 0x456   : > { %v1971_v14 = vpop.xlane.xlu1 %1970 }
 0x457   : > { %v2056_v2 = vmul.f32 1.442695, %v2026_v51  ;;  %v2027_v10 = vsub.f32 %v6697_v47, %v1971_v14  ;;  %v2014_v29 = vsel %vm1947_vm11, %v6782_v40, -inf  ;;  %v2098_v47 = vsel %vm1947_vm11, %v6787_v61, 0.0  ;;  %v6804_v55 = vpop.eup %5472 }
 0x458   : > { %2015 = vmax.xlane.f32.xlu0 %v2014_v29  ;;  %v1974_v9 = vpop.xlane.xlu0 %1973  ;;  %v6808_v36 = vpop.eup %5474  ;;  %v2104_v32 = vsel %vm1947_vm11, %v6804_v55, 0.0 }
 0x459   : > { %v2058_v25 = vmul.f32 1.442695, %v2027_v10  ;;  %v2028_v23 = vsub.f32 %v6700_v12, %v1974_v9  ;;  %2012 = vmax.xlane.f32.xlu1 %v2011_v28  ;;  %5476 = vpow2.f32 %v2056_v2  ;;  %v2092_v12 = vsel %vm1947_vm11, %v6796_v19, 0.0 }
 0x45a   : > { %v2107_v41 = vsel %vm1947_vm11, %v6808_v36, 0.0 }
 0x45b   : > { %5478 = vpow2.f32 %v2058_v25  ;;  %v2060_v48 = vmul.f32 1.442695, %v2028_v23 }
 0x45c   : > { %2099 = vadd.xlane.f32.xlu0 %v2098_v47 }
 0x45d   : > { %2096 = vadd.xlane.f32.xlu1 %v2095_v20  ;;  %5480 = vpow2.f32 %v2060_v48 }
 0x460   : > { %2093 = vadd.xlane.f32.xlu0 %v2092_v12 }
 0x461   : > { %2102 = vadd.xlane.f32.xlu1 %v2101_v3 }
 0x463   : > { %v6812_v50 = vpop.eup %5476 }
 0x464   : > { %v1977_v7 = vpop.xlane.xlu1 %1976  ;;  %2105 = vadd.xlane.f32.xlu0 %v2104_v32  ;;  %v2110_v24 = vsel %vm1947_vm11, %v6812_v50, 0.0 }
 0x465   : > { %v6816_v39 = vpop.eup %5478  ;;  %v2029_v27 = vsub.f32 %v6707_v54, %v1977_v7  ;;  %2108 = vadd.xlane.f32.xlu1 %v2107_v41 }
 0x466   : > { %v1980_v5 = vpop.xlane.xlu0 %1979  ;;  %v2113_v51 = vsel %vm1947_vm11, %v6816_v39, 0.0 }
 0x467   : > { %v2062_v17 = vmul.f32 1.442695, %v2029_v27  ;;  %v2030_v30 = vsub.f32 %v6712_v18, %v1980_v5  ;;  %v6822_v34 = vpop.eup %5480 }
 0x468   : > { %v1983_v33 = vpop.xlane.xlu1 %1982  ;;  %2111 = vadd.xlane.f32.xlu0 %v2110_v24  ;;  %v2116_v18 = vsel %vm1947_vm11, %v6822_v34, 0.0 }
 0x469   : > { %5482 = vpow2.f32 %v2062_v17  ;;  %v2064_v14 = vmul.f32 1.442695, %v2030_v30  ;;  %v2031_v2 = vsub.f32 %v6715_v52, %v1983_v33  ;;  %2114 = vadd.xlane.f32.xlu1 %v2113_v51 }
 0x46b   : > { %5484 = vpow2.f32 %v2064_v14  ;;  %v2066_v54 = vmul.f32 1.442695, %v2031_v2 }
 0x46c   : > { %2117 = vadd.xlane.f32.xlu0 %v2116_v18 }
 0x46d   : > { %5486 = vpow2.f32 %v2066_v54 }
 0x473   : > { %v6829_v10 = vpop.eup %5482  ;;  %v1992_v29 = vpop.xlane.xlu0 %1991 }
 0x474   : > { %v2034_v9 = vsub.f32 %v6722_v22, %v1992_v29  ;;  %v2119_v28 = vsel %vm1947_vm11, %v6829_v10, 0.0 }
 0x475   : > { %v6834_v25 = vpop.eup %5484  ;;  %2120 = vadd.xlane.f32.xlu1 %v2119_v28 }
 0x476   : > { %v2072_v52 = vmul.f32 1.442695, %v2034_v9  ;;  %v1989_v23 = vpop.xlane.xlu1 %1988  ;;  %v2122_v48 = vsel %vm1947_vm11, %v6834_v25, 0.0 }
 0x477   : > { %v6838_v47 = vpop.eup %5486  ;;  %v2033_v20 = vsub.f32 %v6730_v63, %v1989_v23  ;;  %2123 = vadd.xlane.f32.xlu0 %v2122_v48  ;;  %v1986_v12 = vpop.xlane.xlu0 %1985 }
 0x478   : > { %5488 = vpow2.f32 %v2072_v52  ;;  %v2032_v22 = vsub.f32 %v6727_v46, %v1986_v12  ;;  %v2125_v3 = vsel %vm1947_vm11, %v6838_v47, 0.0 }
 0x479   : > { %v2070_v32 = vmul.f32 1.442695, %v2033_v20  ;;  %2126 = vadd.xlane.f32.xlu1 %v2125_v3 }
 0x47a   : > { %v2068_v7 = vmul.f32 1.442695, %v2032_v22 }
 0x47b   : > { %5490 = vpow2.f32 %v2070_v32 }
 0x47c   : > { %5492 = vpow2.f32 %v2068_v7 }
 0x482   : > { %v6844_v41 = vpop.eup %5488 }
 0x483   : > { %v2134_v27 = vsel %vm1947_vm11, %v6844_v41, 0.0 }
 0x484   : > { %2135 = vadd.xlane.f32.xlu0 %v2134_v27 }
 0x485   : > { %v6848_v63 = vpop.eup %5490 }
 0x486   : > { %v6850_v5 = vpop.eup %5492  ;;  %v2131_v46 = vsel %vm1947_vm11, %v6848_v63, 0.0 }
 0x487   : > { %2132 = vadd.xlane.f32.xlu1 %v2131_v46  ;;  %v2128_v17 = vsel %vm1947_vm11, %v6850_v5, 0.0 }
 0x488   : > { %2129 = vadd.xlane.f32.xlu0 %v2128_v17 }
 0x4cb   : > { %v1995_v30 = vpop.xlane.xlu1 %1994 }
 0x4cc   : > { %v2035_v24 = vsub.f32 %v6737_v44, %v1995_v30 }
 0x4cd   : > { %v1998_v33 = vpop.xlane.xlu0 %1997 }
 0x4ce   : > { %v2074_v51 = vmul.f32 1.442695, %v2035_v24  ;;  %v2036_v14 = vsub.f32 %v6742_v60, %v1998_v33 }
 0x4cf   : > { %v2001_v2 = vpop.xlane.xlu1 %2000 }
 0x4d0   : > { %5494 = vpow2.f32 %v2074_v51  ;;  %v2076_v54 = vmul.f32 1.442695, %v2036_v14  ;;  %v2037_v18 = vsub.f32 %v6745_v0, %v2001_v2 }
 0x4d2   : > { %5496 = vpow2.f32 %v2076_v54  ;;  %v2078_v29 = vmul.f32 1.442695, %v2037_v18 }
 0x4d4   : > { %5498 = vpow2.f32 %v2078_v29 }
 0x4d5   : > { %v2004_v9 = vpop.xlane.xlu0 %2003 }
 0x4d6   : > { %v2038_v28 = vsub.f32 %v6752_v15, %v2004_v9 }
 0x4d7   : > { %v2007_v52 = vpop.xlane.xlu1 %2006 }
 0x4d8   : > { %v2080_v23 = vmul.f32 1.442695, %v2038_v28  ;;  %v2039_v48 = vsub.f32 %v6759_v53, %v2007_v52 }
 0x4d9   : > { %v2010_v44 = vpop.xlane.xlu0 %2009 }
 0x4da   : > { %v6861_v20 = vpop.eup %5494  ;;  %5500 = vpow2.f32 %v2080_v23  ;;  %v2082_v60 = vmul.f32 1.442695, %v2039_v48  ;;  %v2040_v12 = vsub.f32 %v6762_v1, %v2010_v44 }
 0x4db   : > { %v2137_v0 = vsel %vm1947_vm11, %v6861_v20, 0.0 }
 0x4dc   : > { %v6866_v22 = vpop.eup %5496  ;;  %5502 = vpow2.f32 %v2082_v60  ;;  %v2084_v3 = vmul.f32 1.442695, %v2040_v12  ;;  %2138 = vadd.xlane.f32.xlu1 %v2137_v0 }
 0x4dd   : > { %v2140_v15 = vsel %vm1947_vm11, %v6866_v22, 0.0 }
 0x4de   : > { %v6870_v32 = vpop.eup %5498  ;;  %5504 = vpow2.f32 %v2084_v3  ;;  %2141 = vadd.xlane.f32.xlu0 %v2140_v15 }
 0x4df   : > { %v2143_v53 = vsel %vm1947_vm11, %v6870_v32, 0.0 }
 0x4e0   : > { %2144 = vadd.xlane.f32.xlu1 %v2143_v53 }
 0x4e2   : > { %v2019_v1 = vpop.xlane.xlu1 %2018 }
 0x4e3   : > { %v2043_v7 = vsub.f32 %v6773_v11, %v2019_v1 }
 0x4e4   : > { %v6875_v27 = vpop.eup %5500 }
 0x4e5   : > { %v2090_v46 = vmul.f32 1.442695, %v2043_v7  ;;  %v2016_v17 = vpop.xlane.xlu0 %2015  ;;  %v2146_v30 = vsel %vm1947_vm11, %v6875_v27, 0.0 }
 0x4e6   : > { %v6879_v24 = vpop.eup %5502  ;;  %v2042_v33 = vsub.f32 %v6782_v40, %v2016_v17  ;;  %v2013_v51 = vpop.xlane.xlu1 %2012  ;;  %2147 = vadd.xlane.f32.xlu0 %v2146_v30 }
 0x4e7   : > { %v2041_v14 = vsub.f32 %v6778_v42, %v2013_v51  ;;  %v2149_v2 = vsel %vm1947_vm11, %v6879_v24, 0.0  ;;  %5506 = vpow2.f32 %v2090_v46 }
 0x4e8   : > { %v6885_v54 = vpop.eup %5504  ;;  %v2088_v11 = vmul.f32 1.442695, %v2042_v33  ;;  %2150 = vadd.xlane.f32.xlu1 %v2149_v2 }
 0x4e9   : > { %v2086_v18 = vmul.f32 1.442695, %v2041_v14  ;;  %v2100_v29 = vpop.xlane.xlu0 %2099  ;;  %v2152_v9 = vsel %vm1947_vm11, %v6885_v54, 0.0  ;;  %v1263_v14 = vadd.f32 %v6500_v37, %v6455_v13 }
 0x4ea   : > { %5508 = vpow2.f32 %v2088_v11  ;;  %v2097_v28 = vpop.xlane.xlu1 %2096  ;;  %2153 = vadd.xlane.f32.xlu0 %v2152_v9 }
 0x4eb   : > { %5510 = vpow2.f32 %v2086_v18 }
 0x4ec   : > { %5512 = vrcp.f32 %v2100_v29 }
 0x4ed   : > { %5514 = vrcp.f32 %v2097_v28  ;;  %v2094_v42 = vpop.xlane.xlu0 %2093  ;;  %v1277_v28 = vadd.f32 %v6513_v57, %v6455_v13 }
 0x4ee   : > { %5516 = vrcp.f32 %v2094_v42  ;;  %v2103_v40 = vpop.xlane.xlu1 %2102 }
 0x4ef   : > { %5518 = vrcp.f32 %v2103_v40 }
 0x4f1   : > { %v2106_v52 = vpop.xlane.xlu0 %2105  ;;  %v6889_v48 = vpop.eup %5506 }
 0x4f2   : > { %5520 = vrcp.f32 %v2106_v52  ;;  %v2109_v23 = vpop.xlane.xlu1 %2108  ;;  %v2161_v2 = vsel %vm1947_vm11, %v6889_v48, 0.0 }
 0x4f3   : > { %5522 = vrcp.f32 %v2109_v23 }
 0x4f4   : > { %v6891_v44 = vpop.eup %5508 }
 0x4f5   : > { %v6893_v60 = vpop.eup %5510  ;;  %v2112_v12 = vpop.xlane.xlu0 %2111  ;;  %v2158_v0 = vsel %vm1947_vm11, %v6891_v44, 0.0 }
 0x4f6   : > { %v5513_v3 = vpop.eup %5512  ;;  %5524 = vrcp.f32 %v2112_v12  ;;  %v2115_v15 = vpop.xlane.xlu1 %2114  ;;  %2159 = vadd.xlane.f32.xlu0 %v2158_v0  ;;  %v2155_v53 = vsel %vm1947_vm11, %v6893_v60, 0.0  ;;  %v2235_v12 = vpack.c.bf16 %v1277_v28, %v1277_v28 }
 0x4f7   : > { %v5515_v1 = vpop.eup %5514  ;;  %5526 = vrcp.f32 %v2115_v15  ;;  %2156 = vadd.xlane.f32.xlu1 %v2155_v53  ;;  %v2190_v46 = vmul.f32 %v5513_v3, %v6787_v61 }
 0x4f8   : > { %v5517_v7 = vpop.eup %5516  ;;  %v2189_v33 = vmul.f32 %v5515_v1, %v6791_v58  ;;  %v2233_v58 = vpack.c.bf16 %v1263_v14, %v1263_v14  ;;  %v2423_v53 = vsel %vm2250_vm3, %v2235_v12, 0 }
 0x4f9   : > { %v2118_v17 = vpop.xlane.xlu0 %2117  ;;  %v2188_v30 = vmul.f32 %v5517_v7, %v6796_v19  ;;  %v5519_v51 = vpop.eup %5518  ;;  %v2213_v29 = vpack.c.bf16 %v2190_v46, %v2190_v46 }
 0x4fa   : > { %5528 = vrcp.f32 %v2118_v17  ;;  %v2191_v61 = vmul.f32 %v5519_v51, %v6800_v43  ;;  %v1307_v51 = vadd.f32 %v6565_v56, %v6455_v13 }
 0x4fb   : > { %2162 = vadd.xlane.f32.xlu1 %v2161_v2  ;;  %v2212_v11 = vpack.c.bf16 %v2189_v33, %v2188_v30 }
 0x4fc   : > { %v5521_v18 = vpop.eup %5520 }
 0x4fd   : > { %v5523_v9 = vpop.eup %5522  ;;  %5223 = vmatprep.mubr.msk.bf16.mxu0 %vm1947_vm11, %v2212_v11  ;;  %v2192_v19 = vmul.f32 %v5521_v18, %v6804_v55  ;;  %v2366_v55 = vsel %vm2250_vm3, %v2233_v58, 0 }
 0x4fe   : > { %v2193_v37 = vmul.f32 %v5523_v9, %v6808_v36  ;;  %5224 = vmatmul.mubr.msk.bf16.vlgmr.msra.gmra.mrb[40].mxu0 %vm1947_vm11, %v2213_v29  ;;  %v2239_v29 = vpack.c.bf16 %v1307_v51, %v1307_v51 }
 0x4ff   : > { %5236 = vmatpush3.bf16.msra.mxu0 %v6495_v8  ;;  %v2214_v42 = vpack.c.bf16 %v2192_v19, %v2191_v61 }
 0x500   : > { %v5525_v40 = vpop.eup %5524  ;;  %5353 = vmatprep.subr.msk.bf16.mxu0 %vm2250_vm3, %v2233_v58  ;;  %v2215_v52 = vpack.c.bf16 %v2193_v37, %v2193_v37  ;;  %v2537_v56 = vsel %vm2250_vm3, %v2239_v29, 0 }
 0x501   : > { %v5527_v23 = vpop.eup %5526  ;;  %5231 = vmatprep.mubr.msk.bf16.mxu1 %vm1947_vm11, %v2214_v42  ;;  %v2194_v43 = vmul.f32 %v5525_v40, %v6812_v50  ;;  %v1293_v50 = vadd.f32 %v6534_v21, %v6455_v13  ;;  %v5384_v42 = vld [vmem:[%s5967_s22] sm:$0xff]  }
 0x502   : > { %v2121_v57 = vpop.xlane.xlu1 %2120  ;;  %5232 = vmatmul.mubr.msk.bf16.vlgmr.msra.gmra.mrb[40].mxu1 %vm1947_vm11, %v2215_v52  ;;  %v2195_v36 = vmul.f32 %v5527_v23, %v6816_v39 }
 0x503   : > { %5530 = vrcp.f32 %v2121_v57  ;;  %5238 = vmatpush3.bf16.msra.mxu0 %v2366_v55  ;;  %5244 = vmatpush3.bf16.msra.mxu1 %v6515_v16  ;;  %v2237_v1 = vpack.c.bf16 %v1293_v50, %v1293_v50 }
 0x504   : > { %v5529_v8 = vpop.eup %5528  ;;  %5354 = vmatprep.subr.msk.bf16.mxu1 %vm2250_vm3, %v2235_v12  ;;  %5251 = vmatprep.subr.bf16.mxu0 %v6529_v35  ;;  %v2124_v0 = vpop.xlane.xlu0 %2123  ;;  %v2216_v3 = vpack.c.bf16 %v2195_v36, %v2194_v43  ;;  %v1337_v36 = vadd.f32 %v6602_v38, %v6455_v13 }
 0x505   : > { %v2196_v15 = vmul.f32 %v5529_v8, %v6822_v34  ;;  %5532 = vrcp.f32 %v2124_v0  ;;  %v2480_v34 = vsel %vm2250_vm3, %v2237_v1, 0 }
 0x506   : > { %v2127_v39 = vpop.xlane.xlu1 %2126  ;;  %5239 = vmatprep.mubr.msk.bf16.mxu0 %vm1947_vm11, %v2216_v3  ;;  %v2243_v50 = vpack.c.bf16 %v1337_v36, %v1337_v36 }
 0x507   : > { %5534 = vrcp.f32 %v2127_v39  ;;  %5246 = vmatpush3.bf16.msra.mxu1 %v2423_v53  ;;  %v2217_v16 = vpack.c.bf16 %v2196_v15, %v2196_v15 }
 0x508   : > { %5259 = vmatprep.subr.bf16.mxu1 %v6568_v49 }
 0x509   : > { %5240 = vmatmul.mubr.msk.bf16.vlgmr.msra.gmra.mrb[44].mxu0 %vm1947_vm11, %v2217_v16 }
 0x50a   : > { %5252 = vmatpush3.bf16.msra.mxu0 %v6529_v35 }
 0x50b   : > { %5355 = vmatprep.subr.msk.bf16.mxu0 %vm2250_vm3, %v2237_v1 }
 0x50d   : > { %v5531_v21 = vpop.eup %5530 }
 0x50e   : > { %5254 = vmatpush3.bf16.msra.mxu0 %v2480_v34  ;;  %v2197_v46 = vmul.f32 %v5531_v21, %v6829_v10  ;;  %v5385_v21 = vld [vmem:[%s5967_s22 + $0x8] sm:$0xff]  }
 0x50f   : > { %v5533_v7 = vpop.eup %5532  ;;  %5267 = vmatprep.subr.bf16.mxu0 %v6582_v6 }
 0x510   : > { %v2198_v17 = vmul.f32 %v5533_v7, %v6834_v25 }
 0x511   : > { %v5535_v30 = vpop.eup %5534  ;;  %v2136_v33 = vpop.xlane.xlu0 %2135 }
 0x512   : > { %v2199_v35 = vmul.f32 %v5535_v30, %v6838_v47  ;;  %v2218_v14 = vpack.c.bf16 %v2198_v17, %v2197_v46  ;;  %5536 = vrcp.f32 %v2136_v33 }
 0x514   : > { %v2133_v2 = vpop.xlane.xlu1 %2132  ;;  %5247 = vmatprep.mubr.msk.bf16.mxu1 %vm1947_vm11, %v2218_v14  ;;  %v2219_v11 = vpack.c.bf16 %v2199_v35, %v2199_v35 }
 0x515   : > { %5538 = vrcp.f32 %v2133_v2  ;;  %v2130_v18 = vpop.xlane.xlu0 %2129 }
 0x516   : > { %5540 = vrcp.f32 %v2130_v18  ;;  %5248 = vmatmul.mubr.msk.bf16.vlgmr.msra.gmra.mrb[44].mxu1 %vm1947_vm11, %v2219_v11 }
 0x517   : > { %5260 = vmatpush3.bf16.msra.mxu1 %v6568_v49  ;;  %v1323_v49 = vadd.f32 %v6587_v4, %v6455_v13 }
 0x518   : > { %5356 = vmatprep.subr.msk.bf16.mxu1 %vm2250_vm3, %v2239_v29 }
 0x519   : > { %v2241_v37 = vpack.c.bf16 %v1323_v49, %v1323_v49 }
 0x51b   : > { %5262 = vmatpush3.bf16.msra.mxu1 %v2537_v56 }
 0x51c   : > { %5275 = vmatprep.subr.bf16.mxu1 %v6605_v26  ;;  %v5537_v10 = vpop.eup %5536 }
 0x51d   : > { %v2202_v9 = vmul.f32 %v5537_v10, %v6844_v41  ;;  %v2594_v41 = vsel %vm2250_vm3, %v2241_v37, 0 }
 0x51f   : > { %v5539_v25 = vpop.eup %5538  ;;  %v2221_v28 = vpack.c.bf16 %v2202_v9, %v2202_v9 }
 0x520   : > { %v5541_v47 = vpop.eup %5540  ;;  %v2201_v61 = vmul.f32 %v5539_v25, %v6848_v63 }
 0x521   : > { %v2200_v19 = vmul.f32 %v5541_v47, %v6850_v5 }
 0x523   : > { %v2220_v58 = vpack.c.bf16 %v2201_v61, %v2200_v19 }
 0x525   : > { %5255 = vmatprep.mubr.msk.bf16.mxu0 %vm1947_vm11, %v2220_v58 }
 0x526   : > { %5256 = vmatmul.mubr.msk.bf16.vlgmr.msra.gmra.mrb[48].mxu0 %vm1947_vm11, %v2221_v28 }
 0x527   : > { %5268 = vmatpush3.bf16.msra.mxu0 %v6582_v6 }
 0x528   : > { %5357 = vmatprep.subr.msk.bf16.mxu0 %vm2250_vm3, %v2241_v37 }
 0x52b   : > { %5270 = vmatpush3.bf16.msra.mxu0 %v2594_v41 }
 0x52c   : > { %5283 = vmatprep.subr.bf16.mxu0 %v5384_v42 }
 0x569   : > { %v2139_v63 = vpop.xlane.xlu1 %2138 }
 0x56a   : > { %5542 = vrcp.f32 %v2139_v63 }
 0x56b   : > { %v2142_v5 = vpop.xlane.xlu0 %2141 }
 0x56c   : > { %5544 = vrcp.f32 %v2142_v5 }
 0x56d   : > { %v2145_v4 = vpop.xlane.xlu1 %2144 }
 0x56e   : > { %5546 = vrcp.f32 %v2145_v4 }
 0x573   : > { %v2148_v40 = vpop.xlane.xlu0 %2147 }
 0x574   : > { %v5543_v52 = vpop.eup %5542  ;;  %5548 = vrcp.f32 %v2148_v40 }
 0x575   : > { %v2151_v23 = vpop.xlane.xlu1 %2150  ;;  %v2203_v55 = vmul.f32 %v5543_v52, %v6861_v20 }
 0x576   : > { %v5545_v43 = vpop.eup %5544  ;;  %5550 = vrcp.f32 %v2151_v23 }
 0x577   : > { %v2154_v6 = vpop.xlane.xlu0 %2153  ;;  %v2204_v12 = vmul.f32 %v5545_v43, %v6866_v22  ;;  %v2651_v22 = vsel %vm2250_vm3, %v2243_v50, 0 }
 0x578   : > { %v5547_v57 = vpop.eup %5546  ;;  %5552 = vrcp.f32 %v2154_v6 }
 0x579   : > { %v2205_v8 = vmul.f32 %v5547_v57, %v6870_v32  ;;  %v2222_v0 = vpack.c.bf16 %v2204_v12, %v2203_v55 }
 0x57b   : > { %5263 = vmatprep.mubr.msk.bf16.mxu1 %vm1947_vm11, %v2222_v0  ;;  %v2223_v3 = vpack.c.bf16 %v2205_v8, %v2205_v8 }
 0x57d   : > { %5264 = vmatmul.mubr.msk.bf16.vlgmr.msra.gmra.mrb[48].mxu1 %vm1947_vm11, %v2223_v3 }
 0x57e   : > { %v5549_v15 = vpop.eup %5548  ;;  %5276 = vmatpush3.bf16.msra.mxu1 %v6605_v26 }
 0x57f   : > { %5358 = vmatprep.subr.msk.bf16.mxu1 %vm2250_vm3, %v2243_v50  ;;  %v2206_v13 = vmul.f32 %v5549_v15, %v6875_v27  ;;  %vm4476_vm3 = vcmask (!%p4969_p5), 1047559  }
 0x580   : > { %v5551_v20 = vpop.eup %5550 }
 0x581   : > { %v2207_v38 = vmul.f32 %v5551_v20, %v6879_v24  ;;  %v5386_v24 = vld [vmem:[%s5967_s22 + $0x10] sm:$0xff]  }
 0x582   : > { %v5553_v32 = vpop.eup %5552  ;;  %5278 = vmatpush3.bf16.msra.mxu1 %v2651_v22 }
 0x583   : > { %v2208_v53 = vmul.f32 %v5553_v32, %v6885_v54  ;;  %v2160_v39 = vpop.xlane.xlu0 %2159  ;;  %v2224_v16 = vpack.c.bf16 %v2207_v38, %v2206_v13  ;;  %v5387_v54 = vld [vmem:[%s5967_s22 + $0x18] sm:$0xff]  }
 0x584   : > { %5554 = vrcp.f32 %v2160_v39  ;;  %v2157_v26 = vpop.xlane.xlu1 %2156  ;;  %v6997_v39 = vld [vmem:[%s594_s1] ss:$0 sm:$0xff] }
 0x585   : > { %5556 = vrcp.f32 %v2157_v26  ;;  %5271 = vmatprep.mubr.msk.bf16.mxu0 %vm1947_vm11, %v2224_v16  ;;  %v2225_v1 = vpack.c.bf16 %v2208_v53, %v2208_v53 }
 0x587   : > { %5272 = vmatmul.mubr.msk.bf16.vlgmr.msra.gmra.mrb[52].mxu0 %vm1947_vm11, %v2225_v1 }
 0x588   : > { %v2163_v27 = vpop.xlane.xlu1 %2162  ;;  %5284 = vmatpush3.bf16.msra.mxu0 %v5384_v42 }
 0x589   : > { %5558 = vrcp.f32 %v2163_v27  ;;  %5285 = vmatprep.subr.bf16.mxu0 %v5385_v21 }
 0x58c   : > { %5286 = vmatpush3.bf16.msra.mxu0 %v5385_v21 }
 0x58d   : > { %5287 = vmatprep.subr.bf16.mxu0 %v5386_v24 }
 0x58e   : > { %v5555_v34 = vpop.eup %5554 }
 0x58f   : > { %v5557_v7 = vpop.eup %5556  ;;  %v2210_v46 = vmul.f32 %v5555_v34, %v6891_v44 }
 0x590   : > { %v2209_v17 = vmul.f32 %v5557_v7, %v6893_v60  ;;  %5288 = vmatpush3.bf16.msra.mxu0 %v5386_v24 }
 0x591   : > { %5289 = vmatprep.subr.bf16.mxu0 %v5387_v54 }
 0x592   : > { %v2226_v30 = vpack.c.bf16 %v2210_v46, %v2209_v17  ;;  %v5801_v17 = vld [vmem:[#allocation2 + $0x10] sm:$0xff] }
 0x593   : > { %v5559_v33 = vpop.eup %5558 }
 0x594   : > { %v2211_v51 = vmul.f32 %v5559_v33, %v6889_v48  ;;  %5279 = vmatprep.mubr.msk.bf16.mxu1 %vm1947_vm11, %v2226_v30  ;;  %5290 = vmatpush3.bf16.msra.mxu0 %v5387_v54  ;;  %v5800_v54 = vld [vmem:[#allocation2] sm:$0xff]  ;;  %v5802_v33 = vld [vmem:[#allocation2 + $0x8] sm:$0xff] }
 0x596   : > { %v2227_v35 = vpack.c.bf16 %v2211_v51, %v2211_v51 }
 0x598   : > { %5280 = vmatmul.mubr.msk.bf16.vlgmr.msra.gmra.mrb[52].mxu1 %vm1947_vm11, %v2227_v35 }
 0x599   : > { %3449 = vmatprep.mubr.bf16.mxu1 %v7821_v62 }
 0x5d1   : > { %v5225_v14 = vpop.f32.mrb[40].mxu0 }
 0x5d2   : > { %v2288_v2 = vpop.f32.mrb[41].mxu0 }
 0x5d3   : > { %v5226_v11 = vpop.f32.mrb[42].mxu0 }
 0x5d4   : > { %v2291_v44 = vpop.f32.mrb[43].mxu0 }
 0x5d5   : > { %v2709_v18 = vpack.c.bf16 %v2291_v44, %v2288_v2  ;;  %v5233_v60 = vpop.f32.mrb[40].mxu1 }
 0x5d6   : > { %v2345_v29 = vpop.f32.mrb[41].mxu1 }
 0x5d7   : > { %v2710_v56 = vpack.c.bf16 %v2345_v29, %v5225_v14  ;;  %v5234_v10 = vpop.f32.mrb[42].mxu1  ;;  %5291 = vmatprep.mubr.msk.bf16.mxu0 %vm708_vm2, %v2709_v18  ;;  %v5803_v14 = vld [vmem:[#allocation2 + $0x18] sm:$0xff] }
 0x5d8   : > { %v2348_v48 = vpop.f32.mrb[43].mxu1 }
 0x5d9   : > { %v2711_v25 = vpack.c.bf16 %v5233_v60, %v2348_v48  ;;  %5292 = vmatmul.mubr.msk.bf16.vlgmr.msra.gmra.mrb[56].mxu0 %vm708_vm2, %v2710_v56 }
 0x5db   : > { %5295 = vmatprep.mubr.msk.bf16.mxu0 %vm708_vm2, %v2711_v25 }
 0x5dc   : > { %v5241_v47 = vpop.f32.mrb[44].mxu0 }
 0x5dd   : > { %v2402_v9 = vpop.f32.mrb[45].mxu0 }
 0x5de   : > { %v5242_v61 = vpop.f32.mrb[46].mxu0 }
 0x5df   : > { %v2405_v19 = vpop.f32.mrb[47].mxu0 }
 0x5e0   : > { %v2712_v49 = vpack.c.bf16 %v2405_v19, %v2402_v9 }
 0x5e2   : > { %5296 = vmatmul.mubr.msk.bf16.gmra.mrb[60].mxu0 %vm708_vm2, %v2712_v49  ;;  %v5805_v49 = vld [vmem:[#allocation2 + $0x30] sm:$0xff] }
 0x5e9   : > { %v5249_v58 = vpop.f32.mrb[44].mxu1 }
 0x5ea   : > { %v2459_v28 = vpop.f32.mrb[45].mxu1 }
 0x5eb   : > { %v2713_v37 = vpack.c.bf16 %v2459_v28, %v5241_v47  ;;  %v5250_v42 = vpop.f32.mrb[46].mxu1  ;;  %v5804_v47 = vld [vmem:[#allocation2 + $0x20] sm:$0xff]  ;;  %v5806_v28 = vld [vmem:[#allocation2 + $0x28] sm:$0xff] }
 0x5ec   : > { %v2462_v41 = vpop.f32.mrb[47].mxu1 }
 0x5ed   : > { %v2714_v63 = vpack.c.bf16 %v5249_v58, %v2462_v41  ;;  %5299 = vmatprep.mubr.msk.bf16.mxu0 %vm708_vm2, %v2713_v37  ;;  %v5807_v41 = vld [vmem:[#allocation2 + $0x38] sm:$0xff] }
 0x5ef   : > { %5300 = vmatmul.mubr.msk.bf16.gmra.mrb[64].mxu0 %vm708_vm2, %v2714_v63 }
 0x5f9   : > { %v5257_v5 = vpop.f32.mrb[48].mxu0 }
 0x5fa   : > { %v2516_v4 = vpop.f32.mrb[49].mxu0 }
 0x5fb   : > { %v5258_v40 = vpop.f32.mrb[50].mxu0 }
 0x5fc   : > { %v2519_v52 = vpop.f32.mrb[51].mxu0 }
 0x5fd   : > { %v2715_v23 = vpack.c.bf16 %v2519_v52, %v2516_v4 }
 0x5ff   : > { %5303 = vmatprep.mubr.msk.bf16.mxu0 %vm708_vm2, %v2715_v23 }
 0x650   : > { %v5265_v43 = vpop.f32.mrb[48].mxu1 }
 0x651   : > { %v2573_v6 = vpop.f32.mrb[49].mxu1 }
 0x652   : > { %v2716_v55 = vpack.c.bf16 %v2573_v6, %v5257_v5  ;;  %v5266_v12 = vpop.f32.mrb[50].mxu1 }
 0x653   : > { %v2576_v57 = vpop.f32.mrb[51].mxu1 }
 0x654   : > { %v2717_v36 = vpack.c.bf16 %v5265_v43, %v2576_v57  ;;  %5304 = vmatmul.mubr.msk.bf16.gmra.mrb[68].mxu0 %vm708_vm2, %v2716_v55  ;;  %v5808_v57 = vld [vmem:[#allocation2 + $0x40] sm:$0xff] }
 0x656   : > { %5307 = vmatprep.mubr.msk.bf16.mxu0 %vm708_vm2, %v2717_v36 }
 0x65a   : > { %v5273_v8 = vpop.f32.mrb[52].mxu0 }
 0x65b   : > { %v2630_v0 = vpop.f32.mrb[53].mxu0 }
 0x65c   : > { %v5274_v3 = vpop.f32.mrb[54].mxu0 }
 0x65d   : > { %v2633_v50 = vpop.f32.mrb[55].mxu0  ;;  %v5809_v3 = vld [vmem:[#allocation2 + $0x50] sm:$0xff] }
 0x65e   : > { %v2718_v15 = vpack.c.bf16 %v2633_v50, %v2630_v0 }
 0x660   : > { %5308 = vmatmul.mubr.msk.bf16.gmra.mrb[72].mxu0 %vm708_vm2, %v2718_v15  ;;  %v5810_v15 = vld [vmem:[#allocation2 + $0x48] sm:$0xff] }
 0x66b   : > { %v5281_v20 = vpop.f32.mrb[52].mxu1 }
 0x66c   : > { %v2687_v22 = vpop.f32.mrb[53].mxu1 }
 0x66d   : > { %v2719_v13 = vpack.c.bf16 %v2687_v22, %v5273_v8  ;;  %v5282_v38 = vpop.f32.mrb[54].mxu1 }
 0x66e   : > { %v2690_v32 = vpop.f32.mrb[55].mxu1 }
 0x66f   : > { %v2720_v53 = vpack.c.bf16 %v5281_v20, %v2690_v32  ;;  %5311 = vmatprep.mubr.msk.bf16.mxu0 %vm708_vm2, %v2719_v13  ;;  %v5811_v13 = vld [vmem:[#allocation2 + $0x58] sm:$0xff] }
 0x671   : > { %5312 = vmatmul.mubr.msk.bf16.gmra.mrb[76].mxu0 %vm708_vm2, %v2720_v53 }
 0x6ac   : > { %v5293_v16 = vpop.f32.mrb[56].mxu0 }
 0x6ad   : > { %v2822_v26 = vpop.f32.mrb[57].mxu0  ;;  %v2831_v1 = vadd.f32 %v5293_v16, %v6997_v39 }
 0x6ae   : > { %v2823_v21 = vadd.f32 %v6997_v39, %v2822_v26  ;;  %v5294_v27 = vpop.f32.mrb[58].mxu0 }
 0x6af   : > { %v2825_v24 = vpop.f32.mrb[59].mxu0  ;;  %v2834_v7 = vadd.f32 %v5294_v27, %v6997_v39  ;;  %v7005_v30 = vadd.f32 %v5801_v17, %v2831_v1 }
 0x6b0   : > { %v7001_v34 = vadd.f32 %v5800_v54, %v2823_v21  ;;  %v2826_v46 = vadd.f32 %v6997_v39, %v2825_v24 }
 0x6b1   : > { %v7011_v2 = vadd.f32 %v5803_v14, %v2834_v7  ;;  %v2947_v60 = vsel %vm708_vm2, %v7005_v30, 0.0  ;;  %v5812_v7 = vld [vmem:[#allocation2 + $0x60] sm:$0xff] }
 0x6b2   : > { %v7007_v51 = vadd.f32 %v5802_v33, %v2826_v46  ;;  %v2941_v35 = vsel %vm708_vm2, %v7001_v34, 0.0 }
 0x6b3   : > { %2942 = vadd.xlane.f32.xlu0 %v2941_v35  ;;  %v2950_v25 = vsel %vm708_vm2, %v7011_v2, 0.0  ;;  %v5813_v35 = vld [vmem:[#allocation2 + $0x70] sm:$0xff] }
 0x6b4   : > { %v2944_v11 = vsel %vm708_vm2, %v7007_v51, 0.0 }
 0x6b5   : > { %v5297_v44 = vpop.f32.mrb[60].mxu0  ;;  %2945 = vadd.xlane.f32.xlu1 %v2944_v11  ;;  %v5814_v11 = vld [vmem:[#allocation2 + $0x68] sm:$0xff] }
 0x6b6   : > { %v2838_v18 = vpop.f32.mrb[61].mxu0  ;;  %v2847_v29 = vadd.f32 %v5297_v44, %v6997_v39 }
 0x6b7   : > { %v2839_v56 = vadd.f32 %v6997_v39, %v2838_v18  ;;  %v5298_v10 = vpop.f32.mrb[62].mxu0  ;;  %2948 = vadd.xlane.f32.xlu0 %v2947_v60  ;;  %v5815_v60 = vld [vmem:[#allocation2 + $0x78] sm:$0xff] }
 0x6b8   : > { %v2841_v48 = vpop.f32.mrb[63].mxu0  ;;  %v2850_v61 = vadd.f32 %v5298_v10, %v6997_v39  ;;  %v7025_v58 = vadd.f32 %v5805_v49, %v2847_v29 }
 0x6b9   : > { %v7021_v9 = vadd.f32 %v5804_v47, %v2839_v56  ;;  %v2842_v19 = vadd.f32 %v6997_v39, %v2841_v48  ;;  %2951 = vadd.xlane.f32.xlu1 %v2950_v25 }
 0x6ba   : > { %v7031_v63 = vadd.f32 %v5807_v41, %v2850_v61  ;;  %v2959_v4 = vsel %vm708_vm2, %v7025_v58, 0.0 }
 0x6bb   : > { %v7027_v37 = vadd.f32 %v5806_v28, %v2842_v19  ;;  %v2953_v42 = vsel %vm708_vm2, %v7021_v9, 0.0 }
 0x6bc   : > { %2954 = vadd.xlane.f32.xlu0 %v2953_v42  ;;  %v2962_v40 = vsel %vm708_vm2, %v7031_v63, 0.0  ;;  %v5816_v42 = vld [vmem:[#allocation2 + $0x80] sm:$0xff] }
 0x6bd   : > { %v2956_v5 = vsel %vm708_vm2, %v7027_v37, 0.0 }
 0x6be   : > { %2957 = vadd.xlane.f32.xlu1 %v2956_v5 }
 0x6c0   : > { %2960 = vadd.xlane.f32.xlu0 %v2959_v4 }
 0x6c2   : > { %v5301_v52 = vpop.f32.mrb[64].mxu0  ;;  %2963 = vadd.xlane.f32.xlu1 %v2962_v40  ;;  %v5817_v40 = vld [vmem:[#allocation2 + $0x90] sm:$0xff] }
 0x6c3   : > { %v2854_v23 = vpop.f32.mrb[65].mxu0  ;;  %v2863_v43 = vadd.f32 %v5301_v52, %v6997_v39 }
 0x6c4   : > { %v2855_v6 = vadd.f32 %v6997_v39, %v2854_v23  ;;  %v5302_v55 = vpop.f32.mrb[66].mxu0  ;;  %v5818_v23 = vld [vmem:[#allocation2 + $0x88] sm:$0xff] }
 0x6c5   : > { %v2857_v12 = vpop.f32.mrb[67].mxu0  ;;  %v2866_v8 = vadd.f32 %v5302_v55, %v6997_v39  ;;  %v7045_v50 = vadd.f32 %v5809_v3, %v2863_v43  ;;  %v5819_v55 = vld [vmem:[#allocation2 + $0x98] sm:$0xff] }
 0x6c6   : > { %v7041_v36 = vadd.f32 %v5808_v57, %v2855_v6  ;;  %v2858_v0 = vadd.f32 %v6997_v39, %v2857_v12 }
 0x6c7   : > { %v7051_v38 = vadd.f32 %v5811_v13, %v2866_v8  ;;  %v2971_v53 = vsel %vm708_vm2, %v7045_v50, 0.0 }
 0x6c8   : > { %v7047_v20 = vadd.f32 %v5810_v15, %v2858_v0  ;;  %v2965_v22 = vsel %vm708_vm2, %v7041_v36, 0.0 }
 0x6c9   : > { %2966 = vadd.xlane.f32.xlu0 %v2965_v22  ;;  %v2974_v16 = vsel %vm708_vm2, %v7051_v38, 0.0 }
 0x6ca   : > { %v2968_v32 = vsel %vm708_vm2, %v7047_v20, 0.0 }
 0x6cb   : > { %2969 = vadd.xlane.f32.xlu1 %v2968_v32 }
 0x6cd   : > { %2972 = vadd.xlane.f32.xlu0 %v2971_v53 }
 0x6cf   : > { %2975 = vadd.xlane.f32.xlu1 %v2974_v16 }
 0x727   : > { %v5305_v26 = vpop.f32.mrb[68].mxu0 }
 0x728   : > { %v2870_v1 = vpop.f32.mrb[69].mxu0  ;;  %v2879_v21 = vadd.f32 %v5305_v26, %v6997_v39 }
 0x729   : > { %v2871_v27 = vadd.f32 %v6997_v39, %v2870_v1  ;;  %v5306_v24 = vpop.f32.mrb[70].mxu0 }
 0x72a   : > { %v2873_v54 = vpop.f32.mrb[71].mxu0  ;;  %v2882_v17 = vadd.f32 %v5306_v24, %v6997_v39  ;;  %v7065_v14 = vadd.f32 %v5813_v35, %v2879_v21 }
 0x72b   : > { %v7061_v46 = vadd.f32 %v5812_v7, %v2871_v27  ;;  %v2874_v33 = vadd.f32 %v6997_v39, %v2873_v54 }
 0x72c   : > { %v7071_v29 = vadd.f32 %v5815_v60, %v2882_v17  ;;  %v2983_v10 = vsel %vm708_vm2, %v7065_v14, 0.0 }
 0x72d   : > { %v7067_v44 = vadd.f32 %v5814_v11, %v2874_v33  ;;  %v2977_v18 = vsel %vm708_vm2, %v7061_v46, 0.0  ;;  %v5820_v11 = vld [vmem:[#allocation2 + $0xa0] sm:$0xff] }
 0x72e   : > { %2978 = vadd.xlane.f32.xlu0 %v2977_v18  ;;  %v2986_v25 = vsel %vm708_vm2, %v7071_v29, 0.0 }
 0x72f   : > { %v2980_v56 = vsel %vm708_vm2, %v7067_v44, 0.0 }
 0x730   : > { %2981 = vadd.xlane.f32.xlu1 %v2980_v56 }
 0x732   : > { %2984 = vadd.xlane.f32.xlu0 %v2983_v10 }
 0x733   : > { %v5309_v48 = vpop.f32.mrb[72].mxu0 }
 0x734   : > { %2987 = vadd.xlane.f32.xlu1 %v2986_v25  ;;  %v2886_v47 = vpop.f32.mrb[73].mxu0  ;;  %v2895_v61 = vadd.f32 %v5309_v48, %v6997_v39 }
 0x735   : > { %v2887_v19 = vadd.f32 %v6997_v39, %v2886_v47  ;;  %v5310_v49 = vpop.f32.mrb[74].mxu0  ;;  %v5821_v47 = vld [vmem:[#allocation2 + $0xa8] sm:$0xff] }
 0x736   : > { %v2889_v28 = vpop.f32.mrb[75].mxu0  ;;  %v2898_v5 = vadd.f32 %v5310_v49, %v6997_v39  ;;  %v7085_v52 = vadd.f32 %v5817_v40, %v2895_v61 }
 0x737   : > { %v7081_v41 = vadd.f32 %v5816_v42, %v2887_v19  ;;  %v2890_v4 = vadd.f32 %v6997_v39, %v2889_v28 }
 0x738   : > { %v7091_v12 = vadd.f32 %v5819_v55, %v2898_v5  ;;  %v2995_v8 = vsel %vm708_vm2, %v7085_v52, 0.0 }
 0x739   : > { %v7087_v43 = vadd.f32 %v5818_v23, %v2890_v4  ;;  %v2989_v6 = vsel %vm708_vm2, %v7081_v41, 0.0 }
 0x73a   : > { %2990 = vadd.xlane.f32.xlu0 %v2989_v6  ;;  %7845 = vst [vmem:[#allocation5_spill] sm:$0xff] %v7091_v12  ;;  %v2998_v0 = vsel %vm708_vm2, %v7091_v12, 0.0 }
 0x73b   : > { %v2992_v57 = vsel %vm708_vm2, %v7087_v43, 0.0 }
 0x73c   : > { %2993 = vadd.xlane.f32.xlu1 %v2992_v57 }
 0x73e   : > { %2996 = vadd.xlane.f32.xlu0 %v2995_v8 }
 0x740   : > { %2999 = vadd.xlane.f32.xlu1 %v2998_v0  ;;  %v2943_v3 = vpop.xlane.xlu0 %2942  ;;  %v5822_v0 = vld [vmem:[#allocation2 + $0xb0] sm:$0xff] }
 0x741   : > { %v3013_v15 = vmul.f32 0.015625, %v2943_v3 }
 0x742   : > { %v2946_v22 = vpop.xlane.xlu1 %2945 }
 0x743   : > { %v7100_v13 = vsub.f32 %v7001_v34, %v3013_v15  ;;  %v3014_v32 = vmul.f32 0.015625, %v2946_v22 }
 0x744   : > { %v5313_v53 = vpop.f32.mrb[76].mxu0  ;;  %v2949_v16 = vpop.xlane.xlu0 %2948 }
 0x745   : > { %v7103_v26 = vsub.f32 %v7007_v51, %v3014_v32  ;;  %v3015_v1 = vmul.f32 0.015625, %v2949_v16  ;;  %v2902_v21 = vpop.f32.mrb[77].mxu0  ;;  %v3061_v27 = vmul.f32 %v7100_v13, %v7100_v13  ;;  %v2911_v42 = vadd.f32 %v5313_v53, %v6997_v39  ;;  %v5823_v53 = vld [vmem:[#allocation2 + $0xb8] sm:$0xff] }
 0x746   : > { %v2903_v24 = vadd.f32 %v6997_v39, %v2902_v21  ;;  %v2952_v54 = vpop.xlane.xlu1 %2951  ;;  %v5314_v7 = vpop.f32.mrb[78].mxu0 }
 0x747   : > { %v7109_v17 = vsub.f32 %v7005_v30, %v3015_v1  ;;  %v3016_v33 = vmul.f32 0.015625, %v2952_v54  ;;  %v2905_v35 = vpop.f32.mrb[79].mxu0  ;;  %v3085_v56 = vsel %vm708_vm2, %v3061_v27, 0.0  ;;  %v3062_v10 = vmul.f32 %v7103_v26, %v7103_v26 }
 0x748   : > { %v7111_v18 = vadd.f32 %v5820_v11, %v2903_v24  ;;  %v2906_v60 = vadd.f32 %v6997_v39, %v2905_v35  ;;  %3086 = vadd.xlane.f32.xlu0 %v3085_v56  ;;  %v2914_v6 = vadd.f32 %v5314_v7, %v6997_v39  ;;  %v7133_v3 = vadd.f32 %v5822_v0, %v2911_v42 }
 0x749   : > { %v2955_v48 = vpop.xlane.xlu0 %2954  ;;  %v7118_v25 = vsub.f32 %v7011_v2, %v3016_v33  ;;  %v3088_v19 = vsel %vm708_vm2, %v3062_v10, 0.0  ;;  %v3063_v40 = vmul.f32 %v7109_v17, %v7109_v17 }
 0x74a   : > { %7846 = vst [vmem:[#allocation6_spill] sm:$0xff] %v7111_v18  ;;  %v7120_v61 = vadd.f32 %v5821_v47, %v2906_v60  ;;  %v3001_v49 = vsel %vm708_vm2, %v7111_v18, 0.0  ;;  %3089 = vadd.xlane.f32.xlu1 %v3088_v19  ;;  %v3017_v5 = vmul.f32 0.015625, %v2955_v48  ;;  %7848 = vst [vmem:[#allocation8_spill] sm:$0xff] %v7133_v3  ;;  %v7139_v16 = vadd.f32 %v5823_v53, %v2914_v6 }
 0x74b   : > { %v2958_v28 = vpop.xlane.xlu1 %2957  ;;  %v3064_v57 = vmul.f32 %v7118_v25, %v7118_v25  ;;  %v3091_v32 = vsel %vm708_vm2, %v3063_v40, 0.0  ;;  %v3007_v24 = vsel %vm708_vm2, %v7133_v3, 0.0 }
 0x74c   : > { %7847 = vst [vmem:[#allocation7_spill] sm:$0xff] %v7120_v61  ;;  %v3004_v4 = vsel %vm708_vm2, %v7120_v61, 0.0  ;;  %3002 = vadd.xlane.f32.xlu0 %v3001_v49  ;;  %v3018_v55 = vmul.f32 0.015625, %v2958_v28  ;;  %v7136_v15 = vsub.f32 %v7021_v9, %v3017_v5  ;;  %7849 = vst [vmem:[#allocation9_spill] sm:$0xff] %v7139_v16  ;;  %v3010_v33 = vsel %vm708_vm2, %v7139_v16, 0.0 }
 0x74d   : > { %v2961_v23 = vpop.xlane.xlu0 %2960  ;;  %v3094_v21 = vsel %vm708_vm2, %v3064_v57, 0.0 }
 0x74e   : > { %3005 = vadd.xlane.f32.xlu1 %v3004_v4  ;;  %v3019_v22 = vmul.f32 0.015625, %v2961_v23  ;;  %v7142_v39 = vsub.f32 %v7027_v37, %v3018_v55  ;;  %v3065_v54 = vmul.f32 %v7136_v15, %v7136_v15 }
 0x74f   : > { %v2964_v8 = vpop.xlane.xlu1 %2963 }
 0x750   : > { %3092 = vadd.xlane.f32.xlu0 %v3091_v32  ;;  %v3020_v1 = vmul.f32 0.015625, %v2964_v8  ;;  %v7146_v27 = vsub.f32 %v7025_v58, %v3019_v22  ;;  %v3066_v11 = vmul.f32 %v7142_v39, %v7142_v39  ;;  %v3097_v10 = vsel %vm708_vm2, %v3065_v54, 0.0  ;;  %v5390_v32 = vld [vmem:[%s5972_s26 + $0x4] ss:$8 sps:$4 sm:$0xff]  }
 0x751   : > { %3417 = vmatprep.subr.bf16.mxu1 %v5390_v32 }
 0x752   : > { %3095 = vadd.xlane.f32.xlu1 %v3094_v21  ;;  %v7153_v7 = vsub.f32 %v7031_v63, %v3020_v1  ;;  %v3067_v48 = vmul.f32 %v7146_v27, %v7146_v27  ;;  %v3100_v49 = vsel %vm708_vm2, %v3066_v11, 0.0  ;;  %v5388_v21 = vld [vmem:[%s5972_s26] ss:$8 sps:$4 sm:$0xff]   ;;  %v5391_v11 = vld [vmem:[%s5972_s26 + $0x10] ss:$8 sps:$4 sm:$0xff]  }
 0x753   : > { %3418 = vmatpush1.bf16.msra.mxu1 %v5388_v21 }
 0x754   : > { %3008 = vadd.xlane.f32.xlu0 %v3007_v24  ;;  %v3068_v42 = vmul.f32 %v7153_v7, %v7153_v7  ;;  %v3103_v23 = vsel %vm708_vm2, %v3067_v48, 0.0  ;;  %v5399_v48 = vld [vmem:[%s5972_s26 + $0x34] ss:$8 sps:$4 sm:$0xff]  }
 0x756   : > { %v2967_v35 = vpop.xlane.xlu0 %2966  ;;  %3011 = vadd.xlane.f32.xlu1 %v3010_v33  ;;  %v3106_v8 = vsel %vm708_vm2, %v3068_v42, 0.0  ;;  %v5393_v33 = vld [vmem:[%s5972_s26 + $0x14] ss:$8 sps:$4 sm:$0xff]  }
 0x757   : > { %v3021_v60 = vmul.f32 0.015625, %v2967_v35  ;;  %3419 = vmatprep.subr.bf16.mxu1 %v5393_v33 }
 0x758   : > { %v2970_v56 = vpop.xlane.xlu1 %2969  ;;  %3098 = vadd.xlane.f32.xlu0 %v3097_v10  ;;  %3420 = vmatpush1.bf16.msra.mxu1 %v5391_v11  ;;  %v5394_v10 = vld [vmem:[%s5972_s26 + $0x20] ss:$8 sps:$4 sm:$0xff]  }
 0x759   : > { %v7163_v47 = vsub.f32 %v7041_v36, %v3021_v60  ;;  %v3022_v19 = vmul.f32 0.015625, %v2970_v56  ;;  %v5396_v56 = vld [vmem:[%s5972_s26 + $0x24] ss:$8 sps:$4 sm:$0xff]  }
 0x75a   : > { %v2973_v28 = vpop.xlane.xlu0 %2972  ;;  %3101 = vadd.xlane.f32.xlu1 %v3100_v49  ;;  %3421 = vmatprep.subr.bf16.mxu1 %v5396_v56 }
 0x75b   : > { %v7169_v5 = vsub.f32 %v7047_v20, %v3022_v19  ;;  %v3023_v4 = vmul.f32 0.015625, %v2973_v28  ;;  %v3069_v6 = vmul.f32 %v7163_v47, %v7163_v47  ;;  %v5397_v19 = vld [vmem:[%s5972_s26 + $0x30] ss:$8 sps:$4 sm:$0xff]   ;;  %s7857_s26 = sld [smem:[#allocation11_spill]] (!%p4969_p5) }
 0x75c   : > { %v2976_v40 = vpop.xlane.xlu1 %2975  ;;  %3104 = vadd.xlane.f32.xlu0 %v3103_v23  ;;  %3422 = vmatpush1.bf16.msra.mxu1 %v5394_v10 }
 0x75d   : > { %v7175_v55 = vsub.f32 %v7045_v50, %v3023_v4  ;;  %v3024_v57 = vmul.f32 0.015625, %v2976_v40  ;;  %v3070_v0 = vmul.f32 %v7169_v5, %v7169_v5  ;;  %v3109_v53 = vsel %vm708_vm2, %v3069_v6, 0.0  ;;  %3423 = vmatprep.subr.bf16.mxu1 %v5399_v48 }
 0x75e   : > { %3107 = vadd.xlane.f32.xlu1 %v3106_v8 }
 0x75f   : > { %v7181_v22 = vsub.f32 %v7051_v38, %v3024_v57  ;;  %v3071_v1 = vmul.f32 %v7175_v55, %v7175_v55  ;;  %v3112_v24 = vsel %vm708_vm2, %v3070_v0, 0.0 }
 0x760   : > { %3110 = vadd.xlane.f32.xlu0 %v3109_v53  ;;  %3424 = vmatpush1.bf16.msra.mxu1 %v5397_v19 }
 0x761   : > { %v3072_v54 = vmul.f32 %v7181_v22, %v7181_v22  ;;  %v3115_v35 = vsel %vm708_vm2, %v3071_v1, 0.0 }
 0x762   : > { %3113 = vadd.xlane.f32.xlu1 %v3112_v24 }
 0x763   : > { %v3118_v60 = vsel %vm708_vm2, %v3072_v54, 0.0 }
 0x764   : > { %3116 = vadd.xlane.f32.xlu0 %v3115_v35 }
 0x766   : > { %3119 = vadd.xlane.f32.xlu1 %v3118_v60 }
 0x7bb   : > { %v2979_v49 = vpop.xlane.xlu0 %2978 }
 0x7bc   : > { %v3025_v28 = vmul.f32 0.015625, %v2979_v49 }
 0x7bd   : > { %v2982_v42 = vpop.xlane.xlu1 %2981 }
 0x7be   : > { %v7200_v4 = vsub.f32 %v7061_v46, %v3025_v28  ;;  %v3026_v40 = vmul.f32 0.015625, %v2982_v42 }
 0x7bf   : > { %v2985_v23 = vpop.xlane.xlu0 %2984 }
 0x7c0   : > { %v7203_v6 = vsub.f32 %v7067_v44, %v3026_v40  ;;  %v3027_v57 = vmul.f32 0.015625, %v2985_v23  ;;  %v3073_v8 = vmul.f32 %v7200_v4, %v7200_v4 }
 0x7c1   : > { %v2988_v0 = vpop.xlane.xlu1 %2987 }
 0x7c2   : > { %v7208_v32 = vsub.f32 %v7065_v14, %v3027_v57  ;;  %v3028_v53 = vmul.f32 0.015625, %v2988_v0  ;;  %v3121_v1 = vsel %vm708_vm2, %v3073_v8, 0.0  ;;  %v3074_v21 = vmul.f32 %v7203_v6, %v7203_v6 }
 0x7c3   : > { %3122 = vadd.xlane.f32.xlu0 %v3121_v1 }
 0x7c4   : > { %v7214_v24 = vsub.f32 %v7071_v29, %v3028_v53  ;;  %v3124_v54 = vsel %vm708_vm2, %v3074_v21, 0.0  ;;  %v3075_v33 = vmul.f32 %v7208_v32, %v7208_v32 }
 0x7c5   : > { %3125 = vadd.xlane.f32.xlu1 %v3124_v54 }
 0x7c6   : > { %v3127_v35 = vsel %vm708_vm2, %v3075_v33, 0.0  ;;  %v3076_v11 = vmul.f32 %v7214_v24, %v7214_v24 }
 0x7c7   : > { %3128 = vadd.xlane.f32.xlu0 %v3127_v35  ;;  %v2991_v60 = vpop.xlane.xlu0 %2990 }
 0x7c8   : > { %v3029_v56 = vmul.f32 0.015625, %v2991_v60  ;;  %v3130_v10 = vsel %vm708_vm2, %v3076_v11, 0.0 }
 0x7c9   : > { %v2994_v48 = vpop.xlane.xlu1 %2993  ;;  %3131 = vadd.xlane.f32.xlu1 %v3130_v10 }
 0x7ca   : > { %v7224_v19 = vsub.f32 %v7081_v41, %v3029_v56  ;;  %v3030_v49 = vmul.f32 0.015625, %v2994_v48 }
 0x7cb   : > { %v2997_v28 = vpop.xlane.xlu0 %2996 }
 0x7cc   : > { %v7227_v42 = vsub.f32 %v7087_v43, %v3030_v49  ;;  %v3031_v40 = vmul.f32 0.015625, %v2997_v28  ;;  %v3077_v23 = vmul.f32 %v7224_v19, %v7224_v19 }
 0x7cd   : > { %v3000_v57 = vpop.xlane.xlu1 %2999 }
 0x7ce   : > { %v7232_v8 = vsub.f32 %v7085_v52, %v3031_v40  ;;  %v3032_v0 = vmul.f32 0.015625, %v3000_v57  ;;  %v3133_v53 = vsel %vm708_vm2, %v3077_v23, 0.0  ;;  %v3078_v1 = vmul.f32 %v7227_v42, %v7227_v42 }
 0x7cf   : > { %3134 = vadd.xlane.f32.xlu0 %v3133_v53 }
 0x7d0   : > { %v7238_v21 = vsub.f32 %v7091_v12, %v3032_v0  ;;  %v3136_v54 = vsel %vm708_vm2, %v3078_v1, 0.0  ;;  %v3079_v33 = vmul.f32 %v7232_v8, %v7232_v8 }
 0x7d1   : > { %3137 = vadd.xlane.f32.xlu1 %v3136_v54 }
 0x7d2   : > { %v3139_v35 = vsel %vm708_vm2, %v3079_v33, 0.0  ;;  %v3080_v11 = vmul.f32 %v7238_v21, %v7238_v21 }
 0x7d3   : > { %3140 = vadd.xlane.f32.xlu0 %v3139_v35 }
 0x7d4   : > { %v3142_v60 = vsel %vm708_vm2, %v3080_v11, 0.0 }
 0x7d5   : > { %3143 = vadd.xlane.f32.xlu1 %v3142_v60  ;;  %v3087_v56 = vpop.xlane.xlu0 %3086  ;;  %v7824_v60 = vsub.s32 2, %v6296_v45 }
 0x7d6   : > { %v3157_v10 = vmul.f32 0.015625, %v3087_v56 }
 0x7d7   : > { %v3090_v48 = vpop.xlane.xlu1 %3089 }
 0x7d8   : > { %v3181_v49 = vadd.f32 1e-05, %v3157_v10  ;;  %v3158_v28 = vmul.f32 0.015625, %v3090_v48 }
 0x7d9   : > { %v3003_v40 = vpop.xlane.xlu0 %3002 }
 0x7da   : > { %5560 = vrsqrt.f32 %v3181_v49  ;;  %v3182_v23 = vadd.f32 1e-05, %v3158_v28  ;;  %v3033_v57 = vmul.f32 0.015625, %v3003_v40 }
 0x7db   : > { %v3006_v0 = vpop.xlane.xlu1 %3005 }
 0x7dc   : > { %5562 = vrsqrt.f32 %v3182_v23  ;;  %v7248_v53 = vsub.f32 %v7111_v18, %v3033_v57  ;;  %v3034_v1 = vmul.f32 0.015625, %v3006_v0 }
 0x7dd   : > { %v3093_v54 = vpop.xlane.xlu0 %3092 }
 0x7de   : > { %v7251_v33 = vsub.f32 %v7120_v61, %v3034_v1  ;;  %v3159_v35 = vmul.f32 0.015625, %v3093_v54  ;;  %v3081_v11 = vmul.f32 %v7248_v53, %v7248_v53  ;;  %v5824_v1 = vld [vmem:[%s5945_s23] sm:$0xf] }
 0x7df   : > { %v3096_v56 = vpop.xlane.xlu1 %3095  ;;  %v7263_v54 = vrot.slane %v5824_v1, %v7824_v60 }
 0x7e0   : > { %v3183_v10 = vadd.f32 1e-05, %v3159_v35  ;;  %v3160_v48 = vmul.f32 0.015625, %v3096_v56  ;;  %v3145_v49 = vsel %vm708_vm2, %v3081_v11, 0.0  ;;  %v3082_v28 = vmul.f32 %v7251_v33, %v7251_v33 }
 0x7e1   : > { %3146 = vadd.xlane.f32.xlu0 %v3145_v49  ;;  %v3009_v40 = vpop.xlane.xlu0 %3008 }
 0x7e2   : > { %5564 = vrsqrt.f32 %v3183_v10  ;;  %v3184_v23 = vadd.f32 1e-05, %v3160_v48  ;;  %v3035_v57 = vmul.f32 0.015625, %v3009_v40  ;;  %v3148_v0 = vsel %vm708_vm2, %v3082_v28, 0.0 }
 0x7e3   : > { %3149 = vadd.xlane.f32.xlu1 %v3148_v0  ;;  %v3012_v35 = vpop.xlane.xlu1 %3011 }
 0x7e4   : > { %v5561_v11 = vpop.eup %5560  ;;  %5566 = vrsqrt.f32 %v3184_v23  ;;  %v7267_v62 = vsub.f32 %v7133_v3, %v3035_v57  ;;  %v3036_v49 = vmul.f32 0.015625, %v3012_v35  ;;  %v7850_v57 = vsub.s32 3, %v6296_v45 }
 0x7e5   : > { %v3229_v10 = vmul.f32 %v5561_v11, %v7100_v13  ;;  %v3099_v48 = vpop.xlane.xlu0 %3098 }
 0x7e6   : > { %v5563_v40 = vpop.eup %5562  ;;  %v7271_v28 = vsub.f32 %v7139_v16, %v3036_v49  ;;  %v3161_v61 = vmul.f32 0.015625, %v3099_v48  ;;  %v3083_v0 = vmul.f32 %v7267_v62, %v7267_v62  ;;  %v7279_v3 = vrot.slane %v5824_v1, %v7850_v57 }
 0x7e7   : > { %v3257_v60 = vmul.f32 %v7263_v54, %v3229_v10  ;;  %v3230_v56 = vmul.f32 %v5563_v40, %v7103_v26  ;;  %v3102_v23 = vpop.xlane.xlu1 %3101 }
 0x7e8   : > { %v3185_v35 = vadd.f32 1e-05, %v3161_v61  ;;  %v3162_v13 = vmul.f32 0.015625, %v3102_v23  ;;  %v3151_v11 = vsel %vm708_vm2, %v3083_v0, 0.0  ;;  %v3084_v49 = vmul.f32 %v7271_v28, %v7271_v28 }
 0x7e9   : > { %v3258_v48 = vmul.f32 %v7263_v54, %v3230_v56  ;;  %3152 = vadd.xlane.f32.xlu0 %v3151_v11  ;;  %v3105_v16 = vpop.xlane.xlu0 %3104  ;;  %v3285_v1 = vadd.f32 %v7279_v3, %v3257_v60 }
 0x7ea   : > { %5568 = vrsqrt.f32 %v3185_v35  ;;  %v3186_v10 = vadd.f32 1e-05, %v3162_v13  ;;  %v3163_v18 = vmul.f32 0.015625, %v3105_v16  ;;  %v3154_v26 = vsel %vm708_vm2, %v3084_v49, 0.0 }
 0x7eb   : > { %3155 = vadd.xlane.f32.xlu1 %v3154_v26  ;;  %v3108_v40 = vpop.xlane.xlu1 %3107  ;;  %v3286_v61 = vadd.f32 %v7279_v3, %v3258_v48 }
 0x7ec   : > { %v5565_v23 = vpop.eup %5564  ;;  %5570 = vrsqrt.f32 %v3186_v10  ;;  %v3187_v0 = vadd.f32 1e-05, %v3163_v18  ;;  %v3164_v57 = vmul.f32 0.015625, %v3108_v40  ;;  %v7851_v10 = vmov 0  }
 0x7ed   : > { %v3231_v45 = vmul.f32 %v5565_v23, %v7109_v17  ;;  %v3111_v56 = vpop.xlane.xlu0 %3110  ;;  %v3317_v11 = vpack.c.bf16 %v3286_v61, %v3285_v1 }
 0x7ee   : > { %v5567_v12 = vpop.eup %5566  ;;  %5572 = vrsqrt.f32 %v3187_v0  ;;  %v3188_v35 = vadd.f32 1e-05, %v3164_v57  ;;  %v3165_v16 = vmul.f32 0.015625, %v3111_v56 }
 0x7ef   : > { %v3232_v13 = vmul.f32 %v5567_v12, %v7118_v25  ;;  %v3114_v49 = vpop.xlane.xlu1 %3113  ;;  %4940 = vmatmul.mubr.msk.bf16.vlgmr.msra.gmra.mrb[56].mxu1 %vm708_vm2, %v3317_v11  ;;  %v3259_v60 = vmul.f32 %v7263_v54, %v3231_v45 }
 0x7f0   : > { %5574 = vrsqrt.f32 %v3188_v35  ;;  %v3166_v48 = vmul.f32 0.015625, %v3114_v49  ;;  %3459 = vmatprep.mubr.bf16.mxu1 %v7851_v10  ;;  %v3189_v17 = vadd.f32 1e-05, %v3165_v16 }
 0x7f1   : > { %v3260_v18 = vmul.f32 %v7263_v54, %v3232_v13  ;;  %v3117_v40 = vpop.xlane.xlu0 %3116  ;;  %v3287_v61 = vadd.f32 %v7279_v3, %v3259_v60 }
 0x7f2   : > { %v3190_v26 = vadd.f32 1e-05, %v3166_v48  ;;  %v3167_v56 = vmul.f32 0.015625, %v3117_v40 }
 0x7f3   : > { %v3120_v1 = vpop.xlane.xlu1 %3119  ;;  %v3288_v23 = vadd.f32 %v7279_v3, %v3260_v18 }
 0x7f4   : > { %v5569_v12 = vpop.eup %5568  ;;  %5576 = vrsqrt.f32 %v3190_v26  ;;  %v3168_v25 = vmul.f32 0.015625, %v3120_v1  ;;  %v3191_v48 = vadd.f32 1e-05, %v3167_v56 }
 0x7f5   : > { %v3233_v0 = vmul.f32 %v5569_v12, %v7136_v15  ;;  %v3318_v45 = vpack.c.bf16 %v3288_v23, %v3287_v61  ;;  %5578 = vrsqrt.f32 %v3189_v17 }
 0x7f6   : > { %v5571_v57 = vpop.eup %5570  ;;  %v3192_v13 = vadd.f32 1e-05, %v3168_v25 }
 0x7f7   : > { %v3234_v11 = vmul.f32 %v5571_v57, %v7142_v39  ;;  %4941 = vmatmul.mubr.msk.bf16.gmra.mrb[60].mxu1 %vm708_vm2, %v3318_v45  ;;  %v3261_v35 = vmul.f32 %v7263_v54, %v3233_v0 }
 0x7f8   : > { %v5573_v16 = vpop.eup %5572  ;;  %3469 = vmatprep.mubr.bf16.mxu1 %v7851_v10  ;;  %5580 = vrsqrt.f32 %v3192_v13 }
 0x7f9   : > { %v3262_v49 = vmul.f32 %v7263_v54, %v3234_v11  ;;  %v3235_v15 = vmul.f32 %v5573_v16, %v7146_v27  ;;  %v3289_v17 = vadd.f32 %v7279_v3, %v3261_v35  ;;  %5582 = vrsqrt.f32 %v3191_v48 }
 0x7fa   : > { %v5575_v60 = vpop.eup %5574 }
 0x7fb   : > { %v3236_v18 = vmul.f32 %v5575_v60, %v7153_v7  ;;  %v3290_v39 = vadd.f32 %v7279_v3, %v3262_v49  ;;  %v3263_v61 = vmul.f32 %v7263_v54, %v3235_v15  ;;  %v5400_v15 = vld [vmem:[%s5983_s16 + $0x40] sm:$0xff]  }
 0x7fc   : > { %5062 = vmatprep.subr.bf16.mxu0 %v5400_v15 }
 0x7fd   : > { %v3319_v26 = vpack.c.bf16 %v3290_v39, %v3289_v17  ;;  %v3264_v40 = vmul.f32 %v7263_v54, %v3236_v18  ;;  %v3291_v25 = vadd.f32 %v7279_v3, %v3263_v61  ;;  %v5401_v18 = vld [vmem:[%s5983_s16] sm:$0xff]   ;;  %v5402_v17 = vld [vmem:[%s5983_s16 + $0x48] sm:$0xff]  }
 0x7fe   : > { %v5577_v1 = vpop.eup %5576  ;;  %5063 = vmatpush3.bf16.msra.mxu0 %v5401_v18  ;;  %v5403_v39 = vld [vmem:[%s5983_s16 + $0x8] sm:$0xff]  }
 0x7ff   : > { %4942 = vmatmul.mubr.msk.bf16.gmra.mrb[64].mxu1 %vm708_vm2, %v3319_v26  ;;  %v5579_v23 = vpop.eup %5578  ;;  %v3238_v27 = vmul.f32 %v5577_v1, %v7169_v5  ;;  %v3292_v7 = vadd.f32 %v7279_v3, %v3264_v40  ;;  %5064 = vmatprep.subr.bf16.mxu0 %v5402_v17  ;;  %v5404_v1 = vld [vmem:[%s5983_s16 + $0x50] sm:$0xff]  }
 0x800   : > { %3479 = vmatprep.mubr.bf16.mxu1 %v7851_v10  ;;  %v3237_v12 = vmul.f32 %v5579_v23, %v7163_v47  ;;  %v5405_v23 = vld [vmem:[%s5983_s16 + $0x10] sm:$0xff]  }
 0x801   : > { %v3320_v0 = vpack.c.bf16 %v3292_v7, %v3291_v25  ;;  %v3266_v45 = vmul.f32 %v7263_v54, %v3238_v27 }
 0x802   : > { %v5581_v57 = vpop.eup %5580  ;;  %v3265_v56 = vmul.f32 %v7263_v54, %v3237_v12  ;;  %5065 = vmatpush3.bf16.msra.mxu0 %v5403_v39 }
 0x803   : > { %v5583_v11 = vpop.eup %5582  ;;  %v3240_v5 = vmul.f32 %v5581_v57, %v7181_v22  ;;  %v3294_v35 = vadd.f32 %v7279_v3, %v3266_v45  ;;  %5066 = vmatprep.subr.bf16.mxu0 %v5404_v1  ;;  %v5406_v45 = vld [vmem:[%s5983_s16 + $0x58] sm:$0xff]  }
 0x804   : > { %v3239_v47 = vmul.f32 %v5583_v11, %v7175_v55  ;;  %v3293_v16 = vadd.f32 %v7279_v3, %v3265_v56  ;;  %v5407_v56 = vld [vmem:[%s5983_s16 + $0x18] sm:$0xff]  }
 0x805   : > { %v3268_v49 = vmul.f32 %v7263_v54, %v3240_v5 }
 0x806   : > { %v3321_v13 = vpack.c.bf16 %v3294_v35, %v3293_v16  ;;  %v3267_v60 = vmul.f32 %v7263_v54, %v3239_v47  ;;  %5067 = vmatpush3.bf16.msra.mxu0 %v5405_v23  ;;  %v5408_v47 = vld [vmem:[%s5983_s16 + $0x60] sm:$0xff]  }
 0x807   : > { %4943 = vmatmul.mubr.msk.bf16.gmra.mrb[68].mxu1 %vm708_vm2, %v3320_v0  ;;  %v3296_v22 = vadd.f32 %v7279_v3, %v3268_v49  ;;  %5068 = vmatprep.subr.bf16.mxu0 %v5406_v45  ;;  %v5409_v16 = vld [vmem:[%s5983_s16 + $0x20] sm:$0xff]  }
 0x808   : > { %3489 = vmatprep.mubr.bf16.mxu1 %v7851_v10  ;;  %v3295_v48 = vadd.f32 %v7279_v3, %v3267_v60  ;;  %v5410_v60 = vld [vmem:[%s5983_s16 + $0x68] sm:$0xff]  }
 0x80a   : > { %v3322_v55 = vpack.c.bf16 %v3296_v22, %v3295_v48  ;;  %5069 = vmatpush3.bf16.msra.mxu0 %v5407_v56  ;;  %v5411_v48 = vld [vmem:[%s5983_s16 + $0x28] sm:$0xff]  }
 0x80b   : > { %5070 = vmatprep.subr.bf16.mxu0 %v5408_v47  ;;  %v5414_v47 = vld [vmem:[%s5983_s16 + $0x78] sm:$0xff]  }
 0x80e   : > { %5071 = vmatpush3.bf16.msra.mxu0 %v5409_v16  ;;  %v5415_v16 = vld [vmem:[%s5983_s16 + $0x38] sm:$0xff]  }
 0x80f   : > { %4944 = vmatmul.mubr.msk.bf16.gmra.mrb[72].mxu1 %vm708_vm2, %v3321_v13  ;;  %5072 = vmatprep.subr.bf16.mxu0 %v5410_v60 }
 0x810   : > { %3499 = vmatprep.mubr.bf16.mxu1 %v7851_v10 }
 0x812   : > { %5073 = vmatpush3.bf16.msra.mxu0 %v5411_v48 }
 0x817   : > { %4945 = vmatmul.mubr.msk.bf16.gmra.mrb[76].mxu1 %vm708_vm2, %v3322_v55 }
 0x818   : > { %3509 = vmatprep.mubr.bf16.mxu1 %v7851_v10 }
 0x850   : > { %v3123_v26 = vpop.xlane.xlu0 %3122 }
 0x851   : > { %v3169_v40 = vmul.f32 0.015625, %v3123_v26 }
 0x852   : > { %v3126_v61 = vpop.xlane.xlu1 %3125 }
 0x853   : > { %v3193_v27 = vadd.f32 1e-05, %v3169_v40  ;;  %v3170_v7 = vmul.f32 0.015625, %v3126_v61  ;;  %v5412_v61 = vld [vmem:[%s5983_s16 + $0x70] sm:$0xff]  }
 0x854   : > { %v3129_v12 = vpop.xlane.xlu0 %3128  ;;  %5074 = vmatprep.subr.bf16.mxu0 %v5412_v61 }
 0x855   : > { %5584 = vrsqrt.f32 %v3193_v27  ;;  %v3194_v25 = vadd.f32 1e-05, %v3170_v7  ;;  %v3171_v0 = vmul.f32 0.015625, %v3129_v12 }
 0x856   : > { %v3132_v57 = vpop.xlane.xlu1 %3131 }
 0x857   : > { %5586 = vrsqrt.f32 %v3194_v25  ;;  %v3195_v11 = vadd.f32 1e-05, %v3171_v0  ;;  %v3172_v5 = vmul.f32 0.015625, %v3132_v57  ;;  %v5413_v0 = vld [vmem:[%s5983_s16 + $0x30] sm:$0xff]   ;;  %s7861_s16 = sld [smem:[#allocation13_spill]] (!%p4969_p5) }
 0x858   : > { %5075 = vmatpush3.bf16.msra.mxu0 %v5413_v0 }
 0x859   : > { %5588 = vrsqrt.f32 %v3195_v11  ;;  %v3196_v35 = vadd.f32 1e-05, %v3172_v5  ;;  %5076 = vmatprep.subr.bf16.mxu0 %v5414_v47 }
 0x85b   : > { %5590 = vrsqrt.f32 %v3196_v35 }
 0x85c   : > { %v3135_v13 = vpop.xlane.xlu0 %3134  ;;  %5077 = vmatpush3.bf16.msra.mxu0 %v5415_v16 }
 0x85d   : > { %v3173_v49 = vmul.f32 0.015625, %v3135_v13 }
 0x85e   : > { %v3138_v22 = vpop.xlane.xlu1 %3137 }
 0x85f   : > { %v5585_v55 = vpop.eup %5584  ;;  %v3197_v15 = vadd.f32 1e-05, %v3173_v49  ;;  %v3174_v18 = vmul.f32 0.015625, %v3138_v22 }
 0x860   : > { %v3241_v17 = vmul.f32 %v5585_v55, %v7200_v4  ;;  %v3141_v39 = vpop.xlane.xlu0 %3140 }
 0x861   : > { %v5587_v26 = vpop.eup %5586  ;;  %5592 = vrsqrt.f32 %v3197_v15  ;;  %v3198_v40 = vadd.f32 1e-05, %v3174_v18  ;;  %v3175_v1 = vmul.f32 0.015625, %v3141_v39 }
 0x862   : > { %v3242_v23 = vmul.f32 %v5587_v26, %v7203_v6  ;;  %v3144_v27 = vpop.xlane.xlu1 %3143  ;;  %v3269_v7 = vmul.f32 %v7263_v54, %v3241_v17 }
 0x863   : > { %v5589_v12 = vpop.eup %5588  ;;  %5594 = vrsqrt.f32 %v3198_v40  ;;  %v3176_v25 = vmul.f32 0.015625, %v3144_v27  ;;  %v3199_v57 = vadd.f32 1e-05, %v3175_v1 }
 0x864   : > { %v3270_v4 = vmul.f32 %v7263_v54, %v3242_v23  ;;  %v3243_v11 = vmul.f32 %v5589_v12, %v7208_v32  ;;  %v3297_v5 = vadd.f32 %v7279_v3, %v3269_v7 }
 0x865   : > { %v5591_v45 = vpop.eup %5590  ;;  %v3200_v56 = vadd.f32 1e-05, %v3176_v25 }
 0x866   : > { %v3244_v6 = vmul.f32 %v5591_v45, %v7214_v24  ;;  %v3298_v35 = vadd.f32 %v7279_v3, %v3270_v4  ;;  %v3271_v60 = vmul.f32 %v7263_v54, %v3243_v11 }
 0x867   : > { %5596 = vrsqrt.f32 %v3200_v56 }
 0x868   : > { %v3323_v13 = vpack.c.bf16 %v3298_v35, %v3297_v5  ;;  %v3272_v49 = vmul.f32 %v7263_v54, %v3244_v6  ;;  %5598 = vrsqrt.f32 %v3199_v57  ;;  %v3299_v15 = vadd.f32 %v7279_v3, %v3271_v60 }
 0x86a   : > { %4946 = vmatmul.mubr.msk.bf16.gmra.mrb[80].mxu1 %vm708_vm2, %v3323_v13  ;;  %v3300_v24 = vadd.f32 %v7279_v3, %v3272_v49 }
 0x86b   : > { %v5593_v32 = vpop.eup %5592  ;;  %3519 = vmatprep.mubr.bf16.mxu1 %v7851_v10 }
 0x86c   : > { %v3245_v48 = vmul.f32 %v5593_v32, %v7224_v19  ;;  %v3324_v39 = vpack.c.bf16 %v3300_v24, %v3299_v15 }
 0x86d   : > { %v5595_v22 = vpop.eup %5594 }
 0x86e   : > { %v3246_v55 = vmul.f32 %v5595_v22, %v7227_v42  ;;  %v3147_v18 = vpop.xlane.xlu0 %3146  ;;  %v3273_v27 = vmul.f32 %v7263_v54, %v3245_v48 }
 0x86f   : > { %v3177_v17 = vmul.f32 0.015625, %v3147_v18 }
 0x870   : > { %v3274_v26 = vmul.f32 %v7263_v54, %v3246_v55  ;;  %v3150_v1 = vpop.xlane.xlu1 %3149  ;;  %v3301_v0 = vadd.f32 %v7279_v3, %v3273_v27 }
 0x871   : > { %v5597_v40 = vpop.eup %5596  ;;  %v3201_v61 = vadd.f32 1e-05, %v3177_v17  ;;  %v3178_v23 = vmul.f32 0.015625, %v3150_v1 }
 0x872   : > { %4947 = vmatmul.mubr.msk.bf16.gmra.mrb[84].mxu1 %vm708_vm2, %v3324_v39  ;;  %v5599_v7 = vpop.eup %5598  ;;  %v3248_v19 = vmul.f32 %v5597_v40, %v7238_v21  ;;  %v3302_v12 = vadd.f32 %v7279_v3, %v3274_v26 }
 0x873   : > { %3529 = vmatprep.mubr.bf16.mxu1 %v7851_v10  ;;  %5600 = vrsqrt.f32 %v3201_v61  ;;  %v3202_v42 = vadd.f32 1e-05, %v3178_v23  ;;  %v3247_v25 = vmul.f32 %v5599_v7, %v7232_v8 }
 0x874   : > { %v3325_v57 = vpack.c.bf16 %v3302_v12, %v3301_v0  ;;  %v3276_v56 = vmul.f32 %v7263_v54, %v3248_v19 }
 0x875   : > { %5602 = vrsqrt.f32 %v3202_v42  ;;  %v3275_v21 = vmul.f32 %v7263_v54, %v3247_v25 }
 0x876   : > { %v3153_v4 = vpop.xlane.xlu0 %3152  ;;  %v3304_v8 = vadd.f32 %v7279_v3, %v3276_v56 }
 0x877   : > { %v3179_v45 = vmul.f32 0.015625, %v3153_v4  ;;  %v3303_v16 = vadd.f32 %v7279_v3, %v3275_v21 }
 0x878   : > { %v3156_v11 = vpop.xlane.xlu1 %3155 }
 0x879   : > { %v3203_v6 = vadd.f32 1e-05, %v3179_v45  ;;  %v3180_v5 = vmul.f32 0.015625, %v3156_v11  ;;  %v3326_v60 = vpack.c.bf16 %v3304_v8, %v3303_v16 }
 0x87a   : > { %4948 = vmatmul.mubr.msk.bf16.gmra.mrb[88].mxu1 %vm708_vm2, %v3325_v57 }
 0x87b   : > { %3539 = vmatprep.mubr.bf16.mxu1 %v7851_v10  ;;  %5604 = vrsqrt.f32 %v3203_v6  ;;  %v3204_v35 = vadd.f32 1e-05, %v3180_v5 }
 0x87d   : > { %v5601_v47 = vpop.eup %5600  ;;  %5606 = vrsqrt.f32 %v3204_v35 }
 0x87e   : > { %v3249_v13 = vmul.f32 %v5601_v47, %v7248_v53 }
 0x87f   : > { %v5603_v49 = vpop.eup %5602 }
 0x880   : > { %v3250_v32 = vmul.f32 %v5603_v49, %v7251_v33  ;;  %v3277_v24 = vmul.f32 %v7263_v54, %v3249_v13 }
 0x882   : > { %4949 = vmatmul.mubr.msk.bf16.gmra.mrb[92].mxu1 %vm708_vm2, %v3326_v60  ;;  %v3278_v22 = vmul.f32 %v7263_v54, %v3250_v32  ;;  %v3305_v15 = vadd.f32 %v7279_v3, %v3277_v24 }
 0x883   : > { %3549 = vmatprep.mubr.bf16.mxu1 %v7851_v10 }
 0x884   : > { %v3306_v48 = vadd.f32 %v7279_v3, %v3278_v22 }
 0x885   : > { %v5605_v55 = vpop.eup %5604 }
 0x886   : > { %v3251_v53 = vmul.f32 %v5605_v55, %v7267_v62  ;;  %v3327_v17 = vpack.c.bf16 %v3306_v48, %v3305_v15  ;;  %v3329_v62 = vld [vmem:[%s5977_s14] sm:$0x3] }
 0x887   : > { %v5607_v18 = vpop.eup %5606  ;;  %v7395_v23 = vrot.slane %v3329_v62, %v6305_v31 }
 0x888   : > { %v3252_v33 = vmul.f32 %v5607_v18, %v7271_v28  ;;  %v3279_v39 = vmul.f32 %v7263_v54, %v3251_v53  ;;  %v7398_v28 = vrot.slane %v3329_v62, %v6319_v59 }
 0x88a   : > { %4950 = vmatmul.mubr.msk.bf16.gmra.mrb[96].mxu1 %vm708_vm2, %v3327_v17  ;;  %v3280_v26 = vmul.f32 %v7263_v54, %v3252_v33  ;;  %v3307_v1 = vadd.f32 %v7279_v3, %v3279_v39 }
 0x88b   : > { %3559 = vmatprep.mubr.bf16.mxu1 %v7851_v10 }
 0x88c   : > { %v3308_v40 = vadd.f32 %v7279_v3, %v3280_v26 }
 0x88e   : > { %v3328_v61 = vpack.c.bf16 %v3308_v40, %v3307_v1 }
 0x892   : > { %4951 = vmatmul.mubr.msk.bf16.gmra.mrb[100].mxu1 %vm708_vm2, %v3328_v61 }
 0x8c2   : > { %v3451_v27 = vpop.f32.mrb[56].mxu1 }
 0x8c3   : > { %v7401_v7 = vadd.f32 %v3451_v27, %v7395_v23  ;;  %v3453_v10 = vpop.f32.mrb[57].mxu1 }
 0x8c4   : > { %v7404_v54 = vadd.f32 %v3453_v10, %v7398_v28  ;;  %v3455_v19 = vpop.f32.mrb[58].mxu1 }
 0x8c5   : > { %v3570_v3 = vmul.f32 -1.702, %v7401_v7  ;;  %v7408_v42 = vadd.f32 %v3455_v19, %v7395_v23  ;;  %v3457_v12 = vpop.f32.mrb[59].mxu1 }
 0x8c6   : > { %v3571_v25 = vmul.f32 -1.702, %v7404_v54  ;;  %v7412_v0 = vadd.f32 %v3457_v12, %v7398_v28 }
 0x8c7   : > { %v3618_v4 = vmul.f32 1.442695, %v3570_v3  ;;  %v3572_v45 = vmul.f32 -1.702, %v7408_v42 }
 0x8c8   : > { %v3620_v57 = vmul.f32 1.442695, %v3571_v25  ;;  %v3573_v56 = vmul.f32 -1.702, %v7412_v0 }
 0x8c9   : > { %5608 = vpow2.f32 %v3618_v4  ;;  %v3622_v11 = vmul.f32 1.442695, %v3572_v45 }
 0x8ca   : > { %5610 = vpow2.f32 %v3620_v57  ;;  %v3624_v6 = vmul.f32 1.442695, %v3573_v56  ;;  %v3461_v5 = vpop.f32.mrb[60].mxu1 }
 0x8cb   : > { %5612 = vpow2.f32 %v3622_v11  ;;  %v7417_v21 = vadd.f32 %v3461_v5, %v7395_v23  ;;  %v3463_v35 = vpop.f32.mrb[61].mxu1 }
 0x8cc   : > { %5614 = vpow2.f32 %v3624_v6  ;;  %v7420_v8 = vadd.f32 %v3463_v35, %v7398_v28  ;;  %v3465_v47 = vpop.f32.mrb[62].mxu1 }
 0x8cd   : > { %v3574_v16 = vmul.f32 -1.702, %v7417_v21  ;;  %v7424_v13 = vadd.f32 %v3465_v47, %v7395_v23  ;;  %v3467_v49 = vpop.f32.mrb[63].mxu1 }
 0x8ce   : > { %v3575_v60 = vmul.f32 -1.702, %v7420_v8  ;;  %v7428_v32 = vadd.f32 %v3467_v49, %v7398_v28 }
 0x8cf   : > { %v3626_v24 = vmul.f32 1.442695, %v3574_v16  ;;  %v3576_v22 = vmul.f32 -1.702, %v7424_v13 }
 0x8d0   : > { %v3628_v48 = vmul.f32 1.442695, %v3575_v60  ;;  %v3577_v55 = vmul.f32 -1.702, %v7428_v32 }
 0x8d1   : > { %5616 = vpow2.f32 %v3626_v24  ;;  %v3630_v15 = vmul.f32 1.442695, %v3576_v22 }
 0x8d2   : > { %5618 = vpow2.f32 %v3628_v48  ;;  %v3632_v53 = vmul.f32 1.442695, %v3577_v55  ;;  %v3471_v18 = vpop.f32.mrb[64].mxu1 }
 0x8d3   : > { %v5609_v17 = vpop.eup %5608  ;;  %5620 = vpow2.f32 %v3630_v15  ;;  %v7433_v33 = vadd.f32 %v3471_v18, %v7395_v23  ;;  %v3473_v39 = vpop.f32.mrb[65].mxu1 }
 0x8d4   : > { %v5611_v26 = vpop.eup %5610  ;;  %v3714_v40 = vadd.f32 1.0, %v5609_v17  ;;  %5622 = vpow2.f32 %v3632_v53  ;;  %v7436_v1 = vadd.f32 %v3473_v39, %v7398_v28  ;;  %v3475_v61 = vpop.f32.mrb[66].mxu1 }
 0x8d5   : > { %v5613_v62 = vpop.eup %5612  ;;  %v3715_v27 = vadd.f32 1.0, %v5611_v26  ;;  %v3578_v10 = vmul.f32 -1.702, %v7433_v33  ;;  %v7440_v19 = vadd.f32 %v3475_v61, %v7395_v23  ;;  %v3477_v3 = vpop.f32.mrb[67].mxu1 }
 0x8d6   : > { %v5615_v12 = vpop.eup %5614  ;;  %5624 = vrcp.f32 %v3714_v40  ;;  %v3716_v25 = vadd.f32 1.0, %v5613_v62  ;;  %v3579_v4 = vmul.f32 -1.702, %v7436_v1  ;;  %v7444_v45 = vadd.f32 %v3477_v3, %v7398_v28 }
 0x8d7   : > { %5626 = vrcp.f32 %v3715_v27  ;;  %v3717_v57 = vadd.f32 1.0, %v5615_v12  ;;  %v3634_v56 = vmul.f32 1.442695, %v3578_v10  ;;  %v3580_v11 = vmul.f32 -1.702, %v7440_v19 }
 0x8d8   : > { %5628 = vrcp.f32 %v3716_v25  ;;  %v3636_v6 = vmul.f32 1.442695, %v3579_v4  ;;  %v3581_v5 = vmul.f32 -1.702, %v7444_v45 }
 0x8d9   : > { %5630 = vrcp.f32 %v3717_v57  ;;  %v3638_v35 = vmul.f32 1.442695, %v3580_v11 }
 0x8da   : > { %5632 = vpow2.f32 %v3634_v56  ;;  %v3640_v47 = vmul.f32 1.442695, %v3581_v5  ;;  %v3481_v16 = vpop.f32.mrb[68].mxu1 }
 0x8db   : > { %v5617_v49 = vpop.eup %5616  ;;  %5634 = vpow2.f32 %v3636_v6  ;;  %v7449_v60 = vadd.f32 %v3481_v16, %v7395_v23  ;;  %v3483_v24 = vpop.f32.mrb[69].mxu1 }
 0x8dc   : > { %v5619_v22 = vpop.eup %5618  ;;  %v3718_v48 = vadd.f32 1.0, %v5617_v49  ;;  %5636 = vpow2.f32 %v3638_v35  ;;  %v7452_v55 = vadd.f32 %v3483_v24, %v7398_v28  ;;  %v3485_v15 = vpop.f32.mrb[70].mxu1 }
 0x8dd   : > { %v5621_v53 = vpop.eup %5620  ;;  %v3719_v18 = vadd.f32 1.0, %v5619_v22  ;;  %5638 = vpow2.f32 %v3640_v47  ;;  %v3582_v17 = vmul.f32 -1.702, %v7449_v60  ;;  %v7456_v39 = vadd.f32 %v3485_v15, %v7395_v23  ;;  %v3487_v26 = vpop.f32.mrb[71].mxu1 }
 0x8de   : > { %v5623_v40 = vpop.eup %5622  ;;  %5640 = vrcp.f32 %v3718_v48  ;;  %v3720_v61 = vadd.f32 1.0, %v5621_v53  ;;  %v3583_v62 = vmul.f32 -1.702, %v7452_v55  ;;  %v7460_v27 = vadd.f32 %v3487_v26, %v7398_v28 }
 0x8df   : > { %5642 = vrcp.f32 %v3719_v18  ;;  %v3721_v10 = vadd.f32 1.0, %v5623_v40  ;;  %v3642_v3 = vmul.f32 1.442695, %v3582_v17  ;;  %v3584_v12 = vmul.f32 -1.702, %v7456_v39 }
 0x8e0   : > { %v5625_v25 = vpop.eup %5624  ;;  %5644 = vrcp.f32 %v3720_v61  ;;  %v3644_v4 = vmul.f32 1.442695, %v3583_v62  ;;  %v3585_v57 = vmul.f32 -1.702, %v7460_v27 }
 0x8e1   : > { %v5627_v56 = vpop.eup %5626  ;;  %5646 = vrcp.f32 %v3721_v10  ;;  %v3646_v11 = vmul.f32 1.442695, %v3584_v12  ;;  %v3810_v16 = vmul.f32 %v5625_v25, %v7401_v7 }
 0x8e2   : > { %v5629_v6 = vpop.eup %5628  ;;  %5648 = vpow2.f32 %v3642_v3  ;;  %v3648_v5 = vmul.f32 1.442695, %v3585_v57  ;;  %v3491_v35 = vpop.f32.mrb[72].mxu1  ;;  %v3811_v15 = vmul.f32 %v5627_v56, %v7404_v54 }
 0x8e3   : > { %v5631_v47 = vpop.eup %5630  ;;  %v3812_v49 = vmul.f32 %v5629_v6, %v7408_v42  ;;  %5650 = vpow2.f32 %v3644_v4  ;;  %v7467_v24 = vadd.f32 %v3491_v35, %v7395_v23  ;;  %v3493_v22 = vpop.f32.mrb[73].mxu1 }
 0x8e4   : > { %v5633_v48 = vpop.eup %5632  ;;  %v3813_v53 = vmul.f32 %v5631_v47, %v7412_v0  ;;  %5652 = vpow2.f32 %v3646_v11  ;;  %v7472_v18 = vadd.f32 %v3493_v22, %v7398_v28  ;;  %v3495_v17 = vpop.f32.mrb[74].mxu1 }
 0x8e5   : > { %v5635_v26 = vpop.eup %5634  ;;  %v3890_v40 = vpack.c.bf16 %v3812_v49, %v3810_v16  ;;  %v3722_v7 = vadd.f32 1.0, %v5633_v48  ;;  %5654 = vpow2.f32 %v3648_v5  ;;  %v3586_v42 = vmul.f32 -1.702, %v7467_v24  ;;  %v3497_v61 = vpop.f32.mrb[75].mxu1 }
 0x8e6   : > { %v5637_v62 = vpop.eup %5636  ;;  %v3723_v10 = vadd.f32 1.0, %v5635_v26  ;;  %v3587_v3 = vmul.f32 -1.702, %v7472_v18  ;;  %v7477_v54 = vadd.f32 %v3495_v17, %v7395_v23  ;;  %v7480_v0 = vadd.f32 %v3497_v61, %v7398_v28 }
 0x8e7   : > { %v5639_v12 = vpop.eup %5638  ;;  %5656 = vrcp.f32 %v3722_v7  ;;  %v3724_v25 = vadd.f32 1.0, %v5637_v62  ;;  %v3650_v4 = vmul.f32 1.442695, %v3586_v42  ;;  %v3891_v57 = vpack.c.bf16 %v3813_v53, %v3811_v15 }
 0x8e8   : > { %v5641_v56 = vpop.eup %5640  ;;  %5658 = vrcp.f32 %v3723_v10  ;;  %v3725_v11 = vadd.f32 1.0, %v5639_v12  ;;  %v3652_v6 = vmul.f32 1.442695, %v3587_v3  ;;  %v3588_v5 = vmul.f32 -1.702, %v7477_v54 }
 0x8e9   : > { %v5643_v35 = vpop.eup %5642  ;;  %5660 = vrcp.f32 %v3724_v25  ;;  %v3589_v47 = vmul.f32 -1.702, %v7480_v0  ;;  %4049 = vmatprep.mubr.bf16.mxu0 %v3891_v57  ;;  %v3814_v49 = vmul.f32 %v5641_v56, %v7417_v21 }
 0x8ea   : > { %v5645_v16 = vpop.eup %5644  ;;  %5662 = vrcp.f32 %v3725_v11  ;;  %v3654_v22 = vmul.f32 1.442695, %v3588_v5  ;;  %4050 = vmatmul.mubr.bf16.vlgmr.msra.gmra.mrb[80].mxu0 %v3890_v40  ;;  %v3501_v48 = vpop.f32.mrb[76].mxu1  ;;  %v3815_v15 = vmul.f32 %v5643_v35, %v7420_v8 }
 0x8eb   : > { %v5647_v17 = vpop.eup %5646  ;;  %5664 = vpow2.f32 %v3650_v4  ;;  %v3656_v53 = vmul.f32 1.442695, %v3589_v47  ;;  %v7487_v26 = vadd.f32 %v3501_v48, %v7395_v23  ;;  %v3503_v7 = vpop.f32.mrb[77].mxu1  ;;  %v3816_v61 = vmul.f32 %v5645_v16, %v7424_v13 }
 0x8ec   : > { %v5649_v42 = vpop.eup %5648  ;;  %v3817_v62 = vmul.f32 %v5647_v17, %v7428_v32  ;;  %5666 = vpow2.f32 %v3652_v6  ;;  %v7492_v21 = vadd.f32 %v3503_v7, %v7398_v28  ;;  %v3505_v40 = vpop.f32.mrb[78].mxu1 }
 0x8ed   : > { %v5651_v10 = vpop.eup %5650  ;;  %v3726_v3 = vadd.f32 1.0, %v5649_v42  ;;  %5668 = vpow2.f32 %v3654_v22  ;;  %v3590_v8 = vmul.f32 -1.702, %v7487_v26  ;;  %v7496_v12 = vadd.f32 %v3505_v40, %v7395_v23  ;;  %v3507_v25 = vpop.f32.mrb[79].mxu1 }
 0x8ee   : > { %v5653_v4 = vpop.eup %5652  ;;  %v3727_v57 = vadd.f32 1.0, %v5651_v10  ;;  %5670 = vpow2.f32 %v3656_v53  ;;  %v3591_v13 = vmul.f32 -1.702, %v7492_v21  ;;  %v7500_v32 = vadd.f32 %v3507_v25, %v7398_v28 }
 0x8ef   : > { %v5655_v56 = vpop.eup %5654  ;;  %5672 = vrcp.f32 %v3726_v3  ;;  %v3728_v11 = vadd.f32 1.0, %v5653_v4  ;;  %v3658_v6 = vmul.f32 1.442695, %v3590_v8  ;;  %v3592_v5 = vmul.f32 -1.702, %v7496_v12 }
 0x8f0   : > { %5674 = vrcp.f32 %v3727_v57  ;;  %v3729_v35 = vadd.f32 1.0, %v5655_v56  ;;  %v3660_v47 = vmul.f32 1.442695, %v3591_v13  ;;  %v3593_v16 = vmul.f32 -1.702, %v7500_v32 }
 0x8f1   : > { %v5657_v22 = vpop.eup %5656  ;;  %5676 = vrcp.f32 %v3728_v11  ;;  %v3662_v48 = vmul.f32 1.442695, %v3592_v5  ;;  %v3893_v17 = vpack.c.bf16 %v3817_v62, %v3815_v15  ;;  %v3892_v53 = vpack.c.bf16 %v3816_v61, %v3814_v49 }
 0x8f2   : > { %v5659_v7 = vpop.eup %5658  ;;  %5678 = vrcp.f32 %v3729_v35  ;;  %v3664_v42 = vmul.f32 1.442695, %v3593_v16  ;;  %v3818_v3 = vmul.f32 %v5657_v22, %v7433_v33 }
 0x8f3   : > { %v5661_v40 = vpop.eup %5660  ;;  %5680 = vpow2.f32 %v3658_v6  ;;  %4057 = vmatprep.mubr.bf16.mxu0 %v3893_v17  ;;  %v3819_v4 = vmul.f32 %v5659_v7, %v7436_v1 }
 0x8f4   : > { %v5663_v10 = vpop.eup %5662  ;;  %v3820_v8 = vmul.f32 %v5661_v40, %v7440_v19  ;;  %5682 = vpow2.f32 %v3660_v47  ;;  %4058 = vmatmul.mubr.bf16.gmra.mrb[84].mxu0 %v3892_v53 }
 0x8f5   : > { %v5665_v25 = vpop.eup %5664  ;;  %v3821_v57 = vmul.f32 %v5663_v10, %v7444_v45  ;;  %5684 = vpow2.f32 %v3662_v48 }
 0x8f6   : > { %v5667_v49 = vpop.eup %5666  ;;  %v3730_v15 = vadd.f32 1.0, %v5665_v25  ;;  %5686 = vpow2.f32 %v3664_v42  ;;  %v3894_v61 = vpack.c.bf16 %v3820_v8, %v3818_v3 }
 0x8f7   : > { %v5669_v62 = vpop.eup %5668  ;;  %v3731_v13 = vadd.f32 1.0, %v5667_v49  ;;  %v3895_v56 = vpack.c.bf16 %v3821_v57, %v3819_v4 }
 0x8f8   : > { %v5671_v11 = vpop.eup %5670  ;;  %5688 = vrcp.f32 %v3730_v15  ;;  %v3732_v33 = vadd.f32 1.0, %v5669_v62 }
 0x8f9   : > { %v5673_v6 = vpop.eup %5672  ;;  %5690 = vrcp.f32 %v3731_v13  ;;  %v3733_v19 = vadd.f32 1.0, %v5671_v11  ;;  %4065 = vmatprep.mubr.bf16.mxu0 %v3895_v56 }
 0x8fa   : > { %v5675_v5 = vpop.eup %5674  ;;  %5692 = vrcp.f32 %v3732_v33  ;;  %v3822_v35 = vmul.f32 %v5673_v6, %v7449_v60 }
 0x8fb   : > { %v5677_v1 = vpop.eup %5676  ;;  %5694 = vrcp.f32 %v3733_v19  ;;  %v3823_v22 = vmul.f32 %v5675_v5, %v7452_v55 }
 0x8fc   : > { %v5679_v45 = vpop.eup %5678  ;;  %v3824_v47 = vmul.f32 %v5677_v1, %v7456_v39  ;;  %4066 = vmatmul.mubr.bf16.gmra.mrb[88].mxu0 %v3894_v61 }
 0x8fd   : > { %v5681_v16 = vpop.eup %5680  ;;  %v3825_v48 = vmul.f32 %v5679_v45, %v7460_v27 }
 0x8fe   : > { %v5683_v17 = vpop.eup %5682  ;;  %v3734_v53 = vadd.f32 1.0, %v5681_v16  ;;  %v3896_v7 = vpack.c.bf16 %v3824_v47, %v3822_v35 }
 0x8ff   : > { %v5685_v42 = vpop.eup %5684  ;;  %v3735_v40 = vadd.f32 1.0, %v5683_v17  ;;  %v3897_v10 = vpack.c.bf16 %v3825_v48, %v3823_v22 }
 0x900   : > { %v5687_v3 = vpop.eup %5686  ;;  %5696 = vrcp.f32 %v3734_v53  ;;  %v3736_v8 = vadd.f32 1.0, %v5685_v42 }
 0x901   : > { %5698 = vrcp.f32 %v3735_v40  ;;  %v3737_v25 = vadd.f32 1.0, %v5687_v3  ;;  %4073 = vmatprep.mubr.bf16.mxu0 %v3897_v10 }
 0x902   : > { %v5689_v60 = vpop.eup %5688  ;;  %5700 = vrcp.f32 %v3736_v8 }
 0x903   : > { %v5691_v39 = vpop.eup %5690  ;;  %5702 = vrcp.f32 %v3737_v25  ;;  %v3826_v27 = vmul.f32 %v5689_v60, %v7467_v24 }
 0x904   : > { %v5693_v4 = vpop.eup %5692  ;;  %4074 = vmatmul.mubr.bf16.gmra.mrb[92].mxu0 %v3896_v7  ;;  %v3827_v49 = vmul.f32 %v5691_v39, %v7472_v18 }
 0x905   : > { %v5695_v55 = vpop.eup %5694  ;;  %v3828_v57 = vmul.f32 %v5693_v4, %v7477_v54 }
 0x906   : > { %v3829_v15 = vmul.f32 %v5695_v55, %v7480_v0 }
 0x907   : > { %v3898_v61 = vpack.c.bf16 %v3828_v57, %v3826_v27 }
 0x908   : > { %v3899_v62 = vpack.c.bf16 %v3829_v15, %v3827_v49 }
 0x90a   : > { %v5697_v13 = vpop.eup %5696  ;;  %4081 = vmatprep.mubr.bf16.mxu0 %v3899_v62 }
 0x90b   : > { %v5699_v56 = vpop.eup %5698  ;;  %v3830_v6 = vmul.f32 %v5697_v13, %v7487_v26 }
 0x90c   : > { %v5701_v11 = vpop.eup %5700  ;;  %4082 = vmatmul.mubr.bf16.gmra.mrb[96].mxu0 %v3898_v61  ;;  %v3831_v24 = vmul.f32 %v5699_v56, %v7492_v21 }
 0x90d   : > { %v5703_v33 = vpop.eup %5702  ;;  %v3832_v19 = vmul.f32 %v5701_v11, %v7496_v12 }
 0x90e   : > { %v3833_v54 = vmul.f32 %v5703_v33, %v7500_v32 }
 0x90f   : > { %v3900_v5 = vpack.c.bf16 %v3832_v19, %v3830_v6 }
 0x910   : > { %v3901_v18 = vpack.c.bf16 %v3833_v54, %v3831_v24 }
 0x912   : > { %4089 = vmatprep.mubr.bf16.mxu0 %v3901_v18 }
 0x914   : > { %4090 = vmatmul.mubr.bf16.gmra.mrb[100].mxu0 %v3900_v5 }
 0x93d   : > { %v3511_v0 = vpop.f32.mrb[80].mxu1 }
 0x93e   : > { %v7521_v1 = vadd.f32 %v3511_v0, %v7395_v23  ;;  %v3513_v45 = vpop.f32.mrb[81].mxu1 }
 0x93f   : > { %v7524_v35 = vadd.f32 %v3513_v45, %v7398_v28  ;;  %v3515_v47 = vpop.f32.mrb[82].mxu1 }
 0x940   : > { %v3594_v26 = vmul.f32 -1.702, %v7521_v1  ;;  %v7528_v12 = vadd.f32 %v3515_v47, %v7395_v23  ;;  %v3517_v21 = vpop.f32.mrb[83].mxu1 }
 0x941   : > { %v3595_v32 = vmul.f32 -1.702, %v7524_v35  ;;  %v7532_v16 = vadd.f32 %v3517_v21, %v7398_v28 }
 0x942   : > { %v3666_v22 = vmul.f32 1.442695, %v3594_v26  ;;  %v3596_v48 = vmul.f32 -1.702, %v7528_v12 }
 0x943   : > { %v3668_v17 = vmul.f32 1.442695, %v3595_v32  ;;  %v3597_v53 = vmul.f32 -1.702, %v7532_v16 }
 0x944   : > { %5704 = vpow2.f32 %v3666_v22  ;;  %v3670_v7 = vmul.f32 1.442695, %v3596_v48 }
 0x945   : > { %5706 = vpow2.f32 %v3668_v17  ;;  %v3672_v42 = vmul.f32 1.442695, %v3597_v53  ;;  %v3521_v40 = vpop.f32.mrb[84].mxu1 }
 0x946   : > { %5708 = vpow2.f32 %v3670_v7  ;;  %v7537_v10 = vadd.f32 %v3521_v40, %v7395_v23  ;;  %v3523_v3 = vpop.f32.mrb[85].mxu1 }
 0x947   : > { %5710 = vpow2.f32 %v3672_v42  ;;  %v7540_v8 = vadd.f32 %v3523_v3, %v7398_v28  ;;  %v3525_v25 = vpop.f32.mrb[86].mxu1 }
 0x948   : > { %v3598_v60 = vmul.f32 -1.702, %v7537_v10  ;;  %v7544_v39 = vadd.f32 %v3525_v25, %v7395_v23  ;;  %v3527_v4 = vpop.f32.mrb[87].mxu1 }
 0x949   : > { %v3599_v55 = vmul.f32 -1.702, %v7540_v8  ;;  %v7548_v27 = vadd.f32 %v3527_v4, %v7398_v28 }
 0x94a   : > { %v3674_v57 = vmul.f32 1.442695, %v3598_v60  ;;  %v3600_v49 = vmul.f32 -1.702, %v7544_v39 }
 0x94b   : > { %v3676_v15 = vmul.f32 1.442695, %v3599_v55  ;;  %v3601_v61 = vmul.f32 -1.702, %v7548_v27 }
 0x94c   : > { %5712 = vpow2.f32 %v3674_v57  ;;  %v3678_v62 = vmul.f32 1.442695, %v3600_v49 }
 0x94d   : > { %5714 = vpow2.f32 %v3676_v15  ;;  %v3680_v13 = vmul.f32 1.442695, %v3601_v61  ;;  %v3531_v56 = vpop.f32.mrb[88].mxu1 }
 0x94e   : > { %v5705_v11 = vpop.eup %5704  ;;  %5716 = vpow2.f32 %v3678_v62  ;;  %v7553_v33 = vadd.f32 %v3531_v56, %v7395_v23  ;;  %v3533_v6 = vpop.f32.mrb[89].mxu1 }
 0x94f   : > { %v5707_v19 = vpop.eup %5706  ;;  %v3738_v24 = vadd.f32 1.0, %v5705_v11  ;;  %5718 = vpow2.f32 %v3680_v13  ;;  %v7556_v54 = vadd.f32 %v3533_v6, %v7398_v28  ;;  %v3535_v5 = vpop.f32.mrb[90].mxu1 }
 0x950   : > { %v5709_v18 = vpop.eup %5708  ;;  %v3739_v0 = vadd.f32 1.0, %v5707_v19  ;;  %v3602_v45 = vmul.f32 -1.702, %v7553_v33  ;;  %v7560_v47 = vadd.f32 %v3535_v5, %v7395_v23  ;;  %v3537_v26 = vpop.f32.mrb[91].mxu1 }
 0x951   : > { %v5711_v21 = vpop.eup %5710  ;;  %5720 = vrcp.f32 %v3738_v24  ;;  %v3740_v32 = vadd.f32 1.0, %v5709_v18  ;;  %v3603_v22 = vmul.f32 -1.702, %v7556_v54  ;;  %v7564_v48 = vadd.f32 %v3537_v26, %v7398_v28 }
 0x952   : > { %5722 = vrcp.f32 %v3739_v0  ;;  %v3741_v17 = vadd.f32 1.0, %v5711_v21  ;;  %v3682_v53 = vmul.f32 1.442695, %v3602_v45  ;;  %v3604_v7 = vmul.f32 -1.702, %v7560_v47 }
 0x953   : > { %5724 = vrcp.f32 %v3740_v32  ;;  %v3684_v42 = vmul.f32 1.442695, %v3603_v22  ;;  %v3605_v40 = vmul.f32 -1.702, %v7564_v48 }
 0x954   : > { %5726 = vrcp.f32 %v3741_v17  ;;  %v3686_v3 = vmul.f32 1.442695, %v3604_v7 }
 0x955   : > { %5728 = vpow2.f32 %v3682_v53  ;;  %v3688_v25 = vmul.f32 1.442695, %v3605_v40  ;;  %v3541_v60 = vpop.f32.mrb[92].mxu1 }
 0x956   : > { %v5713_v4 = vpop.eup %5712  ;;  %5730 = vpow2.f32 %v3684_v42  ;;  %v7569_v55 = vadd.f32 %v3541_v60, %v7395_v23  ;;  %v3543_v57 = vpop.f32.mrb[93].mxu1 }
 0x957   : > { %v5715_v49 = vpop.eup %5714  ;;  %v3742_v15 = vadd.f32 1.0, %v5713_v4  ;;  %5732 = vpow2.f32 %v3686_v3  ;;  %v7572_v61 = vadd.f32 %v3543_v57, %v7398_v28  ;;  %v3545_v62 = vpop.f32.mrb[94].mxu1 }
 0x958   : > { %v5717_v13 = vpop.eup %5716  ;;  %v3743_v56 = vadd.f32 1.0, %v5715_v49  ;;  %5734 = vpow2.f32 %v3688_v25  ;;  %v3606_v11 = vmul.f32 -1.702, %v7569_v55  ;;  %v7576_v6 = vadd.f32 %v3545_v62, %v7395_v23  ;;  %v3547_v19 = vpop.f32.mrb[95].mxu1 }
 0x959   : > { %v5719_v24 = vpop.eup %5718  ;;  %5736 = vrcp.f32 %v3742_v15  ;;  %v3744_v5 = vadd.f32 1.0, %v5717_v13  ;;  %v3607_v18 = vmul.f32 -1.702, %v7572_v61  ;;  %v7580_v0 = vadd.f32 %v3547_v19, %v7398_v28 }
 0x95a   : > { %5738 = vrcp.f32 %v3743_v56  ;;  %v3745_v45 = vadd.f32 1.0, %v5719_v24  ;;  %v3690_v26 = vmul.f32 1.442695, %v3606_v11  ;;  %v3608_v21 = vmul.f32 -1.702, %v7576_v6 }
 0x95b   : > { %v5721_v32 = vpop.eup %5720  ;;  %5740 = vrcp.f32 %v3744_v5  ;;  %v3692_v22 = vmul.f32 1.442695, %v3607_v18  ;;  %v3609_v17 = vmul.f32 -1.702, %v7580_v0 }
 0x95c   : > { %v5723_v53 = vpop.eup %5722  ;;  %5742 = vrcp.f32 %v3745_v45  ;;  %v3694_v7 = vmul.f32 1.442695, %v3608_v21  ;;  %v3834_v60 = vmul.f32 %v5721_v32, %v7521_v1 }
 0x95d   : > { %v5725_v42 = vpop.eup %5724  ;;  %5744 = vpow2.f32 %v3690_v26  ;;  %v3696_v40 = vmul.f32 1.442695, %v3609_v17  ;;  %v3551_v3 = vpop.f32.mrb[96].mxu1  ;;  %v3835_v4 = vmul.f32 %v5723_v53, %v7524_v35 }
 0x95e   : > { %v5727_v25 = vpop.eup %5726  ;;  %5746 = vpow2.f32 %v3692_v22  ;;  %v7587_v57 = vadd.f32 %v3551_v3, %v7395_v23  ;;  %v3553_v49 = vpop.f32.mrb[97].mxu1  ;;  %v3836_v62 = vmul.f32 %v5725_v42, %v7528_v12 }
 0x95f   : > { %v5729_v15 = vpop.eup %5728  ;;  %v3837_v13 = vmul.f32 %v5727_v25, %v7532_v16  ;;  %5748 = vpow2.f32 %v3694_v7  ;;  %v7592_v56 = vadd.f32 %v3553_v49, %v7398_v28  ;;  %v3555_v11 = vpop.f32.mrb[98].mxu1 }
 0x960   : > { %v5731_v19 = vpop.eup %5730  ;;  %v3746_v24 = vadd.f32 1.0, %v5729_v15  ;;  %5750 = vpow2.f32 %v3696_v40  ;;  %v3610_v1 = vmul.f32 -1.702, %v7587_v57  ;;  %v7596_v35 = vadd.f32 %v3555_v11, %v7395_v23  ;;  %v3557_v5 = vpop.f32.mrb[99].mxu1 }
 0x961   : > { %v5733_v18 = vpop.eup %5732  ;;  %v3747_v45 = vadd.f32 1.0, %v5731_v19  ;;  %v3611_v12 = vmul.f32 -1.702, %v7592_v56  ;;  %v7600_v16 = vadd.f32 %v3557_v5, %v7398_v28  ;;  %v3903_v26 = vpack.c.bf16 %v3837_v13, %v3835_v4 }
 0x962   : > { %v5735_v21 = vpop.eup %5734  ;;  %5752 = vrcp.f32 %v3746_v24  ;;  %v3748_v32 = vadd.f32 1.0, %v5733_v18  ;;  %v3698_v22 = vmul.f32 1.442695, %v3610_v1  ;;  %v3612_v17 = vmul.f32 -1.702, %v7596_v35 }
 0x963   : > { %v5737_v53 = vpop.eup %5736  ;;  %5754 = vrcp.f32 %v3747_v45  ;;  %v3749_v7 = vadd.f32 1.0, %v5735_v21  ;;  %v3700_v42 = vmul.f32 1.442695, %v3611_v12  ;;  %v3613_v40 = vmul.f32 -1.702, %v7600_v16  ;;  %4097 = vmatprep.mubr.bf16.mxu0 %v3903_v26 }
 0x964   : > { %v5739_v3 = vpop.eup %5738  ;;  %5756 = vrcp.f32 %v3748_v32  ;;  %v3702_v25 = vmul.f32 1.442695, %v3612_v17  ;;  %v3902_v49 = vpack.c.bf16 %v3836_v62, %v3834_v60  ;;  %v3838_v19 = vmul.f32 %v5737_v53, %v7537_v10 }
 0x965   : > { %v5741_v15 = vpop.eup %5740  ;;  %5758 = vrcp.f32 %v3749_v7  ;;  %v3704_v4 = vmul.f32 1.442695, %v3613_v40  ;;  %v3561_v13 = vpop.f32.mrb[100].mxu1  ;;  %v3839_v24 = vmul.f32 %v5739_v3, %v7540_v8 }
 0x966   : > { %v5743_v11 = vpop.eup %5742  ;;  %5760 = vpow2.f32 %v3698_v22  ;;  %4098 = vmatmul.mubr.bf16.gmra.mrb[104].mxu0 %v3902_v49  ;;  %v7607_v1 = vadd.f32 %v3561_v13, %v7395_v23  ;;  %v3563_v5 = vpop.f32.mrb[101].mxu1  ;;  %v3840_v45 = vmul.f32 %v5741_v15, %v7544_v39 }
 0x967   : > { %v5745_v18 = vpop.eup %5744  ;;  %v3841_v60 = vmul.f32 %v5743_v11, %v7548_v27  ;;  %5762 = vpow2.f32 %v3700_v42  ;;  %v7612_v62 = vadd.f32 %v3563_v5, %v7398_v28  ;;  %v3565_v12 = vpop.f32.mrb[102].mxu1 }
 0x968   : > { %v5747_v26 = vpop.eup %5746  ;;  %v3750_v10 = vadd.f32 1.0, %v5745_v18  ;;  %5764 = vpow2.f32 %v3702_v25  ;;  %v3614_v8 = vmul.f32 -1.702, %v7607_v1  ;;  %v7616_v21 = vadd.f32 %v3565_v12, %v7395_v23  ;;  %v3567_v32 = vpop.f32.mrb[103].mxu1 }
 0x969   : > { %v5749_v22 = vpop.eup %5748  ;;  %v3751_v17 = vadd.f32 1.0, %v5747_v26  ;;  %5766 = vpow2.f32 %v3704_v4  ;;  %v3615_v39 = vmul.f32 -1.702, %v7612_v62  ;;  %v7620_v27 = vadd.f32 %v3567_v32, %v7398_v28 }
 0x96a   : > { %v5751_v53 = vpop.eup %5750  ;;  %5768 = vrcp.f32 %v3750_v10  ;;  %v3752_v7 = vadd.f32 1.0, %v5749_v22  ;;  %v3706_v42 = vmul.f32 1.442695, %v3614_v8  ;;  %v3616_v40 = vmul.f32 -1.702, %v7616_v21 }
 0x96b   : > { %5770 = vrcp.f32 %v3751_v17  ;;  %v3753_v3 = vadd.f32 1.0, %v5751_v53  ;;  %v3708_v25 = vmul.f32 1.442695, %v3615_v39  ;;  %v3617_v23 = vmul.f32 -1.702, %v7620_v27 }
 0x96c   : > { %v5753_v49 = vpop.eup %5752  ;;  %5772 = vrcp.f32 %v3752_v7  ;;  %v3710_v15 = vmul.f32 1.442695, %v3616_v40  ;;  %v3905_v4 = vpack.c.bf16 %v3841_v60, %v3839_v24  ;;  %v3904_v13 = vpack.c.bf16 %v3840_v45, %v3838_v19 }
 0x96d   : > { %v5755_v11 = vpop.eup %5754  ;;  %5774 = vrcp.f32 %v3753_v3  ;;  %v3712_v28 = vmul.f32 1.442695, %v3617_v23  ;;  %v3842_v12 = vmul.f32 %v5753_v49, %v7553_v33 }
 0x96e   : > { %v5757_v5 = vpop.eup %5756  ;;  %5776 = vpow2.f32 %v3706_v42  ;;  %4105 = vmatprep.mubr.bf16.mxu0 %v3905_v4  ;;  %v3843_v8 = vmul.f32 %v5755_v11, %v7556_v54 }
 0x96f   : > { %v5759_v18 = vpop.eup %5758  ;;  %v3844_v26 = vmul.f32 %v5757_v5, %v7560_v47  ;;  %5778 = vpow2.f32 %v3708_v25  ;;  %4106 = vmatmul.mubr.bf16.gmra.mrb[108].mxu0 %v3904_v13 }
 0x970   : > { %v5761_v10 = vpop.eup %5760  ;;  %v3845_v32 = vmul.f32 %v5759_v18, %v7564_v48  ;;  %5780 = vpow2.f32 %v3710_v15 }
 0x971   : > { %v5763_v19 = vpop.eup %5762  ;;  %v3754_v24 = vadd.f32 1.0, %v5761_v10  ;;  %5782 = vpow2.f32 %v3712_v28  ;;  %v3906_v45 = vpack.c.bf16 %v3844_v26, %v3842_v12 }
 0x972   : > { %v5765_v60 = vpop.eup %5764  ;;  %v3755_v22 = vadd.f32 1.0, %v5763_v19  ;;  %v3907_v17 = vpack.c.bf16 %v3845_v32, %v3843_v8 }
 0x973   : > { %v5767_v39 = vpop.eup %5766  ;;  %5784 = vrcp.f32 %v3754_v24  ;;  %v3756_v33 = vadd.f32 1.0, %v5765_v60 }
 0x974   : > { %v5769_v53 = vpop.eup %5768  ;;  %5786 = vrcp.f32 %v3755_v22  ;;  %v3757_v47 = vadd.f32 1.0, %v5767_v39  ;;  %4113 = vmatprep.mubr.bf16.mxu0 %v3907_v17 }
 0x975   : > { %v5771_v7 = vpop.eup %5770  ;;  %5788 = vrcp.f32 %v3756_v33  ;;  %v3846_v42 = vmul.f32 %v5769_v53, %v7569_v55 }
 0x976   : > { %v5773_v54 = vpop.eup %5772  ;;  %5790 = vrcp.f32 %v3757_v47  ;;  %v3847_v25 = vmul.f32 %v5771_v7, %v7572_v61  ;;  %v7645_v47 = vld [vmem:[%s611_s18] ss:$0 sm:$0xff] }
 0x977   : > { %v5775_v48 = vpop.eup %5774  ;;  %v3848_v40 = vmul.f32 %v5773_v54, %v7576_v6  ;;  %4114 = vmatmul.mubr.bf16.gmra.mrb[112].mxu0 %v3906_v45 }
 0x978   : > { %v5777_v3 = vpop.eup %5776  ;;  %v3849_v23 = vmul.f32 %v5775_v48, %v7580_v0 }
 0x979   : > { %v5779_v49 = vpop.eup %5778  ;;  %v3758_v15 = vadd.f32 1.0, %v5777_v3  ;;  %v3908_v4 = vpack.c.bf16 %v3848_v40, %v3846_v42 }
 0x97a   : > { %v5781_v13 = vpop.eup %5780  ;;  %v3759_v11 = vadd.f32 1.0, %v5779_v49  ;;  %v3909_v28 = vpack.c.bf16 %v3849_v23, %v3847_v25 }
 0x97b   : > { %v5783_v5 = vpop.eup %5782  ;;  %5792 = vrcp.f32 %v3758_v15  ;;  %v3760_v18 = vadd.f32 1.0, %v5781_v13 }
 0x97c   : > { %5794 = vrcp.f32 %v3759_v11  ;;  %v3761_v12 = vadd.f32 1.0, %v5783_v5  ;;  %4121 = vmatprep.mubr.bf16.mxu0 %v3909_v28 }
 0x97d   : > { %v5785_v55 = vpop.eup %5784  ;;  %5796 = vrcp.f32 %v3760_v18 }
 0x97e   : > { %v5787_v6 = vpop.eup %5786  ;;  %5798 = vrcp.f32 %v3761_v12  ;;  %v3850_v0 = vmul.f32 %v5785_v55, %v7587_v57 }
 0x97f   : > { %v5789_v26 = vpop.eup %5788  ;;  %4122 = vmatmul.mubr.bf16.gmra.mrb[116].mxu0 %v3908_v4  ;;  %v3851_v8 = vmul.f32 %v5787_v6, %v7592_v56 }
 0x980   : > { %v5791_v61 = vpop.eup %5790  ;;  %v3852_v10 = vmul.f32 %v5789_v26, %v7596_v35 }
 0x981   : > { %v3853_v32 = vmul.f32 %v5791_v61, %v7600_v16 }
 0x982   : > { %v3910_v19 = vpack.c.bf16 %v3852_v10, %v3850_v0 }
 0x983   : > { %v3911_v24 = vpack.c.bf16 %v3853_v32, %v3851_v8 }
 0x985   : > { %v5793_v45 = vpop.eup %5792  ;;  %4129 = vmatprep.mubr.bf16.mxu0 %v3911_v24 }
 0x986   : > { %v5795_v60 = vpop.eup %5794  ;;  %v3854_v39 = vmul.f32 %v5793_v45, %v7607_v1 }
 0x987   : > { %v5797_v22 = vpop.eup %5796  ;;  %4130 = vmatmul.mubr.bf16.gmra.mrb[120].mxu0 %v3910_v19  ;;  %v3855_v57 = vmul.f32 %v5795_v60, %v7612_v62 }
 0x988   : > { %v5799_v17 = vpop.eup %5798  ;;  %v3856_v33 = vmul.f32 %v5797_v22, %v7616_v21 }
 0x989   : > { %v3857_v35 = vmul.f32 %v5799_v17, %v7620_v27 }
 0x98a   : > { %v3912_v56 = vpack.c.bf16 %v3856_v33, %v3854_v39 }
 0x98b   : > { %v3913_v53 = vpack.c.bf16 %v3857_v35, %v3855_v57 }
 0x98d   : > { %4137 = vmatprep.mubr.bf16.mxu0 %v3913_v53 }
 0x98f   : > { %4138 = vmatmul.mubr.bf16.gmra.mrb[124].mxu0 %v3912_v56 }
 0x9bd   : > { %v5078_v16 = vpop.f32.mrb[80].mxu0 }
 0x9be   : > { %v5079_v7 = vpop.f32.mrb[81].mxu0 }
 0x9bf   : > { %v5080_v54 = vadd.f32 %v5079_v7, %v5078_v16  ;;  %v5081_v1 = vpop.f32.mrb[82].mxu0 }
 0x9c0   : > { %v5082_v48 = vpop.f32.mrb[83].mxu0 }
 0x9c1   : > { %v4052_v21 = vadd.f32 %v5080_v54, %v7645_v47  ;;  %v5083_v62 = vadd.f32 %v5082_v48, %v5081_v1 }
 0x9c3   : > { %v4146_v27 = vadd.f32 %v4052_v21, %v7001_v34  ;;  %v4055_v42 = vadd.f32 %v5083_v62, %v7645_v47 }
 0x9c5   : > { %4170 = vst.msk [vmem:[#allocation2] sm:$0xff] %vm708_vm2, %v4146_v27  ;;  %v4147_v40 = vadd.f32 %v4055_v42, %v7007_v51 }
 0x9c7   : > { %4171 = vst.msk [vmem:[#allocation2 + $0x8] sm:$0xff] %vm708_vm2, %v4147_v40  ;;  %v5084_v3 = vpop.f32.mrb[84].mxu0 }
 0x9c8   : > { %v5085_v25 = vpop.f32.mrb[85].mxu0 }
 0x9c9   : > { %v5086_v23 = vadd.f32 %v5085_v25, %v5084_v3  ;;  %v5087_v49 = vpop.f32.mrb[86].mxu0 }
 0x9ca   : > { %v5088_v15 = vpop.f32.mrb[87].mxu0 }
 0x9cb   : > { %v4060_v4 = vadd.f32 %v5086_v23, %v7645_v47  ;;  %v5089_v13 = vadd.f32 %v5088_v15, %v5087_v49 }
 0x9cd   : > { %v4148_v11 = vadd.f32 %v4060_v4, %v7005_v30  ;;  %v4063_v34 = vadd.f32 %v5089_v13, %v7645_v47 }
 0x9cf   : > { %4172 = vst.msk [vmem:[#allocation2 + $0x10] sm:$0xff] %vm708_vm2, %v4148_v11  ;;  %v4149_v28 = vadd.f32 %v4063_v34, %v7011_v2  ;;  %v5090_v5 = vpop.f32.mrb[88].mxu0 }
 0x9d0   : > { %v5091_v51 = vpop.f32.mrb[89].mxu0 }
 0x9d1   : > { %4173 = vst.msk [vmem:[#allocation2 + $0x18] sm:$0xff] %vm708_vm2, %v4149_v28  ;;  %v5092_v18 = vadd.f32 %v5091_v51, %v5090_v5  ;;  %v5093_v12 = vpop.f32.mrb[90].mxu0 }
 0x9d2   : > { %v5094_v55 = vpop.f32.mrb[91].mxu0 }
 0x9d3   : > { %v4068_v6 = vadd.f32 %v5092_v18, %v7645_v47  ;;  %v5095_v26 = vadd.f32 %v5094_v55, %v5093_v12 }
 0x9d5   : > { %v4150_v61 = vadd.f32 %v4068_v6, %v7021_v9  ;;  %v4071_v30 = vadd.f32 %v5095_v26, %v7645_v47 }
 0x9d7   : > { %4174 = vst.msk [vmem:[#allocation2 + $0x20] sm:$0xff] %vm708_vm2, %v4150_v61  ;;  %v4151_v0 = vadd.f32 %v4071_v30, %v7027_v37  ;;  %v5096_v10 = vpop.f32.mrb[92].mxu0 }
 0x9d8   : > { %v5097_v2 = vpop.f32.mrb[93].mxu0 }
 0x9d9   : > { %4175 = vst.msk [vmem:[#allocation2 + $0x28] sm:$0xff] %vm708_vm2, %v4151_v0  ;;  %v5098_v8 = vadd.f32 %v5097_v2, %v5096_v10  ;;  %v5099_v32 = vpop.f32.mrb[94].mxu0 }
 0x9da   : > { %v5100_v19 = vpop.f32.mrb[95].mxu0 }
 0x9db   : > { %v4076_v24 = vadd.f32 %v5098_v8, %v7645_v47  ;;  %v5101_v45 = vadd.f32 %v5100_v19, %v5099_v32 }
 0x9dd   : > { %v4152_v60 = vadd.f32 %v4076_v24, %v7025_v58  ;;  %v4079_v9 = vadd.f32 %v5101_v45, %v7645_v47 }
 0x9df   : > { %4176 = vst.msk [vmem:[#allocation2 + $0x30] sm:$0xff] %vm708_vm2, %v4152_v60  ;;  %v4153_v22 = vadd.f32 %v4079_v9, %v7031_v63  ;;  %v5102_v17 = vpop.f32.mrb[96].mxu0 }
 0x9e0   : > { %v5103_v37 = vpop.f32.mrb[97].mxu0 }
 0x9e1   : > { %4177 = vst.msk [vmem:[#allocation2 + $0x38] sm:$0xff] %vm708_vm2, %v4153_v22  ;;  %v5104_v39 = vadd.f32 %v5103_v37, %v5102_v17  ;;  %v5105_v33 = vpop.f32.mrb[98].mxu0  ;;  %v7852_v17 = vld [vmem:[#allocation5_spill] sm:$0xff] }
 0x9e2   : > { %v5106_v57 = vpop.f32.mrb[99].mxu0 }
 0x9e3   : > { %v4084_v35 = vadd.f32 %v5104_v39, %v7645_v47  ;;  %v5107_v56 = vadd.f32 %v5106_v57, %v5105_v33 }
 0x9e5   : > { %v4154_v53 = vadd.f32 %v4084_v35, %v7041_v36  ;;  %v4087_v58 = vadd.f32 %v5107_v56, %v7645_v47 }
 0x9e7   : > { %4178 = vst.msk [vmem:[#allocation2 + $0x40] sm:$0xff] %vm708_vm2, %v4154_v53  ;;  %v4155_v16 = vadd.f32 %v4087_v58, %v7047_v20  ;;  %v5108_v7 = vpop.f32.mrb[100].mxu0  ;;  %v7853_v58 = vld [vmem:[#allocation6_spill] sm:$0xff] }
 0x9e8   : > { %v5109_v63 = vpop.f32.mrb[101].mxu0 }
 0x9e9   : > { %4179 = vst.msk [vmem:[#allocation2 + $0x48] sm:$0xff] %vm708_vm2, %v4155_v16  ;;  %v5110_v54 = vadd.f32 %v5109_v63, %v5108_v7  ;;  %v5111_v1 = vpop.f32.mrb[102].mxu0  ;;  %v7854_v7 = vld [vmem:[#allocation7_spill] sm:$0xff] }
 0x9ea   : > { %v5112_v48 = vpop.f32.mrb[103].mxu0 }
 0x9eb   : > { %v4092_v21 = vadd.f32 %v5110_v54, %v7645_v47  ;;  %v5113_v62 = vadd.f32 %v5112_v48, %v5111_v1 }
 0x9ed   : > { %v4156_v27 = vadd.f32 %v4092_v21, %v7045_v50  ;;  %v4095_v36 = vadd.f32 %v5113_v62, %v7645_v47 }
 0x9ef   : > { %4180 = vst.msk [vmem:[#allocation2 + $0x50] sm:$0xff] %vm708_vm2, %v4156_v27  ;;  %v4157_v42 = vadd.f32 %v4095_v36, %v7051_v38 }
 0x9f1   : > { %4181 = vst.msk [vmem:[#allocation2 + $0x58] sm:$0xff] %vm708_vm2, %v4157_v42  ;;  %v7855_v42 = vld [vmem:[#allocation8_spill] sm:$0xff] }
 0xa39   : > { %v5114_v20 = vpop.f32.mrb[104].mxu0 }
 0xa3a   : > { %v5115_v40 = vpop.f32.mrb[105].mxu0 }
 0xa3b   : > { %v5116_v3 = vadd.f32 %v5115_v40, %v5114_v20  ;;  %v5117_v25 = vpop.f32.mrb[106].mxu0 }
 0xa3c   : > { %v5118_v23 = vpop.f32.mrb[107].mxu0 }
 0xa3d   : > { %v4100_v49 = vadd.f32 %v5116_v3, %v7645_v47  ;;  %v5119_v15 = vadd.f32 %v5118_v23, %v5117_v25  ;;  %v7856_v3 = vld [vmem:[#allocation9_spill] sm:$0xff]  ;;  %v4222_v23 = vld [vmem:[%s7857_s26] sm:$0xff] (!%p4969_p5) }
 0xa3f   : > { %v4158_v4 = vadd.f32 %v4100_v49, %v7061_v46  ;;  %v4103_v50 = vadd.f32 %v5119_v15, %v7645_v47  ;;  %v4241_v49 = vrot.slane (!%p4969_p5), %v4222_v23, %v6319_v59  ;;  %v4226_v15 = vrot.slane (!%p4969_p5), %v4222_v23, %v6305_v31 }
 0xa41   : > { %4182 = vst.msk [vmem:[#allocation2 + $0x60] sm:$0xff] %vm708_vm2, %v4158_v4  ;;  %v4159_v13 = vadd.f32 %v4103_v50, %v7067_v44  ;;  %4243 = vbcast.lane.b32.xlu1 (!%p4969_p5), %v4241_v49, 256  ;;  %4228 = vbcast.lane.b32.xlu0 (!%p4969_p5), %v4226_v15, 256 }
 0xa42   : > { %v5120_v11 = vpop.f32.mrb[108].mxu0 }
 0xa43   : > { %4183 = vst.msk [vmem:[#allocation2 + $0x68] sm:$0xff] %vm708_vm2, %v4159_v13  ;;  %v5121_v38 = vpop.f32.mrb[109].mxu0 }
 0xa44   : > { %v5122_v34 = vadd.f32 %v5121_v38, %v5120_v11  ;;  %v5123_v28 = vpop.f32.mrb[110].mxu0 }
 0xa45   : > { %v5124_v5 = vpop.f32.mrb[111].mxu0  ;;  %4247 = vbcast.lane.b32.xlu1 (!%p4969_p5), %v4241_v49, 264  ;;  %4232 = vbcast.lane.b32.xlu0 (!%p4969_p5), %v4226_v15, 264 }
 0xa46   : > { %v4108_v51 = vadd.f32 %v5122_v34, %v7645_v47  ;;  %v5125_v18 = vadd.f32 %v5124_v5, %v5123_v28 }
 0xa48   : > { %v4160_v12 = vadd.f32 %v4108_v51, %v7065_v14  ;;  %v4111_v46 = vadd.f32 %v5125_v18, %v7645_v47 }
 0xa4a   : > { %4184 = vst.msk [vmem:[#allocation2 + $0x70] sm:$0xff] %vm708_vm2, %v4160_v12  ;;  %v4161_v55 = vadd.f32 %v4111_v46, %v7071_v29  ;;  %v5126_v6 = vpop.f32.mrb[112].mxu0 }
 0xa4b   : > { %v5127_v44 = vpop.f32.mrb[113].mxu0 }
 0xa4c   : > { %4185 = vst.msk [vmem:[#allocation2 + $0x78] sm:$0xff] %vm708_vm2, %v4161_v55  ;;  %v5128_v26 = vadd.f32 %v5127_v44, %v5126_v6  ;;  %v5129_v61 = vpop.f32.mrb[114].mxu0 }
 0xa4d   : > { %v5130_v30 = vpop.f32.mrb[115].mxu0 }
 0xa4e   : > { %v4116_v0 = vadd.f32 %v5128_v26, %v7645_v47  ;;  %v5131_v10 = vadd.f32 %v5130_v30, %v5129_v61 }
 0xa50   : > { %v4162_v2 = vadd.f32 %v4116_v0, %v7081_v41  ;;  %v4119_v14 = vadd.f32 %v5131_v10, %v7645_v47 }
 0xa52   : > { %4186 = vst.msk [vmem:[#allocation2 + $0x80] sm:$0xff] %vm708_vm2, %v4162_v2  ;;  %v4163_v8 = vadd.f32 %v4119_v14, %v7087_v43  ;;  %v5132_v32 = vpop.f32.mrb[116].mxu0  ;;  %v4202_v2 = vld [vmem:[#allocation2 + $0x20] sm:$0xff] (!%p4969_p5) }
 0xa53   : > { %v5133_v29 = vpop.f32.mrb[117].mxu0 }
 0xa54   : > { %4187 = vst.msk [vmem:[#allocation2 + $0x88] sm:$0xff] %vm708_vm2, %v4163_v8  ;;  %v5134_v19 = vadd.f32 %v5133_v29, %v5132_v32  ;;  %v5135_v24 = vpop.f32.mrb[118].mxu0  ;;  %v4201_v32 = vld [vmem:[#allocation2 + $0x18] sm:$0xff] (!%p4969_p5)  ;;  %v4198_v29 = vld [vmem:[#allocation2] sm:$0xff] (!%p4969_p5) }
 0xa55   : > { %v5136_v45 = vpop.f32.mrb[119].mxu0 }
 0xa56   : > { %v4124_v60 = vadd.f32 %v5134_v19, %v7645_v47  ;;  %v5137_v9 = vadd.f32 %v5136_v45, %v5135_v24  ;;  %v4199_v19 = vld [vmem:[#allocation2 + $0x8] sm:$0xff] (!%p4969_p5)  ;;  %v4205_v24 = vld [vmem:[#allocation2 + $0x38] sm:$0xff] (!%p4969_p5)  ;;  %v4204_v45 = vld [vmem:[#allocation2 + $0x30] sm:$0xff] (!%p4969_p5) }
 0xa58   : > { %v4164_v22 = vadd.f32 %v4124_v60, %v7085_v52  ;;  %v4127_v41 = vadd.f32 %v5137_v9, %v7645_v47  ;;  %v4203_v60 = vld [vmem:[#allocation2 + $0x28] sm:$0xff] (!%p4969_p5) }
 0xa5a   : > { %4188 = vst.msk [vmem:[#allocation2 + $0x90] sm:$0xff] %vm708_vm2, %v4164_v22  ;;  %v4165_v37 = vadd.f32 %v4127_v41, %v7852_v17  ;;  %v5138_v39 = vpop.f32.mrb[120].mxu0  ;;  %v4200_v22 = vld [vmem:[#allocation2 + $0x10] sm:$0xff] (!%p4969_p5)  ;;  %v4207_v17 = vld [vmem:[#allocation2 + $0x48] sm:$0xff] (!%p4969_p5) }
 0xa5b   : > { %v5139_v43 = vpop.f32.mrb[121].mxu0  ;;  %v4208_v41 = vld [vmem:[#allocation2 + $0x50] sm:$0xff] (!%p4969_p5) }
 0xa5c   : > { %4189 = vst.msk [vmem:[#allocation2 + $0x98] sm:$0xff] %vm708_vm2, %v4165_v37  ;;  %v5140_v33 = vadd.f32 %v5139_v43, %v5138_v39  ;;  %v5141_v57 = vpop.f32.mrb[122].mxu0 }
 0xa5d   : > { %v5142_v35 = vpop.f32.mrb[123].mxu0 }
 0xa5e   : > { %v4132_v56 = vadd.f32 %v5140_v33, %v7645_v47  ;;  %v5143_v53 = vadd.f32 %v5142_v35, %v5141_v57  ;;  %v4206_v35 = vld [vmem:[#allocation2 + $0x40] sm:$0xff] (!%p4969_p5) }
 0xa60   : > { %v4166_v16 = vadd.f32 %v4132_v56, %v7853_v58  ;;  %v4135_v52 = vadd.f32 %v5143_v53, %v7645_v47 }
 0xa62   : > { %4190 = vst.msk [vmem:[#allocation2 + $0xa0] sm:$0xff] %vm708_vm2, %v4166_v16  ;;  %v4167_v63 = vadd.f32 %v4135_v52, %v7854_v7  ;;  %v5144_v54 = vpop.f32.mrb[124].mxu0 }
 0xa63   : > { %v5145_v1 = vpop.f32.mrb[125].mxu0 }
 0xa64   : > { %4191 = vst.msk [vmem:[#allocation2 + $0xa8] sm:$0xff] %vm708_vm2, %v4167_v63  ;;  %v5146_v48 = vadd.f32 %v5145_v1, %v5144_v54  ;;  %v5147_v21 = vpop.f32.mrb[126].mxu0  ;;  %v4209_v63 = vld [vmem:[#allocation2 + $0x58] sm:$0xff] (!%p4969_p5) }
 0xa65   : > { %v5148_v62 = vpop.f32.mrb[127].mxu0 }
 0xa66   : > { %v4140_v27 = vadd.f32 %v5146_v48, %v7645_v47  ;;  %v5149_v36 = vadd.f32 %v5148_v62, %v5147_v21  ;;  %4197 = sbr.rel (%p4969_p5) target bundleno = 3553 (0xde1), region = 84 }
 0xa68   : > { %v4168_v20 = vadd.f32 %v4140_v27, %v7855_v42  ;;  %v4143_v40 = vadd.f32 %v5149_v36, %v7645_v47  ;;  %v7858_v47 = vld [vmem:[#allocation4_spill] sm:$0xff] (!%p4969_p5)  ;;  %v4211_v42 = vld [vmem:[#allocation2 + $0x68] sm:$0xff] (!%p4969_p5) }
 0xa69   : > { %v7859_v4 = vsub.s32 (!%p4969_p5), 2, %v7858_v47  ;;  %v7860_v13 = vsub.s32 (!%p4969_p5), 3, %v7858_v47  ;;  %v4285_v38 = vsub.s32 (!%p4969_p5), 4, %v7858_v47  ;;  %v4300_v28 = vsub.s32 (!%p4969_p5), 5, %v7858_v47 }
 0xa6a   : > { %4192 = vst.msk [vmem:[#allocation2 + $0xb0] sm:$0xff] %vm708_vm2, %v4168_v20  ;;  %v4169_v25 = vadd.f32 %v4143_v40, %v7856_v3  ;;  %v4315_v51 = vsub.s32 (!%p4969_p5), 6, %v7858_v47  ;;  %v4330_v12 = vsub.s32 (!%p4969_p5), 7, %v7858_v47 }
 0xa6b   : > { %v4256_v50 = vrot.slane (!%p4969_p5), %v4222_v23, %v7859_v4  ;;  %v4271_v11 = vrot.slane (!%p4969_p5), %v4222_v23, %v7860_v13  ;;  %v4286_v34 = vrot.slane (!%p4969_p5), %v4222_v23, %v4285_v38  ;;  %v4301_v5 = vrot.slane (!%p4969_p5), %v4222_v23, %v4300_v28  ;;  %v4210_v4 = vld [vmem:[#allocation2 + $0x60] sm:$0xff] (!%p4969_p5) }
 0xa6c   : > { %4193 = vst.msk [vmem:[#allocation2 + $0xb8] sm:$0xff] %vm708_vm2, %v4169_v25  ;;  %v4316_v18 = vrot.slane (!%p4969_p5), %v4222_v23, %v4315_v51  ;;  %v4331_v46 = vrot.slane (!%p4969_p5), %v4222_v23, %v4330_v12  ;;  %v4214_v51 = vld [vmem:[#allocation2 + $0x80] sm:$0xff] (!%p4969_p5)  ;;  %v4213_v12 = vld [vmem:[#allocation2 + $0x78] sm:$0xff] (!%p4969_p5) }
 0xa6d   : > { %4262 = vbcast.lane.b32.xlu1 %v4256_v50, 264  ;;  %4258 = vbcast.lane.b32.xlu0 %v4256_v50, 256 }
 0xa71   : > { %4251 = vbcast.lane.b32.xlu1 %v4241_v49, 272  ;;  %4236 = vbcast.lane.b32.xlu0 %v4226_v15, 272 }
 0xa75   : > { %4277 = vbcast.lane.b32.xlu1 %v4271_v11, 264  ;;  %4273 = vbcast.lane.b32.xlu0 %v4271_v11, 256 }
 0xa79   : > { %4288 = vbcast.lane.b32.xlu1 %v4286_v34, 256  ;;  %4266 = vbcast.lane.b32.xlu0 %v4256_v50, 272 }
 0xa7d   : > { %4281 = vbcast.lane.b32.xlu1 %v4271_v11, 272  ;;  %4292 = vbcast.lane.b32.xlu0 %v4286_v34, 264 }
 0xa81   : > { %4307 = vbcast.lane.b32.xlu1 %v4301_v5, 264  ;;  %4303 = vbcast.lane.b32.xlu0 %v4301_v5, 256 }
 0xa85   : > { %4318 = vbcast.lane.b32.xlu1 %v4316_v18, 256  ;;  %4296 = vbcast.lane.b32.xlu0 %v4286_v34, 272 }
 0xa89   : > { %4311 = vbcast.lane.b32.xlu1 %v4301_v5, 272  ;;  %4322 = vbcast.lane.b32.xlu0 %v4316_v18, 264 }
 0xa8d   : > { %4337 = vbcast.lane.b32.xlu1 %v4331_v46, 264  ;;  %4333 = vbcast.lane.b32.xlu0 %v4331_v46, 256 }
 0xa91   : > { %4341 = vbcast.lane.b32.xlu1 %v4331_v46, 272  ;;  %4326 = vbcast.lane.b32.xlu0 %v4316_v18, 272 }
 0xab3   : > { %v4244_v55 = vpop.permute.xlu1 %4243  ;;  %v4229_v6 = vpop.permute.xlu0 %4228 }
 0xab4   : > { %v4346_v37 = vmul.f32 %v4244_v55, %v4201_v32  ;;  %v4343_v39 = vmul.f32 %v4229_v6, %v4198_v29 }
 0xab6   : > { %v4378_v48 = vsel %vm708_vm2, %v4346_v37, 0.0  ;;  %v4367_v21 = vsel %vm708_vm2, %v4343_v39, 0.0 }
 0xab7   : > { %v4248_v44 = vpop.permute.xlu1 %4247  ;;  %v4233_v26 = vpop.permute.xlu0 %4232 }
 0xab8   : > { %v4347_v9 = vmul.f32 %v4248_v44, %v4202_v2  ;;  %v4344_v43 = vmul.f32 %v4233_v26, %v4199_v19  ;;  %v4212_v26 = vld [vmem:[#allocation2 + $0x70] sm:$0xff] }
 0xaba   : > { %v4379_v54 = vsel %vm708_vm2, %v4347_v9, 0.0  ;;  %v4368_v62 = vsel %vm708_vm2, %v4344_v43, 0.0 }
 0xabb   : > { %v4380_v23 = vadd.f32 %v4379_v54, %v4378_v48  ;;  %v4369_v50 = vadd.f32 %v4368_v62, %v4367_v21 }
 0xadf   : > { %v4263_v61 = vpop.permute.xlu1 %4262  ;;  %v4259_v30 = vpop.permute.xlu0 %4258 }
 0xae0   : > { %v4350_v56 = vmul.f32 %v4263_v61, %v4205_v24  ;;  %v4349_v53 = vmul.f32 %v4259_v30, %v4204_v45 }
 0xae2   : > { %v4390_v20 = vsel %vm708_vm2, %v4350_v56, 0.0  ;;  %v4389_v40 = vsel %vm708_vm2, %v4349_v53, 0.0 }
 0xae3   : > { %v4252_v0 = vpop.permute.xlu1 %4251  ;;  %v4237_v10 = vpop.permute.xlu0 %4236  ;;  %v4391_v38 = vadd.f32 %v4390_v20, %v4389_v40 }
 0xae4   : > { %v4348_v58 = vmul.f32 %v4252_v0, %v4203_v60  ;;  %v4345_v16 = vmul.f32 %v4237_v10, %v4200_v22  ;;  %v4215_v60 = vld [vmem:[#allocation2 + $0x88] sm:$0xff] }
 0xae6   : > { %v4381_v3 = vsel %vm708_vm2, %v4348_v58, 0.0  ;;  %v4370_v49 = vsel %vm708_vm2, %v4345_v16, 0.0  ;;  %v4216_v16 = vld [vmem:[#allocation2 + $0x90] sm:$0xff] }
 0xae7   : > { %v4278_v14 = vpop.permute.xlu1 %4277  ;;  %v4274_v8 = vpop.permute.xlu0 %4273  ;;  %v4382_v34 = vadd.f32 %v4381_v3, %v4380_v23  ;;  %v4371_v46 = vadd.f32 %v4370_v49, %v4369_v50 }
 0xae8   : > { %v4353_v52 = vmul.f32 %v4278_v14, %v4208_v41  ;;  %v4352_v7 = vmul.f32 %v4274_v8, %v4207_v17 }
 0xae9   : > { %v4383_v2 = vrot.slane %v4382_v34, 4  ;;  %v4372_v32 = vrot.slane %v4371_v46, 4 }
 0xaea   : > { %v4401_v15 = vsel %vm708_vm2, %v4353_v52, 0.0  ;;  %v4400_v47 = vsel %vm708_vm2, %v4352_v7, 0.0  ;;  %v4220_v7 = vld [vmem:[#allocation2 + $0xb0] sm:$0xff] }
 0xaeb   : > { %v4289_v33 = vpop.permute.xlu1 %4288  ;;  %v4267_v57 = vpop.permute.xlu0 %4266  ;;  %v4402_v55 = vadd.f32 %v4401_v15, %v4400_v47  ;;  %v4384_v37 = vadd.f32 %v4383_v2, %v4382_v34  ;;  %v4221_v15 = vld [vmem:[#allocation2 + $0xb8] sm:$0xff]  ;;  %v4218_v47 = vld [vmem:[#allocation2 + $0xa0] sm:$0xff] }
 0xaec   : > { %v4351_v1 = vmul.f32 %v4267_v57, %v4206_v35  ;;  %v4355_v6 = vmul.f32 %v4289_v33, %v4210_v4  ;;  %v4217_v57 = vld [vmem:[#allocation2 + $0x98] sm:$0xff]  ;;  %v4373_v35 = vadd.f32 %v4372_v32, %v4371_v46 }
 0xaed   : > { %v4385_v21 = vrot.slane %v4384_v37, 2 }
 0xaee   : > { %v4392_v13 = vsel %vm708_vm2, %v4351_v1, 0.0  ;;  %v4411_v29 = vsel %vm708_vm2, %v4355_v6, 0.0  ;;  %v4374_v20 = vrot.slane %v4373_v35, 2 }
 0xaef   : > { %v4282_v27 = vpop.permute.xlu1 %4281  ;;  %v4293_v36 = vpop.permute.xlu0 %4292  ;;  %v4393_v44 = vadd.f32 %v4392_v13, %v4391_v38  ;;  %v4386_v38 = vadd.f32 %v4385_v21, %v4384_v37 }
 0xaf0   : > { %v4354_v25 = vmul.f32 %v4282_v27, %v4209_v63  ;;  %v4356_v11 = vmul.f32 %v4293_v36, %v4211_v42  ;;  %v4219_v63 = vld [vmem:[#allocation2 + $0xa8] sm:$0xff] }
 0xaf1   : > { %v4394_v24 = vrot.slane %v4393_v44, 4  ;;  %v4387_v32 = vrot.slane %v4386_v38, 1 }
 0xaf2   : > { %v4403_v28 = vsel %vm708_vm2, %v4354_v25, 0.0  ;;  %v4412_v30 = vsel %vm708_vm2, %v4356_v11, 0.0 }
 0xaf3   : > { %v4308_v5 = vpop.permute.xlu1 %4307  ;;  %v4304_v18 = vpop.permute.xlu0 %4303  ;;  %v4404_v61 = vadd.f32 %v4403_v28, %v4402_v55  ;;  %v4413_v45 = vadd.f32 %v4412_v30, %v4411_v29  ;;  %v4395_v53 = vadd.f32 %v4394_v24, %v4393_v44  ;;  %v4388_v37 = vadd.f32 %v4387_v32, %v4386_v38 }
 0xaf4   : > { %v4359_v0 = vmul.f32 %v4308_v5, %v4214_v51  ;;  %v4358_v10 = vmul.f32 %v4304_v18, %v4213_v12  ;;  %v4375_v18 = vadd.f32 %v4374_v20, %v4373_v35 }
 0xaf5   : > { %v4405_v9 = vrot.slane %v4404_v61, 4  ;;  %v4396_v23 = vrot.slane %v4395_v53, 2 }
 0xaf6   : > { %v4423_v22 = vsel %vm708_vm2, %v4359_v0, 0.0  ;;  %v4422_v41 = vsel %vm708_vm2, %v4358_v10, 0.0  ;;  %v4376_v29 = vrot.slane %v4375_v18, 1 }
 0xaf7   : > { %v4319_v14 = vpop.permute.xlu1 %4318  ;;  %v4297_v8 = vpop.permute.xlu0 %4296  ;;  %v4424_v58 = vadd.f32 %v4423_v22, %v4422_v41  ;;  %v4406_v54 = vadd.f32 %v4405_v9, %v4404_v61  ;;  %v4397_v6 = vadd.f32 %v4396_v23, %v4395_v53 }
 0xaf8   : > { %v4357_v19 = vmul.f32 %v4297_v8, %v4212_v26  ;;  %v4361_v40 = vmul.f32 %v4319_v14, %v4216_v16 }
 0xaf9   : > { %v4407_v4 = vrot.slane %v4406_v54, 2  ;;  %v4398_v24 = vrot.slane %v4397_v6, 1 }
 0xafa   : > { %v4414_v17 = vsel %vm708_vm2, %v4357_v19, 0.0  ;;  %v4433_v12 = vsel %vm708_vm2, %v4361_v40, 0.0 }
 0xafb   : > { %v4415_v39 = vadd.f32 %v4414_v17, %v4413_v45  ;;  %v4312_v43 = vpop.permute.xlu1 %4311  ;;  %v4323_v33 = vpop.permute.xlu0 %4322  ;;  %v4408_v30 = vadd.f32 %v4407_v4, %v4406_v54 }
 0xafc   : > { %v4360_v56 = vmul.f32 %v4312_v43, %v4215_v60  ;;  %v4362_v48 = vmul.f32 %v4323_v33, %v4217_v57  ;;  %v4399_v33 = vadd.f32 %v4398_v24, %v4397_v6 }
 0xafd   : > { %v4416_v52 = vrot.slane %v4415_v39, 4  ;;  %v4409_v9 = vrot.slane %v4408_v30, 1 }
 0xafe   : > { %v4425_v1 = vsel %vm708_vm2, %v4360_v56, 0.0  ;;  %v4434_v50 = vsel %vm708_vm2, %v4362_v48, 0.0 }
 0xaff   : > { %v4417_v62 = vadd.f32 %v4416_v52, %v4415_v39  ;;  %v4426_v27 = vadd.f32 %v4425_v1, %v4424_v58  ;;  %v4338_v36 = vpop.permute.xlu1 %4337  ;;  %v4334_v42 = vpop.permute.xlu0 %4333  ;;  %v4435_v26 = vadd.f32 %v4434_v50, %v4433_v12  ;;  %v4377_v39 = vadd.f32 %v4376_v29, %v4375_v18 }
 0xb00   : > { %v4365_v3 = vmul.f32 %v4338_v36, %v4220_v7  ;;  %v4364_v25 = vmul.f32 %v4334_v42, %v4219_v63  ;;  %v4410_v56 = vadd.f32 %v4409_v9, %v4408_v30 }
 0xb01   : > { %v4427_v49 = vrot.slane %v4426_v27, 4  ;;  %v4418_v34 = vrot.slane %v4417_v62, 2  ;;  %v4465_v52 = vsel %vm4464_vm12, %v4388_v37, %v4377_v39 }
 0xb02   : > { %v4445_v13 = vsel %vm708_vm2, %v4365_v3, 0.0  ;;  %v4444_v11 = vsel %vm708_vm2, %v4364_v25, 0.0  ;;  %v4467_v1 = vsel %vm4466_vm13, %v4399_v33, %v4465_v52 }
 0xb03   : > { %v4428_v28 = vadd.f32 %v4427_v49, %v4426_v27  ;;  %v4342_v5 = vpop.permute.xlu1 %4341  ;;  %v4327_v51 = vpop.permute.xlu0 %4326  ;;  %v4446_v61 = vadd.f32 %v4445_v13, %v4444_v11  ;;  %v4419_v2 = vadd.f32 %v4418_v34, %v4417_v62  ;;  %v4469_v48 = vsel %vm4468_vm14, %v4410_v56, %v4467_v1 }
 0xb04   : > { %v4366_v46 = vmul.f32 %v4342_v5, %v4221_v15  ;;  %v4363_v55 = vmul.f32 %v4327_v51, %v4218_v47 }
 0xb05   : > { %v4429_v44 = vrot.slane %v4428_v28, 2  ;;  %v4420_v22 = vrot.slane %v4419_v2, 1 }
 0xb06   : > { %v4447_v0 = vsel %vm708_vm2, %v4366_v46, 0.0  ;;  %v4436_v10 = vsel %vm708_vm2, %v4363_v55, 0.0 }
 0xb07   : > { %v4448_v14 = vadd.f32 %v4447_v0, %v4446_v61  ;;  %v4437_v8 = vadd.f32 %v4436_v10, %v4435_v26  ;;  %v4430_v19 = vadd.f32 %v4429_v44, %v4428_v28  ;;  %v4421_v53 = vadd.f32 %v4420_v22, %v4419_v2 }
 0xb09   : > { %v4449_v45 = vrot.slane %v4448_v14, 4  ;;  %v4438_v60 = vrot.slane %v4437_v8, 4  ;;  %v4431_v43 = vrot.slane %v4430_v19, 1  ;;  %v4471_v27 = vsel %vm4470_vm15, %v4421_v53, %v4469_v48 }
 0xb0b   : > { %v4450_v41 = vadd.f32 %v4449_v45, %v4448_v14  ;;  %v4439_v17 = vadd.f32 %v4438_v60, %v4437_v8  ;;  %v4432_v7 = vadd.f32 %v4431_v43, %v4430_v19  ;;  %v5844_v43 = vmov 0.0  }
 0xb0c   : > { %5315 = vmatprep.subr.bf16.mxu0 %v5844_v43  ;;  %5323 = vmatprep.mubr.msk.bf16.mxu0 %vm5845_vm4, %v5844_v43 }
 0xb0d   : > { %v4451_v57 = vrot.slane %v4450_v41, 2  ;;  %v4440_v35 = vrot.slane %v4439_v17, 2  ;;  %v4473_v36 = vsel %vm4472_vm0, %v4432_v7, %v4471_v27 }
 0xb0f   : > { %v4452_v58 = vadd.f32 %v4451_v57, %v4450_v41  ;;  %v4441_v16 = vadd.f32 %v4440_v35, %v4439_v17  ;;  %v5827_v57 = vld [vmem:[%s7861_s16 + $0x10] sm:$0xff]   ;;  %v5828_v35 = vld [vmem:[%s7861_s16 + $0x18] sm:$0xff]  }
 0xb11   : > { %v4442_v63 = vrot.slane %v4441_v16, 1  ;;  %v4453_v54 = vrot.slane %v4452_v58, 1 }
 0xb13   : > { %v4443_v21 = vadd.f32 %v4442_v63, %v4441_v16  ;;  %v4454_v62 = vadd.f32 %v4453_v54, %v4452_v58  ;;  %v4455_v16 = vld [vmem:[%s7862_s17] sm:$0x3] }
 0xb14   : > { %v4583_v63 = vrot.slane %v4455_v16, %v6319_v59 }
 0xb15   : > { %v4475_v42 = vsel %vm4474_vm1, %v4443_v21, %v4473_v36 }
 0xb16   : > { %v4477_v20 = vsel %vm4476_vm3, %v4454_v62, %v4475_v42 }
 0xb17   : > { %v4479_v40 = vsel %vm708_vm2, %v4477_v20, 0.0 }
 0xb18   : > { %4480 = vadd.xlane.f32.xlu0 %v4479_v40 }
 0xba5   : > { %v4481_v3 = vpop.xlane.xlu0 %4480 }
 0xba6   : > { %v4482_v25 = vmul.f32 0.015625, %v4481_v3 }
 0xba8   : > { %v4484_v23 = vrot.slane %v4482_v25, 1  ;;  %v4485_v49 = vrot.slane %v4482_v25, 2  ;;  %v4486_v15 = vrot.slane %v4482_v25, 3  ;;  %v4487_v47 = vrot.slane %v4482_v25, 4 }
 0xba9   : > { %v4488_v4 = vrot.slane %v4482_v25, 5  ;;  %v4489_v50 = vrot.slane %v4482_v25, 6  ;;  %v4490_v13 = vrot.slane %v4482_v25, 7  ;;  %v4499_v11 = vsub.f32 %v4377_v39, %v4482_v25  ;;  %v5825_v39 = vld [vmem:[%s7861_s16] sm:$0xff]  }
 0xbaa   : > { %v4500_v38 = vsub.f32 %v4388_v37, %v4484_v23  ;;  %v4501_v34 = vsub.f32 %v4399_v33, %v4485_v49  ;;  %v4502_v28 = vsub.f32 %v4410_v56, %v4486_v15  ;;  %v4503_v5 = vsub.f32 %v4421_v53, %v4487_v47  ;;  %5316 = vmatpush3.bf16.msra.mxu0 %v5825_v39  ;;  %v5826_v33 = vld [vmem:[%s7861_s16 + $0x8] sm:$0xff]  }
 0xbab   : > { %v4504_v51 = vsub.f32 %v4432_v7, %v4488_v4  ;;  %v4505_v18 = vsub.f32 %v4443_v21, %v4489_v50  ;;  %v4506_v12 = vsub.f32 %v4454_v62, %v4490_v13  ;;  %v4507_v26 = vmul.f32 %v4499_v11, %v4499_v11  ;;  %5317 = vmatprep.subr.bf16.mxu0 %v5844_v43 }
 0xbac   : > { %v4508_v46 = vmul.f32 %v4500_v38, %v4500_v38  ;;  %v4509_v55 = vmul.f32 %v4501_v34, %v4501_v34  ;;  %v4510_v6 = vmul.f32 %v4502_v28, %v4502_v28  ;;  %v4511_v44 = vmul.f32 %v4503_v5, %v4503_v5 }
 0xbad   : > { %v4512_v61 = vmul.f32 %v4504_v51, %v4504_v51  ;;  %v4513_v10 = vmul.f32 %v4505_v18, %v4505_v18  ;;  %v4514_v2 = vmul.f32 %v4506_v12, %v4506_v12  ;;  %v4571_v7 = vrot.slane %v4455_v16, %v6305_v31 }
 0xbae   : > { %v4523_v30 = vrot.slane %v4508_v46, 7  ;;  %v4525_v0 = vrot.slane %v4509_v55, 6  ;;  %v4527_v8 = vrot.slane %v4510_v6, 5  ;;  %v4529_v29 = vrot.slane %v4511_v44, 4  ;;  %5318 = vmatpush3.bf16.msra.mxu0 %v5826_v33 }
 0xbaf   : > { %v4531_v24 = vrot.slane %v4512_v61, 3  ;;  %v4533_v60 = vrot.slane %v4513_v10, 2  ;;  %v4535_v22 = vrot.slane %v4514_v2, 1  ;;  %5319 = vmatprep.subr.bf16.mxu0 %v5844_v43 }
 0xbb0   : > { %v4524_v14 = vsel %vm4464_vm12, %v4523_v30, %v4507_v26 }
 0xbb1   : > { %v4526_v32 = vsel %vm4466_vm13, %v4525_v0, %v4524_v14 }
 0xbb2   : > { %v4528_v19 = vsel %vm4468_vm14, %v4527_v8, %v4526_v32  ;;  %5320 = vmatpush3.bf16.msra.mxu0 %v5827_v57 }
 0xbb3   : > { %v4530_v45 = vsel %vm4470_vm15, %v4529_v29, %v4528_v19  ;;  %5321 = vmatprep.subr.bf16.mxu0 %v5844_v43 }
 0xbb4   : > { %v4532_v9 = vsel %vm4472_vm0, %v4531_v24, %v4530_v45 }
 0xbb5   : > { %v4534_v41 = vsel %vm4474_vm1, %v4533_v60, %v4532_v9 }
 0xbb6   : > { %v4536_v17 = vsel %vm4476_vm3, %v4535_v22, %v4534_v41  ;;  %5322 = vmatpush3.bf16.msra.mxu0 %v5828_v35 }
 0xbb7   : > { %v4538_v37 = vsel %vm708_vm2, %v4536_v17, 0.0 }
 0xbb8   : > { %4539 = vadd.xlane.f32.xlu1 %v4538_v37 }
 0xc45   : > { %v4540_v56 = vpop.xlane.xlu1 %4539 }
 0xc46   : > { %v4541_v53 = vmul.f32 0.015625, %v4540_v56 }
 0xc48   : > { %v4542_v58 = vadd.f32 1e-05, %v4541_v53 }
 0xc4a   : > { %5829 = vrsqrt.f32 %v4542_v58 }
 0xc54   : > { %v5830_v52 = vpop.eup %5829 }
 0xc55   : > { %v4545_v54 = vrot.slane %v5830_v52, 1  ;;  %v4546_v1 = vrot.slane %v5830_v52, 2  ;;  %v4547_v48 = vrot.slane %v5830_v52, 3  ;;  %v4548_v21 = vrot.slane %v5830_v52, 4 }
 0xc56   : > { %v4549_v62 = vrot.slane %v5830_v52, 5  ;;  %v4550_v27 = vrot.slane %v5830_v52, 6  ;;  %v4551_v36 = vrot.slane %v5830_v52, 7  ;;  %v4560_v42 = vmul.f32 %v5830_v52, %v4499_v11 }
 0xc57   : > { %v4561_v20 = vmul.f32 %v4545_v54, %v4500_v38  ;;  %v4562_v40 = vmul.f32 %v4546_v1, %v4501_v34  ;;  %v4563_v3 = vmul.f32 %v4547_v48, %v4502_v28  ;;  %v4564_v25 = vmul.f32 %v4548_v21, %v4503_v5 }
 0xc58   : > { %v4565_v23 = vmul.f32 %v4549_v62, %v4504_v51  ;;  %v4566_v49 = vmul.f32 %v4550_v27, %v4505_v18  ;;  %v4567_v15 = vmul.f32 %v4551_v36, %v4506_v12  ;;  %v4572_v47 = vmul.f32 %v4571_v7, %v4560_v42 }
 0xc59   : > { %v4573_v4 = vmul.f32 %v4571_v7, %v4561_v20  ;;  %v4574_v31 = vmul.f32 %v4571_v7, %v4562_v40  ;;  %v4575_v50 = vmul.f32 %v4571_v7, %v4563_v3  ;;  %v4576_v59 = vmul.f32 %v4571_v7, %v4564_v25 }
 0xc5a   : > { %v4577_v13 = vmul.f32 %v4571_v7, %v4565_v23  ;;  %v4578_v46 = vmul.f32 %v4571_v7, %v4566_v49  ;;  %v4579_v55 = vmul.f32 %v4571_v7, %v4567_v15  ;;  %v4584_v6 = vadd.f32 %v4583_v63, %v4572_v47 }
 0xc5b   : > { %v4585_v44 = vadd.f32 %v4583_v63, %v4573_v4  ;;  %v4586_v26 = vadd.f32 %v4583_v63, %v4574_v31  ;;  %v4587_v61 = vadd.f32 %v4583_v63, %v4575_v50  ;;  %v4588_v11 = vadd.f32 %v4583_v63, %v4576_v59 }
 0xc5c   : > { %v4589_v38 = vadd.f32 %v4583_v63, %v4577_v13  ;;  %v4590_v34 = vadd.f32 %v4583_v63, %v4578_v46  ;;  %v4591_v28 = vadd.f32 %v4583_v63, %v4579_v55  ;;  %v4592_v5 = vpack.c.bf16 %v4584_v6, %v4584_v6 }
 0xc5d   : > { %v4593_v51 = vpack.c.bf16 %v4585_v44, %v4585_v44  ;;  %v4594_v18 = vpack.c.bf16 %v4586_v26, %v4586_v26  ;;  %v4595_v12 = vpack.c.bf16 %v4587_v61, %v4587_v61  ;;  %v4596_v30 = vpack.c.bf16 %v4588_v11, %v4588_v11 }
 0xc5e   : > { %v4597_v0 = vpack.c.bf16 %v4589_v38, %v4589_v38  ;;  %v4598_v10 = vpack.c.bf16 %v4590_v34, %v4590_v34  ;;  %v4599_v2 = vpack.c.bf16 %v4591_v28, %v4591_v28  ;;  %v4616_v19 = vunpack.c.l.b16 %v4592_v5 }
 0xc5f   : > { %v4617_v14 = vunpack.c.l.b16 %v4593_v51  ;;  %v4618_v8 = vunpack.c.l.b16 %v4594_v18  ;;  %v4619_v32 = vunpack.c.l.b16 %v4595_v12  ;;  %v4620_v29 = vunpack.c.l.b16 %v4596_v30 }
 0xc60   : > { %v4621_v24 = vunpack.c.l.b16 %v4597_v0  ;;  %v4622_v9 = vunpack.c.l.b16 %v4598_v10  ;;  %v4623_v22 = vunpack.c.l.b16 %v4599_v2 }
 0xc61   : > { %v4624_v45 = vrot.slane %v4617_v14, 7  ;;  %v4626_v60 = vrot.slane %v4618_v8, 6  ;;  %v4628_v17 = vrot.slane %v4619_v32, 5  ;;  %v4630_v39 = vrot.slane %v4620_v29, 4 }
 0xc62   : > { %v4632_v33 = vrot.slane %v4621_v24, 3  ;;  %v4634_v35 = vrot.slane %v4622_v9, 2  ;;  %v4636_v53 = vrot.slane %v4623_v22, 1 }
 0xc63   : > { %v4625_v41 = vsel %vm4464_vm12, %v4624_v45, %v4616_v19 }
 0xc64   : > { %v4627_v37 = vsel %vm4466_vm13, %v4626_v60, %v4625_v41 }
 0xc65   : > { %v4629_v43 = vsel %vm4468_vm14, %v4628_v17, %v4627_v37 }
 0xc66   : > { %v4631_v57 = vsel %vm4470_vm15, %v4630_v39, %v4629_v43 }
 0xc67   : > { %v4633_v56 = vsel %vm4472_vm0, %v4632_v33, %v4631_v57 }
 0xc68   : > { %v4635_v58 = vsel %vm4474_vm1, %v4634_v35, %v4633_v56 }
 0xc69   : > { %v4637_v16 = vsel %vm4476_vm3, %v4636_v53, %v4635_v58 }
 0xc6a   : > { %v4638_v52 = vpack.c.b16 %v4637_v16, %v4637_v16 }
 0xc6c   : > { %5324 = vmatmul.mubr.msk.bf16.vlgmr.msra.gmra.mrb[0].mxu0 %vm708_vm2, %v4638_v52 }
 0xd3f   : > { %v4700_v7 = vpop.f32.mrb[0].mxu0 }
 0xd40   : > { %v4706_v63 = vmul.f32 %v4700_v7, %v4700_v7  ;;  %v5325_v54 = vpop.f32.mrb[1].mxu0 }
 0xd41   : > { %v4703_v1 = vpop.f32.mrb[2].mxu0 }
 0xd42   : > { %v5326_v48 = vpop.f32.mrb[3].mxu0  ;;  %v4708_v21 = vsel %vm4707_vm5, %v4706_v63, 0.0 }
 0xd43   : > { %4709 = vadd.xlane.f32.xlu0 %v4708_v21 }
 0xdd0   : > { %v4710_v62 = vpop.xlane.xlu0 %4709 }
 0xdd1   : > { %v4711_v27 = vadd.f32 1e-12, %v4710_v62 }
 0xdd3   : > { %5831 = vrsqrt.f32 %v4711_v27 }
 0xddd   : > { %v5832_v36 = vpop.eup %5831 }
 0xdde   : > { %v4713_v42 = vmul.f32 %v5832_v36, %v4700_v7 }
 0xde0   : > { %4714 = vst.msk [vmem:[%s7863_s19] sm:$0xff] %vm4707_vm5, %v4713_v42 }
 0xde1 PF: > { %s7864_s21 = sld [smem:[#allocation3_spill]] }
 0xde7   : > { %s24_s29 = sadd.s32 1, %s7864_s21  }
 0xde8   : > { %p21_p6 = scmp.ge.s32.totalorder %s24_s29, 4  }
 0xdea   :  { %23 = sbr.rel (!%p21_p6) target bundleno = 9 (0x9), region = 137 }

</bundles_post_ra>
